<compile_context>
chip_gen: v6e
topology: v6e:2x2x1
jax: 0.10.0
libtpu: 0.0.40
codegen_flags: <defaults>
</compile_context>

<pallas_src>
import functools

import jax
import jax.numpy as jnp
import numpy as np
from jax.experimental import pallas as pl
from jax.experimental.pallas import tpu as pltpu


def _conv3d_bn_relu_kernel(x0_ref, x1_ref, x2_ref, w_ref, b_ref, o_ref, *,
                           H, W, K, Cout):
    # x{0,1,2}_ref: (H+2, W+2, Cin) bf16  halo-padded H/W slab at padded depth
    #               d + kd for kd = 0, 1, 2 (depth tap folded into this step).
    # w_ref:        (27, Cin, Cout_p) bf16  per-tap weights (BN scale folded),
    #               resident in VMEM across the grid (constant index map).
    # b_ref:        (1, Cout_p) f32  folded BN bias (beta - mean*scale).
    # o_ref:        (H, W, Cout) f32  unpadded output slab for (n, d).
    Cin = w_ref.shape[1]
    cout_p = w_ref.shape[2]
    HW = H * W

    x_refs = (x0_ref, x1_ref, x2_ref)
    acc = None
    for kd in range(K):
        xr = x_refs[kd]
        for kh in range(K):
            for kw in range(K):
                # bf16 shifted window straight off the ref (no f32 detour, no
                # lane concat); one small MXU dot per tap, f32 accumulation.
                lhs = xr[kh:kh + H, kw:kw + W, :].reshape(HW, Cin)
                tap = (kd * K + kh) * K + kw
                part = jax.lax.dot_general(
                    lhs, w_ref[tap],
                    dimension_numbers=(((1,), (0,)), ((), ())),
                    preferred_element_type=jnp.float32)
                acc = part if acc is None else acc + part

    y = jnp.maximum(acc + b_ref[...], 0.0)                  # bias + ReLU (f32)
    # Store only the real output channels: a masked narrow store beats writing
    # a 128-padded slab to HBM (and re-slicing it) by Cout_p / Cout.
    o_ref[...] = y.reshape(H, W, cout_p)[:, :, :Cout].astype(o_ref.dtype)


def conv_bn_relu_3d(x_ncdhw, weight_oidhw, gamma, beta, running_mean,
                    running_var, eps=1e-5):
    """Fused Conv3d(3x3x3, s=1, p=1, d=1, bias=False) + BatchNorm3d(eval) + ReLU.

    x_ncdhw:      (N, Cin, D, H, W)   float32
    weight_oidhw: (Cout, Cin, 3, 3, 3)
    returns:      (N, Cout, D, H, W)  float32
    """
    N, Cin, D, H, W = x_ncdhw.shape
    Cout, Cin_w, Kd, Kh, Kw = weight_oidhw.shape
    assert Cin == Cin_w and Kd == Kh == Kw == 3
    K, pad = 3, 1

    LANES = 128
    cout_p = ((Cout + LANES - 1) // LANES) * LANES   # lane-dense matmul columns

    # Fold BN (inference) into the conv weights + a per-channel bias.
    scale = (gamma / jnp.sqrt(running_var + eps)).astype(jnp.float32)   # (Cout,)
    bias = (beta - running_mean * scale).astype(jnp.float32)            # (Cout,)

    w_scaled = weight_oidhw.astype(jnp.float32) * scale[:, None, None, None, None]
    # (O, I, Kd, Kh, Kw) -> (Kd, Kh, Kw, I, O) -> (27, Cin, Cout_p) bf16.
    w_taps = jnp.transpose(w_scaled, (2, 3, 4, 1, 0)).reshape(K * K * K, Cin, Cout)
    w_taps = jnp.pad(w_taps, ((0, 0), (0, 0), (0, cout_p - Cout))).astype(jnp.bfloat16)
    bias_p = jnp.pad(bias, (0, cout_p - Cout)).reshape(1, cout_p)

    # NCDHW -> NDHWC (C on the lane axis), bf16, halo-pad D/H/W by 1.
    # TODO(synk): keep the surrounding graph channels-last and handle the
    #             1-voxel halo in-kernel to drop these wrapper HBM passes.
    x_ndhwc = jnp.transpose(x_ncdhw, (0, 2, 3, 4, 1)).astype(jnp.bfloat16)
    x_pad = jnp.pad(x_ndhwc, ((0, 0), (pad, pad), (pad, pad), (pad, pad), (0, 0)))
    Hp, Wp = H + 2 * pad, W + 2 * pad

    # Per-generation scoped-VMEM limit (128 MiB parts can afford larger tiles;
    # stay well under v7x's 64 MiB).
    try:
        vmem_cap = int(pltpu.get_tpu_info().vmem_capacity_bytes)
    except Exception:
        vmem_cap = 64 * 1024 * 1024
    vmem_limit = int(min(vmem_cap * 3 // 4, 100 * 1024 * 1024))

    # TODO(synk): for production H*W (e.g. 128x128, Cin>=32), add a halo'd
    #             H-tile grid axis so the per-step working set stays < ~48 MiB.
    # TODO(synk): for the tiny-channel regime (Cin<=8), a VPU direct-conv
    #             variant with W on lanes would use the vector lanes better.
    kernel = functools.partial(_conv3d_bn_relu_kernel, H=H, W=W, K=K, Cout=Cout)

    x_block = (None, None, Hp, Wp, Cin)   # one padded depth slice, full H/W/Cin

    out_ndhwc = pl.pallas_call(
        kernel,
        out_shape=jax.ShapeDtypeStruct((N, D, H, W, Cout), jnp.float32),
        grid_spec=pltpu.PrefetchScalarGridSpec(
            num_scalar_prefetch=0,
            grid=(N, D),                  # both axes are pure output parallelism
            in_specs=[
                # Three depth-shifted views of the padded input (kd = 0, 1, 2).
                pl.BlockSpec(x_block, lambda n, d: (n, d, 0, 0, 0)),
                pl.BlockSpec(x_block, lambda n, d: (n, d + 1, 0, 0, 0)),
                pl.BlockSpec(x_block, lambda n, d: (n, d + 2, 0, 0, 0)),
                # Weight taps + bias: constant index map -> fetched once, stays
                # resident in VMEM for the whole grid.
                pl.BlockSpec((K * K * K, Cin, cout_p), lambda n, d: (0, 0, 0)),
                pl.BlockSpec((1, cout_p), lambda n, d: (0, 0)),
            ],
            out_specs=pl.BlockSpec((None, None, H, W, Cout),
                                   lambda n, d: (n, d, 0, 0, 0)),
        ),
        compiler_params=pltpu.CompilerParams(
            dimension_semantics=("parallel", "parallel"),
            vmem_limit_bytes=vmem_limit,
        ),
    )(x_pad, x_pad, x_pad, w_taps, bias_p)

    return jnp.transpose(out_ndhwc, (0, 4, 1, 2, 3))        # NDHWC -> NCDHW


def _reference(x_ncdhw, weight_oidhw, gamma, beta, running_mean, running_var,
               eps=1e-5):
    """Pure-JAX f32 reference (Conv3d + inference BN + ReLU)."""
    y = jax.lax.conv_general_dilated(
        x_ncdhw, weight_oidhw,
        window_strides=(1, 1, 1),
        padding=((1, 1), (1, 1), (1, 1)),
        dimension_numbers=("NCDHW", "OIDHW", "NCDHW"))
    scale = gamma / jnp.sqrt(running_var + eps)
    bias = beta - running_mean * scale
    y = y * scale[None, :, None, None, None] + bias[None, :, None, None, None]
    return jnp.maximum(y, 0.0)


if __name__ == "__main__":
    key = jax.random.PRNGKey(0)
    k_x, k_w, k_g, k_b, k_m, k_v = jax.random.split(key, 6)

    N, Cin, D, H, W = 2, 4, 8, 16, 16
    Cout, K = 8, 3

    x = jax.random.normal(k_x, (N, Cin, D, H, W), dtype=jnp.float32)
    weight = jax.random.normal(k_w, (Cout, Cin, K, K, K), dtype=jnp.float32) * 0.1
    gamma = 1.0 + 0.1 * jax.random.normal(k_g, (Cout,), dtype=jnp.float32)
    beta = 0.1 * jax.random.normal(k_b, (Cout,), dtype=jnp.float32)
    running_mean = 0.1 * jax.random.normal(k_m, (Cout,), dtype=jnp.float32)
    running_var = jnp.abs(1.0 + 0.1 * jax.random.normal(k_v, (Cout,),
                                                        dtype=jnp.float32))

    fn = jax.jit(conv_bn_relu_3d)
    out = jax.block_until_ready(fn(x, weight, gamma, beta, running_mean,
                                   running_var))

    ref = _reference(x, weight, gamma, beta, running_mean, running_var)
    # bf16 activations/weights feed the MXU (f32 accumulation); the f32
    # reference therefore matches to ~1e-2 absolute at these magnitudes.
    np.testing.assert_allclose(np.asarray(out), np.asarray(ref),
                               rtol=5e-2, atol=5e-2)
    print("KERNEL_OK")
</pallas_src>

<mosaic_0001>
module attributes {stable_mosaic.version = 11 : i64} {
  func.func @_conv3d_bn_relu_kernel(%arg0: i32, %arg1: i32, %arg2: memref<1x1x18x18x4xbf16, #tpu.memory_space<vmem>>, %arg3: memref<1x1x18x18x4xbf16, #tpu.memory_space<vmem>>, %arg4: memref<1x1x18x18x4xbf16, #tpu.memory_space<vmem>>, %arg5: memref<27x4x128xbf16, #tpu.memory_space<vmem>>, %arg6: memref<1x128xf32, #tpu.memory_space<vmem>>, %arg7: memref<1x1x16x16x8xf32, #tpu.memory_space<vmem>>) attributes {dimension_semantics = [#tpu.dimension_semantics<parallel>, #tpu.dimension_semantics<parallel>], iteration_bounds = array<i64: 2, 8>, scalar_prefetch = 0 : i64, scratch_operands = 0 : i64, tpu.core_type = #tpu.core_type<tc>, window_params = [{transform_indices = @transform_0, window_bounds = array<i64: 1, 1, 18, 18, 4>}, {transform_indices = @transform_1, window_bounds = array<i64: 1, 1, 18, 18, 4>}, {transform_indices = @transform_2, window_bounds = array<i64: 1, 1, 18, 18, 4>}, {pipeline_mode = #tpu.pipeline_mode<synchronous>, transform_indices = @transform_3, window_bounds = array<i64: 27, 4, 128>}, {pipeline_mode = #tpu.pipeline_mode<synchronous>, transform_indices = @transform_4, window_bounds = array<i64: 1, 128>}, {transform_indices = @transform_5, window_bounds = array<i64: 1, 1, 16, 16, 8>}]} {
    %c0 = arith.constant 0 : index
    %c0_0 = arith.constant 0 : index
    %c0_1 = arith.constant 0 : index
    %c0_2 = arith.constant 0 : index
    %c0_3 = arith.constant 0 : index
    %0 = vector.load %arg2[%c0, %c0_0, %c0_1, %c0_2, %c0_3] : memref<1x1x18x18x4xbf16, #tpu.memory_space<vmem>>, vector<1x1x16x16x4xbf16>
    %1 = vector.shape_cast %0 : vector<1x1x16x16x4xbf16> to vector<16x16x4xbf16>
    %2 = vector.shape_cast %1 : vector<16x16x4xbf16> to vector<256x4xbf16>
    %c0_4 = arith.constant 0 : index
    %c0_5 = arith.constant 0 : index
    %c0_6 = arith.constant 0 : index
    %3 = vector.load %arg5[%c0_4, %c0_5, %c0_6] : memref<27x4x128xbf16, #tpu.memory_space<vmem>>, vector<1x4x128xbf16>
    %4 = vector.shape_cast %3 : vector<1x4x128xbf16> to vector<4x128xbf16>
    %cst = arith.constant dense<0.000000e+00> : vector<256x128xf32>
    %5 = tpu.matmul %2, %4, %cst {dimension_numbers = #tpu.dot_dimension_numbers<[1], [0], [0], [1], [0, 0, 1, 1], [], []>} : vector<256x4xbf16>, vector<4x128xbf16>, vector<256x128xf32> -> vector<256x128xf32>
    %c0_7 = arith.constant 0 : index
    %c0_8 = arith.constant 0 : index
    %c0_9 = arith.constant 0 : index
    %c1 = arith.constant 1 : index
    %c0_10 = arith.constant 0 : index
    %6 = vector.load %arg2[%c0_7, %c0_8, %c0_9, %c1, %c0_10] : memref<1x1x18x18x4xbf16, #tpu.memory_space<vmem>>, vector<1x1x16x16x4xbf16>
    %7 = vector.shape_cast %6 : vector<1x1x16x16x4xbf16> to vector<16x16x4xbf16>
    %8 = vector.shape_cast %7 : vector<16x16x4xbf16> to vector<256x4xbf16>
    %c1_11 = arith.constant 1 : index
    %c0_12 = arith.constant 0 : index
    %c0_13 = arith.constant 0 : index
    %9 = vector.load %arg5[%c1_11, %c0_12, %c0_13] : memref<27x4x128xbf16, #tpu.memory_space<vmem>>, vector<1x4x128xbf16>
    %10 = vector.shape_cast %9 : vector<1x4x128xbf16> to vector<4x128xbf16>
    %cst_14 = arith.constant dense<0.000000e+00> : vector<256x128xf32>
    %11 = tpu.matmul %8, %10, %cst_14 {dimension_numbers = #tpu.dot_dimension_numbers<[1], [0], [0], [1], [0, 0, 1, 1], [], []>} : vector<256x4xbf16>, vector<4x128xbf16>, vector<256x128xf32> -> vector<256x128xf32>
    %12 = arith.addf %5, %11 : vector<256x128xf32>
    %c0_15 = arith.constant 0 : index
    %c0_16 = arith.constant 0 : index
    %c0_17 = arith.constant 0 : index
    %c2 = arith.constant 2 : index
    %c0_18 = arith.constant 0 : index
    %13 = vector.load %arg2[%c0_15, %c0_16, %c0_17, %c2, %c0_18] : memref<1x1x18x18x4xbf16, #tpu.memory_space<vmem>>, vector<1x1x16x16x4xbf16>
    %14 = vector.shape_cast %13 : vector<1x1x16x16x4xbf16> to vector<16x16x4xbf16>
    %15 = vector.shape_cast %14 : vector<16x16x4xbf16> to vector<256x4xbf16>
    %c2_19 = arith.constant 2 : index
    %c0_20 = arith.constant 0 : index
    %c0_21 = arith.constant 0 : index
    %16 = vector.load %arg5[%c2_19, %c0_20, %c0_21] : memref<27x4x128xbf16, #tpu.memory_space<vmem>>, vector<1x4x128xbf16>
    %17 = vector.shape_cast %16 : vector<1x4x128xbf16> to vector<4x128xbf16>
    %cst_22 = arith.constant dense<0.000000e+00> : vector<256x128xf32>
    %18 = tpu.matmul %15, %17, %cst_22 {dimension_numbers = #tpu.dot_dimension_numbers<[1], [0], [0], [1], [0, 0, 1, 1], [], []>} : vector<256x4xbf16>, vector<4x128xbf16>, vector<256x128xf32> -> vector<256x128xf32>
    %19 = arith.addf %12, %18 : vector<256x128xf32>
    %c0_23 = arith.constant 0 : index
    %c0_24 = arith.constant 0 : index
    %c1_25 = arith.constant 1 : index
    %c0_26 = arith.constant 0 : index
    %c0_27 = arith.constant 0 : index
    %20 = vector.load %arg2[%c0_23, %c0_24, %c1_25, %c0_26, %c0_27] : memref<1x1x18x18x4xbf16, #tpu.memory_space<vmem>>, vector<1x1x16x16x4xbf16>
    %21 = vector.shape_cast %20 : vector<1x1x16x16x4xbf16> to vector<16x16x4xbf16>
    %22 = vector.shape_cast %21 : vector<16x16x4xbf16> to vector<256x4xbf16>
    %c3 = arith.constant 3 : index
    %c0_28 = arith.constant 0 : index
    %c0_29 = arith.constant 0 : index
    %23 = vector.load %arg5[%c3, %c0_28, %c0_29] : memref<27x4x128xbf16, #tpu.memory_space<vmem>>, vector<1x4x128xbf16>
    %24 = vector.shape_cast %23 : vector<1x4x128xbf16> to vector<4x128xbf16>
    %cst_30 = arith.constant dense<0.000000e+00> : vector<256x128xf32>
    %25 = tpu.matmul %22, %24, %cst_30 {dimension_numbers = #tpu.dot_dimension_numbers<[1], [0], [0], [1], [0, 0, 1, 1], [], []>} : vector<256x4xbf16>, vector<4x128xbf16>, vector<256x128xf32> -> vector<256x128xf32>
    %26 = arith.addf %19, %25 : vector<256x128xf32>
    %c0_31 = arith.constant 0 : index
    %c0_32 = arith.constant 0 : index
    %c1_33 = arith.constant 1 : index
    %c1_34 = arith.constant 1 : index
    %c0_35 = arith.constant 0 : index
    %27 = vector.load %arg2[%c0_31, %c0_32, %c1_33, %c1_34, %c0_35] : memref<1x1x18x18x4xbf16, #tpu.memory_space<vmem>>, vector<1x1x16x16x4xbf16>
    %28 = vector.shape_cast %27 : vector<1x1x16x16x4xbf16> to vector<16x16x4xbf16>
    %29 = vector.shape_cast %28 : vector<16x16x4xbf16> to vector<256x4xbf16>
    %c4 = arith.constant 4 : index
    %c0_36 = arith.constant 0 : index
    %c0_37 = arith.constant 0 : index
    %30 = vector.load %arg5[%c4, %c0_36, %c0_37] : memref<27x4x128xbf16, #tpu.memory_space<vmem>>, vector<1x4x128xbf16>
    %31 = vector.shape_cast %30 : vector<1x4x128xbf16> to vector<4x128xbf16>
    %cst_38 = arith.constant dense<0.000000e+00> : vector<256x128xf32>
    %32 = tpu.matmul %29, %31, %cst_38 {dimension_numbers = #tpu.dot_dimension_numbers<[1], [0], [0], [1], [0, 0, 1, 1], [], []>} : vector<256x4xbf16>, vector<4x128xbf16>, vector<256x128xf32> -> vector<256x128xf32>
    %33 = arith.addf %26, %32 : vector<256x128xf32>
    %c0_39 = arith.constant 0 : index
    %c0_40 = arith.constant 0 : index
    %c1_41 = arith.constant 1 : index
    %c2_42 = arith.constant 2 : index
    %c0_43 = arith.constant 0 : index
    %34 = vector.load %arg2[%c0_39, %c0_40, %c1_41, %c2_42, %c0_43] : memref<1x1x18x18x4xbf16, #tpu.memory_space<vmem>>, vector<1x1x16x16x4xbf16>
    %35 = vector.shape_cast %34 : vector<1x1x16x16x4xbf16> to vector<16x16x4xbf16>
    %36 = vector.shape_cast %35 : vector<16x16x4xbf16> to vector<256x4xbf16>
    %c5 = arith.constant 5 : index
    %c0_44 = arith.constant 0 : index
    %c0_45 = arith.constant 0 : index
    %37 = vector.load %arg5[%c5, %c0_44, %c0_45] : memref<27x4x128xbf16, #tpu.memory_space<vmem>>, vector<1x4x128xbf16>
    %38 = vector.shape_cast %37 : vector<1x4x128xbf16> to vector<4x128xbf16>
    %cst_46 = arith.constant dense<0.000000e+00> : vector<256x128xf32>
    %39 = tpu.matmul %36, %38, %cst_46 {dimension_numbers = #tpu.dot_dimension_numbers<[1], [0], [0], [1], [0, 0, 1, 1], [], []>} : vector<256x4xbf16>, vector<4x128xbf16>, vector<256x128xf32> -> vector<256x128xf32>
    %40 = arith.addf %33, %39 : vector<256x128xf32>
    %c0_47 = arith.constant 0 : index
    %c0_48 = arith.constant 0 : index
    %c2_49 = arith.constant 2 : index
    %c0_50 = arith.constant 0 : index
    %c0_51 = arith.constant 0 : index
    %41 = vector.load %arg2[%c0_47, %c0_48, %c2_49, %c0_50, %c0_51] : memref<1x1x18x18x4xbf16, #tpu.memory_space<vmem>>, vector<1x1x16x16x4xbf16>
    %42 = vector.shape_cast %41 : vector<1x1x16x16x4xbf16> to vector<16x16x4xbf16>
    %43 = vector.shape_cast %42 : vector<16x16x4xbf16> to vector<256x4xbf16>
    %c6 = arith.constant 6 : index
    %c0_52 = arith.constant 0 : index
    %c0_53 = arith.constant 0 : index
    %44 = vector.load %arg5[%c6, %c0_52, %c0_53] : memref<27x4x128xbf16, #tpu.memory_space<vmem>>, vector<1x4x128xbf16>
    %45 = vector.shape_cast %44 : vector<1x4x128xbf16> to vector<4x128xbf16>
    %cst_54 = arith.constant dense<0.000000e+00> : vector<256x128xf32>
    %46 = tpu.matmul %43, %45, %cst_54 {dimension_numbers = #tpu.dot_dimension_numbers<[1], [0], [0], [1], [0, 0, 1, 1], [], []>} : vector<256x4xbf16>, vector<4x128xbf16>, vector<256x128xf32> -> vector<256x128xf32>
    %47 = arith.addf %40, %46 : vector<256x128xf32>
    %c0_55 = arith.constant 0 : index
    %c0_56 = arith.constant 0 : index
    %c2_57 = arith.constant 2 : index
    %c1_58 = arith.constant 1 : index
    %c0_59 = arith.constant 0 : index
    %48 = vector.load %arg2[%c0_55, %c0_56, %c2_57, %c1_58, %c0_59] : memref<1x1x18x18x4xbf16, #tpu.memory_space<vmem>>, vector<1x1x16x16x4xbf16>
    %49 = vector.shape_cast %48 : vector<1x1x16x16x4xbf16> to vector<16x16x4xbf16>
    %50 = vector.shape_cast %49 : vector<16x16x4xbf16> to vector<256x4xbf16>
    %c7 = arith.constant 7 : index
    %c0_60 = arith.constant 0 : index
    %c0_61 = arith.constant 0 : index
    %51 = vector.load %arg5[%c7, %c0_60, %c0_61] : memref<27x4x128xbf16, #tpu.memory_space<vmem>>, vector<1x4x128xbf16>
    %52 = vector.shape_cast %51 : vector<1x4x128xbf16> to vector<4x128xbf16>
    %cst_62 = arith.constant dense<0.000000e+00> : vector<256x128xf32>
    %53 = tpu.matmul %50, %52, %cst_62 {dimension_numbers = #tpu.dot_dimension_numbers<[1], [0], [0], [1], [0, 0, 1, 1], [], []>} : vector<256x4xbf16>, vector<4x128xbf16>, vector<256x128xf32> -> vector<256x128xf32>
    %54 = arith.addf %47, %53 : vector<256x128xf32>
    %c0_63 = arith.constant 0 : index
    %c0_64 = arith.constant 0 : index
    %c2_65 = arith.constant 2 : index
    %c2_66 = arith.constant 2 : index
    %c0_67 = arith.constant 0 : index
    %55 = vector.load %arg2[%c0_63, %c0_64, %c2_65, %c2_66, %c0_67] : memref<1x1x18x18x4xbf16, #tpu.memory_space<vmem>>, vector<1x1x16x16x4xbf16>
    %56 = vector.shape_cast %55 : vector<1x1x16x16x4xbf16> to vector<16x16x4xbf16>
    %57 = vector.shape_cast %56 : vector<16x16x4xbf16> to vector<256x4xbf16>
    %c8 = arith.constant 8 : index
    %c0_68 = arith.constant 0 : index
    %c0_69 = arith.constant 0 : index
    %58 = vector.load %arg5[%c8, %c0_68, %c0_69] : memref<27x4x128xbf16, #tpu.memory_space<vmem>>, vector<1x4x128xbf16>
    %59 = vector.shape_cast %58 : vector<1x4x128xbf16> to vector<4x128xbf16>
    %cst_70 = arith.constant dense<0.000000e+00> : vector<256x128xf32>
    %60 = tpu.matmul %57, %59, %cst_70 {dimension_numbers = #tpu.dot_dimension_numbers<[1], [0], [0], [1], [0, 0, 1, 1], [], []>} : vector<256x4xbf16>, vector<4x128xbf16>, vector<256x128xf32> -> vector<256x128xf32>
    %61 = arith.addf %54, %60 : vector<256x128xf32>
    %c0_71 = arith.constant 0 : index
    %c0_72 = arith.constant 0 : index
    %c0_73 = arith.constant 0 : index
    %c0_74 = arith.constant 0 : index
    %c0_75 = arith.constant 0 : index
    %62 = vector.load %arg3[%c0_71, %c0_72, %c0_73, %c0_74, %c0_75] : memref<1x1x18x18x4xbf16, #tpu.memory_space<vmem>>, vector<1x1x16x16x4xbf16>
    %63 = vector.shape_cast %62 : vector<1x1x16x16x4xbf16> to vector<16x16x4xbf16>
    %64 = vector.shape_cast %63 : vector<16x16x4xbf16> to vector<256x4xbf16>
    %c9 = arith.constant 9 : index
    %c0_76 = arith.constant 0 : index
    %c0_77 = arith.constant 0 : index
    %65 = vector.load %arg5[%c9, %c0_76, %c0_77] : memref<27x4x128xbf16, #tpu.memory_space<vmem>>, vector<1x4x128xbf16>
    %66 = vector.shape_cast %65 : vector<1x4x128xbf16> to vector<4x128xbf16>
    %cst_78 = arith.constant dense<0.000000e+00> : vector<256x128xf32>
    %67 = tpu.matmul %64, %66, %cst_78 {dimension_numbers = #tpu.dot_dimension_numbers<[1], [0], [0], [1], [0, 0, 1, 1], [], []>} : vector<256x4xbf16>, vector<4x128xbf16>, vector<256x128xf32> -> vector<256x128xf32>
    %68 = arith.addf %61, %67 : vector<256x128xf32>
    %c0_79 = arith.constant 0 : index
    %c0_80 = arith.constant 0 : index
    %c0_81 = arith.constant 0 : index
    %c1_82 = arith.constant 1 : index
    %c0_83 = arith.constant 0 : index
    %69 = vector.load %arg3[%c0_79, %c0_80, %c0_81, %c1_82, %c0_83] : memref<1x1x18x18x4xbf16, #tpu.memory_space<vmem>>, vector<1x1x16x16x4xbf16>
    %70 = vector.shape_cast %69 : vector<1x1x16x16x4xbf16> to vector<16x16x4xbf16>
    %71 = vector.shape_cast %70 : vector<16x16x4xbf16> to vector<256x4xbf16>
    %c10 = arith.constant 10 : index
    %c0_84 = arith.constant 0 : index
    %c0_85 = arith.constant 0 : index
    %72 = vector.load %arg5[%c10, %c0_84, %c0_85] : memref<27x4x128xbf16, #tpu.memory_space<vmem>>, vector<1x4x128xbf16>
    %73 = vector.shape_cast %72 : vector<1x4x128xbf16> to vector<4x128xbf16>
    %cst_86 = arith.constant dense<0.000000e+00> : vector<256x128xf32>
    %74 = tpu.matmul %71, %73, %cst_86 {dimension_numbers = #tpu.dot_dimension_numbers<[1], [0], [0], [1], [0, 0, 1, 1], [], []>} : vector<256x4xbf16>, vector<4x128xbf16>, vector<256x128xf32> -> vector<256x128xf32>
    %75 = arith.addf %68, %74 : vector<256x128xf32>
    %c0_87 = arith.constant 0 : index
    %c0_88 = arith.constant 0 : index
    %c0_89 = arith.constant 0 : index
    %c2_90 = arith.constant 2 : index
    %c0_91 = arith.constant 0 : index
    %76 = vector.load %arg3[%c0_87, %c0_88, %c0_89, %c2_90, %c0_91] : memref<1x1x18x18x4xbf16, #tpu.memory_space<vmem>>, vector<1x1x16x16x4xbf16>
    %77 = vector.shape_cast %76 : vector<1x1x16x16x4xbf16> to vector<16x16x4xbf16>
    %78 = vector.shape_cast %77 : vector<16x16x4xbf16> to vector<256x4xbf16>
    %c11 = arith.constant 11 : index
    %c0_92 = arith.constant 0 : index
    %c0_93 = arith.constant 0 : index
    %79 = vector.load %arg5[%c11, %c0_92, %c0_93] : memref<27x4x128xbf16, #tpu.memory_space<vmem>>, vector<1x4x128xbf16>
    %80 = vector.shape_cast %79 : vector<1x4x128xbf16> to vector<4x128xbf16>
    %cst_94 = arith.constant dense<0.000000e+00> : vector<256x128xf32>
    %81 = tpu.matmul %78, %80, %cst_94 {dimension_numbers = #tpu.dot_dimension_numbers<[1], [0], [0], [1], [0, 0, 1, 1], [], []>} : vector<256x4xbf16>, vector<4x128xbf16>, vector<256x128xf32> -> vector<256x128xf32>
    %82 = arith.addf %75, %81 : vector<256x128xf32>
    %c0_95 = arith.constant 0 : index
    %c0_96 = arith.constant 0 : index
    %c1_97 = arith.constant 1 : index
    %c0_98 = arith.constant 0 : index
    %c0_99 = arith.constant 0 : index
    %83 = vector.load %arg3[%c0_95, %c0_96, %c1_97, %c0_98, %c0_99] : memref<1x1x18x18x4xbf16, #tpu.memory_space<vmem>>, vector<1x1x16x16x4xbf16>
    %84 = vector.shape_cast %83 : vector<1x1x16x16x4xbf16> to vector<16x16x4xbf16>
    %85 = vector.shape_cast %84 : vector<16x16x4xbf16> to vector<256x4xbf16>
    %c12 = arith.constant 12 : index
    %c0_100 = arith.constant 0 : index
    %c0_101 = arith.constant 0 : index
    %86 = vector.load %arg5[%c12, %c0_100, %c0_101] : memref<27x4x128xbf16, #tpu.memory_space<vmem>>, vector<1x4x128xbf16>
    %87 = vector.shape_cast %86 : vector<1x4x128xbf16> to vector<4x128xbf16>
    %cst_102 = arith.constant dense<0.000000e+00> : vector<256x128xf32>
    %88 = tpu.matmul %85, %87, %cst_102 {dimension_numbers = #tpu.dot_dimension_numbers<[1], [0], [0], [1], [0, 0, 1, 1], [], []>} : vector<256x4xbf16>, vector<4x128xbf16>, vector<256x128xf32> -> vector<256x128xf32>
    %89 = arith.addf %82, %88 : vector<256x128xf32>
    %c0_103 = arith.constant 0 : index
    %c0_104 = arith.constant 0 : index
    %c1_105 = arith.constant 1 : index
    %c1_106 = arith.constant 1 : index
    %c0_107 = arith.constant 0 : index
    %90 = vector.load %arg3[%c0_103, %c0_104, %c1_105, %c1_106, %c0_107] : memref<1x1x18x18x4xbf16, #tpu.memory_space<vmem>>, vector<1x1x16x16x4xbf16>
    %91 = vector.shape_cast %90 : vector<1x1x16x16x4xbf16> to vector<16x16x4xbf16>
    %92 = vector.shape_cast %91 : vector<16x16x4xbf16> to vector<256x4xbf16>
    %c13 = arith.constant 13 : index
    %c0_108 = arith.constant 0 : index
    %c0_109 = arith.constant 0 : index
    %93 = vector.load %arg5[%c13, %c0_108, %c0_109] : memref<27x4x128xbf16, #tpu.memory_space<vmem>>, vector<1x4x128xbf16>
    %94 = vector.shape_cast %93 : vector<1x4x128xbf16> to vector<4x128xbf16>
    %cst_110 = arith.constant dense<0.000000e+00> : vector<256x128xf32>
    %95 = tpu.matmul %92, %94, %cst_110 {dimension_numbers = #tpu.dot_dimension_numbers<[1], [0], [0], [1], [0, 0, 1, 1], [], []>} : vector<256x4xbf16>, vector<4x128xbf16>, vector<256x128xf32> -> vector<256x128xf32>
    %96 = arith.addf %89, %95 : vector<256x128xf32>
    %c0_111 = arith.constant 0 : index
    %c0_112 = arith.constant 0 : index
    %c1_113 = arith.constant 1 : index
    %c2_114 = arith.constant 2 : index
    %c0_115 = arith.constant 0 : index
    %97 = vector.load %arg3[%c0_111, %c0_112, %c1_113, %c2_114, %c0_115] : memref<1x1x18x18x4xbf16, #tpu.memory_space<vmem>>, vector<1x1x16x16x4xbf16>
    %98 = vector.shape_cast %97 : vector<1x1x16x16x4xbf16> to vector<16x16x4xbf16>
    %99 = vector.shape_cast %98 : vector<16x16x4xbf16> to vector<256x4xbf16>
    %c14 = arith.constant 14 : index
    %c0_116 = arith.constant 0 : index
    %c0_117 = arith.constant 0 : index
    %100 = vector.load %arg5[%c14, %c0_116, %c0_117] : memref<27x4x128xbf16, #tpu.memory_space<vmem>>, vector<1x4x128xbf16>
    %101 = vector.shape_cast %100 : vector<1x4x128xbf16> to vector<4x128xbf16>
    %cst_118 = arith.constant dense<0.000000e+00> : vector<256x128xf32>
    %102 = tpu.matmul %99, %101, %cst_118 {dimension_numbers = #tpu.dot_dimension_numbers<[1], [0], [0], [1], [0, 0, 1, 1], [], []>} : vector<256x4xbf16>, vector<4x128xbf16>, vector<256x128xf32> -> vector<256x128xf32>
    %103 = arith.addf %96, %102 : vector<256x128xf32>
    %c0_119 = arith.constant 0 : index
    %c0_120 = arith.constant 0 : index
    %c2_121 = arith.constant 2 : index
    %c0_122 = arith.constant 0 : index
    %c0_123 = arith.constant 0 : index
    %104 = vector.load %arg3[%c0_119, %c0_120, %c2_121, %c0_122, %c0_123] : memref<1x1x18x18x4xbf16, #tpu.memory_space<vmem>>, vector<1x1x16x16x4xbf16>
    %105 = vector.shape_cast %104 : vector<1x1x16x16x4xbf16> to vector<16x16x4xbf16>
    %106 = vector.shape_cast %105 : vector<16x16x4xbf16> to vector<256x4xbf16>
    %c15 = arith.constant 15 : index
    %c0_124 = arith.constant 0 : index
    %c0_125 = arith.constant 0 : index
    %107 = vector.load %arg5[%c15, %c0_124, %c0_125] : memref<27x4x128xbf16, #tpu.memory_space<vmem>>, vector<1x4x128xbf16>
    %108 = vector.shape_cast %107 : vector<1x4x128xbf16> to vector<4x128xbf16>
    %cst_126 = arith.constant dense<0.000000e+00> : vector<256x128xf32>
    %109 = tpu.matmul %106, %108, %cst_126 {dimension_numbers = #tpu.dot_dimension_numbers<[1], [0], [0], [1], [0, 0, 1, 1], [], []>} : vector<256x4xbf16>, vector<4x128xbf16>, vector<256x128xf32> -> vector<256x128xf32>
    %110 = arith.addf %103, %109 : vector<256x128xf32>
    %c0_127 = arith.constant 0 : index
    %c0_128 = arith.constant 0 : index
    %c2_129 = arith.constant 2 : index
    %c1_130 = arith.constant 1 : index
    %c0_131 = arith.constant 0 : index
    %111 = vector.load %arg3[%c0_127, %c0_128, %c2_129, %c1_130, %c0_131] : memref<1x1x18x18x4xbf16, #tpu.memory_space<vmem>>, vector<1x1x16x16x4xbf16>
    %112 = vector.shape_cast %111 : vector<1x1x16x16x4xbf16> to vector<16x16x4xbf16>
    %113 = vector.shape_cast %112 : vector<16x16x4xbf16> to vector<256x4xbf16>
    %c16 = arith.constant 16 : index
    %c0_132 = arith.constant 0 : index
    %c0_133 = arith.constant 0 : index
    %114 = vector.load %arg5[%c16, %c0_132, %c0_133] : memref<27x4x128xbf16, #tpu.memory_space<vmem>>, vector<1x4x128xbf16>
    %115 = vector.shape_cast %114 : vector<1x4x128xbf16> to vector<4x128xbf16>
    %cst_134 = arith.constant dense<0.000000e+00> : vector<256x128xf32>
    %116 = tpu.matmul %113, %115, %cst_134 {dimension_numbers = #tpu.dot_dimension_numbers<[1], [0], [0], [1], [0, 0, 1, 1], [], []>} : vector<256x4xbf16>, vector<4x128xbf16>, vector<256x128xf32> -> vector<256x128xf32>
    %117 = arith.addf %110, %116 : vector<256x128xf32>
    %c0_135 = arith.constant 0 : index
    %c0_136 = arith.constant 0 : index
    %c2_137 = arith.constant 2 : index
    %c2_138 = arith.constant 2 : index
    %c0_139 = arith.constant 0 : index
    %118 = vector.load %arg3[%c0_135, %c0_136, %c2_137, %c2_138, %c0_139] : memref<1x1x18x18x4xbf16, #tpu.memory_space<vmem>>, vector<1x1x16x16x4xbf16>
    %119 = vector.shape_cast %118 : vector<1x1x16x16x4xbf16> to vector<16x16x4xbf16>
    %120 = vector.shape_cast %119 : vector<16x16x4xbf16> to vector<256x4xbf16>
    %c17 = arith.constant 17 : index
    %c0_140 = arith.constant 0 : index
    %c0_141 = arith.constant 0 : index
    %121 = vector.load %arg5[%c17, %c0_140, %c0_141] : memref<27x4x128xbf16, #tpu.memory_space<vmem>>, vector<1x4x128xbf16>
    %122 = vector.shape_cast %121 : vector<1x4x128xbf16> to vector<4x128xbf16>
    %cst_142 = arith.constant dense<0.000000e+00> : vector<256x128xf32>
    %123 = tpu.matmul %120, %122, %cst_142 {dimension_numbers = #tpu.dot_dimension_numbers<[1], [0], [0], [1], [0, 0, 1, 1], [], []>} : vector<256x4xbf16>, vector<4x128xbf16>, vector<256x128xf32> -> vector<256x128xf32>
    %124 = arith.addf %117, %123 : vector<256x128xf32>
    %c0_143 = arith.constant 0 : index
    %c0_144 = arith.constant 0 : index
    %c0_145 = arith.constant 0 : index
    %c0_146 = arith.constant 0 : index
    %c0_147 = arith.constant 0 : index
    %125 = vector.load %arg4[%c0_143, %c0_144, %c0_145, %c0_146, %c0_147] : memref<1x1x18x18x4xbf16, #tpu.memory_space<vmem>>, vector<1x1x16x16x4xbf16>
    %126 = vector.shape_cast %125 : vector<1x1x16x16x4xbf16> to vector<16x16x4xbf16>
    %127 = vector.shape_cast %126 : vector<16x16x4xbf16> to vector<256x4xbf16>
    %c18 = arith.constant 18 : index
    %c0_148 = arith.constant 0 : index
    %c0_149 = arith.constant 0 : index
    %128 = vector.load %arg5[%c18, %c0_148, %c0_149] : memref<27x4x128xbf16, #tpu.memory_space<vmem>>, vector<1x4x128xbf16>
    %129 = vector.shape_cast %128 : vector<1x4x128xbf16> to vector<4x128xbf16>
    %cst_150 = arith.constant dense<0.000000e+00> : vector<256x128xf32>
    %130 = tpu.matmul %127, %129, %cst_150 {dimension_numbers = #tpu.dot_dimension_numbers<[1], [0], [0], [1], [0, 0, 1, 1], [], []>} : vector<256x4xbf16>, vector<4x128xbf16>, vector<256x128xf32> -> vector<256x128xf32>
    %131 = arith.addf %124, %130 : vector<256x128xf32>
    %c0_151 = arith.constant 0 : index
    %c0_152 = arith.constant 0 : index
    %c0_153 = arith.constant 0 : index
    %c1_154 = arith.constant 1 : index
    %c0_155 = arith.constant 0 : index
    %132 = vector.load %arg4[%c0_151, %c0_152, %c0_153, %c1_154, %c0_155] : memref<1x1x18x18x4xbf16, #tpu.memory_space<vmem>>, vector<1x1x16x16x4xbf16>
    %133 = vector.shape_cast %132 : vector<1x1x16x16x4xbf16> to vector<16x16x4xbf16>
    %134 = vector.shape_cast %133 : vector<16x16x4xbf16> to vector<256x4xbf16>
    %c19 = arith.constant 19 : index
    %c0_156 = arith.constant 0 : index
    %c0_157 = arith.constant 0 : index
    %135 = vector.load %arg5[%c19, %c0_156, %c0_157] : memref<27x4x128xbf16, #tpu.memory_space<vmem>>, vector<1x4x128xbf16>
    %136 = vector.shape_cast %135 : vector<1x4x128xbf16> to vector<4x128xbf16>
    %cst_158 = arith.constant dense<0.000000e+00> : vector<256x128xf32>
    %137 = tpu.matmul %134, %136, %cst_158 {dimension_numbers = #tpu.dot_dimension_numbers<[1], [0], [0], [1], [0, 0, 1, 1], [], []>} : vector<256x4xbf16>, vector<4x128xbf16>, vector<256x128xf32> -> vector<256x128xf32>
    %138 = arith.addf %131, %137 : vector<256x128xf32>
    %c0_159 = arith.constant 0 : index
    %c0_160 = arith.constant 0 : index
    %c0_161 = arith.constant 0 : index
    %c2_162 = arith.constant 2 : index
    %c0_163 = arith.constant 0 : index
    %139 = vector.load %arg4[%c0_159, %c0_160, %c0_161, %c2_162, %c0_163] : memref<1x1x18x18x4xbf16, #tpu.memory_space<vmem>>, vector<1x1x16x16x4xbf16>
    %140 = vector.shape_cast %139 : vector<1x1x16x16x4xbf16> to vector<16x16x4xbf16>
    %141 = vector.shape_cast %140 : vector<16x16x4xbf16> to vector<256x4xbf16>
    %c20 = arith.constant 20 : index
    %c0_164 = arith.constant 0 : index
    %c0_165 = arith.constant 0 : index
    %142 = vector.load %arg5[%c20, %c0_164, %c0_165] : memref<27x4x128xbf16, #tpu.memory_space<vmem>>, vector<1x4x128xbf16>
    %143 = vector.shape_cast %142 : vector<1x4x128xbf16> to vector<4x128xbf16>
    %cst_166 = arith.constant dense<0.000000e+00> : vector<256x128xf32>
    %144 = tpu.matmul %141, %143, %cst_166 {dimension_numbers = #tpu.dot_dimension_numbers<[1], [0], [0], [1], [0, 0, 1, 1], [], []>} : vector<256x4xbf16>, vector<4x128xbf16>, vector<256x128xf32> -> vector<256x128xf32>
    %145 = arith.addf %138, %144 : vector<256x128xf32>
    %c0_167 = arith.constant 0 : index
    %c0_168 = arith.constant 0 : index
    %c1_169 = arith.constant 1 : index
    %c0_170 = arith.constant 0 : index
    %c0_171 = arith.constant 0 : index
    %146 = vector.load %arg4[%c0_167, %c0_168, %c1_169, %c0_170, %c0_171] : memref<1x1x18x18x4xbf16, #tpu.memory_space<vmem>>, vector<1x1x16x16x4xbf16>
    %147 = vector.shape_cast %146 : vector<1x1x16x16x4xbf16> to vector<16x16x4xbf16>
    %148 = vector.shape_cast %147 : vector<16x16x4xbf16> to vector<256x4xbf16>
    %c21 = arith.constant 21 : index
    %c0_172 = arith.constant 0 : index
    %c0_173 = arith.constant 0 : index
    %149 = vector.load %arg5[%c21, %c0_172, %c0_173] : memref<27x4x128xbf16, #tpu.memory_space<vmem>>, vector<1x4x128xbf16>
    %150 = vector.shape_cast %149 : vector<1x4x128xbf16> to vector<4x128xbf16>
    %cst_174 = arith.constant dense<0.000000e+00> : vector<256x128xf32>
    %151 = tpu.matmul %148, %150, %cst_174 {dimension_numbers = #tpu.dot_dimension_numbers<[1], [0], [0], [1], [0, 0, 1, 1], [], []>} : vector<256x4xbf16>, vector<4x128xbf16>, vector<256x128xf32> -> vector<256x128xf32>
    %152 = arith.addf %145, %151 : vector<256x128xf32>
    %c0_175 = arith.constant 0 : index
    %c0_176 = arith.constant 0 : index
    %c1_177 = arith.constant 1 : index
    %c1_178 = arith.constant 1 : index
    %c0_179 = arith.constant 0 : index
    %153 = vector.load %arg4[%c0_175, %c0_176, %c1_177, %c1_178, %c0_179] : memref<1x1x18x18x4xbf16, #tpu.memory_space<vmem>>, vector<1x1x16x16x4xbf16>
    %154 = vector.shape_cast %153 : vector<1x1x16x16x4xbf16> to vector<16x16x4xbf16>
    %155 = vector.shape_cast %154 : vector<16x16x4xbf16> to vector<256x4xbf16>
    %c22 = arith.constant 22 : index
    %c0_180 = arith.constant 0 : index
    %c0_181 = arith.constant 0 : index
    %156 = vector.load %arg5[%c22, %c0_180, %c0_181] : memref<27x4x128xbf16, #tpu.memory_space<vmem>>, vector<1x4x128xbf16>
    %157 = vector.shape_cast %156 : vector<1x4x128xbf16> to vector<4x128xbf16>
    %cst_182 = arith.constant dense<0.000000e+00> : vector<256x128xf32>
    %158 = tpu.matmul %155, %157, %cst_182 {dimension_numbers = #tpu.dot_dimension_numbers<[1], [0], [0], [1], [0, 0, 1, 1], [], []>} : vector<256x4xbf16>, vector<4x128xbf16>, vector<256x128xf32> -> vector<256x128xf32>
    %159 = arith.addf %152, %158 : vector<256x128xf32>
    %c0_183 = arith.constant 0 : index
    %c0_184 = arith.constant 0 : index
    %c1_185 = arith.constant 1 : index
    %c2_186 = arith.constant 2 : index
    %c0_187 = arith.constant 0 : index
    %160 = vector.load %arg4[%c0_183, %c0_184, %c1_185, %c2_186, %c0_187] : memref<1x1x18x18x4xbf16, #tpu.memory_space<vmem>>, vector<1x1x16x16x4xbf16>
    %161 = vector.shape_cast %160 : vector<1x1x16x16x4xbf16> to vector<16x16x4xbf16>
    %162 = vector.shape_cast %161 : vector<16x16x4xbf16> to vector<256x4xbf16>
    %c23 = arith.constant 23 : index
    %c0_188 = arith.constant 0 : index
    %c0_189 = arith.constant 0 : index
    %163 = vector.load %arg5[%c23, %c0_188, %c0_189] : memref<27x4x128xbf16, #tpu.memory_space<vmem>>, vector<1x4x128xbf16>
    %164 = vector.shape_cast %163 : vector<1x4x128xbf16> to vector<4x128xbf16>
    %cst_190 = arith.constant dense<0.000000e+00> : vector<256x128xf32>
    %165 = tpu.matmul %162, %164, %cst_190 {dimension_numbers = #tpu.dot_dimension_numbers<[1], [0], [0], [1], [0, 0, 1, 1], [], []>} : vector<256x4xbf16>, vector<4x128xbf16>, vector<256x128xf32> -> vector<256x128xf32>
    %166 = arith.addf %159, %165 : vector<256x128xf32>
    %c0_191 = arith.constant 0 : index
    %c0_192 = arith.constant 0 : index
    %c2_193 = arith.constant 2 : index
    %c0_194 = arith.constant 0 : index
    %c0_195 = arith.constant 0 : index
    %167 = vector.load %arg4[%c0_191, %c0_192, %c2_193, %c0_194, %c0_195] : memref<1x1x18x18x4xbf16, #tpu.memory_space<vmem>>, vector<1x1x16x16x4xbf16>
    %168 = vector.shape_cast %167 : vector<1x1x16x16x4xbf16> to vector<16x16x4xbf16>
    %169 = vector.shape_cast %168 : vector<16x16x4xbf16> to vector<256x4xbf16>
    %c24 = arith.constant 24 : index
    %c0_196 = arith.constant 0 : index
    %c0_197 = arith.constant 0 : index
    %170 = vector.load %arg5[%c24, %c0_196, %c0_197] : memref<27x4x128xbf16, #tpu.memory_space<vmem>>, vector<1x4x128xbf16>
    %171 = vector.shape_cast %170 : vector<1x4x128xbf16> to vector<4x128xbf16>
    %cst_198 = arith.constant dense<0.000000e+00> : vector<256x128xf32>
    %172 = tpu.matmul %169, %171, %cst_198 {dimension_numbers = #tpu.dot_dimension_numbers<[1], [0], [0], [1], [0, 0, 1, 1], [], []>} : vector<256x4xbf16>, vector<4x128xbf16>, vector<256x128xf32> -> vector<256x128xf32>
    %173 = arith.addf %166, %172 : vector<256x128xf32>
    %c0_199 = arith.constant 0 : index
    %c0_200 = arith.constant 0 : index
    %c2_201 = arith.constant 2 : index
    %c1_202 = arith.constant 1 : index
    %c0_203 = arith.constant 0 : index
    %174 = vector.load %arg4[%c0_199, %c0_200, %c2_201, %c1_202, %c0_203] : memref<1x1x18x18x4xbf16, #tpu.memory_space<vmem>>, vector<1x1x16x16x4xbf16>
    %175 = vector.shape_cast %174 : vector<1x1x16x16x4xbf16> to vector<16x16x4xbf16>
    %176 = vector.shape_cast %175 : vector<16x16x4xbf16> to vector<256x4xbf16>
    %c25 = arith.constant 25 : index
    %c0_204 = arith.constant 0 : index
    %c0_205 = arith.constant 0 : index
    %177 = vector.load %arg5[%c25, %c0_204, %c0_205] : memref<27x4x128xbf16, #tpu.memory_space<vmem>>, vector<1x4x128xbf16>
    %178 = vector.shape_cast %177 : vector<1x4x128xbf16> to vector<4x128xbf16>
    %cst_206 = arith.constant dense<0.000000e+00> : vector<256x128xf32>
    %179 = tpu.matmul %176, %178, %cst_206 {dimension_numbers = #tpu.dot_dimension_numbers<[1], [0], [0], [1], [0, 0, 1, 1], [], []>} : vector<256x4xbf16>, vector<4x128xbf16>, vector<256x128xf32> -> vector<256x128xf32>
    %180 = arith.addf %173, %179 : vector<256x128xf32>
    %c0_207 = arith.constant 0 : index
    %c0_208 = arith.constant 0 : index
    %c2_209 = arith.constant 2 : index
    %c2_210 = arith.constant 2 : index
    %c0_211 = arith.constant 0 : index
    %181 = vector.load %arg4[%c0_207, %c0_208, %c2_209, %c2_210, %c0_211] : memref<1x1x18x18x4xbf16, #tpu.memory_space<vmem>>, vector<1x1x16x16x4xbf16>
    %182 = vector.shape_cast %181 : vector<1x1x16x16x4xbf16> to vector<16x16x4xbf16>
    %183 = vector.shape_cast %182 : vector<16x16x4xbf16> to vector<256x4xbf16>
    %c26 = arith.constant 26 : index
    %c0_212 = arith.constant 0 : index
    %c0_213 = arith.constant 0 : index
    %184 = vector.load %arg5[%c26, %c0_212, %c0_213] : memref<27x4x128xbf16, #tpu.memory_space<vmem>>, vector<1x4x128xbf16>
    %185 = vector.shape_cast %184 : vector<1x4x128xbf16> to vector<4x128xbf16>
    %cst_214 = arith.constant dense<0.000000e+00> : vector<256x128xf32>
    %186 = tpu.matmul %183, %185, %cst_214 {dimension_numbers = #tpu.dot_dimension_numbers<[1], [0], [0], [1], [0, 0, 1, 1], [], []>} : vector<256x4xbf16>, vector<4x128xbf16>, vector<256x128xf32> -> vector<256x128xf32>
    %187 = arith.addf %180, %186 : vector<256x128xf32>
    %c0_215 = arith.constant 0 : index
    %c0_216 = arith.constant 0 : index
    %188 = vector.load %arg6[%c0_215, %c0_216] : memref<1x128xf32, #tpu.memory_space<vmem>>, vector<1x128xf32>
    %189 = vector.broadcast %188 : vector<1x128xf32> to vector<256x128xf32>
    %190 = arith.addf %187, %189 : vector<256x128xf32>
    %cst_217 = arith.constant 0.000000e+00 : f32
    %191 = vector.broadcast %cst_217 : f32 to vector<256x128xf32>
    %192 = arith.maximumf %190, %191 : vector<256x128xf32>
    %193 = vector.shape_cast %192 : vector<256x128xf32> to vector<16x16x128xf32>
    %194 = vector.extract_strided_slice %193 {offsets = [0, 0, 0], sizes = [16, 16, 8], strides = [1, 1, 1]} : vector<16x16x128xf32> to vector<16x16x8xf32>
    %c0_218 = arith.constant 0 : index
    %c0_219 = arith.constant 0 : index
    %c0_220 = arith.constant 0 : index
    %c0_221 = arith.constant 0 : index
    %c0_222 = arith.constant 0 : index
    %195 = vector.load %arg7[%c0_218, %c0_219, %c0_220, %c0_221, %c0_222] : memref<1x1x16x16x8xf32, #tpu.memory_space<vmem>>, vector<1x1x16x16x8xf32>
    %196 = vector.shape_cast %195 : vector<1x1x16x16x8xf32> to vector<16x16x8xf32>
    %197 = vector.shape_cast %194 : vector<16x16x8xf32> to vector<1x1x16x16x8xf32>
    tpu.vector_store %arg7[%c0_218, %c0_219, %c0_220, %c0_221, %c0_222], %197 {strides = array<i32>} : memref<1x1x16x16x8xf32, #tpu.memory_space<vmem>>, vector<1x1x16x16x8xf32>,
    return
  }
  func.func @transform_0(%arg0: i32, %arg1: i32) -> (i32, i32, i32, i32, i32) {
    %c0_i32 = arith.constant 0 : i32
    %c0_i32_0 = arith.constant 0 : i32
    %c0_i32_1 = arith.constant 0 : i32
    %c0_i32_2 = arith.constant 0 : i32
    return %arg0, %arg1, %c0_i32, %c0_i32_0, %c0_i32_1 : i32, i32, i32, i32, i32
  }
  func.func @transform_1(%arg0: i32, %arg1: i32) -> (i32, i32, i32, i32, i32) {
    %c1_i32 = arith.constant 1 : i32
    %0 = arith.addi %arg1, %c1_i32 : i32
    %c0_i32 = arith.constant 0 : i32
    %c0_i32_0 = arith.constant 0 : i32
    %c0_i32_1 = arith.constant 0 : i32
    %c0_i32_2 = arith.constant 0 : i32
    return %arg0, %0, %c0_i32, %c0_i32_0, %c0_i32_1 : i32, i32, i32, i32, i32
  }
  func.func @transform_2(%arg0: i32, %arg1: i32) -> (i32, i32, i32, i32, i32) {
    %c2_i32 = arith.constant 2 : i32
    %0 = arith.addi %arg1, %c2_i32 : i32
    %c0_i32 = arith.constant 0 : i32
    %c0_i32_0 = arith.constant 0 : i32
    %c0_i32_1 = arith.constant 0 : i32
    %c0_i32_2 = arith.constant 0 : i32
    return %arg0, %0, %c0_i32, %c0_i32_0, %c0_i32_1 : i32, i32, i32, i32, i32
  }
  func.func @transform_3(%arg0: i32, %arg1: i32) -> (i32, i32, i32) {
    %c0_i32 = arith.constant 0 : i32
    %c0_i32_0 = arith.constant 0 : i32
    %c0_i32_1 = arith.constant 0 : i32
    %c0_i32_2 = arith.constant 0 : i32
    return %c0_i32, %c0_i32_0, %c0_i32_1 : i32, i32, i32
  }
  func.func @transform_4(%arg0: i32, %arg1: i32) -> (i32, i32) {
    %c0_i32 = arith.constant 0 : i32
    %c0_i32_0 = arith.constant 0 : i32
    %c0_i32_1 = arith.constant 0 : i32
    return %c0_i32, %c0_i32_0 : i32, i32
  }
  func.func @transform_5(%arg0: i32, %arg1: i32) -> (i32, i32, i32, i32, i32) {
    %c0_i32 = arith.constant 0 : i32
    %c0_i32_0 = arith.constant 0 : i32
    %c0_i32_1 = arith.constant 0 : i32
    %c0_i32_2 = arith.constant 0 : i32
    return %arg0, %arg1, %c0_i32, %c0_i32_0, %c0_i32_1 : i32, i32, i32, i32, i32
  }
}

</mosaic_0001>

<bundles_post_ra>
// kernel: conv_bn_relu_3d.1
= control target key start
LH: loop header
LB: loop body
LE: loop exit
PB: predicated region body
PF: predicated region fallthrough
CT: control target
= control target key end

     0   :  { %s17785_s18 = smov 0   ;;  %s17787_s19 = smov 0   ;;  %s24890_s0 = inlined_call_operand.vmem [shape: bf16[2,10,18,18,4], index: 0, kind: input, shape index: {}, may-alias: {0,1,2}]   ;;  %s24891_s1 = inlined_call_operand.vmem [shape: bf16[2,10,18,18,4], index: 1, kind: input, shape index: {}, may-alias: {0,1,2}]   ;;  %s24892_s2 = inlined_call_operand.vmem [shape: bf16[2,10,18,18,4], index: 2, kind: input, shape index: {}, may-alias: {0,1,2}]   ;;  %s24893_s3 = inlined_call_operand.vmem [shape: bf16[27,4,128], index: 3, kind: input, shape index: {}]   ;;  %s24894_s4 = inlined_call_operand.vmem [shape: f32[1,128], index: 4, kind: input, shape index: {}]   ;;  %s24895_s5 = inlined_call_operand.vmem [shape: f32[2,8,16,16,8], index: 5, kind: output, shape index: {}]  }
   0x1   :  { %s17789_s20 = smov 0   ;;  %s17791_s21 = smov 0  }
   0x2   :  { %s17793_s22 = smov 0  }
   0x3 LB: > { %s24_s23 = sadd.s32 1, %s17745_s20  ;;  %s27_s24 = sadd.s32 1, %s17749_s21  ;;  %s17753_s22 = sphi %s17793_s22, %s15_s22   ;;  %s17749_s21 = sphi %s17791_s21, %s25758_s21   ;;  %s17745_s20 = sphi %s17789_s20, %s25757_s20   ;;  %s17741_s19 = sphi %s17787_s19, %s25756_s19   ;;  %s17737_s18 = sphi %s17785_s18, %s25755_s18  }
   0x4   : > { %p25_p0 = scmp.ge.s32.totalorder %s24_s23, 8  ;;  %p14476_p1 = scmp.ge.s32.totalorder %s17753_s22, 1 }
   0x5   : > { %p247_p2 = scmp.lt.s32.totalorder %s17753_s22, 17 }
   0x6   : > { %s25760_s23 = smov (%p25_p0, %s24_s23), 0  ;;  %s25762_s24 = smov (!%p25_p0, %s27_s24), %s17749_s21 }
   0x7   : > { %p248_p3 = pnand %p14476_p1, %p247_p2  ;;  %p29_p4 = scmp.ge.s32.totalorder %s25762_s24, 2 }
   0x9   : > { %s25764_s24 = smov (%p29_p4, %s25762_s24), 0  ;;  %251 = sbr.rel (%p248_p3) target bundleno = 1277 (0x4fd), region = 40 }
   0xe   : > { %v14483_v0 = vld [vmem:[%s24893_s3 + $0x2] sm:$0x3]  ;;  %vm879_vm0 = vcmask 1041408   ;;  %p303_p5 = scmp.lt.s32.totalorder %s17741_s19, 1  ;;  %p305_p6 = scmp.lt.s32.totalorder %s17737_s18, 9  ;;  %vm830_vm3 = vcmask 31744  }
   0xf   : > { %17476 = vmatprep.subr.msk.bf16.mxu1 %vm879_vm0, %v14483_v0  ;;  %17475 = vmatprep.subr.msk.bf16.mxu0 %vm879_vm0, %v14483_v0  ;;  %v881_v1 = vsel %vm879_vm0, %v14483_v0, 0  ;;  %v376_v2 = vld [vmem:[%s24893_s3] sm:$0x3]  ;;  %v14564_v3 = vld [vmem:[%s24893_s3 + $0x4] sm:$0x3]  ;;  %v24995_v36 = vmov 0 }
  0x10   : > { %17474 = vmatpush3.bf16.msra.mxu1 %v881_v1  ;;  %16556 = vmatpush3.bf16.msra.mxu0 %v881_v1  ;;  %s25766_s19 = smov (!%p303_p5, %s17741_s19), 1  ;;  %v17841_v4 = vld [vmem:[%s24893_s3 + $0x6] sm:$0x3]  ;;  %v17846_v5 = vld [vmem:[%s24893_s3 + $0x8] sm:$0x3]  ;;  %v17855_v6 = vsel %vm879_vm0, %v376_v2, 0 }
  0x11   : > { %s306_s29 = scalar_select %p305_p6, %s17737_s18, 9  ;;  %17477 = vmatprep.subr.msk.bf16.mxu1 %vm879_vm0, %v376_v2  ;;  %17478 = vmatprep.subr.msk.bf16.mxu0 %vm879_vm0, %v14564_v3  ;;  %vm393_vm1 = vsmask.f32 3328  ;;  %vm394_vm2 = vsmask.f32 7440  ;;  %v17858_v7 = vsel %vm879_vm0, %v14564_v3, 0 }
  0x12   : > { %s17835_s7 = smul.u32 540, %s25766_s19  ;;  %v17862_v8 = vsel %vm879_vm0, %v17841_v4, 0  ;;  %v17866_v9 = vsel %vm879_vm0, %v17846_v5, 0  ;;  %vm17904_vm4 = vmor %vm393_vm1, %vm394_vm2  ;;  %vm1384_vm5 = vcmask 1042432   ;;  %vm1385_vm6 = vcmask 1046532   ;;  %p336_p9 = scmp.lt.s32.totalorder %s17737_s18, 7 }
  0x13   : > { %s17503_s8 = smul.u32 54, %s306_s29  ;;  %v24996_v36 = vsel %vm17904_vm4, 4294967295, %v24995_v36  ;;  %vm18183_vm7 = vmor %vm1384_vm5, %vm1385_vm6  ;;  %s312_s29 = sadd.s32 1, %s17737_s18  ;;  %vm14302_vm8 = vcmask 64512  }
  0x14   : > { %24997 = vst [vmem:[#allocation2_spill] sm:$0xff] %v24996_v36  ;;  %p18674_p7 = scmp.lt.s32.totalorder %s312_s29, 9  ;;  %s14481_s25 = sshll.u32 %s25766_s19, 8 }
  0x15   : > { %s309_s13 = sadd.s32 %s17835_s7, %s17503_s8 }
  0x16   : > { %s14477_s14 = sshll.u32 %s309_s13, 2  ;;  %s25768_s29 = smov (!%p18674_p7, %s312_s29), 9 }
  0x17   : > { %s17852_s17 = scalar_lea.vmem %s24890_s0, %s14477_s14  ;;  %s17505_s6 = smul.u32 54, %s25768_s29 }
  0x18   : > { %v17869_v10 = vld [vmem:[%s17852_s17] sm:$0xf]  ;;  %v17872_v11 = vld [vmem:[%s17852_s17 + $0x4] sm:$0xf]  ;;  %v17875_v12 = vld [vmem:[%s17852_s17 + $0x8] sm:$0x1] }
  0x19   : > { %v397_v13 = vshrl.u32 %v17869_v10, 16  ;;  %v400_v14 = vshll.u32 %v17869_v10, 16  ;;  %v406_v15 = vshll.u32 %v17872_v11, 16  ;;  %v410_v16 = vshrl.u32 %v17872_v11, 16  ;;  %v17884_v19 = vld [vmem:[%s17852_s17 + $0x60] sm:$0xf]  ;;  %s18771_s12 = sadd.s32 %s17505_s6, %s17835_s7 }
  0x1a   : > { %v416_v17 = vshll.u32 %v17875_v12, 16  ;;  %v17887_v20 = vld [vmem:[%s17852_s17 + $0x64] sm:$0xf]  ;;  %v17892_v27 = vld [vmem:[%s17852_s17 + $0x68] sm:$0x1]  ;;  %v589_v28 = vshrl.u32 %v17884_v19, 16 }
  0x1b   : > { %v399_v22 = vrot.slane %v397_v13, 4  ;;  %v402_v23 = vrot.slane %v400_v14, 5  ;;  %v408_v24 = vrot.slane %v406_v15, 5  ;;  %v412_v25 = vrot.slane %v410_v16, 4  ;;  %v17900_v35 = vld [vmem:[%s17852_s17 + $0xc] sm:$0xf] }
  0x1c   : > { %v418_v26 = vrot.slane %v416_v17, 5  ;;  %v592_v29 = vshll.u32 %v17884_v19, 16  ;;  %v598_v30 = vshll.u32 %v17887_v20, 16  ;;  %v602_v33 = vshrl.u32 %v17887_v20, 16  ;;  %v17910_v41 = vld [vmem:[%s17852_s17 + $0x10] sm:$0xf] }
  0x1d   : > { %v403_v31 = vor.u32 %v402_v23, %v399_v22  ;;  %v413_v32 = vor.u32 %v412_v25, %v408_v24  ;;  %v608_v34 = vshll.u32 %v17892_v27, 16  ;;  %v591_v37 = vrot.slane %v589_v28, 4  ;;  %v17913_v47 = vld [vmem:[%s17852_s17 + $0x14] sm:$0x1]  ;;  %v17924_v59 = vld [vmem:[%s17852_s17 + $0x6c] sm:$0xf] }
  0x1e   : > { %v594_v38 = vrot.slane %v592_v29, 5  ;;  %v600_v39 = vrot.slane %v598_v30, 5  ;;  %v604_v44 = vrot.slane %v602_v33, 4  ;;  %v421_v48 = vshrl.u32 %v17900_v35, 16  ;;  %v17928_v0 = vld [vmem:[%s17852_s17 + $0x70] sm:$0xf] }
  0x1f   : > { %v404_v42 = vrot.slane %v403_v31, 4  ;;  %v414_v43 = vrot.slane %v413_v32, 4  ;;  %v610_v45 = vrot.slane %v608_v34, 5  ;;  %v424_v49 = vshll.u32 %v17900_v35, 16  ;;  %v17936_v14 = vld [vmem:[%s17852_s17 + $0x74] sm:$0x1] }
  0x20   : > { %v595_v46 = vor.u32 %v594_v38, %v591_v37  ;;  %v430_v50 = vshll.u32 %v17910_v41, 16  ;;  %v605_v53 = vor.u32 %v604_v44, %v600_v39  ;;  %v434_v54 = vshrl.u32 %v17910_v41, 16  ;;  %v17942_v23 = vld [vmem:[%s17852_s17 + $0x18] sm:$0xf]  ;;  %v17949_v33 = vld [vmem:[%s17852_s17 + $0x1c] sm:$0xf] }
  0x21   : > { %v409_v51 = vsel %vm17904_vm4, %v404_v42, %v408_v24  ;;  %v419_v52 = vsel %vm17904_vm4, %v414_v43, %v418_v26  ;;  %v423_v57 = vrot.slane %v421_v48, 4  ;;  %v426_v58 = vrot.slane %v424_v49, 5  ;;  %v17962_v48 = vld [vmem:[%s17852_s17 + $0x78] sm:$0xf]  ;;  %s14478_s13 = sshll.u32 %s18771_s12, 2  ;;  %s323_s29 = sadd.s32 2, %s17737_s18 }
  0x22   : > { %v14484_v55 = vcombine.low %v409_v51, %v419_v52  ;;  %v596_v56 = vrot.slane %v595_v46, 4  ;;  %v606_v60 = vrot.slane %v605_v53, 4  ;;  %v432_v61 = vrot.slane %v430_v50, 5  ;;  %s18815_s16 = scalar_lea.vmem %s24891_s1, %s14478_s13  ;;  %p19561_p8 = scmp.lt.s32.totalorder %s323_s29, 9 }
  0x23   : > { %v436_v62 = vrot.slane %v434_v54, 4  ;;  %v440_v63 = vshll.u32 %v17913_v47, 16  ;;  %v427_v2 = vor.u32 %v426_v58, %v423_v57  ;;  %v613_v22 = vshrl.u32 %v17924_v59, 16  ;;  %v17968_v57 = vld [vmem:[%s17852_s17 + $0x7c] sm:$0xf]  ;;  %s25772_s18 = smov (!%p336_p9, %s17737_s18), 7 }
  0x24   : > { %16557 = vmatprep.mubr.msk.bf16.mxu0 %vm830_vm3, %v14484_v55  ;;  %v601_v1 = vsel %vm17904_vm4, %v596_v56, %v600_v39  ;;  %v611_v15 = vsel %vm17904_vm4, %v606_v60, %v610_v45  ;;  %v616_v26 = vshll.u32 %v17924_v59, 16  ;;  %v622_v28 = vshll.u32 %v17928_v0, 16  ;;  %v17955_v39 = vld [vmem:[%s17852_s17 + $0x20] sm:$0x1]  ;;  %s25770_s29 = smov (!%p19561_p8, %s323_s29), 9 }
  0x25   : > { %v437_v16 = vor.u32 %v436_v62, %v432_v61  ;;  %v442_v17 = vrot.slane %v440_v63, 5  ;;  %v14492_v24 = vcombine.low %v601_v1, %v611_v15  ;;  %v428_v25 = vrot.slane %v427_v2, 4  ;;  %s17506_s11 = smul.u32 54, %s25770_s29 }
  0x26   : > { %v615_v30 = vrot.slane %v613_v22, 4  ;;  %v626_v31 = vshrl.u32 %v17928_v0, 16  ;;  %v632_v32 = vshll.u32 %v17936_v14, 16  ;;  %v618_v37 = vrot.slane %v616_v26, 5  ;;  %v17981_v26 = vld [vmem:[%s17852_s17 + $0x24] sm:$0xf] }
  0x27   : > { %v438_v29 = vrot.slane %v437_v16, 4  ;;  %16573 = vmatprep.mubr.msk.bf16.mxu1 %vm830_vm3, %v14492_v24  ;;  %v433_v34 = vsel %vm17904_vm4, %v428_v25, %v432_v61  ;;  %v624_v38 = vrot.slane %v622_v28, 5  ;;  %v445_v42 = vshrl.u32 %v17942_v23, 16  ;;  %v17975_v16 = vld [vmem:[%s17852_s17 + $0x80] sm:$0x1]  ;;  %s19706_s12 = sadd.s32 %s17506_s11, %s17835_s7 }
  0x28   : > { %v628_v44 = vrot.slane %v626_v31, 4  ;;  %v634_v45 = vrot.slane %v632_v32, 5  ;;  %v448_v46 = vshll.u32 %v17942_v23, 16  ;;  %v619_v50 = vor.u32 %v618_v37, %v615_v30  ;;  %v17989_v31 = vld [vmem:[%s17852_s17 + $0x28] sm:$0xf]  ;;  %s14479_s7 = sshll.u32 %s19706_s12, 2 }
  0x29   : > { %v443_v43 = vsel %vm17904_vm4, %v438_v29, %v442_v17  ;;  %v447_v51 = vrot.slane %v445_v42, 4  ;;  %v454_v52 = vshll.u32 %v17949_v33, 16  ;;  %v458_v55 = vshrl.u32 %v17949_v33, 16  ;;  %s19775_s14 = scalar_lea.vmem %s24892_s2, %s14479_s7 }
  0x2a   : > { %v14485_v49 = vcombine.low %v433_v34, %v443_v43  ;;  %v629_v53 = vor.u32 %v628_v44, %v624_v38  ;;  %v450_v54 = vrot.slane %v448_v46, 5  ;;  %v464_v56 = vshll.u32 %v17955_v39, 16  ;;  %v17995_v44 = vld [vmem:[%s17852_s17 + $0x2c] sm:$0x1] }
  0x2b   : > { %v620_v58 = vrot.slane %v619_v50, 4  ;;  %v456_v60 = vrot.slane %v454_v52, 5  ;;  %v637_v61 = vshrl.u32 %v17962_v48, 16  ;;  %v640_v62 = vshll.u32 %v17962_v48, 16  ;;  %v18002_v52 = vld [vmem:[%s17852_s17 + $0x84] sm:$0xf] }
  0x2c   : > { %16558 = vmatmul.mubr.msk.bf16.vlgmr.msra.gmra.mxu0 %vm830_vm3, %v14485_v49  ;;  %v630_v63 = vrot.slane %v629_v53, 4  ;;  %v451_v1 = vor.u32 %v450_v54, %v447_v51  ;;  %v460_v2 = vrot.slane %v458_v55, 4  ;;  %v466_v15 = vrot.slane %v464_v56, 5  ;;  %24998 = vst [vmem:[#allocation3_spill] sm:$0xff] %v18002_v52 }
  0x2d   : > { %16624 = vmatpush3.bf16.msra.mxu0 %v17858_v7  ;;  %v625_v17 = vsel %vm17904_vm4, %v620_v58, %v624_v38  ;;  %v639_v22 = vrot.slane %v637_v61, 4  ;;  %v642_v24 = vrot.slane %v640_v62, 5  ;;  %v646_v25 = vshll.u32 %v17968_v57, 16  ;;  %v18009_v58 = vld [vmem:[%s17852_s17 + $0x88] sm:$0xf] }
  0x2e   : > { %17480 = vmatprep.subr.msk.bf16.mxu0 %vm879_vm0, %v17846_v5  ;;  %v635_v7 = vsel %vm17904_vm4, %v630_v63, %v634_v45  ;;  %v452_v28 = vrot.slane %v451_v1, 4  ;;  %v461_v29 = vor.u32 %v460_v2, %v456_v60  ;;  %v650_v30 = vshrl.u32 %v17968_v57, 16 }
  0x2f   : > { %v14493_v32 = vcombine.low %v625_v17, %v635_v7  ;;  %v643_v34 = vor.u32 %v642_v24, %v639_v22  ;;  %v648_v37 = vrot.slane %v646_v25, 5  ;;  %v656_v38 = vshll.u32 %v17975_v16, 16 }
  0x30   : > { %v457_v42 = vsel %vm17904_vm4, %v452_v28, %v456_v60  ;;  %v462_v5 = vrot.slane %v461_v29, 4  ;;  %v652_v43 = vrot.slane %v650_v30, 4  ;;  %v469_v45 = vshrl.u32 %v17981_v26, 16  ;;  %v18025_v28 = vld [vmem:[%s17852_s17 + $0x30] sm:$0xf] }
  0x31   : > { %16574 = vmatmul.mubr.msk.bf16.vlgmr.msra.gmra.mxu1 %vm830_vm3, %v14493_v32  ;;  %v644_v46 = vrot.slane %v643_v34, 4  ;;  %v658_v49 = vrot.slane %v656_v38, 5  ;;  %v472_v50 = vshll.u32 %v17981_v26, 16  ;;  %v478_v51 = vshll.u32 %v17989_v31, 16  ;;  %v18030_v34 = vld [vmem:[%s17852_s17 + $0x34] sm:$0xf] }
  0x32   : > { %16590 = vmatpush3.bf16.msra.mxu1 %v17855_v6  ;;  %v467_v53 = vsel %vm17904_vm4, %v462_v5, %v466_v15  ;;  %v653_v54 = vor.u32 %v652_v43, %v648_v37  ;;  %v471_v55 = vrot.slane %v469_v45, 4  ;;  %v482_v56 = vshrl.u32 %v17989_v31, 16  ;;  %v18017_v15 = vld [vmem:[%s17852_s17 + $0x8c] sm:$0x1] }
  0x33   : > { %v14486_v60 = vcombine.low %v457_v42, %v467_v53  ;;  %v649_v61 = vsel %vm17904_vm4, %v644_v46, %v648_v37  ;;  %v474_v62 = vrot.slane %v472_v50, 5  ;;  %v480_v63 = vrot.slane %v478_v51, 5  ;;  %17479 = vmatprep.subr.msk.bf16.mxu1 %vm879_vm0, %v17841_v4  ;;  %24999 = vst [vmem:[#allocation4_spill] sm:$0xff] %v18017_v15  ;;  %v18038_v53 = vld [vmem:[%s17852_s17 + $0x38] sm:$0x1] }
  0x34   : > { %v654_v6 = vrot.slane %v653_v54, 4  ;;  %v484_v1 = vrot.slane %v482_v56, 4  ;;  %v488_v2 = vshll.u32 %v17995_v44, 16  ;;  %v661_v17 = vshrl.u32 %v18002_v52, 16  ;;  %v18043_v56 = vld [vmem:[%s17852_s17 + $0x90] sm:$0xf] }
  0x35   : > { %16561 = vmatprep.mubr.msk.bf16.mxu0 %vm830_vm3, %v14486_v60  ;;  %v475_v22 = vor.u32 %v474_v62, %v471_v55  ;;  %v664_v24 = vshll.u32 %v18002_v52, 16  ;;  %v670_v25 = vshll.u32 %v18009_v58, 16  ;;  %v674_v7 = vshrl.u32 %v18009_v58, 16  ;;  %25000 = vst [vmem:[#allocation5_spill] sm:$0xff] %v18043_v56  ;;  %v1337_v52 = vld [vmem:[%s17852_s17 + $0xc] sm:$0xe] }
  0x36   : > { %v659_v4 = vsel %vm17904_vm4, %v654_v6, %v658_v49  ;;  %v485_v29 = vor.u32 %v484_v1, %v480_v63  ;;  %v490_v30 = vrot.slane %v488_v2, 5  ;;  %v663_v32 = vrot.slane %v661_v17, 4  ;;  %v18048_v1 = vld [vmem:[%s17852_s17 + $0x94] sm:$0xf] }
  0x37   : > { %v14494_v37 = vcombine.low %v649_v61, %v659_v4  ;;  %v476_v38 = vrot.slane %v475_v22, 4  ;;  %v666_v42 = vrot.slane %v664_v24, 5  ;;  %v672_v5 = vrot.slane %v670_v25, 5  ;;  %25001 = vst [vmem:[#allocation6_spill] sm:$0xff] %v18048_v1 }
  0x38   : > { %v486_v43 = vrot.slane %v485_v29, 4  ;;  %v676_v45 = vrot.slane %v674_v7, 4  ;;  %v680_v46 = vshll.u32 %v18017_v15, 16  ;;  %v493_v50 = vshrl.u32 %v18025_v28, 16 }
  0x39   : > { %16577 = vmatprep.mubr.msk.bf16.mxu1 %vm830_vm3, %v14494_v37  ;;  %v481_v49 = vsel %vm17904_vm4, %v476_v38, %v480_v63  ;;  %v667_v51 = vor.u32 %v666_v42, %v663_v32  ;;  %v496_v54 = vshll.u32 %v18025_v28, 16  ;;  %v502_v55 = vshll.u32 %v18030_v34, 16  ;;  %v18057_v32 = vld [vmem:[%s17852_s17 + $0x98] sm:$0x1]  ;;  %v18062_v42 = vld [vmem:[%s17852_s17 + $0x3c] sm:$0xf] }
  0x3a   : > { %v491_v60 = vsel %vm17904_vm4, %v486_v43, %v490_v30  ;;  %v677_v61 = vor.u32 %v676_v45, %v672_v5  ;;  %v682_v62 = vrot.slane %v680_v46, 5  ;;  %v495_v6 = vrot.slane %v493_v50, 4  ;;  %25002 = vst [vmem:[#allocation7_spill] sm:$0xff] %v18057_v32 }
  0x3b   : > { %v14487_v63 = vcombine.low %v481_v49, %v491_v60  ;;  %v668_v2 = vrot.slane %v667_v51, 4  ;;  %v498_v17 = vrot.slane %v496_v54, 5  ;;  %v504_v22 = vrot.slane %v502_v55, 5  ;;  %v18067_v49 = vld [vmem:[%s17852_s17 + $0x40] sm:$0xf] }
  0x3c   : > { %v678_v24 = vrot.slane %v677_v61, 4  ;;  %v506_v25 = vshrl.u32 %v18030_v34, 16  ;;  %v512_v7 = vshll.u32 %v18038_v53, 16  ;;  %v685_v4 = vshrl.u32 %v18043_v56, 16 }
  0x3d   : > { %16562 = vmatmul.mubr.msk.bf16.gmra.mxu0 %vm830_vm3, %v14487_v63  ;;  %v673_v29 = vsel %vm17904_vm4, %v668_v2, %v672_v5  ;;  %v499_v30 = vor.u32 %v498_v17, %v495_v6  ;;  %v688_v37 = vshll.u32 %v18043_v56, 16  ;;  %v694_v38 = vshll.u32 %v18048_v1, 16  ;;  %v18076_v17 = vld [vmem:[%s17852_s17 + $0x44] sm:$0x1] }
  0x3e   : > { %v683_v43 = vsel %vm17904_vm4, %v678_v24, %v682_v62  ;;  %v508_v45 = vrot.slane %v506_v25, 4  ;;  %v514_v46 = vrot.slane %v512_v7, 5  ;;  %v687_v50 = vrot.slane %v685_v4, 4  ;;  %v18081_v7 = vld [vmem:[%s17852_s17 + $0x9c] sm:$0xf] }
  0x3f   : > { %v14495_v5 = vcombine.low %v673_v29, %v683_v43  ;;  %v500_v51 = vrot.slane %v499_v30, 4  ;;  %v690_v54 = vrot.slane %v688_v37, 5  ;;  %v696_v55 = vrot.slane %v694_v38, 5  ;;  %25003 = vst [vmem:[#allocation8_spill] sm:$0xff] %v18081_v7 }
  0x40   : > { %v509_v60 = vor.u32 %v508_v45, %v504_v22  ;;  %v698_v61 = vshrl.u32 %v18048_v1, 16  ;;  %v704_v6 = vshll.u32 %v18057_v32, 16  ;;  %v517_v63 = vshrl.u32 %v18062_v42, 16  ;;  %v18148_v32 = vld [vmem:[%s17852_s17 + $0x5c] sm:$0x1] }
  0x41   : > { %16578 = vmatmul.mubr.msk.bf16.gmra.mxu1 %vm830_vm3, %v14495_v5  ;;  %v505_v62 = vsel %vm17904_vm4, %v500_v51, %v504_v22  ;;  %v691_v2 = vor.u32 %v690_v54, %v687_v50  ;;  %v520_v24 = vshll.u32 %v18062_v42, 16  ;;  %v526_v25 = vshll.u32 %v18067_v49, 16  ;;  %v18088_v54 = vld [vmem:[%s17852_s17 + $0xa0] sm:$0xf] }
  0x42   : > { %v510_v4 = vrot.slane %v509_v60, 4  ;;  %v700_v29 = vrot.slane %v698_v61, 4  ;;  %v706_v30 = vrot.slane %v704_v6, 5  ;;  %v519_v37 = vrot.slane %v517_v63, 4  ;;  %25004 = vst [vmem:[#allocation9_spill] sm:$0xff] %v18088_v54 }
  0x43   : > { %v692_v38 = vrot.slane %v691_v2, 4  ;;  %v522_v43 = vrot.slane %v520_v24, 5  ;;  %v528_v45 = vrot.slane %v526_v25, 5  ;;  %v530_v22 = vshrl.u32 %v18067_v49, 16  ;;  %v18094_v24 = vld [vmem:[%s17852_s17 + $0xa4] sm:$0x1] }
  0x44   : > { %v515_v50 = vsel %vm17904_vm4, %v510_v4, %v514_v46  ;;  %v701_v5 = vor.u32 %v700_v29, %v696_v55  ;;  %v536_v51 = vshll.u32 %v18076_v17, 16  ;;  %v709_v60 = vshrl.u32 %v18081_v7, 16  ;;  %25005 = vst [vmem:[#allocation10_spill] sm:$0xff] %v18094_v24  ;;  %v18097_v25 = vld [vmem:[%s17852_s17 + $0x48] sm:$0xf] }
  0x45   : > { %v14488_v61 = vcombine.low %v505_v62, %v515_v50  ;;  %v697_v6 = vsel %vm17904_vm4, %v692_v38, %v696_v55  ;;  %v523_v63 = vor.u32 %v522_v43, %v519_v37  ;;  %v532_v2 = vrot.slane %v530_v22, 4  ;;  %v18101_v29 = vld [vmem:[%s17852_s17 + $0x4c] sm:$0xf] }
  0x46   : > { %v702_v40 = vrot.slane %v701_v5, 4  ;;  %v538_v21 = vrot.slane %v536_v51, 5  ;;  %v711_v46 = vrot.slane %v709_v60, 4  ;;  %v712_v4 = vshll.u32 %v18081_v7, 16 }
  0x47   : > { %16565 = vmatprep.mubr.msk.bf16.mxu0 %vm830_vm3, %v14488_v61  ;;  %v524_v62 = vrot.slane %v523_v63, 4  ;;  %v533_v50 = vor.u32 %v532_v2, %v528_v45  ;;  %v718_v55 = vshll.u32 %v18088_v54, 16  ;;  %v722_v37 = vshrl.u32 %v18088_v54, 16  ;;  %v18113_v2 = vld [vmem:[%s17852_s17 + $0x50] sm:$0x1] }
  0x48   : > { %v707_v38 = vsel %vm17904_vm4, %v702_v40, %v706_v30  ;;  %v714_v43 = vrot.slane %v712_v4, 5  ;;  %v728_v22 = vshll.u32 %v18094_v24, 16  ;;  %v541_v5 = vshrl.u32 %v18097_v25, 16  ;;  %v18116_v40 = vld [vmem:[%s17852_s17 + $0xa8] sm:$0xf] }
  0x49   : > { %v14496_v51 = vcombine.low %v697_v6, %v707_v38  ;;  %v529_v60 = vsel %vm17904_vm4, %v524_v62, %v528_v45  ;;  %v534_v61 = vrot.slane %v533_v50, 4  ;;  %v720_v63 = vrot.slane %v718_v55, 5  ;;  %25006 = vst [vmem:[#allocation11_spill] sm:$0xff] %v18116_v40  ;;  %v18125_v62 = vld [vmem:[%s17852_s17 + $0xac] sm:$0xf] }
  0x4a   : > { %v715_v13 = vor.u32 %v714_v43, %v711_v46  ;;  %v724_v18 = vrot.slane %v722_v37, 4  ;;  %v730_v3 = vrot.slane %v728_v22, 5  ;;  %v543_v7 = vrot.slane %v541_v5, 4  ;;  %25007 = vst [vmem:[#allocation12_spill] sm:$0xff] %v18125_v62  ;;  %v18129_v5 = vld [vmem:[%s17852_s17 + $0xb0] sm:$0x1] }
  0x4b   : > { %16581 = vmatprep.mubr.msk.bf16.mxu1 %vm830_vm3, %v14496_v51  ;;  %v539_v30 = vsel %vm17904_vm4, %v534_v61, %v538_v21  ;;  %v544_v6 = vshll.u32 %v18097_v25, 16  ;;  %v550_v45 = vshll.u32 %v18101_v29, 16  ;;  %v554_v4 = vshrl.u32 %v18101_v29, 16  ;;  %25008 = vst [vmem:[#allocation13_spill] sm:$0xff] %v18129_v5 }
  0x4c   : > { %v14489_v46 = vcombine.low %v529_v60, %v539_v30  ;;  %v716_v50 = vrot.slane %v715_v13, 4  ;;  %v725_v55 = vor.u32 %v724_v18, %v720_v63  ;;  %v560_v37 = vshll.u32 %v18113_v2, 16 }
  0x4d   : > { %v546_v38 = vrot.slane %v544_v6, 5  ;;  %v552_v43 = vrot.slane %v550_v45, 5  ;;  %v556_v22 = vrot.slane %v554_v4, 4  ;;  %v733_v21 = vshrl.u32 %v18116_v40, 16  ;;  %v18138_v45 = vld [vmem:[%s17852_s17 + $0x54] sm:$0xf] }
  0x4e   : > { %16566 = vmatmul.mubr.msk.bf16.gmra.mxu0 %vm830_vm3, %v14489_v46  ;;  %v721_v51 = vsel %vm17904_vm4, %v716_v50, %v720_v63  ;;  %v726_v61 = vrot.slane %v725_v55, 4  ;;  %v562_v60 = vrot.slane %v560_v37, 5  ;;  %v736_v18 = vshll.u32 %v18116_v40, 16  ;;  %v18141_v4 = vld [vmem:[%s17852_s17 + $0x58] sm:$0xf] }
  0x4f   : > { %v547_v13 = vor.u32 %v546_v38, %v543_v7  ;;  %v557_v30 = vor.u32 %v556_v22, %v552_v43  ;;  %v735_v24 = vrot.slane %v733_v21, 4  ;;  %v742_v6 = vshll.u32 %v18125_v62, 16 }
  0x50   : > { %v731_v46 = vsel %vm17904_vm4, %v726_v61, %v730_v3  ;;  %v738_v63 = vrot.slane %v736_v18, 5  ;;  %v746_v50 = vshrl.u32 %v18125_v62, 16  ;;  %v752_v7 = vshll.u32 %v18129_v5, 16 }
  0x51   : > { %v14497_v55 = vcombine.low %v721_v51, %v731_v46  ;;  %v548_v37 = vrot.slane %v547_v13, 4  ;;  %v558_v38 = vrot.slane %v557_v30, 4  ;;  %v744_v22 = vrot.slane %v742_v6, 5  ;;  %v18162_v13 = vld [vmem:[%s17852_s17 + $0xb8] sm:$0xf] }
  0x52   : > { %v739_v21 = vor.u32 %v738_v63, %v735_v24  ;;  %v748_v40 = vrot.slane %v746_v50, 4  ;;  %v754_v54 = vrot.slane %v752_v7, 5  ;;  %v565_v56 = vshrl.u32 %v18138_v45, 16  ;;  %v18159_v24 = vld [vmem:[%s17852_s17 + $0xb4] sm:$0xf] }
  0x53   : > { %16582 = vmatmul.mubr.msk.bf16.gmra.mxu1 %vm830_vm3, %v14497_v55  ;;  %v553_v3 = vsel %vm17904_vm4, %v548_v37, %v552_v43  ;;  %v563_v61 = vsel %vm17904_vm4, %v558_v38, %v562_v60  ;;  %v568_v51 = vshll.u32 %v18138_v45, 16  ;;  %v574_v18 = vshll.u32 %v18141_v4, 16  ;;  %25009 = vst [vmem:[#allocation14_spill] sm:$0xff] %v18159_v24  ;;  %v18170_v38 = vld [vmem:[%s17852_s17 + $0xbc] sm:$0x1] }
  0x54   : > { %v14490_v30 = vcombine.low %v553_v3, %v563_v61  ;;  %v740_v6 = vrot.slane %v739_v21, 4  ;;  %v749_v46 = vor.u32 %v748_v40, %v744_v22  ;;  %v567_v63 = vrot.slane %v565_v56, 4 }
  0x55   : > { %v570_v50 = vrot.slane %v568_v51, 5  ;;  %v576_v7 = vrot.slane %v574_v18, 5  ;;  %v578_v43 = vshrl.u32 %v18141_v4, 16  ;;  %v584_v60 = vshll.u32 %v18148_v32, 16  ;;  %v1336_v18 = vld [vmem:[%s17852_s17] sm:$0xe] }
  0x56   : > { %16569 = vmatprep.mubr.msk.bf16.mxu0 %vm830_vm3, %v14490_v30  ;;  %v745_v55 = vsel %vm17904_vm4, %v740_v6, %v744_v22  ;;  %v750_v37 = vrot.slane %v749_v46, 4  ;;  %v757_v21 = vshrl.u32 %v18159_v24, 16  ;;  %v760_v40 = vshll.u32 %v18159_v24, 16 }
  0x57   : > { %v571_v56 = vor.u32 %v570_v50, %v567_v63  ;;  %v580_v3 = vrot.slane %v578_v43, 4  ;;  %v586_v61 = vrot.slane %v584_v60, 5  ;;  %v766_v51 = vshll.u32 %v18162_v13, 16 }
  0x58   : > { %v755_v30 = vsel %vm17904_vm4, %v750_v37, %v754_v54  ;;  %v759_v5 = vrot.slane %v757_v21, 4  ;;  %v762_v62 = vrot.slane %v760_v40, 5  ;;  %v770_v22 = vshrl.u32 %v18162_v13, 16 }
  0x59   : > { %v14498_v6 = vcombine.low %v745_v55, %v755_v30  ;;  %v572_v46 = vrot.slane %v571_v56, 4  ;;  %v581_v1 = vor.u32 %v580_v3, %v576_v7  ;;  %v768_v15 = vrot.slane %v766_v51, 5 }
  0x5a   : > { %v763_v24 = vor.u32 %v762_v62, %v759_v5  ;;  %v772_v63 = vrot.slane %v770_v22, 4  ;;  %v776_v50 = vshll.u32 %v18170_v38, 16  ;;  %v25010_v43 = vmov 0  ;;  %v1338_v5 = vld [vmem:[%s17852_s17 + $0x18] sm:$0xe] }
  0x5b   : > { %v25011_v43 = vsel %vm18183_vm7, 4294967295, %v25010_v43  ;;  %v14548_v54 = vrot.slane %v1336_v18, 9  ;;  %16585 = vmatprep.mubr.msk.bf16.mxu1 %vm830_vm3, %v14498_v6  ;;  %v577_v60 = vsel %vm17904_vm4, %v572_v46, %v576_v7  ;;  %v582_v55 = vrot.slane %v581_v1, 4 }
  0x5c   : > { %25012 = vst [vmem:[#allocation15_spill] sm:$0xff] %v25011_v43  ;;  %v1389_v37 = vrot.slane %v17872_v11, 5  ;;  %v14517_v62 = vcombine.low %v17900_v35, %v17910_v41  ;;  %v764_v21 = vrot.slane %v763_v24, 4  ;;  %v773_v40 = vor.u32 %v772_v63, %v768_v15  ;;  %v1339_v63 = vld [vmem:[%s17852_s17 + $0x24] sm:$0xe] }
  0x5d   : > { %v778_v56 = vrot.slane %v776_v50, 5  ;;  %v14549_v3 = vrot.slane %v1337_v52, 9  ;;  %v587_v51 = vsel %vm17904_vm4, %v582_v55, %v586_v61  ;;  %v25013_v1 = vrot.slane %v17910_v41, 5 }
  0x5e   : > { %v1390_v18 = vsel %vm18183_vm7, %v14548_v54, %v1389_v37  ;;  %v1391_v30 = vrot.slane %v1389_v37, 4  ;;  %v14491_v22 = vcombine.low %v577_v60, %v587_v51  ;;  %v769_v6 = vsel %vm17904_vm4, %v764_v21, %v768_v15 }
  0x5f   : > { %v1398_v7 = vrot.slane %v25013_v1, 4  ;;  %v774_v46 = vrot.slane %v773_v40, 4  ;;  %v25014_v24 = vmov %v25013_v1  ;;  %v25015_v61 = vrot.slane %v17875_v12, 5 }
  0x60   : > { %v1397_v52 = vsel %vm18183_vm7, %v14549_v3, %v25014_v24  ;;  %v25016_v54 = vrot.slane %v17913_v47, 5  ;;  %v14518_v15 = vcombine.low %v17942_v23, %v17949_v33  ;;  %v14550_v55 = vrot.slane %v1338_v5, 9  ;;  %16570 = vmatmul.mubr.msk.bf16.gmra.mxu0 %vm830_vm3, %v14491_v22  ;;  %v1340_v3 = vld [vmem:[%s17852_s17 + $0x30] sm:$0xe]  ;;  %v1341_v22 = vld [vmem:[%s17852_s17 + $0x3c] sm:$0xe] }
  0x61   : > { %v1393_v50 = vsel %vm18183_vm7, %v1391_v30, %v25015_v61  ;;  %v779_v37 = vsel %vm17904_vm4, %v774_v46, %v778_v56  ;;  %v1403_v40 = vrot.slane %v17949_v33, 5  ;;  %v1406_v47 = vrot.slane %v17955_v39, 5 }
  0x62   : > { %v1400_v60 = vsel %vm18183_vm7, %v1398_v7, %v25016_v54  ;;  %v14565_v21 = vcombine.low %v1390_v18, %v1393_v50  ;;  %v14499_v51 = vcombine.low %v769_v6, %v779_v37  ;;  %v14519_v30 = vcombine.low %v17981_v26, %v17989_v31  ;;  %v1342_v54 = vld [vmem:[%s17852_s17 + $0x48] sm:$0xe] }
  0x63   : > { %v14566_v12 = vcombine.low %v1397_v52, %v1400_v60  ;;  %v14551_v1 = vrot.slane %v1339_v63, 9  ;;  %v1404_v5 = vsel %vm18183_vm7, %v14550_v55, %v1403_v40  ;;  %v1405_v7 = vrot.slane %v1403_v40, 4 }
  0x64   : > { %16625 = vmatprep.mubr.msk.bf16.mxu0 %vm830_vm3, %v14565_v21  ;;  %v1410_v56 = vrot.slane %v17989_v31, 5  ;;  %v1413_v18 = vrot.slane %v17995_v44, 5  ;;  %16586 = vmatmul.mubr.msk.bf16.gmra.mxu1 %vm830_vm3, %v14499_v51  ;;  %v14520_v39 = vcombine.low %v18025_v28, %v18030_v34  ;;  %v14552_v6 = vrot.slane %v1340_v3, 9  ;;  %v1343_v3 = vld [vmem:[%s17852_s17 + $0x54] sm:$0xe]  ;;  %v25023_v31 = vld [vmem:[#allocation7_spill] sm:$0xff] }
  0x65   : > { %v1417_v46 = vrot.slane %v18030_v34, 5  ;;  %v1420_v24 = vrot.slane %v18038_v53, 5  ;;  %v25017_v52 = vcombine.low %v17869_v10, %v17872_v11  ;;  %v1407_v44 = vsel %vm18183_vm7, %v1405_v7, %v1406_v47  ;;  %v18263_v51 = vld [vmem:[%s24893_s3 + $0xc] sm:$0x3] }
  0x66   : > { %v18244_v63 = vsel %vm18183_vm7, %v14551_v1, %v1410_v56  ;;  %v1412_v61 = vrot.slane %v1410_v56, 4  ;;  %v14521_v50 = vcombine.low %v18062_v42, %v18067_v49  ;;  %v14567_v60 = vcombine.low %v1404_v5, %v1407_v44  ;;  %v1345_v44 = vld [vmem:[%s17852_s17 + $0x6c] sm:$0xe]  ;;  %v14668_v42 = vld [vmem:[%s17852_s17 + $0x24] sm:$0xf] }
  0x67   : > { %16591 = vmatprep.mubr.msk.bf16.mxu1 %vm830_vm3, %v25017_v52  ;;  %v18251_v53 = vsel %vm18183_vm7, %v14552_v6, %v1417_v46  ;;  %v1419_v10 = vrot.slane %v1417_v46, 4  ;;  %v14553_v11 = vrot.slane %v1341_v22, 9  ;;  %v1424_v37 = vrot.slane %v18067_v49, 5  ;;  %v1344_v6 = vld [vmem:[%s17852_s17 + $0x60] sm:$0xe] }
  0x68   : > { %v1414_v55 = vsel %vm18183_vm7, %v1412_v61, %v1413_v18  ;;  %v1427_v21 = vrot.slane %v18076_v17, 5  ;;  %v14522_v40 = vcombine.low %v18097_v25, %v18101_v29  ;;  %v14554_v5 = vrot.slane %v1342_v54, 9  ;;  %16626 = vmatmul.mubr.msk.bf16.vlgmr.msra.gmra.mxu0 %vm830_vm3, %v14566_v12  ;;  %v18297_v54 = vld [vmem:[%s24893_s3 + $0xa] sm:$0x3] }
  0x69   : > { %v14568_v47 = vcombine.low %v18244_v63, %v1414_v55  ;;  %v1421_v1 = vsel %vm18183_vm7, %v1419_v10, %v1420_v24  ;;  %v1431_v7 = vrot.slane %v18101_v29, 5  ;;  %v18273_v56 = vsel %vm18183_vm7, %v14553_v11, %v1424_v37  ;;  %16692 = vmatpush3.bf16.msra.mxu0 %v17866_v9  ;;  %16629 = vmatprep.mubr.msk.bf16.mxu0 %vm830_vm3, %v14567_v60  ;;  %v1346_v11 = vld [vmem:[%s17852_s17 + $0x78] sm:$0xe] }
  0x6a   : > { %v14569_v17 = vcombine.low %v18251_v53, %v1421_v1  ;;  %v1426_v18 = vrot.slane %v1424_v37, 4  ;;  %v1434_v22 = vrot.slane %v18113_v2, 5  ;;  %v14555_v52 = vrot.slane %v1343_v3, 9  ;;  %17482 = vmatprep.subr.msk.bf16.mxu0 %vm879_vm0, %v18263_v51  ;;  %v25028_v3 = vld [vmem:[#allocation11_spill] sm:$0xff]  ;;  %v14665_v55 = vld [vmem:[%s17852_s17 + $0x18] sm:$0xf] }
  0x6b   : > { %v18281_v46 = vsel %vm18183_vm7, %v14554_v5, %v1431_v7  ;;  %v1433_v12 = vrot.slane %v1431_v7, 4  ;;  %v1438_v2 = vrot.slane %v18141_v4, 5  ;;  %v1441_v9 = vrot.slane %v18148_v32, 5  ;;  %v1347_v5 = vld [vmem:[%s17852_s17 + $0x84] sm:$0xe] }
  0x6c   : > { %v18288_v63 = vsel %vm18183_vm7, %v1426_v18, %v1427_v21  ;;  %16592 = vmatmul.mubr.msk.bf16.vlgmr.msra.gmra.mxu1 %vm830_vm3, %v14517_v62  ;;  %v14556_v53 = vrot.slane %v1344_v6, 9  ;;  %v1445_v10 = vrot.slane %v17887_v20, 5  ;;  %v14557_v21 = vrot.slane %v1345_v44, 9 }
  0x6d   : > { %v14570_v60 = vcombine.low %v18273_v56, %v18288_v63  ;;  %v18309_v32 = vsel %vm18183_vm7, %v1433_v12, %v1434_v22  ;;  %16658 = vmatpush3.bf16.msra.mxu1 %v17862_v8  ;;  %16595 = vmatprep.mubr.msk.bf16.mxu1 %vm830_vm3, %v14518_v15  ;;  %v18322_v41 = vsel %vm18183_vm7, %v14555_v52, %v1438_v2  ;;  %v1440_v62 = vrot.slane %v1438_v2, 4  ;;  %v1351_v2 = vld [vmem:[%s17852_s17 + $0xb4] sm:$0xe] }
  0x6e   : > { %v14571_v35 = vcombine.low %v18281_v46, %v18309_v32  ;;  %v18328_v37 = vsel %vm18183_vm7, %v14556_v53, %v1445_v10  ;;  %v1447_v8 = vrot.slane %v1445_v10, 4  ;;  %v1452_v23 = vrot.slane %v17928_v0, 5  ;;  %17481 = vmatprep.subr.msk.bf16.mxu1 %vm879_vm0, %v18297_v54 }
  0x6f   : > { %v18335_v33 = vsel %vm18183_vm7, %v1440_v62, %v1441_v9  ;;  %v1455_v15 = vrot.slane %v17936_v14, 5  ;;  %v14558_v1 = vrot.slane %v1346_v11, 9  ;;  %v25018_v18 = vrot.slane %v17892_v27, 5  ;;  %v25019_v27 = vld [vmem:[#allocation3_spill] sm:$0xff]  ;;  %v1348_v9 = vld [vmem:[%s17852_s17 + $0x90] sm:$0xe] }
  0x70   : > { %v14572_v7 = vcombine.low %v18322_v41, %v18335_v33  ;;  %v18351_v6 = vsel %vm18183_vm7, %v14557_v21, %v1452_v23  ;;  %v1454_v14 = vrot.slane %v1452_v23, 4  ;;  %16630 = vmatmul.mubr.msk.bf16.gmra.mxu0 %vm830_vm3, %v14568_v47  ;;  %v1459_v52 = vrot.slane %v17968_v57, 5  ;;  %v25020_v11 = vld [vmem:[#allocation4_spill] sm:$0xff]  ;;  %v18514_v33 = vld [vmem:[%s17852_s17 + $0x2c] sm:$0x1] }
  0x71   : > { %v18347_v22 = vsel %vm18183_vm7, %v1447_v8, %v25018_v18  ;;  %v1462_v44 = vrot.slane %v17975_v16, 5  ;;  %16633 = vmatprep.mubr.msk.bf16.mxu0 %vm830_vm3, %v14569_v17  ;;  %v14559_v10 = vrot.slane %v1347_v5, 9  ;;  %v1466_v47 = vrot.slane %v18009_v58, 5  ;;  %v1349_v8 = vld [vmem:[%s17852_s17 + $0x9c] sm:$0xe]  ;;  %v25021_v17 = vld [vmem:[#allocation6_spill] sm:$0xff] }
  0x72   : > { %v14573_v12 = vcombine.low %v18328_v37, %v18347_v22  ;;  %v18364_v53 = vsel %vm18183_vm7, %v1454_v14, %v1455_v15  ;;  %v1469_v62 = vrot.slane %v25020_v11, 5  ;;  %v18373_v21 = vsel %vm18183_vm7, %v14558_v1, %v1459_v52  ;;  %v25022_v18 = vld [vmem:[#allocation5_spill] sm:$0xff]  ;;  %v14662_v16 = vld [vmem:[%s17852_s17 + $0xc] sm:$0xf]  ;;  %25032 = vst [vmem:[#allocation4_spill] sm:$0xff] %v18514_v33 }
  0x73   : > { %v1461_v23 = vrot.slane %v1459_v52, 4  ;;  %v18383_v15 = vsel %vm18183_vm7, %v14559_v10, %v1466_v47  ;;  %v1468_v5 = vrot.slane %v1466_v47, 4  ;;  %v14560_v14 = vrot.slane %v1348_v9, 9  ;;  %v25024_v1 = vld [vmem:[#allocation9_spill] sm:$0xff]  ;;  %v25025_v52 = vld [vmem:[#allocation8_spill] sm:$0xff] }
  0x74   : > { %16596 = vmatmul.mubr.msk.bf16.gmra.mxu1 %vm830_vm3, %v14519_v30  ;;  %v1473_v11 = vrot.slane %v25021_v17, 5  ;;  %v1476_v30 = vrot.slane %v25023_v31, 5  ;;  %v14561_v47 = vrot.slane %v1349_v8, 9  ;;  %v1350_v9 = vld [vmem:[%s17852_s17 + $0xa8] sm:$0xe]  ;;  %v25026_v8 = vld [vmem:[#allocation10_spill] sm:$0xff] }
  0x75   : > { %16599 = vmatprep.mubr.msk.bf16.mxu1 %vm830_vm3, %v14520_v39  ;;  %v18392_v26 = vsel %vm18183_vm7, %v1461_v23, %v1462_v44  ;;  %v18402_v28 = vsel %vm18183_vm7, %v1468_v5, %v1469_v62  ;;  %v1480_v23 = vrot.slane %v25024_v1, 5  ;;  %v1483_v31 = vrot.slane %v25026_v8, 5  ;;  %v25027_v10 = vld [vmem:[#allocation12_spill] sm:$0xff] }
  0x76   : > { %v18406_v34 = vsel %vm18183_vm7, %v14560_v14, %v1473_v11  ;;  %v1475_v39 = vrot.slane %v1473_v11, 4  ;;  %v14562_v5 = vrot.slane %v1350_v9, 9  ;;  %v1487_v14 = vrot.slane %v25027_v10, 5  ;;  %v25029_v11 = vld [vmem:[#allocation13_spill] sm:$0xff]  ;;  %v18423_v44 = vld [vmem:[%s17852_s17 + $0x10] sm:$0xf] }
  0x77   : > { %v1490_v61 = vrot.slane %v25029_v11, 5  ;;  %v1482_v9 = vrot.slane %v1480_v23, 4  ;;  %v18447_v11 = vld [vmem:[%s17852_s17 + $0x14] sm:$0x1]  ;;  %v1497_v46 = vrot.slane %v18170_v38, 5  ;;  %v2201_v32 = vshrl.u32 %v14662_v16, 16 }
  0x78   : > { %v18418_v62 = vsel %vm18183_vm7, %v1475_v39, %v1476_v30  ;;  %16634 = vmatmul.mubr.msk.bf16.gmra.mxu0 %vm830_vm3, %v14570_v60  ;;  %v18433_v30 = vsel %vm18183_vm7, %v14561_v47, %v1480_v23  ;;  %v25030_v39 = vld [vmem:[#allocation14_spill] sm:$0xff]  ;;  %v18443_v56 = vsel %vm18183_vm7, %v14562_v5, %v1487_v14  ;;  %v1489_v63 = vrot.slane %v1487_v14, 4 }
  0x79   : > { %16637 = vmatprep.mubr.msk.bf16.mxu0 %vm830_vm3, %v14571_v35  ;;  %v14563_v60 = vrot.slane %v1351_v2, 9  ;;  %v1494_v47 = vrot.slane %v18162_v13, 5  ;;  %v18451_v23 = vsel %vm18183_vm7, %v1482_v9, %v1483_v31  ;;  %v2204_v35 = vshll.u32 %v14662_v16, 16  ;;  %v18470_v16 = vld [vmem:[%s17852_s17 + $0x1c] sm:$0xf] }
  0x7a   : > { %v18463_v5 = vsel %vm18183_vm7, %v1489_v63, %v1490_v61  ;;  %v18473_v14 = vld [vmem:[%s17852_s17 + $0x20] sm:$0x1]  ;;  %v2203_v49 = vrot.slane %v2201_v32, 4  ;;  %v2210_v61 = vshll.u32 %v18423_v44, 16  ;;  %v2214_v63 = vshrl.u32 %v18423_v44, 16 }
  0x7b   : > { %v18467_v31 = vsel %vm18183_vm7, %v14563_v60, %v1494_v47  ;;  %v1496_v38 = vrot.slane %v1494_v47, 4  ;;  %v2220_v60 = vshll.u32 %v18447_v11, 16  ;;  %v2225_v47 = vshrl.u32 %v14665_v55, 16  ;;  %v18492_v32 = vld [vmem:[%s17852_s17 + $0x28] sm:$0xf] }
  0x7c   : > { %16600 = vmatmul.mubr.msk.bf16.gmra.mxu1 %vm830_vm3, %v14521_v50  ;;  %v2206_v50 = vrot.slane %v2204_v35, 5  ;;  %v2228_v2 = vshll.u32 %v14665_v55, 16  ;;  %25031 = vst [vmem:[#allocation3_spill] sm:$0xff] %v18492_v32  ;;  %v2216_v35 = vrot.slane %v2214_v63, 4  ;;  %v2244_v55 = vshll.u32 %v18473_v14, 16 }
  0x7d   : > { %16603 = vmatprep.mubr.msk.bf16.mxu1 %vm830_vm3, %v14522_v40  ;;  %v18484_v9 = vsel %vm18183_vm7, %v1496_v38, %v1497_v46  ;;  %v2212_v40 = vrot.slane %v2210_v61, 5  ;;  %v2222_v8 = vrot.slane %v2220_v60, 5  ;;  %v2227_v24 = vrot.slane %v2225_v47, 4 }
  0x7e   : > { %v2207_v29 = vor.u32 %v2206_v50, %v2203_v49  ;;  %v2234_v46 = vshll.u32 %v18470_v16, 16  ;;  %v2230_v25 = vrot.slane %v2228_v2, 5  ;;  %v2238_v49 = vshrl.u32 %v18470_v16, 16 }
  0x7f   : > { %v2217_v50 = vor.u32 %v2216_v35, %v2212_v40  ;;  %v18507_v63 = vsel %vm879_vm0, %v18297_v54, 0  ;;  %v18511_v41 = vsel %vm879_vm0, %v18263_v51, 0  ;;  %v2246_v22 = vrot.slane %v2244_v55, 5  ;;  %v18536_v55 = vld [vmem:[%s17852_s17 + $0x38] sm:$0x1] }
  0x80   : > { %16638 = vmatmul.mubr.msk.bf16.gmra.mxu0 %vm830_vm3, %v14572_v7  ;;  %v2208_v38 = vrot.slane %v2207_v29, 4  ;;  %v2236_v61 = vrot.slane %v2234_v46, 5  ;;  %v2231_v2 = vor.u32 %v2230_v25, %v2227_v24  ;;  %v2240_v37 = vrot.slane %v2238_v49, 4 }
  0x81   : > { %16641 = vmatprep.mubr.msk.bf16.mxu0 %vm830_vm3, %v14573_v12  ;;  %v14671_v12 = vld [vmem:[%s17852_s17 + $0x30] sm:$0xf]  ;;  %v25033_v60 = vcombine.low %v18138_v45, %v18141_v4  ;;  %v2218_v54 = vrot.slane %v2217_v50, 4  ;;  %v2249_v47 = vshrl.u32 %v14668_v42, 16  ;;  %v2252_v51 = vshll.u32 %v14668_v42, 16 }
  0x82   : > { %v2213_v7 = vsel %vm17904_vm4, %v2208_v38, %v2212_v40  ;;  %v2258_v29 = vshll.u32 %v18492_v32, 16  ;;  %v25034_v35 = vcombine.low %v17884_v19, %v17887_v20  ;;  %v2232_v24 = vrot.slane %v2231_v2, 4  ;;  %v18531_v4 = vld [vmem:[%s17852_s17 + $0x34] sm:$0xf] }
  0x83   : > { %v2241_v25 = vor.u32 %v2240_v37, %v2236_v61  ;;  %v2262_v40 = vshrl.u32 %v18492_v32, 16  ;;  %v2268_v45 = vshll.u32 %v18514_v33, 16  ;;  %v2223_v46 = vsel %vm17904_vm4, %v2218_v54, %v2222_v8  ;;  %v14674_v37 = vld [vmem:[%s17852_s17 + $0x3c] sm:$0xf] }
  0x84   : > { %16604 = vmatmul.mubr.msk.bf16.gmra.mxu1 %vm830_vm3, %v25033_v60  ;;  %v2251_v42 = vrot.slane %v2249_v47, 4  ;;  %v2254_v38 = vrot.slane %v2252_v51, 5  ;;  %v2260_v49 = vrot.slane %v2258_v29, 5  ;;  %v18538_v19 = vcombine.low %v2213_v7, %v2223_v46  ;;  %v18552_v51 = vld [vmem:[%s17852_s17 + $0x40] sm:$0xf] }
  0x85   : > { %16607 = vmatprep.mubr.msk.bf16.mxu1 %vm830_vm3, %v25034_v35  ;;  %v2237_v20 = vsel %vm17904_vm4, %v2232_v24, %v2236_v61  ;;  %v2242_v50 = vrot.slane %v2241_v25, 4  ;;  %v2264_v2 = vrot.slane %v2262_v40, 4  ;;  %v2270_v35 = vrot.slane %v2268_v45, 5  ;;  %v18561_v25 = vld [vmem:[%s17852_s17 + $0x44] sm:$0x1] }
  0x86   : > { %v2255_v60 = vor.u32 %v2254_v38, %v2251_v42  ;;  %v2273_v33 = vshrl.u32 %v14671_v12, 16  ;;  %v2276_v32 = vshll.u32 %v14671_v12, 16  ;;  %v25035_v8 = vcombine.low %v18351_v6, %v18364_v53  ;;  %v14677_v38 = vld [vmem:[%s17852_s17 + $0x48] sm:$0xf] }
  0x87   : > { %v2247_v7 = vsel %vm17904_vm4, %v2242_v50, %v2246_v22  ;;  %v2265_v54 = vor.u32 %v2264_v2, %v2260_v49  ;;  %v2282_v47 = vshll.u32 %v18531_v4, 16  ;;  %v2286_v61 = vshrl.u32 %v18531_v4, 16 }
  0x88   : > { %16642 = vmatmul.mubr.msk.bf16.gmra.mxu0 %vm830_vm3, %v25035_v8  ;;  %v25036_v29 = vcombine.low %v18373_v21, %v18392_v26  ;;  %v18558_v12 = vcombine.low %v2237_v20, %v2247_v7  ;;  %v2256_v6 = vrot.slane %v2255_v60, 4  ;;  %v2275_v53 = vrot.slane %v2273_v33, 4  ;;  %v18579_v60 = vld [vmem:[%s17852_s17 + $0x4c] sm:$0xf] }
  0x89   : > { %v2278_v24 = vrot.slane %v2276_v32, 5  ;;  %v2266_v22 = vrot.slane %v2265_v54, 4  ;;  %v2284_v40 = vrot.slane %v2282_v47, 5  ;;  %v2288_v45 = vrot.slane %v2286_v61, 4  ;;  %v18584_v54 = vld [vmem:[%s17852_s17 + $0x50] sm:$0x1] }
  0x8a   : > { %16645 = vmatprep.mubr.msk.bf16.mxu0 %vm830_vm3, %v25036_v29  ;;  %v2292_v46 = vshll.u32 %v18536_v55, 16  ;;  %v25037_v42 = vcombine.low %v17924_v59, %v17928_v0  ;;  %v2261_v21 = vsel %vm17904_vm4, %v2256_v6, %v2260_v49  ;;  %v2297_v33 = vshrl.u32 %v14674_v37, 16  ;;  %v14680_v61 = vld [vmem:[%s17852_s17 + $0x54] sm:$0xf] }
  0x8b   : > { %v2279_v26 = vor.u32 %v2278_v24, %v2275_v53  ;;  %v2300_v32 = vshll.u32 %v14674_v37, 16  ;;  %v25038_v20 = vcombine.low %v17962_v48, %v17968_v57  ;;  %v2271_v50 = vsel %vm17904_vm4, %v2266_v22, %v2270_v35  ;;  %v18592_v22 = vld [vmem:[%s17852_s17 + $0x58] sm:$0xf] }
  0x8c   : > { %16608 = vmatmul.mubr.msk.bf16.gmra.mxu1 %vm830_vm3, %v25037_v42  ;;  %v2289_v59 = vor.u32 %v2288_v45, %v2284_v40  ;;  %v2294_v0 = vrot.slane %v2292_v46, 5  ;;  %v2306_v2 = vshll.u32 %v18552_v51, 16  ;;  %v18581_v49 = vcombine.low %v2261_v21, %v2271_v50 }
  0x8d   : > { %16611 = vmatprep.mubr.msk.bf16.mxu1 %vm830_vm3, %v25038_v20  ;;  %v2280_v37 = vrot.slane %v2279_v26, 4  ;;  %v2299_v8 = vrot.slane %v2297_v33, 4  ;;  %v2302_v7 = vrot.slane %v2300_v32, 5  ;;  %v2310_v47 = vshrl.u32 %v18552_v51, 16 }
  0x8e   : > { %v2290_v48 = vrot.slane %v2289_v59, 4  ;;  %v2308_v57 = vrot.slane %v2306_v2, 5  ;;  %v2316_v35 = vshll.u32 %v18561_v25, 16  ;;  %v2321_v53 = vshrl.u32 %v14677_v38, 16 }
  0x8f   : > { %v2285_v29 = vsel %vm17904_vm4, %v2280_v37, %v2284_v40  ;;  %v2303_v6 = vor.u32 %v2302_v7, %v2299_v8  ;;  %v2324_v24 = vshll.u32 %v14677_v38, 16  ;;  %v25039_v45 = vcombine.low %v18383_v15, %v18402_v28  ;;  %v18608_v28 = vld [vmem:[%s17852_s17 + $0x5c] sm:$0x1]  ;;  %v14683_v7 = vld [vmem:[%s17852_s17 + $0x60] sm:$0xf] }
  0x90   : > { %v2295_v46 = vsel %vm17904_vm4, %v2290_v48, %v2294_v0  ;;  %v2312_v42 = vrot.slane %v2310_v47, 4  ;;  %v2318_v21 = vrot.slane %v2316_v35, 5  ;;  %v2330_v26 = vshll.u32 %v18579_v60, 16 }
  0x91   : > { %16646 = vmatmul.mubr.msk.bf16.gmra.mxu0 %vm830_vm3, %v25039_v45  ;;  %v25040_v40 = vcombine.low %v18406_v34, %v18418_v62  ;;  %v18605_v33 = vcombine.low %v2285_v29, %v2295_v46  ;;  %v2304_v32 = vrot.slane %v2303_v6, 4  ;;  %v2323_v38 = vrot.slane %v2321_v53, 4  ;;  %v18632_v46 = vld [vmem:[%s17852_s17 + $0x68] sm:$0x1] }
  0x92   : > { %v2326_v15 = vrot.slane %v2324_v24, 5  ;;  %v2313_v20 = vor.u32 %v2312_v42, %v2308_v57  ;;  %v2332_v50 = vrot.slane %v2330_v26, 5  ;;  %v2334_v59 = vshrl.u32 %v18579_v60, 16 }
  0x93   : > { %16649 = vmatprep.mubr.msk.bf16.mxu0 %vm830_vm3, %v25040_v40  ;;  %v2340_v0 = vshll.u32 %v18584_v54, 16  ;;  %v25041_v34 = vcombine.low %v25019_v27, %v18009_v58  ;;  %v2309_v62 = vsel %vm17904_vm4, %v2304_v32, %v2308_v57  ;;  %v2345_v37 = vshrl.u32 %v14680_v61, 16  ;;  %v18625_v27 = vld [vmem:[%s17852_s17 + $0x64] sm:$0xf] }
  0x94   : > { %v2327_v2 = vor.u32 %v2326_v15, %v2323_v38  ;;  %v2348_v8 = vshll.u32 %v14680_v61, 16  ;;  %v25042_v48 = vcombine.low %v25022_v18, %v25021_v17  ;;  %v2314_v47 = vrot.slane %v2313_v20, 4  ;;  %v14686_v38 = vld [vmem:[%s17852_s17 + $0x6c] sm:$0xf] }
  0x95   : > { %16612 = vmatmul.mubr.msk.bf16.gmra.mxu1 %vm830_vm3, %v25041_v34  ;;  %v2336_v35 = vrot.slane %v2334_v59, 4  ;;  %v2342_v29 = vrot.slane %v2340_v0, 5  ;;  %v2354_v58 = vshll.u32 %v18592_v22, 16  ;;  %v2347_v57 = vrot.slane %v2345_v37, 4  ;;  %v18644_v34 = vld [vmem:[%s17852_s17 + $0x70] sm:$0xf] }
  0x96   : > { %16615 = vmatprep.mubr.msk.bf16.mxu1 %vm830_vm3, %v25042_v48  ;;  %v2328_v6 = vrot.slane %v2327_v2, 4  ;;  %v2350_v53 = vrot.slane %v2348_v8, 5  ;;  %v2358_v61 = vshrl.u32 %v18592_v22, 16  ;;  %v2319_v24 = vsel %vm17904_vm4, %v2314_v47, %v2318_v21  ;;  %v18657_v47 = vld [vmem:[%s17852_s17 + $0x74] sm:$0x1] }
  0x97   : > { %v2337_v17 = vor.u32 %v2336_v35, %v2332_v50  ;;  %v2356_v18 = vrot.slane %v2354_v58, 5  ;;  %v2364_v45 = vshll.u32 %v18608_v28, 16  ;;  %v18634_v42 = vcombine.low %v2309_v62, %v2319_v24 }
  0x98   : > { %v2333_v26 = vsel %vm17904_vm4, %v2328_v6, %v2332_v50  ;;  %v2351_v40 = vor.u32 %v2350_v53, %v2347_v57  ;;  %v2360_v32 = vrot.slane %v2358_v61, 4  ;;  %v25043_v15 = vcombine.low %v18433_v30, %v18451_v23 }
  0x99   : > { %v2338_v21 = vrot.slane %v2337_v17, 4  ;;  %v2366_v20 = vrot.slane %v2364_v45, 5  ;;  %v2369_v59 = vshrl.u32 %v14683_v7, 16  ;;  %v2372_v0 = vshll.u32 %v14683_v7, 16 }
  0x9a   : > { %16650 = vmatmul.mubr.msk.bf16.gmra.mxu0 %vm830_vm3, %v25043_v15  ;;  %v25044_v62 = vcombine.low %v18443_v56, %v18463_v5  ;;  %v2352_v50 = vrot.slane %v2351_v40, 4  ;;  %v2361_v2 = vor.u32 %v2360_v32, %v2356_v18  ;;  %v2378_v37 = vshll.u32 %v18625_v27, 16  ;;  %v18685_v32 = vld [vmem:[%s17852_s17 + $0x7c] sm:$0xf] }
  0x9b   : > { %v2382_v30 = vshrl.u32 %v18625_v27, 16  ;;  %v2343_v23 = vsel %vm17904_vm4, %v2338_v21, %v2342_v29  ;;  %v2371_v8 = vrot.slane %v2369_v59, 4  ;;  %v2374_v7 = vrot.slane %v2372_v0, 5  ;;  %v17563_v0 = vld [vmem:[%s17852_s17 + $0xc] sm:$0xff]  }
  0x9c   : > { %16653 = vmatprep.mubr.msk.bf16.mxu0 %vm830_vm3, %v25044_v62  ;;  %v2388_v48 = vshll.u32 %v18632_v46, 16  ;;  %v25045_v56 = vcombine.low %v25025_v52, %v25024_v1  ;;  %v18663_v5 = vcombine.low %v2333_v26, %v2343_v23  ;;  %v2357_v35 = vsel %vm17904_vm4, %v2352_v50, %v2356_v18  ;;  %v14689_v1 = vld [vmem:[%s17852_s17 + $0x78] sm:$0xf] }
  0x9d   : > { %v2362_v58 = vrot.slane %v2361_v2, 4  ;;  %v2380_v6 = vrot.slane %v2378_v37, 5  ;;  %v25046_v29 = vcombine.low %v25028_v3, %v25027_v10  ;;  %v2375_v57 = vor.u32 %v2374_v7, %v2371_v8  ;;  %v18698_v7 = vld [vmem:[%s17852_s17 + $0x80] sm:$0x1] }
  0x9e   : > { %16616 = vmatmul.mubr.msk.bf16.gmra.mxu1 %vm830_vm3, %v25045_v56  ;;  %v2384_v53 = vrot.slane %v2382_v30, 4  ;;  %v2390_v61 = vrot.slane %v2388_v48, 5  ;;  %v2393_v24 = vshrl.u32 %v14686_v38, 16  ;;  %v2396_v17 = vshll.u32 %v14686_v38, 16 }
  0x9f   : > { %16619 = vmatprep.mubr.msk.bf16.mxu1 %vm830_vm3, %v25046_v29  ;;  %v2367_v52 = vsel %vm17904_vm4, %v2362_v58, %v2366_v20  ;;  %v2402_v3 = vshll.u32 %v18644_v34, 16  ;;  %v2406_v10 = vshrl.u32 %v18644_v34, 16  ;;  %v2376_v45 = vrot.slane %v2375_v57, 4  ;;  %v18712_v58 = vld [vmem:[%s17852_s17 + $0x88] sm:$0xf] }
  0xa0   : > { %v18682_v18 = vcombine.low %v2357_v35, %v2367_v52  ;;  %v2385_v26 = vor.u32 %v2384_v53, %v2380_v6  ;;  %v2395_v40 = vrot.slane %v2393_v24, 4  ;;  %v2398_v15 = vrot.slane %v2396_v17, 5 }
  0xa1   : > { %v2404_v21 = vrot.slane %v2402_v3, 5  ;;  %v2408_v59 = vrot.slane %v2406_v10, 4  ;;  %v2412_v38 = vshll.u32 %v18657_v47, 16  ;;  %v25048_v20 = vcombine.low %v18467_v31, %v18484_v9  ;;  %v14692_v9 = vld [vmem:[%s17852_s17 + $0x84] sm:$0xf] }
  0xa2   : > { %v2381_v62 = vsel %vm17904_vm4, %v2376_v45, %v2380_v6  ;;  %v2386_v50 = vrot.slane %v2385_v26, 4  ;;  %v2417_v2 = vshrl.u32 %v14689_v1, 16  ;;  %v2420_v37 = vshll.u32 %v14689_v1, 16  ;;  %v18727_v3 = vld [vmem:[%s17852_s17 + $0x8c] sm:$0x1] }
  0xa3   : > { %16654 = vmatmul.mubr.msk.bf16.gmra.mxu0 %vm830_vm3, %v25048_v20  ;;  %v2399_v30 = vor.u32 %v2398_v15, %v2395_v40  ;;  %v2409_v23 = vor.u32 %v2408_v59, %v2404_v21  ;;  %v2414_v8 = vrot.slane %v2412_v38, 5  ;;  %v2426_v31 = vshll.u32 %v18685_v32, 16  ;;  %v14695_v26 = vld [vmem:[%s17852_s17 + $0x90] sm:$0xf]  ;;  %v17564_v40 = vld [vmem:[%s17852_s17 + $0x18] sm:$0xff]  }
  0xa4   : > { %16693 = vmatprep.mubr.msk.bf16.mxu0 %vm830_vm3, %v18538_v19  ;;  %v2391_v48 = vsel %vm17904_vm4, %v2386_v50, %v2390_v61  ;;  %v2419_v56 = vrot.slane %v2417_v2, 4  ;;  %v2422_v35 = vrot.slane %v2420_v37, 5  ;;  %v2430_v19 = vshrl.u32 %v18685_v32, 16  ;;  %v18742_v37 = vld [vmem:[%s24893_s3 + $0x10] sm:$0x3] }
  0xa5   : > { %v25049_v6 = vcombine.low %v25030_v39, %v18162_v13  ;;  %v18718_v29 = vcombine.low %v2381_v62, %v2391_v48  ;;  %v2400_v57 = vrot.slane %v2399_v30, 4  ;;  %v2410_v53 = vrot.slane %v2409_v23, 4  ;;  %v17565_v30 = vld [vmem:[%s17852_s17 + $0x24] sm:$0xff]  }
  0xa6   : > { %v2428_v61 = vrot.slane %v2426_v31, 5  ;;  %v2423_v24 = vor.u32 %v2422_v35, %v2419_v56  ;;  %v2432_v1 = vrot.slane %v2430_v19, 4  ;;  %v2436_v52 = vshll.u32 %v18698_v7, 16 }
  0xa7   : > { %16620 = vmatmul.mubr.msk.bf16.gmra.mxu1 %vm830_vm3, %v25049_v6  ;;  %v2441_v17 = vshrl.u32 %v14692_v9, 16  ;;  %v2405_v13 = vsel %vm17904_vm4, %v2400_v57, %v2404_v21  ;;  %v2415_v39 = vsel %vm17904_vm4, %v2410_v53, %v2414_v8  ;;  %v2444_v10 = vshll.u32 %v14692_v9, 16  ;;  %v18751_v9 = vld [vmem:[%s17852_s17 + $0x98] sm:$0x1]  ;;  %v14698_v6 = vld [vmem:[%s17852_s17 + $0x9c] sm:$0xf] }
  0xa8   : > { %16659 = vmatprep.mubr.msk.bf16.mxu1 %vm830_vm3, %v17563_v0  ;;  %v2450_v45 = vshll.u32 %v18712_v58, 16  ;;  %v18733_v15 = vcombine.low %v2405_v13, %v2415_v39  ;;  %v2424_v59 = vrot.slane %v2423_v24, 4  ;;  %v2433_v38 = vor.u32 %v2432_v1, %v2428_v61  ;;  %v18736_v0 = vld [vmem:[%s17852_s17 + $0x94] sm:$0xf]  ;;  %v18777_v13 = vld [vmem:[%s17852_s17 + $0xa0] sm:$0xf] }
  0xa9   : > { %v2438_v20 = vrot.slane %v2436_v52, 5  ;;  %v2443_v21 = vrot.slane %v2441_v17, 4  ;;  %v2446_v62 = vrot.slane %v2444_v10, 5  ;;  %v2454_v2 = vshrl.u32 %v18712_v58, 16 }
  0xaa   : > { %v2452_v50 = vrot.slane %v2450_v45, 5  ;;  %v2429_v23 = vsel %vm17904_vm4, %v2424_v59, %v2428_v61  ;;  %v2434_v8 = vrot.slane %v2433_v38, 4  ;;  %v2460_v31 = vshll.u32 %v18727_v3, 16 }
  0xab   : > { %16694 = vmatmul.mubr.msk.bf16.vlgmr.msra.gmra.mxu0 %vm830_vm3, %v18558_v12  ;;  %v2465_v48 = vshrl.u32 %v14695_v26, 16  ;;  %v2447_v56 = vor.u32 %v2446_v62, %v2443_v21  ;;  %v2456_v35 = vrot.slane %v2454_v2, 4  ;;  %v2468_v12 = vshll.u32 %v14695_v26, 16 }
  0xac   : > { %16760 = vmatpush3.bf16.msra.mxu0 %v18511_v41  ;;  %16697 = vmatprep.mubr.msk.bf16.mxu0 %vm830_vm3, %v18581_v49  ;;  %v2474_v19 = vshll.u32 %v18736_v0, 16  ;;  %v2439_v57 = vsel %vm17904_vm4, %v2434_v8, %v2438_v20  ;;  %v2462_v53 = vrot.slane %v2460_v31, 5  ;;  %v2478_v24 = vshrl.u32 %v18736_v0, 16  ;;  %v18764_v41 = vld [vmem:[%s24893_s3 + $0xe] sm:$0x3]  ;;  %v17566_v8 = vld [vmem:[%s17852_s17 + $0x30] sm:$0xff]  }
  0xad   : > { %v2467_v61 = vrot.slane %v2465_v48, 4  ;;  %17484 = vmatprep.subr.msk.bf16.mxu0 %vm879_vm0, %v18742_v37  ;;  %v18774_v49 = vcombine.low %v2429_v23, %v2439_v57  ;;  %v2448_v1 = vrot.slane %v2447_v56, 4  ;;  %v2457_v52 = vor.u32 %v2456_v35, %v2452_v50  ;;  %v18785_v20 = vld [vmem:[%s17852_s17 + $0xa4] sm:$0x1]  ;;  %v14701_v23 = vld [vmem:[%s17852_s17 + $0xa8] sm:$0xf] }
  0xae   : > { %v2470_v17 = vrot.slane %v2468_v12, 5  ;;  %v2476_v39 = vrot.slane %v2474_v19, 5  ;;  %v2480_v10 = vrot.slane %v2478_v24, 4  ;;  %v2484_v45 = vshll.u32 %v18751_v9, 16  ;;  %v18797_v35 = vld [vmem:[%s17852_s17 + $0xac] sm:$0xf] }
  0xaf   : > { %16660 = vmatmul.mubr.msk.bf16.vlgmr.msra.gmra.mxu1 %vm830_vm3, %v17564_v40  ;;  %v2489_v26 = vshrl.u32 %v14698_v6, 16  ;;  %v2453_v40 = vsel %vm17904_vm4, %v2448_v1, %v2452_v50  ;;  %v2458_v59 = vrot.slane %v2457_v52, 4  ;;  %v2492_v21 = vshll.u32 %v14698_v6, 16  ;;  %v17567_v12 = vld [vmem:[%s17852_s17 + $0x3c] sm:$0xff]   ;;  %v18810_v52 = vld [vmem:[%s17852_s17 + $0xb0] sm:$0x1] }
  0xb0   : > { %16726 = vmatpush3.bf16.msra.mxu1 %v18507_v63  ;;  %16663 = vmatprep.mubr.msk.bf16.mxu1 %vm830_vm3, %v17565_v30  ;;  %v2471_v38 = vor.u32 %v2470_v17, %v2467_v61  ;;  %v2481_v63 = vor.u32 %v2480_v10, %v2476_v39  ;;  %v2486_v62 = vrot.slane %v2484_v45, 5  ;;  %v2498_v30 = vshll.u32 %v18777_v13, 16 }
  0xb1   : > { %17483 = vmatprep.subr.msk.bf16.mxu1 %vm879_vm0, %v18764_v41  ;;  %v2491_v2 = vrot.slane %v2489_v26, 4  ;;  %v2463_v50 = vsel %vm17904_vm4, %v2458_v59, %v2462_v53  ;;  %v2494_v48 = vrot.slane %v2492_v21, 5  ;;  %v2502_v56 = vshrl.u32 %v18777_v13, 16  ;;  %v18825_v21 = vld [vmem:[%s17852_s17 + $0xb8] sm:$0xf] }
  0xb2   : > { %v2472_v31 = vrot.slane %v2471_v38, 4  ;;  %v18802_v19 = vcombine.low %v2453_v40, %v2463_v50  ;;  %v2482_v6 = vrot.slane %v2481_v63, 4  ;;  %v2500_v57 = vrot.slane %v2498_v30, 5  ;;  %v18833_v50 = vld [vmem:[%s17852_s17 + $0xbc] sm:$0x1] }
  0xb3   : > { %16698 = vmatmul.mubr.msk.bf16.gmra.mxu0 %vm830_vm3, %v18605_v33  ;;  %v2508_v61 = vshll.u32 %v18785_v20, 16  ;;  %v2495_v24 = vor.u32 %v2494_v48, %v2491_v2  ;;  %v2504_v1 = vrot.slane %v2502_v56, 4  ;;  %v2513_v33 = vshrl.u32 %v14701_v23, 16 }
  0xb4   : > { %16701 = vmatprep.mubr.msk.bf16.mxu0 %vm830_vm3, %v18634_v42  ;;  %v2477_v53 = vsel %vm17904_vm4, %v2472_v31, %v2476_v39  ;;  %v2487_v17 = vsel %vm17904_vm4, %v2482_v6, %v2486_v62  ;;  %v2516_v45 = vshll.u32 %v14701_v23, 16  ;;  %v2522_v42 = vshll.u32 %v18797_v35, 16  ;;  %v14704_v39 = vld [vmem:[%s17852_s17 + $0xb4] sm:$0xf] }
  0xb5   : > { %v2510_v10 = vrot.slane %v2508_v61, 5  ;;  %v18822_v26 = vcombine.low %v2477_v53, %v2487_v17  ;;  %v2496_v40 = vrot.slane %v2495_v24, 4  ;;  %v2505_v59 = vor.u32 %v2504_v1, %v2500_v57  ;;  %v14707_v53 = vld [vmem:[%s17852_s17 + $0xc0] sm:$0xf]  ;;  %v17568_v24 = vld [vmem:[%s17852_s17 + $0x48] sm:$0xff]  }
  0xb6   : > { %v2515_v38 = vrot.slane %v2513_v33, 4  ;;  %v2518_v63 = vrot.slane %v2516_v45, 5  ;;  %v2524_v62 = vrot.slane %v2522_v42, 5  ;;  %v2526_v2 = vshrl.u32 %v18797_v35, 16  ;;  %v18842_v45 = vld [vmem:[%s17852_s17 + $0xc4] sm:$0xf] }
  0xb7   : > { %16664 = vmatmul.mubr.msk.bf16.gmra.mxu1 %vm830_vm3, %v17566_v8  ;;  %v2532_v30 = vshll.u32 %v18810_v52, 16  ;;  %v2501_v23 = vsel %vm17904_vm4, %v2496_v40, %v2500_v57  ;;  %v2506_v8 = vrot.slane %v2505_v59, 4  ;;  %v2537_v31 = vshrl.u32 %v14704_v39, 16  ;;  %v17569_v42 = vld [vmem:[%s17852_s17 + $0x54] sm:$0xff]  }
  0xb8   : > { %16667 = vmatprep.mubr.msk.bf16.mxu1 %vm830_vm3, %v17567_v12  ;;  %v2540_v48 = vshll.u32 %v14704_v39, 16  ;;  %v2519_v56 = vor.u32 %v2518_v63, %v2515_v38  ;;  %v2528_v6 = vrot.slane %v2526_v2, 4  ;;  %v2546_v12 = vshll.u32 %v18825_v21, 16 }
  0xb9   : > { %v2534_v61 = vrot.slane %v2532_v30, 5  ;;  %v2511_v1 = vsel %vm17904_vm4, %v2506_v8, %v2510_v10  ;;  %v2539_v33 = vrot.slane %v2537_v31, 4  ;;  %v2550_v57 = vshrl.u32 %v18825_v21, 16  ;;  %v18855_v31 = vld [vmem:[%s17852_s17 + $0xc8] sm:$0x1] }
  0xba   : > { %v2542_v17 = vrot.slane %v2540_v48, 5  ;;  %v18847_v39 = vcombine.low %v2501_v23, %v2511_v1  ;;  %v2520_v40 = vrot.slane %v2519_v56, 4  ;;  %v2529_v59 = vor.u32 %v2528_v6, %v2524_v62  ;;  %v14743_v1 = vld [vmem:[%s17852_s17 + $0xc] sm:$0xe] }
  0xbb   : > { %16702 = vmatmul.mubr.msk.bf16.gmra.mxu0 %vm830_vm3, %v18663_v5  ;;  %v2548_v38 = vrot.slane %v2546_v12, 5  ;;  %v2552_v63 = vrot.slane %v2550_v57, 4  ;;  %v2556_v2 = vshll.u32 %v18833_v50, 16  ;;  %v2561_v30 = vshrl.u32 %v14707_v53, 16  ;;  %v14744_v57 = vld [vmem:[%s17852_s17 + $0x18] sm:$0xe] }
  0xbc   : > { %16705 = vmatprep.mubr.msk.bf16.mxu0 %vm830_vm3, %v18682_v18  ;;  %v2543_v10 = vor.u32 %v2542_v17, %v2539_v33  ;;  %v2525_v8 = vsel %vm17904_vm4, %v2520_v40, %v2524_v62  ;;  %v2530_v5 = vrot.slane %v2529_v59, 4  ;;  %v2564_v23 = vshll.u32 %v14707_v53, 16 }
  0xbd   : > { %v2570_v48 = vshll.u32 %v18842_v45, 16  ;;  %v2553_v6 = vor.u32 %v2552_v63, %v2548_v38  ;;  %v2558_v18 = vrot.slane %v2556_v2, 5  ;;  %v2563_v12 = vrot.slane %v2561_v30, 4  ;;  %v17570_v30 = vld [vmem:[%s17852_s17 + $0x60] sm:$0xff]  }
  0xbe   : > { %v2544_v56 = vrot.slane %v2543_v10, 4  ;;  %v2535_v62 = vsel %vm17904_vm4, %v2530_v5, %v2534_v61  ;;  %v2566_v33 = vrot.slane %v2564_v23, 5  ;;  %v2574_v53 = vshrl.u32 %v18842_v45, 16 }
  0xbf   : > { %16668 = vmatmul.mubr.msk.bf16.gmra.mxu1 %vm830_vm3, %v17568_v24  ;;  %v2572_v17 = vrot.slane %v2570_v48, 5  ;;  %v18865_v40 = vcombine.low %v2525_v8, %v2535_v62  ;;  %v2554_v59 = vrot.slane %v2553_v6, 4  ;;  %v2580_v10 = vshll.u32 %v18855_v31, 16  ;;  %v14745_v62 = vld [vmem:[%s17852_s17 + $0x24] sm:$0xe] }
  0xc0   : > { %16671 = vmatprep.mubr.msk.bf16.mxu1 %vm830_vm3, %v17569_v42  ;;  %v2549_v24 = vsel %vm17904_vm4, %v2544_v56, %v2548_v38  ;;  %v2567_v63 = vor.u32 %v2566_v33, %v2563_v12  ;;  %v2576_v42 = vrot.slane %v2574_v53, 4  ;;  %v14759_v2 = vrot.slane %v14743_v1, 9  ;;  %v17571_v38 = vld [vmem:[%s17852_s17 + $0x6c] sm:$0xff]  }
  0xc1   : > { %v2944_v61 = vrot.slane %v18423_v44, 5  ;;  %v2559_v5 = vsel %vm17904_vm4, %v2554_v59, %v2558_v18  ;;  %v2582_v23 = vrot.slane %v2580_v10, 5  ;;  %v2947_v8 = vrot.slane %v18447_v11, 5  ;;  %v14746_v1 = vld [vmem:[%s17852_s17 + $0x30] sm:$0xe] }
  0xc2   : > { %v14760_v48 = vrot.slane %v14744_v57, 9  ;;  %v18879_v56 = vcombine.low %v2549_v24, %v2559_v5  ;;  %v2568_v6 = vrot.slane %v2567_v63, 4  ;;  %v2577_v12 = vor.u32 %v2576_v42, %v2572_v17  ;;  %v25051_v42 = vld [vmem:[#allocation4_spill] sm:$0xff] }
  0xc3   : > { %16706 = vmatmul.mubr.msk.bf16.gmra.mxu0 %vm830_vm3, %v18718_v29  ;;  %v18883_v44 = vsel %vm18183_vm7, %v14759_v2, %v2944_v61  ;;  %v2946_v11 = vrot.slane %v2944_v61, 4  ;;  %v2951_v18 = vrot.slane %v18470_v16, 5  ;;  %v2954_v33 = vrot.slane %v18473_v14, 5 }
  0xc4   : > { %16709 = vmatprep.mubr.msk.bf16.mxu0 %vm830_vm3, %v18733_v15  ;;  %v18892_v29 = vsel %vm879_vm0, %v18764_v41, 0  ;;  %v2573_v53 = vsel %vm17904_vm4, %v2568_v6, %v2572_v17  ;;  %v2578_v57 = vrot.slane %v2577_v12, 4  ;;  %v18898_v24 = vsel %vm879_vm0, %v18742_v37, 0  ;;  %v25050_v41 = vld [vmem:[#allocation3_spill] sm:$0xff]  ;;  %v14747_v17 = vld [vmem:[%s17852_s17 + $0x3c] sm:$0xe] }
  0xc5   : > { %v14761_v59 = vrot.slane %v14745_v62, 9  ;;  %v18903_v16 = vsel %vm18183_vm7, %v2946_v11, %v2947_v8  ;;  %v18907_v14 = vsel %vm18183_vm7, %v14760_v48, %v2951_v18  ;;  %v2953_v15 = vrot.slane %v2951_v18, 4  ;;  %v17572_v11 = vld [vmem:[%s17852_s17 + $0x78] sm:$0xff]  }
  0xc6   : > { %v2958_v10 = vrot.slane %v25050_v41, 5  ;;  %v2583_v37 = vsel %vm17904_vm4, %v2578_v57, %v2582_v23  ;;  %v14776_v63 = vcombine.low %v18883_v44, %v18903_v16  ;;  %v2961_v2 = vrot.slane %v25051_v42, 5 }
  0xc7   : > { %16672 = vmatmul.mubr.msk.bf16.gmra.mxu1 %vm830_vm3, %v17570_v30  ;;  %v14762_v61 = vrot.slane %v14746_v1, 9  ;;  %v14748_v30 = vld [vmem:[%s17852_s17 + $0x48] sm:$0xe]  ;;  %v18918_v5 = vcombine.low %v2573_v53, %v2583_v37  ;;  %v18922_v8 = vsel %vm18183_vm7, %v2953_v15, %v2954_v33  ;;  %v2968_v6 = vrot.slane %v18536_v55, 5  ;;  %v14749_v1 = vld [vmem:[%s17852_s17 + $0x54] sm:$0xe] }
  0xc8   : > { %16675 = vmatprep.mubr.msk.bf16.mxu1 %vm830_vm3, %v17571_v38  ;;  %v18926_v48 = vsel %vm18183_vm7, %v14761_v59, %v2958_v10  ;;  %v2960_v62 = vrot.slane %v2958_v10, 4  ;;  %v2965_v38 = vrot.slane %v18531_v4, 5  ;;  %v14763_v12 = vrot.slane %v14747_v17, 9  ;;  %v17573_v59 = vld [vmem:[%s17852_s17 + $0x84] sm:$0xff]   ;;  %v14750_v10 = vld [vmem:[%s17852_s17 + $0x60] sm:$0xe] }
  0xc9   : > { %v2972_v33 = vrot.slane %v18552_v51, 5  ;;  %v2975_v53 = vrot.slane %v18561_v25, 5  ;;  %v14764_v57 = vrot.slane %v14748_v30, 9  ;;  %v2979_v41 = vrot.slane %v18579_v60, 5 }
  0xca   : > { %v18936_v18 = vsel %vm18183_vm7, %v2960_v62, %v2961_v2  ;;  %v18947_v55 = vsel %vm18183_vm7, %v14762_v61, %v2965_v38  ;;  %v2967_v15 = vrot.slane %v2965_v38, 4  ;;  %v14765_v17 = vrot.slane %v14749_v1, 9  ;;  %v14752_v38 = vld [vmem:[%s17852_s17 + $0x78] sm:$0xe]  ;;  %v17581_v61 = vld [vmem:[%s17852_s17 + $0x30] sm:$0xff]  }
  0xcb   : > { %16710 = vmatmul.mubr.msk.bf16.gmra.mxu0 %vm830_vm3, %v18774_v49  ;;  %v18955_v51 = vsel %vm18183_vm7, %v14763_v12, %v2972_v33  ;;  %v2974_v25 = vrot.slane %v2972_v33, 4  ;;  %v2982_v49 = vrot.slane %v18584_v54, 5  ;;  %v18964_v60 = vsel %vm18183_vm7, %v14764_v57, %v2979_v41  ;;  %v14753_v57 = vld [vmem:[%s17852_s17 + $0x84] sm:$0xe] }
  0xcc   : > { %16713 = vmatprep.mubr.msk.bf16.mxu0 %vm830_vm3, %v18802_v19  ;;  %v18960_v37 = vsel %vm18183_vm7, %v2967_v15, %v2968_v6  ;;  %v2981_v42 = vrot.slane %v2979_v41, 4  ;;  %v2986_v2 = vrot.slane %v18592_v22, 5  ;;  %v14751_v19 = vld [vmem:[%s17852_s17 + $0x6c] sm:$0xe]  ;;  %v2989_v30 = vrot.slane %v18608_v28, 5 }
  0xcd   : > { %v18973_v54 = vsel %vm18183_vm7, %v2974_v25, %v2975_v53  ;;  %v14766_v62 = vrot.slane %v14750_v10, 9  ;;  %v2996_v33 = vrot.slane %v18632_v46, 5  ;;  %v14767_v53 = vrot.slane %v14751_v19, 9  ;;  %v17574_v25 = vld [vmem:[%s17852_s17 + $0x90] sm:$0xff]   ;;  %v14877_v22 = vld [vmem:[%s17852_s17 + $0x28] sm:$0xf] }
  0xce   : > { %v18982_v6 = vsel %vm18183_vm7, %v2981_v42, %v2982_v49  ;;  %v18986_v12 = vsel %vm18183_vm7, %v14765_v17, %v2986_v2  ;;  %v2988_v1 = vrot.slane %v2986_v2, 4  ;;  %v3000_v15 = vrot.slane %v18644_v34, 5  ;;  %v14754_v42 = vld [vmem:[%s17852_s17 + $0x90] sm:$0xe]  ;;  %v17575_v34 = vld [vmem:[%s17852_s17 + $0x9c] sm:$0xff]  }
  0xcf   : > { %16676 = vmatmul.mubr.msk.bf16.gmra.mxu1 %vm830_vm3, %v17572_v11  ;;  %v2993_v11 = vrot.slane %v18625_v27, 5  ;;  %v3003_v41 = vrot.slane %v18657_v47, 5  ;;  %v14768_v10 = vrot.slane %v14752_v38, 9  ;;  %v3007_v17 = vrot.slane %v18685_v32, 5  ;;  %v14755_v38 = vld [vmem:[%s17852_s17 + $0x9c] sm:$0xe] }
  0xd0   : > { %16679 = vmatprep.mubr.msk.bf16.mxu1 %vm830_vm3, %v17573_v59  ;;  %v18995_v59 = vsel %vm18183_vm7, %v2988_v1, %v2989_v30  ;;  %v19013_v47 = vsel %vm18183_vm7, %v14767_v53, %v3000_v15  ;;  %v3002_v2 = vrot.slane %v3000_v15, 4  ;;  %v3010_v19 = vrot.slane %v18698_v7, 5 }
  0xd1   : > { %v19004_v27 = vsel %vm18183_vm7, %v14766_v62, %v2993_v11  ;;  %v2995_v46 = vrot.slane %v2993_v11, 4  ;;  %v14769_v30 = vrot.slane %v14753_v57, 9  ;;  %v3009_v62 = vrot.slane %v3007_v17, 4  ;;  %v17578_v57 = vld [vmem:[%s17852_s17 + $0xc0] sm:$0xff]  }
  0xd2   : > { %v3014_v1 = vrot.slane %v18712_v58, 5  ;;  %v19032_v11 = vsel %vm18183_vm7, %v3002_v2, %v3003_v41  ;;  %v14770_v53 = vrot.slane %v14754_v42, 9  ;;  %v3028_v2 = vrot.slane %v18777_v13, 5 }
  0xd3   : > { %16714 = vmatmul.mubr.msk.bf16.gmra.mxu0 %vm830_vm3, %v18822_v26  ;;  %v19021_v32 = vsel %vm18183_vm7, %v2995_v46, %v2996_v33  ;;  %v19025_v26 = vsel %vm18183_vm7, %v14768_v10, %v3007_v17  ;;  %v14756_v33 = vld [vmem:[%s17852_s17 + $0xa8] sm:$0xe]  ;;  %v19041_v58 = vsel %vm18183_vm7, %v3009_v62, %v3010_v19  ;;  %v3021_v10 = vrot.slane %v18736_v0, 5  ;;  %v14757_v17 = vld [vmem:[%s17852_s17 + $0xb4] sm:$0xe] }
  0xd4   : > { %16717 = vmatprep.mubr.msk.bf16.mxu0 %vm830_vm3, %v18847_v39  ;;  %v3017_v39 = vrot.slane %v18727_v3, 5  ;;  %v19045_v15 = vsel %vm18183_vm7, %v14769_v30, %v3014_v1  ;;  %v3016_v41 = vrot.slane %v3014_v1, 4  ;;  %v14771_v46 = vrot.slane %v14755_v38, 9  ;;  %v17576_v30 = vld [vmem:[%s17852_s17 + $0xa8] sm:$0xff]   ;;  %v14758_v1 = vld [vmem:[%s17852_s17 + $0xc0] sm:$0xe] }
  0xd5   : > { %v3031_v19 = vrot.slane %v18785_v20, 5  ;;  %v19064_v0 = vsel %vm18183_vm7, %v14770_v53, %v3021_v10  ;;  %v3035_v38 = vrot.slane %v18797_v35, 5  ;;  %v3030_v20 = vrot.slane %v3028_v2, 4  ;;  %v14873_v3 = vld [vmem:[%s17852_s17 + $0x18] sm:$0xf] }
  0xd6   : > { %v19055_v42 = vsel %vm18183_vm7, %v3016_v41, %v3017_v39  ;;  %v17577_v39 = vld [vmem:[%s17852_s17 + $0xb4] sm:$0xff]   ;;  %v19071_v13 = vsel %vm18183_vm7, %v14771_v46, %v3028_v2  ;;  %v14773_v41 = vrot.slane %v14757_v17, 9  ;;  %v3042_v46 = vrot.slane %v18825_v21, 5  ;;  %v14874_v2 = vld [vmem:[%s17852_s17 + $0x1c] sm:$0xf] }
  0xd7   : > { %16680 = vmatmul.mubr.msk.bf16.gmra.mxu1 %vm830_vm3, %v17574_v25  ;;  %v3024_v25 = vrot.slane %v18751_v9, 5  ;;  %v3023_v9 = vrot.slane %v3021_v10, 4  ;;  %v3037_v10 = vrot.slane %v3035_v38, 4  ;;  %v14774_v17 = vrot.slane %v14758_v1, 9  ;;  %v14875_v1 = vld [vmem:[%s17852_s17 + $0x20] sm:$0x1] }
  0xd8   : > { %16683 = vmatprep.mubr.msk.bf16.mxu1 %vm830_vm3, %v17575_v34  ;;  %v14772_v34 = vrot.slane %v14756_v33, 9  ;;  %v3038_v33 = vrot.slane %v18810_v52, 5  ;;  %v4502_v28 = vrot.slane %v14875_v1, 5 }
  0xd9   : > { %v19079_v53 = vsel %vm18183_vm7, %v3023_v9, %v3024_v25  ;;  %v3045_v25 = vrot.slane %v18833_v50, 5  ;;  %v3044_v9 = vrot.slane %v3042_v46, 4  ;;  %v17579_v50 = vld [vmem:[%s17852_s17 + $0x18] sm:$0xff]  }
  0xda   : > { %v19083_v35 = vsel %vm18183_vm7, %v14772_v34, %v3035_v38  ;;  %v19100_v21 = vsel %vm18183_vm7, %v3037_v10, %v3038_v33  ;;  %v3052_v38 = vrot.slane %v18855_v31, 5  ;;  %v3765_v10 = vshll.u32 %v14874_v2, 16 }
  0xdb   : > { %16718 = vmatmul.mubr.msk.bf16.gmra.mxu0 %vm830_vm3, %v18865_v40  ;;  %v19093_v40 = vsel %vm18183_vm7, %v3030_v20, %v3031_v19  ;;  %v3049_v19 = vrot.slane %v18842_v45, 5  ;;  %v3756_v20 = vshrl.u32 %v14873_v3, 16  ;;  %v19115_v33 = vsel %vm18183_vm7, %v3044_v9, %v3045_v25 }
  0xdc   : > { %16721 = vmatprep.mubr.msk.bf16.mxu0 %vm830_vm3, %v18879_v56  ;;  %v19104_v56 = vsel %vm18183_vm7, %v14773_v41, %v3042_v46  ;;  %v3759_v41 = vshll.u32 %v14873_v3, 16  ;;  %v14954_v46 = vld [vmem:[%s17852_s17 + $0x18] sm:$0xe]  ;;  %v3767_v62 = vrot.slane %v3765_v10, 5  ;;  %v3775_v9 = vshll.u32 %v14875_v1, 16 }
  0xdd   : > { %v19123_v31 = vsel %vm18183_vm7, %v14774_v17, %v3049_v19  ;;  %v3051_v34 = vrot.slane %v3049_v19, 4  ;;  %v14876_v3 = vld [vmem:[%s17852_s17 + $0x24] sm:$0xf]  ;;  %v14970_v49 = vrot.slane %v14954_v46, 9  ;;  %v4499_v45 = vrot.slane %v14874_v2, 5 }
  0xde   : > { %25052 = vst [vmem:[#allocation6_spill] sm:$0xff] %v19123_v31  ;;  %v3761_v52 = vrot.slane %v3759_v41, 5  ;;  %v3777_v41 = vrot.slane %v3775_v9, 5  ;;  %v14878_v10 = vld [vmem:[%s17852_s17 + $0x2c] sm:$0x1]  ;;  %v3783_v1 = vshll.u32 %v14876_v3, 16 }
  0xdf   : > { %16684 = vmatmul.mubr.msk.bf16.gmra.mxu1 %vm830_vm3, %v17576_v30  ;;  %v3769_v30 = vshrl.u32 %v14874_v2, 16  ;;  %v19129_v7 = vsel %vm18183_vm7, %v3051_v34, %v3052_v38  ;;  %v19140_v34 = vsel %vm18183_vm7, %v14970_v49, %v4499_v45  ;;  %v4501_v2 = vrot.slane %v4499_v45, 4  ;;  %v17580_v49 = vld [vmem:[%s17852_s17 + $0x24] sm:$0xff]  }
  0xe0   : > { %16687 = vmatprep.mubr.msk.bf16.mxu1 %vm830_vm3, %v17577_v39  ;;  %v3758_v39 = vrot.slane %v3756_v20, 4  ;;  %25053 = vst [vmem:[#allocation5_spill] sm:$0xff] %v19129_v7  ;;  %v3780_v38 = vshrl.u32 %v14876_v3, 16  ;;  %v3785_v3 = vrot.slane %v3783_v1, 5  ;;  %v3799_v17 = vshll.u32 %v14878_v10, 16 }
  0xe1   : > { %v3771_v25 = vrot.slane %v3769_v30, 4  ;;  %v19153_v45 = vsel %vm18183_vm7, %v4501_v2, %v4502_v28  ;;  %v4509_v7 = vrot.slane %v14878_v10, 5  ;;  %v14890_v2 = vld [vmem:[%s17852_s17 + $0x5c] sm:$0x1] }
  0xe2   : > { %v3762_v19 = vor.u32 %v3761_v52, %v3758_v39  ;;  %v19146_v52 = vld [vmem:[%s24893_s3 + $0x12] sm:$0x3]  ;;  %v3789_v39 = vshll.u32 %v14877_v22, 16  ;;  %v3782_v9 = vrot.slane %v3780_v38, 4  ;;  %v3801_v44 = vrot.slane %v3799_v17, 5 }
  0xe3   : > { %16722 = vmatmul.mubr.msk.bf16.gmra.mxu0 %vm830_vm3, %v18918_v5  ;;  %v3772_v20 = vor.u32 %v3771_v25, %v3767_v62  ;;  %v14955_v5 = vld [vmem:[%s17852_s17 + $0x24] sm:$0xe]  ;;  %v3793_v25 = vshrl.u32 %v14877_v22, 16  ;;  %v19174_v31 = vsel %vm879_vm0, %v19146_v52, 0 }
  0xe4   : > { %16761 = vmatprep.mubr.msk.bf16.mxu0 %vm830_vm3, %v17579_v50  ;;  %v3763_v30 = vrot.slane %v3762_v19, 4  ;;  %v14879_v50 = vld [vmem:[%s17852_s17 + $0x30] sm:$0xf]  ;;  %v15052_v19 = vld [vmem:[%s24893_s3 + $0x14] sm:$0x3]  ;;  %v3791_v38 = vrot.slane %v3789_v39, 5  ;;  %v3786_v4 = vor.u32 %v3785_v3, %v3782_v9 }
  0xe5   : > { %v3773_v46 = vrot.slane %v3772_v20, 4  ;;  %v14880_v20 = vld [vmem:[%s17852_s17 + $0x34] sm:$0xf]  ;;  %v3795_v23 = vrot.slane %v3793_v25, 4  ;;  %v14971_v16 = vrot.slane %v14955_v5, 9  ;;  %v3804_v39 = vshrl.u32 %v14879_v50, 16 }
  0xe6   : > { %v3807_v10 = vshll.u32 %v14879_v50, 16  ;;  %v3813_v5 = vshll.u32 %v14880_v20, 16  ;;  %v14956_v25 = vld [vmem:[%s17852_s17 + $0x30] sm:$0xe]  ;;  %v17582_v3 = vld [vmem:[%s17852_s17 + $0x3c] sm:$0xff]  }
  0xe7   : > { %16688 = vmatmul.mubr.msk.bf16.gmra.mxu1 %vm830_vm3, %v17578_v57  ;;  %v3768_v57 = vsel %vm17904_vm4, %v3763_v30, %v3767_v62  ;;  %v3778_v28 = vsel %vm17904_vm4, %v3773_v46, %v3777_v41  ;;  %v3787_v62 = vrot.slane %v3786_v4, 4  ;;  %v3796_v30 = vor.u32 %v3795_v23, %v3791_v38  ;;  %v14881_v46 = vld [vmem:[%s17852_s17 + $0x38] sm:$0x1] }
  0xe8   : > { %16727 = vmatprep.mubr.msk.bf16.mxu1 %vm830_vm3, %v14776_v63  ;;  %v19170_v1 = vcombine.low %v3768_v57, %v3778_v28  ;;  %v4506_v63 = vrot.slane %v14877_v22, 5  ;;  %v19177_v41 = vsel %vm879_vm0, %v15052_v19, 0  ;;  %v3806_v9 = vrot.slane %v3804_v39, 4 }
  0xe9   : > { %v3792_v23 = vsel %vm17904_vm4, %v3787_v62, %v3791_v38  ;;  %v3797_v4 = vrot.slane %v3796_v30, 4  ;;  %v3809_v50 = vrot.slane %v3807_v10, 5  ;;  %v3815_v28 = vrot.slane %v3813_v5, 5  ;;  %v17583_v10 = vld [vmem:[%s17852_s17 + $0x48] sm:$0xff]  }
  0xea   : > { %v19183_v17 = vsel %vm18183_vm7, %v14971_v16, %v4506_v63  ;;  %v4508_v22 = vrot.slane %v4506_v63, 4  ;;  %v25054_v38 = vcombine.low %v18907_v14, %v18922_v8  ;;  %v14972_v62 = vrot.slane %v14956_v25, 9 }
  0xeb   : > { %16762 = vmatmul.mubr.msk.bf16.vlgmr.msra.gmra.mxu0 %vm830_vm3, %v17580_v49  ;;  %v3817_v49 = vshrl.u32 %v14880_v20, 16  ;;  %v3802_v16 = vsel %vm17904_vm4, %v3797_v4, %v3801_v44  ;;  %v25055_v30 = vcombine.low %v18926_v48, %v18936_v18  ;;  %v3810_v14 = vor.u32 %v3809_v50, %v3806_v9  ;;  %v14884_v44 = vld [vmem:[%s17852_s17 + $0x44] sm:$0x1] }
  0xec   : > { %16828 = vmatpush3.bf16.msra.mxu0 %v18898_v24  ;;  %16765 = vmatprep.mubr.msk.bf16.mxu0 %vm830_vm3, %v17581_v61  ;;  %v19193_v57 = vsel %vm18183_vm7, %v4508_v22, %v4509_v7  ;;  %v3823_v24 = vshll.u32 %v14881_v46, 16  ;;  %v14882_v61 = vld [vmem:[%s17852_s17 + $0x3c] sm:$0xf]  ;;  %v19211_v39 = vcombine.low %v3792_v23, %v3802_v16  ;;  %v4513_v22 = vrot.slane %v14880_v20, 5 }
  0xed   : > { %17486 = vmatprep.subr.msk.bf16.mxu0 %vm879_vm0, %v15052_v19  ;;  %v3819_v63 = vrot.slane %v3817_v49, 4  ;;  %v14883_v19 = vld [vmem:[%s17852_s17 + $0x40] sm:$0xf]  ;;  %v4516_v25 = vrot.slane %v14881_v46, 5  ;;  %v3828_v4 = vshrl.u32 %v14882_v61, 16  ;;  %v3811_v49 = vrot.slane %v3810_v14, 4 }
  0xee   : > { %v3825_v8 = vrot.slane %v3823_v24, 5  ;;  %v19219_v48 = vsel %vm18183_vm7, %v14972_v62, %v4513_v22  ;;  %v4515_v18 = vrot.slane %v4513_v22, 4  ;;  %v3837_v23 = vshll.u32 %v14883_v19, 16  ;;  %v14885_v62 = vld [vmem:[%s17852_s17 + $0x48] sm:$0xf] }
  0xef   : > { %16728 = vmatmul.mubr.msk.bf16.vlgmr.msra.gmra.mxu1 %vm830_vm3, %v25054_v38  ;;  %v3820_v5 = vor.u32 %v3819_v63, %v3815_v28  ;;  %v3830_v20 = vrot.slane %v3828_v4, 4  ;;  %v3841_v24 = vshrl.u32 %v14883_v19, 16  ;;  %v14957_v38 = vld [vmem:[%s17852_s17 + $0x3c] sm:$0xe]  ;;  %v3816_v46 = vsel %vm17904_vm4, %v3811_v49, %v3815_v28  ;;  %v14886_v28 = vld [vmem:[%s17852_s17 + $0x4c] sm:$0xf] }
  0xf0   : > { %16794 = vmatpush3.bf16.msra.mxu1 %v18892_v29  ;;  %16731 = vmatprep.mubr.msk.bf16.mxu1 %vm830_vm3, %v25055_v30  ;;  %v3831_v29 = vshll.u32 %v14882_v61, 16  ;;  %v19229_v61 = vsel %vm18183_vm7, %v4515_v18, %v4516_v25  ;;  %v3839_v16 = vrot.slane %v3837_v23, 5  ;;  %v3847_v63 = vshll.u32 %v14884_v44, 16  ;;  %v14887_v49 = vld [vmem:[%s17852_s17 + $0x50] sm:$0x1] }
  0xf1   : > { %17485 = vmatprep.subr.msk.bf16.mxu1 %vm879_vm0, %v19146_v52  ;;  %v3821_v9 = vrot.slane %v3820_v5, 4  ;;  %v19223_v52 = vpop.f32.mrf.mxu0  ;;  %v3843_v22 = vrot.slane %v3841_v24, 4  ;;  %v14973_v4 = vrot.slane %v14957_v38, 9  ;;  %v25058_v24 = vcombine.low %v18955_v51, %v18973_v54 }
  0xf2   : > { %v3833_v50 = vrot.slane %v3831_v29, 5  ;;  %v3849_v25 = vrot.slane %v3847_v63, 5  ;;  %v4520_v29 = vrot.slane %v14883_v19, 5  ;;  %v17584_v19 = vld [vmem:[%s17852_s17 + $0x54] sm:$0xff]   ;;  %v3861_v63 = vshll.u32 %v14886_v28, 16 }
  0xf3   : > { %16766 = vmatmul.mubr.msk.bf16.gmra.mxu0 %vm830_vm3, %v17582_v3  ;;  %v3826_v30 = vsel %vm17904_vm4, %v3821_v9, %v3825_v8  ;;  %v19245_v8 = vpop.f32.mrf.mxu1  ;;  %v3844_v23 = vor.u32 %v3843_v22, %v3839_v16  ;;  %v4523_v9 = vrot.slane %v14884_v44, 5  ;;  %v19253_v38 = vpop.f32.mrf.mxu0  ;;  %v17585_v44 = vld [vmem:[%s17852_s17 + $0x60] sm:$0xff]   ;;  %v3865_v54 = vshrl.u32 %v14886_v28, 16  ;;  %v14888_v3 = vld [vmem:[%s17852_s17 + $0x54] sm:$0xf] }
  0xf4   : > { %16769 = vmatprep.mubr.msk.bf16.mxu0 %vm830_vm3, %v17583_v10  ;;  %v3834_v14 = vor.u32 %v3833_v50, %v3830_v20  ;;  %v19238_v5 = vcombine.low %v3816_v46, %v3826_v30  ;;  %v25056_v10 = vcombine.low %v18947_v55, %v18960_v37  ;;  %25057 = vst [vmem:[#allocation7_spill] sm:$0xff] %v19245_v8  ;;  %v3852_v20 = vshrl.u32 %v14885_v62, 16  ;;  %v14958_v50 = vld [vmem:[%s17852_s17 + $0x48] sm:$0xe] }
  0xf5   : > { %v19257_v55 = vsel %vm18183_vm7, %v14973_v4, %v4520_v29  ;;  %v4522_v37 = vrot.slane %v4520_v29, 4  ;;  %v3855_v46 = vshll.u32 %v14885_v62, 16  ;;  %v3871_v4 = vshll.u32 %v14887_v49, 16  ;;  %v19267_v29 = vpop.f32.mrf.mxu1 }
  0xf6   : > { %v3835_v18 = vrot.slane %v3834_v14, 4  ;;  %v3845_v14 = vrot.slane %v3844_v23, 4  ;;  %v3854_v51 = vrot.slane %v3852_v20, 4  ;;  %25059 = vst [vmem:[#allocation9_spill] sm:$0xff] %v19267_v29  ;;  %v14974_v23 = vrot.slane %v14958_v50, 9  ;;  %v17586_v29 = vld [vmem:[%s17852_s17 + $0x6c] sm:$0xff]  }
  0xf7   : > { %16732 = vmatmul.mubr.msk.bf16.gmra.mxu1 %vm830_vm3, %v25056_v10  ;;  %v19264_v22 = vsel %vm18183_vm7, %v4522_v37, %v4523_v9  ;;  %v3857_v10 = vrot.slane %v3855_v46, 5  ;;  %v14889_v20 = vld [vmem:[%s17852_s17 + $0x58] sm:$0xf]  ;;  %v19275_v9 = vpop.f32.mrf.mxu0  ;;  %v4527_v7 = vrot.slane %v14886_v28, 5  ;;  %v14959_v50 = vld [vmem:[%s17852_s17 + $0x54] sm:$0xe]  ;;  %v25061_v28 = vcombine.low %v18964_v60, %v18982_v6 }
  0xf8   : > { %16735 = vmatprep.mubr.msk.bf16.mxu1 %vm830_vm3, %v25058_v24  ;;  %v3840_v30 = vsel %vm17904_vm4, %v3835_v18, %v3839_v16  ;;  %v3863_v24 = vrot.slane %v3861_v63, 5  ;;  %v3850_v62 = vsel %vm17904_vm4, %v3845_v14, %v3849_v25  ;;  %v3867_v18 = vrot.slane %v3865_v54, 4 }
  0xf9   : > { %v19277_v37 = vcombine.low %v3840_v30, %v3850_v62  ;;  %v3858_v46 = vor.u32 %v3857_v10, %v3854_v51  ;;  %v3873_v63 = vrot.slane %v3871_v4, 5  ;;  %v4530_v14 = vrot.slane %v14887_v49, 5  ;;  %v14891_v10 = vld [vmem:[%s17852_s17 + $0x60] sm:$0xf]  ;;  %v19292_v49 = vpop.f32.mrf.mxu1 }
  0xfa   : > { %v3868_v25 = vor.u32 %v3867_v18, %v3863_v24  ;;  %v3876_v54 = vshrl.u32 %v14888_v3, 16  ;;  %v3879_v16 = vshll.u32 %v14888_v3, 16  ;;  %v4529_v30 = vrot.slane %v4527_v7, 4  ;;  %25062 = vst [vmem:[#allocation10_spill] sm:$0xff] %v19292_v49  ;;  %v14892_v18 = vld [vmem:[%s17852_s17 + $0x64] sm:$0xf] }
  0xfb   : > { %16770 = vmatmul.mubr.msk.bf16.gmra.mxu0 %vm830_vm3, %v17584_v19  ;;  %25060 = vst [vmem:[#allocation8_spill] sm:$0xff] %v19277_v37  ;;  %v3859_v8 = vrot.slane %v3858_v46, 4  ;;  %v19285_v19 = vsel %vm18183_vm7, %v14974_v23, %v4527_v7  ;;  %v3885_v51 = vshll.u32 %v14889_v20, 16  ;;  %v3889_v62 = vshrl.u32 %v14889_v20, 16  ;;  %v19299_v7 = vpop.f32.mrf.mxu0 }
  0xfc   : > { %16773 = vmatprep.mubr.msk.bf16.mxu0 %vm830_vm3, %v17585_v44  ;;  %v3869_v44 = vrot.slane %v3868_v25, 4  ;;  %v3878_v3 = vrot.slane %v3876_v54, 4  ;;  %v3881_v4 = vrot.slane %v3879_v16, 5  ;;  %v25063_v23 = vcombine.low %v18986_v12, %v18995_v59  ;;  %25064 = vst [vmem:[#allocation12_spill] sm:$0xff] %v19299_v7  ;;  %v17587_v16 = vld [vmem:[%s17852_s17 + $0x78] sm:$0xff]  }
  0xfd   : > { %v3864_v46 = vsel %vm17904_vm4, %v3859_v8, %v3863_v24  ;;  %v19305_v60 = vsel %vm18183_vm7, %v4529_v30, %v4530_v14  ;;  %v3887_v6 = vrot.slane %v3885_v51, 5  ;;  %v3895_v25 = vshll.u32 %v14890_v2, 16  ;;  %v19314_v14 = vpop.f32.mrf.mxu1  ;;  %v14893_v7 = vld [vmem:[%s17852_s17 + $0x68] sm:$0x1]  ;;  %v14895_v12 = vld [vmem:[%s17852_s17 + $0x70] sm:$0xf] }
  0xfe   : > { %v3874_v54 = vsel %vm17904_vm4, %v3869_v44, %v3873_v63  ;;  %v3882_v59 = vor.u32 %v3881_v4, %v3878_v3  ;;  %v14975_v24 = vrot.slane %v14959_v50, 9  ;;  %v4534_v49 = vrot.slane %v14889_v20, 5  ;;  %25065 = vst [vmem:[#allocation11_spill] sm:$0xff] %v19314_v14  ;;  %v19318_v44 = vpop.f32.mrf.mxu0 }
  0xff   : > { %16736 = vmatmul.mubr.msk.bf16.gmra.mxu1 %vm830_vm3, %v25061_v28  ;;  %v3891_v28 = vrot.slane %v3889_v62, 4  ;;  %v3897_v8 = vrot.slane %v3895_v25, 5  ;;  %v4537_v37 = vrot.slane %v14890_v2, 5  ;;  %v3900_v63 = vshrl.u32 %v14891_v10, 16  ;;  %v14960_v62 = vld [vmem:[%s17852_s17 + $0x60] sm:$0xe] }
 0x100   : > { %16739 = vmatprep.mubr.msk.bf16.mxu1 %vm830_vm3, %v25063_v23  ;;  %v19312_v23 = vcombine.low %v3864_v46, %v3874_v54  ;;  %v3883_v30 = vrot.slane %v3882_v59, 4  ;;  %v19322_v3 = vsel %vm18183_vm7, %v14975_v24, %v4534_v49  ;;  %v4536_v50 = vrot.slane %v4534_v49, 4  ;;  %v14894_v54 = vld [vmem:[%s17852_s17 + $0x6c] sm:$0xf]  ;;  %v17588_v59 = vld [vmem:[%s17852_s17 + $0x84] sm:$0xff]  }
 0x101   : > { %v3892_v51 = vor.u32 %v3891_v28, %v3887_v6  ;;  %v3903_v20 = vshll.u32 %v14891_v10, 16  ;;  %v3909_v4 = vshll.u32 %v14892_v18, 16  ;;  %v3902_v25 = vrot.slane %v3900_v63, 4 }
 0x102   : > { %v3888_v2 = vsel %vm17904_vm4, %v3883_v30, %v3887_v6  ;;  %v19332_v28 = vsel %vm18183_vm7, %v4536_v50, %v4537_v37  ;;  %v3919_v10 = vshll.u32 %v14893_v7, 16  ;;  %v19339_v6 = vpop.f32.mrf.mxu1  ;;  %v14976_v63 = vrot.slane %v14960_v62, 9  ;;  %v14896_v50 = vld [vmem:[%s17852_s17 + $0x74] sm:$0x1] }
 0x103   : > { %16774 = vmatmul.mubr.msk.bf16.gmra.mxu0 %vm830_vm3, %v17586_v29  ;;  %v3893_v46 = vrot.slane %v3892_v51, 4  ;;  %v3913_v29 = vshrl.u32 %v14892_v18, 16  ;;  %25066 = vst [vmem:[#allocation13_spill] sm:$0xff] %v19332_v28  ;;  %v3905_v24 = vrot.slane %v3903_v20, 5  ;;  %v3911_v49 = vrot.slane %v3909_v4, 5  ;;  %25068 = vst [vmem:[#allocation14_spill] sm:$0xff] %v19339_v6  ;;  %v19350_v4 = vpop.f32.mrf.mxu0 }
 0x104   : > { %16777 = vmatprep.mubr.msk.bf16.mxu0 %vm830_vm3, %v17587_v16  ;;  %v25067_v16 = vcombine.low %v19004_v27, %v19021_v32  ;;  %v25069_v20 = vcombine.low %v19013_v47, %v19032_v11  ;;  %v4541_v6 = vrot.slane %v14892_v18, 5  ;;  %v4544_v14 = vrot.slane %v14893_v7, 5  ;;  %v19359_v28 = vpop.f32.mrf.mxu1 }
 0x105   : > { %v3898_v30 = vsel %vm17904_vm4, %v3893_v46, %v3897_v8  ;;  %v3915_v37 = vrot.slane %v3913_v29, 4  ;;  %v3906_v32 = vor.u32 %v3905_v24, %v3902_v25  ;;  %v17589_v8 = vld [vmem:[%s17852_s17 + $0x90] sm:$0xff]   ;;  %v3924_v51 = vshrl.u32 %v14894_v54, 16  ;;  %25070 = vst [vmem:[#allocation3_spill] sm:$0xff] %v19359_v28  ;;  %v19363_v7 = vpop.f32.mrf.mxu0  ;;  %v14900_v28 = vld [vmem:[%s17852_s17 + $0x84] sm:$0xf] }
 0x106   : > { %v19352_v27 = vcombine.low %v3888_v2, %v3898_v30  ;;  %v3927_v29 = vshll.u32 %v14894_v54, 16  ;;  %v19357_v47 = vsel %vm18183_vm7, %v14976_v63, %v4541_v6  ;;  %v4543_v11 = vrot.slane %v4541_v6, 4  ;;  %v14897_v63 = vld [vmem:[%s17852_s17 + $0x78] sm:$0xf] }
 0x107   : > { %16740 = vmatmul.mubr.msk.bf16.gmra.mxu1 %vm830_vm3, %v25067_v16  ;;  %v3921_v16 = vrot.slane %v3919_v10, 5  ;;  %v3916_v46 = vor.u32 %v3915_v37, %v3911_v49  ;;  %v3907_v62 = vrot.slane %v3906_v32, 4  ;;  %v3926_v25 = vrot.slane %v3924_v51, 4  ;;  %v14961_v10 = vld [vmem:[%s17852_s17 + $0x6c] sm:$0xe] }
 0x108   : > { %16743 = vmatprep.mubr.msk.bf16.mxu1 %vm830_vm3, %v25069_v20  ;;  %v3933_v20 = vshll.u32 %v14895_v12, 16  ;;  %v3929_v24 = vrot.slane %v3927_v29, 5  ;;  %v3937_v18 = vshrl.u32 %v14895_v12, 16  ;;  %v19369_v6 = vsel %vm18183_vm7, %v4543_v11, %v4544_v14 }
 0x109   : > { %v3917_v2 = vrot.slane %v3916_v46, 4  ;;  %v3912_v54 = vsel %vm17904_vm4, %v3907_v62, %v3911_v49  ;;  %v3943_v37 = vshll.u32 %v14896_v50, 16  ;;  %v14898_v49 = vld [vmem:[%s17852_s17 + $0x7c] sm:$0xf]  ;;  %v14977_v62 = vrot.slane %v14961_v10, 9  ;;  %v19393_v10 = vpop.f32.mrf.mxu0 }
 0x10a   : > { %v3935_v30 = vrot.slane %v3933_v20, 5  ;;  %v3930_v32 = vor.u32 %v3929_v24, %v3926_v25  ;;  %v3939_v46 = vrot.slane %v3937_v18, 4  ;;  %v4548_v11 = vrot.slane %v14895_v12, 5  ;;  %v14899_v20 = vld [vmem:[%s17852_s17 + $0x80] sm:$0x1] }
 0x10b   : > { %16778 = vmatmul.mubr.msk.bf16.gmra.mxu0 %vm830_vm3, %v17588_v59  ;;  %v3922_v51 = vsel %vm17904_vm4, %v3917_v2, %v3921_v16  ;;  %v3945_v14 = vrot.slane %v3943_v37, 5  ;;  %v19385_v16 = vpop.f32.mrf.mxu1  ;;  %v4551_v25 = vrot.slane %v14896_v50, 5  ;;  %v3948_v24 = vshrl.u32 %v14897_v63, 16  ;;  %v14962_v18 = vld [vmem:[%s17852_s17 + $0x78] sm:$0xe]  ;;  %v17590_v12 = vld [vmem:[%s17852_s17 + $0x9c] sm:$0xff]  }
 0x10c   : > { %16781 = vmatprep.mubr.msk.bf16.mxu0 %vm830_vm3, %v17589_v8  ;;  %v19378_v29 = vcombine.low %v3912_v54, %v3922_v51  ;;  %v25072_v8 = vcombine.low %v19025_v26, %v19041_v58  ;;  %25073 = vst [vmem:[#allocation16_spill] sm:$0xff] %v19385_v16  ;;  %v3931_v2 = vrot.slane %v3930_v32, 4  ;;  %v3940_v59 = vor.u32 %v3939_v46, %v3935_v30  ;;  %v17591_v50 = vld [vmem:[%s17852_s17 + $0xa8] sm:$0xff]  }
 0x10d   : > { %v25074_v54 = vcombine.low %v19045_v15, %v19055_v42  ;;  %v19397_v26 = vsel %vm18183_vm7, %v14977_v62, %v4548_v11  ;;  %v4550_v58 = vrot.slane %v4548_v11, 4  ;;  %v3951_v37 = vshll.u32 %v14897_v63, 16  ;;  %v19407_v11 = vpop.f32.mrf.mxu1 }
 0x10e   : > { %25071 = vst [vmem:[#allocation4_spill] sm:$0xff] %v19378_v29  ;;  %25075 = vst [vmem:[#allocation17_spill] sm:$0xff] %v19397_v26  ;;  %v3957_v51 = vshll.u32 %v14898_v49, 16  ;;  %v3936_v32 = vsel %vm17904_vm4, %v3931_v2, %v3935_v30  ;;  %v3941_v46 = vrot.slane %v3940_v59, 4  ;;  %v3950_v15 = vrot.slane %v3948_v24, 4 }
 0x10f   : > { %16744 = vmatmul.mubr.msk.bf16.gmra.mxu1 %vm830_vm3, %v25072_v8  ;;  %v3961_v42 = vshrl.u32 %v14898_v49, 16  ;;  %v19404_v8 = vsel %vm18183_vm7, %v4550_v58, %v4551_v25  ;;  %v3967_v62 = vshll.u32 %v14899_v20, 16  ;;  %25077 = vst [vmem:[#allocation19_spill] sm:$0xff] %v19407_v11  ;;  %v14978_v2 = vrot.slane %v14962_v18, 9  ;;  %v14901_v24 = vld [vmem:[%s17852_s17 + $0x88] sm:$0xf]  ;;  %v19415_v25 = vpop.f32.mrf.mxu0 }
 0x110   : > { %16747 = vmatprep.mubr.msk.bf16.mxu1 %vm830_vm3, %v25074_v54  ;;  %25076 = vst [vmem:[#allocation18_spill] sm:$0xff] %v19404_v8  ;;  %v3953_v54 = vrot.slane %v3951_v37, 5  ;;  %v3959_v16 = vrot.slane %v3957_v51, 5  ;;  %v3946_v63 = vsel %vm17904_vm4, %v3941_v46, %v3945_v14  ;;  %v4555_v11 = vrot.slane %v14898_v49, 5  ;;  %v14902_v29 = vld [vmem:[%s17852_s17 + $0x8c] sm:$0x1] }
 0x111   : > { %v3963_v59 = vrot.slane %v3961_v42, 4  ;;  %v19417_v58 = vcombine.low %v3936_v32, %v3946_v63  ;;  %v3969_v51 = vrot.slane %v3967_v62, 5  ;;  %v4558_v46 = vrot.slane %v14899_v20, 5  ;;  %v14963_v18 = vld [vmem:[%s17852_s17 + $0x84] sm:$0xe]  ;;  %v17592_v8 = vld [vmem:[%s17852_s17 + $0xb4] sm:$0xff]  }
 0x112   : > { %v3954_v37 = vor.u32 %v3953_v54, %v3950_v15  ;;  %v3972_v42 = vshrl.u32 %v14900_v28, 16  ;;  %v3975_v30 = vshll.u32 %v14900_v28, 16  ;;  %v4557_v32 = vrot.slane %v4555_v11, 4  ;;  %v14903_v54 = vld [vmem:[%s17852_s17 + $0x90] sm:$0xf] }
 0x113   : > { %16782 = vmatmul.mubr.msk.bf16.gmra.mxu0 %vm830_vm3, %v17590_v12  ;;  %25078 = vst [vmem:[#allocation20_spill] sm:$0xff] %v19417_v58  ;;  %v3964_v14 = vor.u32 %v3963_v59, %v3959_v16  ;;  %v19425_v12 = vsel %vm18183_vm7, %v14978_v2, %v4555_v11  ;;  %v3981_v15 = vshll.u32 %v14901_v24, 16  ;;  %v25079_v49 = vcombine.low %v19064_v0, %v19079_v53  ;;  %v19432_v20 = vpop.f32.mrf.mxu1  ;;  %v14904_v59 = vld [vmem:[%s17852_s17 + $0x94] sm:$0xf]  ;;  %v19439_v11 = vpop.f32.mrf.mxu0 }
 0x114   : > { %16785 = vmatprep.mubr.msk.bf16.mxu0 %vm830_vm3, %v17591_v50  ;;  %v3955_v26 = vrot.slane %v3954_v37, 4  ;;  %25080 = vst [vmem:[#allocation21_spill] sm:$0xff] %v19432_v20  ;;  %v3974_v28 = vrot.slane %v3972_v42, 4  ;;  %v3977_v62 = vrot.slane %v3975_v30, 5  ;;  %v3985_v63 = vshrl.u32 %v14901_v24, 16  ;;  %25082 = vst [vmem:[#allocation22_spill] sm:$0xff] %v19439_v11 }
 0x115   : > { %v3965_v50 = vrot.slane %v3964_v14, 4  ;;  %v25081_v2 = vcombine.low %v19071_v13, %v19093_v40  ;;  %v19445_v0 = vsel %vm18183_vm7, %v4557_v32, %v4558_v46  ;;  %v3983_v53 = vrot.slane %v3981_v15, 5  ;;  %v17593_v30 = vld [vmem:[%s17852_s17 + $0xc0] sm:$0xff]   ;;  %v19454_v46 = vpop.f32.mrf.mxu1  ;;  %v14905_v11 = vld [vmem:[%s17852_s17 + $0x98] sm:$0x1] }
 0x116   : > { %v3960_v37 = vsel %vm17904_vm4, %v3955_v26, %v3959_v16  ;;  %v3991_v14 = vshll.u32 %v14902_v29, 16  ;;  %v3978_v40 = vor.u32 %v3977_v62, %v3974_v28  ;;  %v14979_v26 = vrot.slane %v14963_v18, 9  ;;  %25083 = vst [vmem:[#allocation23_spill] sm:$0xff] %v19454_v46  ;;  %v14907_v13 = vld [vmem:[%s17852_s17 + $0xa0] sm:$0xf] }
 0x117   : > { %16748 = vmatmul.mubr.msk.bf16.gmra.mxu1 %vm830_vm3, %v25079_v49  ;;  %v3970_v42 = vsel %vm17904_vm4, %v3965_v50, %v3969_v51  ;;  %v3987_v49 = vrot.slane %v3985_v63, 4  ;;  %v4562_v20 = vrot.slane %v14901_v24, 5  ;;  %v4565_v58 = vrot.slane %v14902_v29, 5  ;;  %v19458_v50 = vpop.f32.mrf.mxu0  ;;  %v14964_v63 = vld [vmem:[%s17852_s17 + $0x90] sm:$0xe] }
 0x118   : > { %16751 = vmatprep.mubr.msk.bf16.mxu1 %vm830_vm3, %v25081_v2  ;;  %v19452_v2 = vcombine.low %v3960_v37, %v3970_v42  ;;  %v3993_v16 = vrot.slane %v3991_v14, 5  ;;  %v3979_v32 = vrot.slane %v3978_v40, 4  ;;  %v3996_v51 = vshrl.u32 %v14903_v54, 16  ;;  %v14906_v42 = vld [vmem:[%s17852_s17 + $0x9c] sm:$0xf]  ;;  %v17594_v40 = vld [vmem:[%s17852_s17 + $0xcc] sm:$0xff]  }
 0x119   : > { %v3988_v15 = vor.u32 %v3987_v49, %v3983_v53  ;;  %v19462_v28 = vsel %vm18183_vm7, %v14979_v26, %v4562_v20  ;;  %v4564_v18 = vrot.slane %v4562_v20, 4  ;;  %v3999_v24 = vshll.u32 %v14903_v54, 16 }
 0x11a   : > { %25084 = vst [vmem:[#allocation24_spill] sm:$0xff] %v19462_v28  ;;  %v4005_v62 = vshll.u32 %v14904_v59, 16  ;;  %v3984_v29 = vsel %vm17904_vm4, %v3979_v32, %v3983_v53  ;;  %v3998_v14 = vrot.slane %v3996_v51, 4  ;;  %v4015_v54 = vshll.u32 %v14905_v11, 16  ;;  %v19479_v53 = vpop.f32.mrf.mxu1 }
 0x11b   : > { %16786 = vmatmul.mubr.msk.bf16.gmra.mxu0 %vm830_vm3, %v17592_v8  ;;  %v3989_v37 = vrot.slane %v3988_v15, 4  ;;  %v4009_v8 = vshrl.u32 %v14904_v59, 16  ;;  %v19472_v49 = vsel %vm18183_vm7, %v4564_v18, %v4565_v58  ;;  %v4001_v26 = vrot.slane %v3999_v24, 5  ;;  %25087 = vst [vmem:[#allocation26_spill] sm:$0xff] %v19479_v53  ;;  %v19486_v18 = vld [vmem:[%s17852_s17 + $0xa4] sm:$0x1]  ;;  %v19488_v24 = vpop.f32.mrf.mxu0 }
 0x11c   : > { %16789 = vmatprep.mubr.msk.bf16.mxu0 %vm830_vm3, %v17593_v30  ;;  %25085 = vst [vmem:[#allocation25_spill] sm:$0xff] %v19472_v49  ;;  %v4007_v20 = vrot.slane %v4005_v62, 5  ;;  %v25086_v30 = vcombine.low %v19083_v35, %v19100_v21  ;;  %v14980_v51 = vrot.slane %v14964_v63, 9  ;;  %v25088_v35 = vcombine.low %v19104_v56, %v19115_v33  ;;  %v14965_v63 = vld [vmem:[%s17852_s17 + $0x9c] sm:$0xe] }
 0x11d   : > { %v3994_v32 = vsel %vm17904_vm4, %v3989_v37, %v3993_v16  ;;  %v4011_v58 = vrot.slane %v4009_v8, 4  ;;  %v4002_v62 = vor.u32 %v4001_v26, %v3998_v14  ;;  %v4569_v16 = vrot.slane %v14904_v59, 5  ;;  %v14909_v33 = vld [vmem:[%s17852_s17 + $0xa8] sm:$0xf] }
 0x11e   : > { %v19494_v21 = vcombine.low %v3984_v29, %v3994_v32  ;;  %v4572_v53 = vrot.slane %v14905_v11, 5  ;;  %v4020_v15 = vshrl.u32 %v14906_v42, 16  ;;  %v4023_v8 = vshll.u32 %v14906_v42, 16 }
 0x11f   : > { %16752 = vmatmul.mubr.msk.bf16.gmra.mxu1 %vm830_vm3, %v25086_v30  ;;  %v4017_v30 = vrot.slane %v4015_v54, 5  ;;  %v4012_v37 = vor.u32 %v4011_v58, %v4007_v20  ;;  %v4003_v46 = vrot.slane %v4002_v62, 4  ;;  %v19499_v49 = vsel %vm18183_vm7, %v14980_v51, %v4569_v16  ;;  %v19515_v51 = vld [vmem:[%s17852_s17 + $0xac] sm:$0xf] }
 0x120   : > { %16755 = vmatprep.mubr.msk.bf16.mxu1 %vm830_vm3, %v25088_v35  ;;  %v4571_v28 = vrot.slane %v4569_v16, 4  ;;  %v4029_v56 = vshll.u32 %v14907_v13, 16  ;;  %v19502_v35 = vpop.f32.mrf.mxu1  ;;  %v4022_v14 = vrot.slane %v4020_v15, 4  ;;  %v4025_v59 = vrot.slane %v4023_v8, 5  ;;  %v19504_v11 = vpop.f32.mrf.mxu0 }
 0x121   : > { %25089 = vst [vmem:[#allocation27_spill] sm:$0xff] %v19502_v35  ;;  %v4013_v29 = vrot.slane %v4012_v37, 4  ;;  %v4033_v26 = vshrl.u32 %v14907_v13, 16  ;;  %v4008_v42 = vsel %vm17904_vm4, %v4003_v46, %v4007_v20  ;;  %v4039_v58 = vshll.u32 %v19486_v18, 16 }
 0x122   : > { %v19511_v54 = vsel %vm18183_vm7, %v4571_v28, %v4572_v53  ;;  %v4031_v32 = vrot.slane %v4029_v56, 5  ;;  %v25090_v15 = vcombine.low %v19140_v34, %v19153_v45  ;;  %v4026_v20 = vor.u32 %v4025_v59, %v4022_v14  ;;  %v19526_v53 = vld [vmem:[%s17852_s17 + $0xb0] sm:$0x1]  ;;  %v19528_v62 = vpop.f32.mrf.mxu0  ;;  %v14966_v45 = vld [vmem:[%s17852_s17 + $0xa8] sm:$0xe] }
 0x123   : > { %16790 = vmatmul.mubr.msk.bf16.gmra.mxu0 %vm830_vm3, %v17594_v40  ;;  %v4018_v40 = vsel %vm17904_vm4, %v4013_v29, %v4017_v30  ;;  %v4035_v28 = vrot.slane %v4033_v26, 4  ;;  %v4041_v37 = vrot.slane %v4039_v58, 5  ;;  %v14981_v8 = vrot.slane %v14965_v63, 9  ;;  %v25093_v30 = vld [vmem:[#allocation6_spill] sm:$0xff]  ;;  %v25094_v29 = vld [vmem:[#allocation5_spill] sm:$0xff] }
 0x124   : > { %16829 = vmatprep.mubr.msk.bf16.mxu0 %vm830_vm3, %v25090_v15  ;;  %v19530_v16 = vcombine.low %v4008_v42, %v4018_v40  ;;  %v4576_v34 = vrot.slane %v14907_v13, 5  ;;  %v19534_v56 = vpop.f32.mrf.mxu1  ;;  %v25095_v15 = vcombine.low %v25093_v30, %v25094_v29  ;;  %v4027_v14 = vrot.slane %v4026_v20, 4  ;;  %v19541_v58 = vpop.f32.mrf.mxu0  ;;  %v14912_v20 = vld [vmem:[%s17852_s17 + $0xb4] sm:$0xf] }
 0x125   : > { %25092 = vst [vmem:[#allocation29_spill] sm:$0xff] %v19534_v56  ;;  %v4036_v59 = vor.u32 %v4035_v28, %v4031_v32  ;;  %v4579_v26 = vrot.slane %v19486_v18, 5  ;;  %v4044_v42 = vshrl.u32 %v14909_v33, 16  ;;  %v4047_v40 = vshll.u32 %v14909_v33, 16  ;;  %v19557_v56 = vld [vmem:[%s17852_s17 + $0xb8] sm:$0xf] }
 0x126   : > { %25091 = vst [vmem:[#allocation28_spill] sm:$0xff] %v19530_v16  ;;  %v19547_v13 = vsel %vm18183_vm7, %v14981_v8, %v4576_v34  ;;  %v4578_v63 = vrot.slane %v4576_v34, 4  ;;  %v4053_v30 = vshll.u32 %v19515_v51, 16  ;;  %v19551_v29 = vpop.f32.mrf.mxu1  ;;  %v4032_v18 = vsel %vm17904_vm4, %v4027_v14, %v4031_v32  ;;  %v19575_v14 = vld [vmem:[%s24893_s3 + $0x18] sm:$0x3] }
 0x127   : > { %16756 = vmatmul.mubr.msk.bf16.gmra.mxu1 %vm830_vm3, %v25095_v15  ;;  %25096 = vst [vmem:[#allocation6_spill] sm:$0xff] %v19551_v29  ;;  %v4037_v28 = vrot.slane %v4036_v59, 4  ;;  %v4046_v15 = vrot.slane %v4044_v42, 4  ;;  %v4057_v46 = vshrl.u32 %v19515_v51, 16  ;;  %v4049_v8 = vrot.slane %v4047_v40, 5 }
 0x128   : > { %16795 = vmatprep.mubr.msk.bf16.mxu1 %vm830_vm3, %v19170_v1  ;;  %v19565_v1 = vpop.f32.mrf.mxu0  ;;  %v19569_v33 = vsel %vm18183_vm7, %v4578_v63, %v4579_v26  ;;  %v4055_v34 = vrot.slane %v4053_v30, 5  ;;  %v4063_v32 = vshll.u32 %v19526_v53, 16  ;;  %v19577_v59 = vpop.f32.mrf.mxu1  ;;  %v14982_v63 = vrot.slane %v14966_v45, 9  ;;  %v19647_v29 = vld [vmem:[%s17852_s17 + $0xc4] sm:$0xf] }
 0x129   : > { %25098 = vst [vmem:[#allocation5_spill] sm:$0xff] %v19577_v59  ;;  %v4042_v42 = vsel %vm17904_vm4, %v4037_v28, %v4041_v37  ;;  %v4059_v26 = vrot.slane %v4057_v46, 4  ;;  %v25099_v30 = vcombine.low %v19183_v17, %v19193_v57  ;;  %v4050_v59 = vor.u32 %v4049_v8, %v4046_v15  ;;  %v19593_v28 = vld [vmem:[%s24893_s3 + $0x16] sm:$0x3] }
 0x12a   : > { %v16627_v40 = vpop.f32.mrf.mxu0  ;;  %v19587_v35 = vcombine.low %v4032_v18, %v4042_v42  ;;  %v4065_v16 = vrot.slane %v4063_v32, 5  ;;  %v4583_v37 = vrot.slane %v19515_v51, 5  ;;  %v19595_v46 = vpop.f32.mrf.mxu1  ;;  %v25100_v17 = vcombine.low %v19219_v48, %v19229_v61  ;;  %v19604_v18 = vld [vmem:[%s17852_s17 + $0xbc] sm:$0x1] }
 0x12b   : > { %16830 = vmatmul.mubr.msk.bf16.vlgmr.msra.gmra.mxu0 %vm830_vm3, %v25099_v30  ;;  %v4060_v57 = vor.u32 %v4059_v26, %v4055_v34  ;;  %v4586_v45 = vrot.slane %v19526_v53, 5  ;;  %v4068_v51 = vshrl.u32 %v14912_v20, 16  ;;  %v4071_v15 = vshll.u32 %v14912_v20, 16 }
 0x12c   : > { %16896 = vmatpush3.bf16.msra.mxu0 %v19177_v41  ;;  %16833 = vmatprep.mubr.msk.bf16.mxu0 %vm830_vm3, %v25100_v17  ;;  %v1634_v8 = vpop.f32.mrf.mxu0  ;;  %v4051_v32 = vrot.slane %v4050_v59, 4  ;;  %v19614_v41 = vsel %vm18183_vm7, %v14982_v63, %v4583_v37  ;;  %v4585_v48 = vrot.slane %v4583_v37, 4  ;;  %v4077_v61 = vshll.u32 %v19557_v56, 16  ;;  %v16593_v53 = vpop.f32.mrf.mxu1 }
 0x12d   : > { %17488 = vmatprep.subr.msk.bf16.mxu0 %vm879_vm0, %v19575_v14  ;;  %v4061_v20 = vrot.slane %v4060_v57, 4  ;;  %v4070_v42 = vrot.slane %v4068_v51, 4  ;;  %v4073_v26 = vrot.slane %v4071_v15, 5  ;;  %v4081_v59 = vshrl.u32 %v19557_v56, 16  ;;  %v14967_v57 = vld [vmem:[%s17852_s17 + $0xb4] sm:$0xe] }
 0x12e   : > { %v1218_v30 = vadd.f32 %v16593_v53, %v19223_v52  ;;  %v16628_v63 = vpop.f32.mrf.mxu0  ;;  %v4056_v37 = vsel %vm17904_vm4, %v4051_v32, %v4055_v34  ;;  %v4079_v17 = vrot.slane %v4077_v61, 5  ;;  %v1209_v51 = vpop.f32.mrf.mxu1  ;;  %v4087_v61 = vshll.u32 %v19604_v18, 16  ;;  %v14915_v53 = vld [vmem:[%s17852_s17 + $0xc0] sm:$0xf] }
 0x12f   : > { %16796 = vmatmul.mubr.msk.bf16.vlgmr.msra.gmra.mxu1 %vm830_vm3, %v19211_v39  ;;  %v19630_v39 = vsel %vm18183_vm7, %v4585_v48, %v4586_v45  ;;  %v4083_v15 = vrot.slane %v4081_v59, 4  ;;  %v1210_v45 = vadd.f32 %v1209_v51, %v19253_v38  ;;  %v4590_v59 = vrot.slane %v19557_v56, 5 }
 0x130   : > { %16862 = vmatpush3.bf16.msra.mxu1 %v19174_v31  ;;  %16799 = vmatprep.mubr.msk.bf16.mxu1 %vm830_vm3, %v19238_v5  ;;  %v4066_v31 = vsel %vm17904_vm4, %v4061_v20, %v4065_v16  ;;  %v4074_v5 = vor.u32 %v4073_v26, %v4070_v42  ;;  %v19639_v34 = vadd.f32 %v16627_v40, %v1218_v30  ;;  %v1637_v32 = vpop.f32.mrf.mxu0  ;;  %v16594_v16 = vpop.f32.mrf.mxu1  ;;  %v14983_v26 = vrot.slane %v14967_v57, 9 }
 0x131   : > { %17487 = vmatprep.subr.msk.bf16.mxu1 %vm879_vm0, %v19593_v28  ;;  %v19642_v48 = vcombine.low %v4056_v37, %v4066_v31  ;;  %v4084_v42 = vor.u32 %v4083_v15, %v4079_v17  ;;  %v19651_v40 = vadd.f32 %v1634_v8, %v1210_v45  ;;  %v1221_v38 = vadd.f32 %v16594_v16, %v19275_v9 }
 0x132   : > { %v4075_v20 = vrot.slane %v4074_v5, 4  ;;  %v16631_v30 = vpop.f32.mrf.mxu0  ;;  %v25101_v37 = vcombine.low %v19257_v55, %v19264_v22  ;;  %v4089_v51 = vrot.slane %v4087_v61, 5  ;;  %v4593_v31 = vrot.slane %v19604_v18, 5  ;;  %v1212_v5 = vpop.f32.mrf.mxu1  ;;  %v19670_v22 = vld [vmem:[%s17852_s17 + $0xc8] sm:$0x1]  ;;  %v25103_v18 = vld [vmem:[#allocation12_spill] sm:$0xff] }
 0x133   : > { %v25102_v57 = vcombine.low %v19285_v19, %v19305_v60  ;;  %v4085_v9 = vrot.slane %v4084_v42, 4  ;;  %v19667_v8 = vsel %vm18183_vm7, %v14983_v26, %v4590_v59  ;;  %v4592_v55 = vrot.slane %v4590_v59, 4  ;;  %v14968_v60 = vld [vmem:[%s17852_s17 + $0xc0] sm:$0xe] }
 0x134   : > { %16834 = vmatmul.mubr.msk.bf16.gmra.mxu0 %vm830_vm3, %v25101_v37  ;;  %v4080_v56 = vsel %vm17904_vm4, %v4075_v20, %v4079_v17  ;;  %v19672_v15 = vadd.f32 %v16628_v63, %v1221_v38  ;;  %v1213_v45 = vadd.f32 %v1212_v5, %v25103_v18  ;;  %v1650_v61 = vpop.f32.mrf.mxu0  ;;  %v4092_v16 = vshrl.u32 %v14915_v53, 16  ;;  %v16597_v37 = vpop.f32.mrf.mxu1  ;;  %v14918_v18 = vld [vmem:[%s17852_s17 + $0xcc] sm:$0xf] }
 0x135   : > { %16837 = vmatprep.mubr.msk.bf16.mxu0 %vm830_vm3, %v25102_v57  ;;  %v4095_v19 = vshll.u32 %v14915_v53, 16  ;;  %v25104_v57 = vld [vmem:[#allocation8_spill] sm:$0xff]  ;;  %v4090_v17 = vsel %vm17904_vm4, %v4085_v9, %v4089_v51  ;;  %v19682_v20 = vsel %vm18183_vm7, %v4592_v55, %v4593_v31  ;;  %v4101_v63 = vshll.u32 %v19647_v29, 16 }
 0x136   : > { %v4105_v42 = vshrl.u32 %v19647_v29, 16  ;;  %v19686_v26 = vadd.f32 %v1637_v32, %v1213_v45  ;;  %v1234_v53 = vadd.f32 %v16597_v37, %v19318_v44  ;;  %v16632_v59 = vpop.f32.mrf.mxu0  ;;  %v19691_v38 = vcombine.low %v4080_v56, %v4090_v17  ;;  %v1225_v31 = vpop.f32.mrf.mxu1 }
 0x137   : > { %16800 = vmatmul.mubr.msk.bf16.gmra.mxu1 %vm830_vm3, %v25104_v57  ;;  %v4094_v5 = vrot.slane %v4092_v16, 4  ;;  %v4097_v9 = vrot.slane %v4095_v19, 5  ;;  %v4103_v55 = vrot.slane %v4101_v63, 5  ;;  %v1226_v44 = vadd.f32 %v1225_v31, %v19350_v4  ;;  %v14919_v57 = vld [vmem:[%s17852_s17 + $0xd0] sm:$0xf] }
 0x138   : > { %16803 = vmatprep.mubr.msk.bf16.mxu1 %vm830_vm3, %v19312_v23  ;;  %v4107_v32 = vrot.slane %v4105_v42, 4  ;;  %v19696_v45 = vadd.f32 %v16631_v30, %v1234_v53  ;;  %v1653_v37 = vpop.f32.mrf.mxu0  ;;  %v4111_v23 = vshll.u32 %v19670_v22, 16  ;;  %v14984_v56 = vrot.slane %v14968_v60, 9  ;;  %v16598_v17 = vpop.f32.mrf.mxu1  ;;  %v25106_v42 = vld [vmem:[#allocation13_spill] sm:$0xff]  ;;  %v19716_v31 = vld [vmem:[%s17852_s17 + $0xd4] sm:$0x1] }
 0x139   : > { %v4098_v51 = vor.u32 %v4097_v9, %v4094_v5  ;;  %v4597_v16 = vrot.slane %v19647_v29, 5  ;;  %v4600_v19 = vrot.slane %v19670_v22, 5  ;;  %v19708_v30 = vadd.f32 %v1650_v61, %v1226_v44 }
 0x13a   : > { %v4108_v52 = vor.u32 %v4107_v32, %v4103_v55  ;;  %v1237_v4 = vadd.f32 %v16598_v17, %v19363_v7  ;;  %v16635_v63 = vpop.f32.mrf.mxu0  ;;  %v25107_v53 = vcombine.low %v19322_v3, %v25106_v42  ;;  %v4113_v60 = vrot.slane %v4111_v23, 5  ;;  %v1228_v22 = vpop.f32.mrf.mxu1 }
 0x13b   : > { %25105 = vst [vmem:[#allocation12_spill] sm:$0xff] %v19708_v30  ;;  %v4116_v29 = vshrl.u32 %v14918_v18, 16  ;;  %v25108_v5 = vcombine.low %v19357_v47, %v19369_v6  ;;  %v4099_v61 = vrot.slane %v4098_v51, 4  ;;  %v19724_v9 = vsel %vm18183_vm7, %v14984_v56, %v4597_v16  ;;  %v25109_v56 = vld [vmem:[#allocation4_spill] sm:$0xff] }
 0x13c   : > { %16838 = vmatmul.mubr.msk.bf16.gmra.mxu0 %vm830_vm3, %v25107_v53  ;;  %v4109_v7 = vrot.slane %v4108_v52, 4  ;;  %v4599_v3 = vrot.slane %v4597_v16, 4  ;;  %v19726_v32 = vadd.f32 %v16632_v59, %v1237_v4  ;;  %v1229_v44 = vadd.f32 %v1228_v22, %v19393_v10  ;;  %v1666_v23 = vpop.f32.mrf.mxu0  ;;  %v14969_v53 = vld [vmem:[%s17852_s17 + $0xcc] sm:$0xe]  ;;  %v16601_v30 = vpop.f32.mrf.mxu1 }
 0x13d   : > { %16841 = vmatprep.mubr.msk.bf16.mxu0 %vm830_vm3, %v25108_v5  ;;  %v4118_v17 = vrot.slane %v4116_v29, 4  ;;  %v4119_v42 = vshll.u32 %v14918_v18, 16  ;;  %v4104_v47 = vsel %vm17904_vm4, %v4099_v61, %v4103_v55  ;;  %v4125_v10 = vshll.u32 %v14919_v57, 16  ;;  %v25112_v55 = vld [vmem:[#allocation17_spill] sm:$0xff] }
 0x13e   : > { %v4114_v6 = vsel %vm17904_vm4, %v4109_v7, %v4113_v60  ;;  %v19739_v52 = vsel %vm18183_vm7, %v4599_v3, %v4600_v19  ;;  %v19741_v59 = vadd.f32 %v1653_v37, %v1229_v44  ;;  %v1250_v51 = vadd.f32 %v16601_v30, %v19415_v25  ;;  %v16636_v18 = vpop.f32.mrf.mxu0  ;;  %v1241_v16 = vpop.f32.mrf.mxu1  ;;  %v5261_v37 = vld [vmem:[%s18815_s16] sm:$0xf]  ;;  %v5262_v3 = vld [vmem:[%s18815_s16 + $0x4] sm:$0xf] }
 0x13f   : > { %16804 = vmatmul.mubr.msk.bf16.gmra.mxu1 %vm830_vm3, %v19352_v27  ;;  %v19746_v27 = vcombine.low %v4104_v47, %v4114_v6  ;;  %v4121_v4 = vrot.slane %v4119_v42, 5  ;;  %v4127_v60 = vrot.slane %v4125_v10, 5  ;;  %v4129_v19 = vshrl.u32 %v14919_v57, 16  ;;  %v25110_v25 = vld [vmem:[#allocation22_spill] sm:$0xff] }
 0x140   : > { %16807 = vmatprep.mubr.msk.bf16.mxu1 %vm830_vm3, %v25109_v56  ;;  %v4135_v29 = vshll.u32 %v19716_v31, 16  ;;  %v19752_v22 = vadd.f32 %v16635_v63, %v1250_v51  ;;  %v1242_v30 = vadd.f32 %v1241_v16, %v25110_v25  ;;  %v1669_v5 = vpop.f32.mrf.mxu0  ;;  %v14985_v61 = vrot.slane %v14969_v53, 9  ;;  %v16602_v44 = vpop.f32.mrf.mxu1  ;;  %v25113_v16 = vld [vmem:[#allocation18_spill] sm:$0xff] }
 0x141   : > { %v4604_v7 = vrot.slane %v14919_v57, 5  ;;  %v4122_v47 = vor.u32 %v4121_v4, %v4118_v17  ;;  %v4131_v6 = vrot.slane %v4129_v19, 4  ;;  %v4607_v10 = vrot.slane %v19716_v31, 5  ;;  %v5263_v17 = vld [vmem:[%s18815_s16 + $0x8] sm:$0x1] }
 0x142   : > { %v4137_v42 = vrot.slane %v4135_v29, 5  ;;  %v19757_v56 = vadd.f32 %v1666_v23, %v1242_v30  ;;  %v1253_v63 = vadd.f32 %v16602_v44, %v19458_v50  ;;  %v16639_v51 = vpop.f32.mrf.mxu0  ;;  %v25114_v25 = vcombine.low %v25112_v55, %v25113_v16  ;;  %v5264_v4 = vld [vmem:[%s18815_s16 + $0xc] sm:$0xf]  ;;  %v1244_v50 = vpop.f32.mrf.mxu1 }
 0x143   : > { %v19766_v57 = vsel %vm18183_vm7, %v14985_v61, %v4604_v7  ;;  %v4606_v53 = vrot.slane %v4604_v7, 4  ;;  %v25115_v31 = vcombine.low %v19425_v12, %v19445_v0  ;;  %v4123_v23 = vrot.slane %v4122_v47, 4 }
 0x144   : > { %25111 = vst [vmem:[#allocation8_spill] sm:$0xff] %v19757_v56  ;;  %16842 = vmatmul.mubr.msk.bf16.gmra.mxu0 %vm830_vm3, %v25114_v25  ;;  %v4132_v55 = vor.u32 %v4131_v6, %v4127_v60  ;;  %v5310_v19 = vshrl.u32 %v5261_v37, 16  ;;  %v5313_v29 = vshll.u32 %v5261_v37, 16  ;;  %v19781_v30 = vadd.f32 %v16636_v18, %v1253_v63  ;;  %v1682_v7 = vpop.f32.mrf.mxu0  ;;  %v16605_v25 = vpop.f32.mrf.mxu1  ;;  %v25116_v56 = vld [vmem:[#allocation20_spill] sm:$0xff] }
 0x145   : > { %16845 = vmatprep.mubr.msk.bf16.mxu0 %vm830_vm3, %v25115_v31  ;;  %v1245_v61 = vadd.f32 %v1244_v50, %v19488_v24  ;;  %v19786_v44 = vsel %vm18183_vm7, %v4606_v53, %v4607_v10  ;;  %v5319_v16 = vshll.u32 %v5262_v3, 16  ;;  %v4128_v12 = vsel %vm17904_vm4, %v4123_v23, %v4127_v60  ;;  %v5265_v31 = vld [vmem:[%s18815_s16 + $0x10] sm:$0xf] }
 0x146   : > { %v4133_v0 = vrot.slane %v4132_v55, 4  ;;  %v5312_v37 = vrot.slane %v5310_v19, 4  ;;  %v1266_v47 = vadd.f32 %v16605_v25, %v19504_v11  ;;  %v16640_v6 = vpop.f32.mrf.mxu0  ;;  %v5315_v10 = vrot.slane %v5313_v29, 5 }
 0x147   : > { %16808 = vmatmul.mubr.msk.bf16.gmra.mxu1 %vm830_vm3, %v25116_v56  ;;  %v19794_v24 = vadd.f32 %v1669_v5, %v1245_v61  ;;  %v5321_v63 = vrot.slane %v5319_v16, 5  ;;  %v1257_v56 = vpop.f32.mrf.mxu1  ;;  %v5323_v53 = vshrl.u32 %v5262_v3, 16  ;;  %v5329_v50 = vshll.u32 %v5263_v17, 16 }
 0x148   : > { %16811 = vmatprep.mubr.msk.bf16.mxu1 %vm830_vm3, %v19452_v2  ;;  %v4138_v60 = vsel %vm17904_vm4, %v4133_v0, %v4137_v42  ;;  %v5334_v23 = vshrl.u32 %v5264_v4, 16  ;;  %v19802_v55 = vadd.f32 %v16639_v51, %v1266_v47  ;;  %v1258_v5 = vadd.f32 %v1257_v56, %v19528_v62  ;;  %v1685_v11 = vpop.f32.mrf.mxu0  ;;  %v5266_v2 = vld [vmem:[%s18815_s16 + $0x14] sm:$0x1]  ;;  %v25118_v0 = vld [vmem:[#allocation25_spill] sm:$0xff] }
 0x149   : > { %v19805_v19 = vcombine.low %v4128_v12, %v4138_v60  ;;  %v5316_v61 = vor.u32 %v5315_v10, %v5312_v37  ;;  %v16606_v29 = vpop.f32.mrf.mxu1  ;;  %v5325_v16 = vrot.slane %v5323_v53, 4  ;;  %v5331_v25 = vrot.slane %v5329_v50, 5  ;;  %v25117_v51 = vld [vmem:[#allocation24_spill] sm:$0xff]  ;;  %v5267_v37 = vld [vmem:[%s18815_s16 + $0x18] sm:$0xf] }
 0x14a   : > { %v5336_v18 = vrot.slane %v5334_v23, 4  ;;  %v5337_v43 = vshll.u32 %v5264_v4, 16  ;;  %v19808_v42 = vadd.f32 %v1682_v7, %v1258_v5  ;;  %v1269_v3 = vadd.f32 %v16606_v29, %v19541_v58  ;;  %v16643_v17 = vpop.f32.mrf.mxu0  ;;  %v5268_v29 = vld [vmem:[%s18815_s16 + $0x1c] sm:$0xf] }
 0x14b   : > { %v25119_v47 = vcombine.low %v25117_v51, %v25118_v0  ;;  %v5317_v62 = vrot.slane %v5316_v61, 4  ;;  %v5343_v12 = vshll.u32 %v5265_v31, 16  ;;  %v1260_v10 = vpop.f32.mrf.mxu1  ;;  %v25120_v56 = vcombine.low %v19499_v49, %v19511_v54 }
 0x14c   : > { %v5326_v4 = vor.u32 %v5325_v16, %v5321_v63  ;;  %v5339_v7 = vrot.slane %v5337_v43, 5  ;;  %v5347_v60 = vshrl.u32 %v5265_v31, 16  ;;  %v5353_v58 = vshll.u32 %v5266_v2, 16  ;;  %v1698_v23 = vpop.f32.mrf.mxu0 }
 0x14d   : > { %16846 = vmatmul.mubr.msk.bf16.gmra.mxu0 %vm830_vm3, %v25119_v47  ;;  %v19820_v53 = vadd.f32 %v16640_v6, %v1269_v3  ;;  %v1261_v50 = vadd.f32 %v1260_v10, %v19565_v1  ;;  %v5322_v5 = vsel %vm17904_vm4, %v5317_v62, %v5321_v63  ;;  %v5345_v61 = vrot.slane %v5343_v12, 5  ;;  %v16609_v51 = vpop.f32.mrf.mxu1  ;;  %v25121_v6 = vld [vmem:[#allocation7_spill] sm:$0xff]  ;;  %v25122_v3 = vld [vmem:[#allocation28_spill] sm:$0xff]  ;;  %v5270_v12 = vld [vmem:[%s18815_s16 + $0x24] sm:$0xf] }
 0x14e   : > { %16849 = vmatprep.mubr.msk.bf16.mxu0 %vm830_vm3, %v25120_v56  ;;  %v5327_v49 = vrot.slane %v5326_v4, 4  ;;  %v5340_v54 = vor.u32 %v5339_v7, %v5336_v18  ;;  %v5349_v43 = vrot.slane %v5347_v60, 4  ;;  %v5355_v31 = vrot.slane %v5353_v58, 5  ;;  %v16644_v16 = vpop.f32.mrf.mxu0  ;;  %v25123_v56 = vld [vmem:[#allocation9_spill] sm:$0xff]  ;;  %v5269_v60 = vld [vmem:[%s18815_s16 + $0x20] sm:$0x1] }
 0x14f   : > { %16812 = vmatmul.mubr.msk.bf16.gmra.mxu1 %vm830_vm3, %v19494_v21  ;;  %v19828_v2 = vadd.f32 %v1685_v11, %v1261_v50  ;;  %v1282_v1 = vadd.f32 %v16609_v51, %v25121_v6  ;;  %v19835_v63 = vsel %vm879_vm0, %v19593_v28, 0  ;;  %v19839_v21 = vsel %vm879_vm0, %v19575_v14, 0  ;;  %v1273_v18 = vpop.f32.mrf.mxu1  ;;  %v25124_v6 = vld [vmem:[#allocation10_spill] sm:$0xff] }
 0x150   : > { %16815 = vmatprep.mubr.msk.bf16.mxu1 %vm830_vm3, %v25122_v3  ;;  %v5332_v11 = vsel %vm17904_vm4, %v5327_v49, %v5331_v25  ;;  %v5341_v0 = vrot.slane %v5340_v54, 4  ;;  %v5350_v47 = vor.u32 %v5349_v43, %v5345_v61  ;;  %v5358_v62 = vshrl.u32 %v5267_v37, 16  ;;  %v1701_v7 = vpop.f32.mrf.mxu0  ;;  %v5271_v54 = vld [vmem:[%s18815_s16 + $0x28] sm:$0xf] }
 0x151   : > { %v19844_v10 = vadd.f32 %v16643_v17, %v1282_v1  ;;  %v1274_v4 = vadd.f32 %v1273_v18, %v25123_v56  ;;  %v19847_v28 = vcombine.low %v5322_v5, %v5332_v11  ;;  %v5361_v58 = vshll.u32 %v5267_v37, 16  ;;  %v16610_v14 = vpop.f32.mrf.mxu1  ;;  %v25127_v56 = vld [vmem:[#allocation11_spill] sm:$0xff] }
 0x152   : > { %v5346_v50 = vsel %vm17904_vm4, %v5341_v0, %v5345_v61  ;;  %v5351_v51 = vrot.slane %v5350_v47, 4  ;;  %v5360_v25 = vrot.slane %v5358_v62, 4  ;;  %v5367_v49 = vshll.u32 %v5268_v29, 16  ;;  %v16647_v1 = vpop.f32.mrf.mxu0 }
 0x153   : > { %v19853_v43 = vadd.f32 %v1698_v23, %v1274_v4  ;;  %v1285_v17 = vadd.f32 %v16610_v14, %v25124_v6  ;;  %v25125_v5 = vcombine.low %v19547_v13, %v19569_v33  ;;  %v5363_v37 = vrot.slane %v5361_v58, 5  ;;  %v1276_v18 = vpop.f32.mrf.mxu1  ;;  %v5272_v58 = vld [vmem:[%s18815_s16 + $0x2c] sm:$0x1] }
 0x154   : > { %v5371_v3 = vshrl.u32 %v5268_v29, 16  ;;  %v25126_v61 = vcombine.low %v19614_v41, %v19630_v39  ;;  %v5356_v23 = vsel %vm17904_vm4, %v5351_v51, %v5355_v31  ;;  %v5369_v11 = vrot.slane %v5367_v49, 5  ;;  %v1714_v33 = vpop.f32.mrf.mxu0 }
 0x155   : > { %16850 = vmatmul.mubr.msk.bf16.gmra.mxu0 %vm830_vm3, %v25125_v5  ;;  %v5377_v0 = vshll.u32 %v5269_v60, 16  ;;  %v5382_v47 = vshrl.u32 %v5270_v12, 16  ;;  %v19866_v62 = vadd.f32 %v16644_v16, %v1285_v17  ;;  %v1277_v13 = vadd.f32 %v1276_v18, %v25127_v56  ;;  %v16613_v14 = vpop.f32.mrf.mxu1  ;;  %v25128_v16 = vld [vmem:[#allocation14_spill] sm:$0xff]  ;;  %v5274_v56 = vld [vmem:[%s18815_s16 + $0x34] sm:$0xf] }
 0x156   : > { %16853 = vmatprep.mubr.msk.bf16.mxu0 %vm830_vm3, %v25126_v61  ;;  %v19869_v4 = vcombine.low %v5346_v50, %v5356_v23  ;;  %v5364_v29 = vor.u32 %v5363_v37, %v5360_v25  ;;  %v5373_v41 = vrot.slane %v5371_v3, 4  ;;  %v5385_v51 = vshll.u32 %v5270_v12, 16  ;;  %v16648_v6 = vpop.f32.mrf.mxu0  ;;  %v5273_v3 = vld [vmem:[%s18815_s16 + $0x30] sm:$0xf]  ;;  %v25129_v12 = vld [vmem:[#allocation3_spill] sm:$0xff] }
 0x157   : > { %16816 = vmatmul.mubr.msk.bf16.gmra.mxu1 %vm830_vm3, %v19587_v35  ;;  %v5379_v39 = vrot.slane %v5377_v0, 5  ;;  %v5384_v31 = vrot.slane %v5382_v47, 4  ;;  %v19874_v60 = vadd.f32 %v1701_v7, %v1277_v13  ;;  %v1298_v49 = vadd.f32 %v16613_v14, %v25128_v16  ;;  %v1289_v17 = vpop.f32.mrf.mxu1 }
 0x158   : > { %16819 = vmatprep.mubr.msk.bf16.mxu1 %vm830_vm3, %v19642_v48  ;;  %v5365_v50 = vrot.slane %v5364_v29, 4  ;;  %v5391_v25 = vshll.u32 %v5271_v54, 16  ;;  %v5374_v5 = vor.u32 %v5373_v41, %v5369_v11  ;;  %v5387_v37 = vrot.slane %v5385_v51, 5  ;;  %v1717_v23 = vpop.f32.mrf.mxu0 }
 0x159   : > { %v5395_v35 = vshrl.u32 %v5271_v54, 16  ;;  %v5401_v18 = vshll.u32 %v5272_v58, 16  ;;  %v19880_v61 = vadd.f32 %v16647_v1, %v1298_v49  ;;  %v1290_v7 = vadd.f32 %v1289_v17, %v25129_v12  ;;  %v16614_v48 = vpop.f32.mrf.mxu1  ;;  %v25130_v58 = vld [vmem:[#allocation16_spill] sm:$0xff] }
 0x15a   : > { %v5370_v0 = vsel %vm17904_vm4, %v5365_v50, %v5369_v11  ;;  %v5393_v47 = vrot.slane %v5391_v25, 5  ;;  %v5375_v13 = vrot.slane %v5374_v5, 4  ;;  %v5388_v29 = vor.u32 %v5387_v37, %v5384_v31  ;;  %v16651_v51 = vpop.f32.mrf.mxu0  ;;  %v5276_v50 = vld [vmem:[%s18815_s16 + $0x3c] sm:$0xf]  ;;  %v5275_v37 = vld [vmem:[%s18815_s16 + $0x38] sm:$0x1] }
 0x15b   : > { %v5397_v14 = vrot.slane %v5395_v35, 4  ;;  %v5403_v41 = vrot.slane %v5401_v18, 5  ;;  %v19886_v54 = vadd.f32 %v1714_v33, %v1290_v7  ;;  %v1301_v1 = vadd.f32 %v16614_v48, %v25130_v58  ;;  %v1292_v25 = vpop.f32.mrf.mxu1 }
 0x15c   : > { %v25131_v16 = vcombine.low %v19667_v8, %v19682_v20  ;;  %v5406_v49 = vshrl.u32 %v5273_v3, 16  ;;  %v5409_v11 = vshll.u32 %v5273_v3, 16  ;;  %v25132_v17 = vcombine.low %v19724_v9, %v19739_v52  ;;  %v25133_v8 = vld [vmem:[#allocation19_spill] sm:$0xff]  ;;  %v1730_v12 = vpop.f32.mrf.mxu0 }
 0x15d   : > { %v5380_v33 = vsel %vm17904_vm4, %v5375_v13, %v5379_v39  ;;  %v5389_v31 = vrot.slane %v5388_v29, 4  ;;  %v5398_v5 = vor.u32 %v5397_v14, %v5393_v47  ;;  %v5415_v35 = vshll.u32 %v5274_v56, 16 }
 0x15e   : > { %16854 = vmatmul.mubr.msk.bf16.gmra.mxu0 %vm830_vm3, %v25131_v16  ;;  %v19901_v18 = vadd.f32 %v16648_v6, %v1301_v1  ;;  %v1293_v20 = vadd.f32 %v1292_v25, %v25133_v8  ;;  %v19904_v3 = vcombine.low %v5370_v0, %v5380_v33  ;;  %v5408_v7 = vrot.slane %v5406_v49, 4  ;;  %v16617_v48 = vpop.f32.mrf.mxu1  ;;  %v25134_v6 = vld [vmem:[#allocation21_spill] sm:$0xff]  ;;  %v16652_v58 = vpop.f32.mrf.mxu0 }
 0x15f   : > { %16857 = vmatprep.mubr.msk.bf16.mxu0 %vm830_vm3, %v25132_v17  ;;  %16820 = vmatmul.mubr.msk.bf16.gmra.mxu1 %vm830_vm3, %v19691_v38  ;;  %v5394_v9 = vsel %vm17904_vm4, %v5389_v31, %v5393_v47  ;;  %v5399_v52 = vrot.slane %v5398_v5, 4  ;;  %v5411_v39 = vrot.slane %v5409_v11, 5  ;;  %v5417_v13 = vrot.slane %v5415_v35, 5  ;;  %v5277_v47 = vld [vmem:[%s18815_s16 + $0x40] sm:$0xf]  ;;  %v25135_v17 = vld [vmem:[#allocation23_spill] sm:$0xff] }
 0x160   : > { %v19910_v29 = vadd.f32 %v1717_v23, %v1293_v20  ;;  %v1314_v14 = vadd.f32 %v16617_v48, %v25134_v6  ;;  %16823 = vmatprep.mubr.msk.bf16.mxu1 %vm830_vm3, %v19746_v27  ;;  %v5419_v0 = vshrl.u32 %v5274_v56, 16  ;;  %v5425_v1 = vshll.u32 %v5275_v37, 16  ;;  %v1305_v16 = vpop.f32.mrf.mxu1  ;;  %v1733_v31 = vpop.f32.mrf.mxu0  ;;  %v5278_v56 = vld [vmem:[%s18815_s16 + $0x44] sm:$0x1] }
 0x161   : > { %v5404_v38 = vsel %vm17904_vm4, %v5399_v52, %v5403_v41  ;;  %v5412_v49 = vor.u32 %v5411_v39, %v5408_v7  ;;  %v5430_v25 = vshrl.u32 %v5276_v50, 16  ;;  %v5433_v11 = vshll.u32 %v5276_v50, 16  ;;  %v25136_v48 = vld [vmem:[#allocation26_spill] sm:$0xff] }
 0x162   : > { %v19918_v23 = vadd.f32 %v16651_v51, %v1314_v14  ;;  %v1306_v33 = vadd.f32 %v1305_v16, %v25135_v17  ;;  %v19921_v5 = vcombine.low %v5394_v9, %v5404_v38  ;;  %v5421_v27 = vrot.slane %v5419_v0, 4  ;;  %v16618_v37 = vpop.f32.mrf.mxu1  ;;  %v17595_v9 = vld [vmem:[%s18815_s16] sm:$0xff]   ;;  %v5279_v14 = vld [vmem:[%s18815_s16 + $0x48] sm:$0xf] }
 0x163   : > { %v5413_v35 = vrot.slane %v5412_v49, 4  ;;  %v5427_v8 = vrot.slane %v5425_v1, 5  ;;  %v5432_v20 = vrot.slane %v5430_v25, 4  ;;  %v5435_v41 = vrot.slane %v5433_v11, 5  ;;  %v16655_v52 = vpop.f32.mrf.mxu0 }
 0x164   : > { %v19924_v7 = vadd.f32 %v1730_v12, %v1306_v33  ;;  %v1317_v50 = vadd.f32 %v16618_v37, %v25136_v48  ;;  %v25137_v51 = vcombine.low %v19766_v57, %v19786_v44  ;;  %v5422_v39 = vor.u32 %v5421_v27, %v5417_v13  ;;  %v1308_v0 = vpop.f32.mrf.mxu1  ;;  %v25138_v57 = vld [vmem:[#allocation27_spill] sm:$0xff] }
 0x165   : > { %v5439_v6 = vshll.u32 %v5277_v47, 16  ;;  %v5418_v12 = vsel %vm17904_vm4, %v5413_v35, %v5417_v13  ;;  %v5436_v1 = vor.u32 %v5435_v41, %v5432_v20  ;;  %v5443_v16 = vshrl.u32 %v5277_v47, 16  ;;  %v1746_v25 = vpop.f32.mrf.mxu0  ;;  %v5280_v33 = vld [vmem:[%s18815_s16 + $0x4c] sm:$0xf]  ;;  %v19944_v20 = vld [vmem:[%s18815_s16 + $0x54] sm:$0xf] }
 0x166   : > { %16858 = vmatmul.mubr.msk.bf16.gmra.mxu0 %vm830_vm3, %v25137_v51  ;;  %v5449_v38 = vshll.u32 %v5278_v56, 16  ;;  %v19937_v49 = vadd.f32 %v16652_v58, %v1317_v50  ;;  %v1309_v44 = vadd.f32 %v1308_v0, %v25138_v57  ;;  %v5423_v11 = vrot.slane %v5422_v39, 4  ;;  %v25139_v47 = vld [vmem:[#allocation29_spill] sm:$0xff]  ;;  %v5281_v50 = vld [vmem:[%s18815_s16 + $0x50] sm:$0x1] }
 0x167   : > { %16897 = vmatprep.mubr.msk.bf16.mxu0 %vm830_vm3, %v19847_v28  ;;  %v5441_v17 = vrot.slane %v5439_v6, 5  ;;  %v16621_v27 = vpop.f32.mrf.mxu1  ;;  %16824 = vmatmul.mubr.msk.bf16.gmra.mxu1 %vm830_vm3, %v19805_v19  ;;  %v5437_v28 = vrot.slane %v5436_v1, 4  ;;  %v5445_v37 = vrot.slane %v5443_v16, 4  ;;  %v5454_v35 = vshrl.u32 %v5279_v14, 16  ;;  %v16656_v41 = vpop.f32.mrf.mxu0  ;;  %v25140_v16 = vld [vmem:[#allocation6_spill] sm:$0xff] }
 0x168   : > { %v5451_v13 = vrot.slane %v5449_v38, 5  ;;  %v19946_v58 = vadd.f32 %v1733_v31, %v1309_v44  ;;  %v1330_v56 = vadd.f32 %v16621_v27, %v25139_v47  ;;  %16863 = vmatprep.mubr.msk.bf16.mxu1 %vm830_vm3, %v17595_v9  ;;  %v5428_v48 = vsel %vm17904_vm4, %v5423_v11, %v5427_v8  ;;  %v17596_v9 = vld [vmem:[%s18815_s16 + $0xc] sm:$0xff]  }
 0x169   : > { %v5457_v51 = vshll.u32 %v5279_v14, 16  ;;  %v1321_v19 = vpop.f32.mrf.mxu1  ;;  %v19953_v39 = vcombine.low %v5418_v12, %v5428_v48  ;;  %v5442_v6 = vsel %vm17904_vm4, %v5437_v28, %v5441_v17  ;;  %v5446_v0 = vor.u32 %v5445_v37, %v5441_v17  ;;  %v1749_v57 = vpop.f32.mrf.mxu0  ;;  %v25141_v28 = vld [vmem:[#allocation5_spill] sm:$0xff] }
 0x16a   : > { %v5456_v1 = vrot.slane %v5454_v35, 4  ;;  %v19957_v31 = vadd.f32 %v16655_v52, %v1330_v56  ;;  %v1322_v38 = vadd.f32 %v1321_v19, %v25140_v16  ;;  %v5463_v8 = vshll.u32 %v5280_v33, 16  ;;  %v19965_v52 = vld [vmem:[%s24893_s3 + $0x1c] sm:$0x3] }
 0x16b   : > { %v5459_v44 = vrot.slane %v5457_v51, 5  ;;  %v16622_v14 = vpop.f32.mrf.mxu1  ;;  %v5447_v11 = vrot.slane %v5446_v0, 4  ;;  %v5467_v12 = vshrl.u32 %v5280_v33, 16  ;;  %v5473_v27 = vshll.u32 %v5281_v50, 16  ;;  %v16695_v35 = vpop.f32.mrf.mxu0  ;;  %v17597_v56 = vld [vmem:[%s18815_s16 + $0x18] sm:$0xff]  }
 0x16c   : > { %v5478_v47 = vshrl.u32 %v19944_v20, 16  ;;  %v19967_v17 = vadd.f32 %v1746_v25, %v1322_v38  ;;  %v1333_v37 = vadd.f32 %v16622_v14, %v25141_v28  ;;  %v5465_v51 = vrot.slane %v5463_v8, 5  ;;  %v19974_v33 = vld [vmem:[%s18815_s16 + $0x58] sm:$0xf]  ;;  %v19977_v50 = vld [vmem:[%s18815_s16 + $0x5c] sm:$0x1] }
 0x16d   : > { %v5460_v48 = vor.u32 %v5459_v44, %v5456_v1  ;;  %25142 = vst [vmem:[#allocation13_spill] sm:$0xff] %v19974_v33  ;;  %25143 = vst [vmem:[#allocation4_spill] sm:$0xff] %v19977_v50  ;;  %v1324_v19 = vpop.f32.mrf.mxu1  ;;  %v5452_v25 = vsel %vm17904_vm4, %v5447_v11, %v5451_v13  ;;  %v5469_v0 = vrot.slane %v5467_v12, 4  ;;  %v5475_v16 = vrot.slane %v5473_v27, 5  ;;  %v19987_v1 = vld [vmem:[%s24893_s3 + $0x1a] sm:$0x3] }
 0x16e   : > { %16898 = vmatmul.mubr.msk.bf16.vlgmr.msra.gmra.mxu0 %vm830_vm3, %v19869_v4  ;;  %v5480_v4 = vrot.slane %v5478_v47, 4  ;;  %v19989_v38 = vadd.f32 %v16656_v41, %v1333_v37  ;;  %v1325_v44 = vadd.f32 %v1324_v19, %v19595_v46  ;;  %v19992_v8 = vcombine.low %v5442_v6, %v5452_v25  ;;  %v5285_v27 = vld [vmem:[%s18815_s16 + $0x60] sm:$0xf] }
 0x16f   : > { %16964 = vmatpush3.bf16.msra.mxu0 %v19839_v21  ;;  %16901 = vmatprep.mubr.msk.bf16.mxu0 %vm830_vm3, %v19904_v3  ;;  %v2719_v21 = vpop.f32.mrf.mxu0  ;;  %v5461_v3 = vrot.slane %v5460_v48, 4  ;;  %v16661_v13 = vpop.f32.mrf.mxu1  ;;  %v5470_v14 = vor.u32 %v5469_v0, %v5465_v51  ;;  %v5481_v11 = vshll.u32 %v19944_v20, 16  ;;  %v5487_v12 = vshll.u32 %v19974_v33, 16  ;;  %v20015_v0 = vld [vmem:[%s18815_s16 + $0x64] sm:$0xf] }
 0x170   : > { %17490 = vmatprep.subr.msk.bf16.mxu0 %vm879_vm0, %v19965_v52  ;;  %16864 = vmatmul.mubr.msk.bf16.vlgmr.msra.gmra.mxu1 %vm830_vm3, %v17596_v9  ;;  %v5491_v41 = vshrl.u32 %v19974_v33, 16  ;;  %v20001_v47 = vadd.f32 %v1749_v57, %v1325_v44  ;;  %v2122_v46 = vadd.f32 %v16661_v13, %v19639_v34  ;;  %v5497_v20 = vshll.u32 %v19977_v50, 16  ;;  %v5288_v33 = vld [vmem:[%s18815_s16 + $0x6c] sm:$0xf] }
 0x171   : > { %16930 = vmatpush3.bf16.msra.mxu1 %v19835_v63  ;;  %v16696_v6 = vpop.f32.mrf.mxu0  ;;  %16867 = vmatprep.mubr.msk.bf16.mxu1 %vm830_vm3, %v17597_v56  ;;  %v5466_v9 = vsel %vm17904_vm4, %v5461_v3, %v5465_v51  ;;  %v1993_v28 = vpop.f32.mrf.mxu1  ;;  %v5471_v37 = vrot.slane %v5470_v14, 4  ;;  %v5483_v48 = vrot.slane %v5481_v11, 5  ;;  %v5489_v57 = vrot.slane %v5487_v12, 5  ;;  %v17598_v3 = vld [vmem:[%s18815_s16 + $0x24] sm:$0xff]  }
 0x172   : > { %v5493_v19 = vrot.slane %v5491_v41, 4  ;;  %17489 = vmatprep.subr.msk.bf16.mxu1 %vm879_vm0, %v19987_v1  ;;  %v20011_v34 = vadd.f32 %v16695_v35, %v2122_v46  ;;  %v2120_v63 = vadd.f32 %v1993_v28, %v19651_v40  ;;  %v5499_v25 = vrot.slane %v5497_v20, 5  ;;  %v20021_v12 = vld [vmem:[%s18815_s16 + $0x68] sm:$0x1]  ;;  %v17599_v20 = vld [vmem:[%s18815_s16 + $0x30] sm:$0xff]  }
 0x173   : > { %v2722_v56 = vpop.f32.mrf.mxu0  ;;  %v5502_v51 = vshrl.u32 %v5285_v27, 16  ;;  %v16662_v44 = vpop.f32.mrf.mxu1  ;;  %v5476_v13 = vsel %vm17904_vm4, %v5471_v37, %v5475_v16  ;;  %v5484_v14 = vor.u32 %v5483_v48, %v5480_v4  ;;  %v5505_v35 = vshll.u32 %v5285_v27, 16 }
 0x174   : > { %25144 = vst [vmem:[#allocation22_spill] sm:$0xff] %v20011_v34  ;;  %v5494_v11 = vor.u32 %v5493_v19, %v5489_v57  ;;  %v20023_v41 = vadd.f32 %v2719_v21, %v2120_v63  ;;  %v2123_v40 = vadd.f32 %v16662_v44, %v19672_v15  ;;  %v15059_v28 = vcombine.low %v5466_v9, %v5476_v13  ;;  %v20044_v44 = vld [vmem:[%s18815_s16 + $0x70] sm:$0xf] }
 0x175   : > { %v16699_v46 = vpop.f32.mrf.mxu0  ;;  %v5504_v50 = vrot.slane %v5502_v51, 4  ;;  %v1996_v34 = vpop.f32.mrf.mxu1  ;;  %v5485_v16 = vrot.slane %v5484_v14, 4  ;;  %v5507_v27 = vrot.slane %v5505_v35, 5  ;;  %v5511_v21 = vshll.u32 %v20015_v0, 16 }
 0x176   : > { %16902 = vmatmul.mubr.msk.bf16.gmra.mxu0 %vm830_vm3, %v19921_v5  ;;  %v5495_v4 = vrot.slane %v5494_v11, 4  ;;  %v20033_v37 = vadd.f32 %v16696_v6, %v2123_v40  ;;  %v2121_v15 = vadd.f32 %v1996_v34, %v19686_v26  ;;  %v5515_v5 = vshrl.u32 %v20015_v0, 16 }
 0x177   : > { %16905 = vmatprep.mubr.msk.bf16.mxu0 %vm830_vm3, %v19953_v39  ;;  %v2735_v48 = vpop.f32.mrf.mxu0  ;;  %v5521_v9 = vshll.u32 %v20021_v12, 16  ;;  %v16665_v19 = vpop.f32.mrf.mxu1  ;;  %v5490_v39 = vsel %vm17904_vm4, %v5485_v16, %v5489_v57  ;;  %v5508_v51 = vor.u32 %v5507_v27, %v5504_v50  ;;  %v5513_v6 = vrot.slane %v5511_v21, 5  ;;  %v5291_v21 = vld [vmem:[%s18815_s16 + $0x78] sm:$0xf] }
 0x178   : > { %16868 = vmatmul.mubr.msk.bf16.gmra.mxu1 %vm830_vm3, %v17598_v3  ;;  %v5500_v63 = vsel %vm17904_vm4, %v5495_v4, %v5499_v25  ;;  %v20046_v26 = vadd.f32 %v2722_v56, %v2121_v15  ;;  %v2126_v34 = vadd.f32 %v16665_v19, %v19696_v45  ;;  %v5517_v14 = vrot.slane %v5515_v5, 4  ;;  %v20053_v25 = vld [vmem:[%s18815_s16 + $0x74] sm:$0x1]  ;;  %v17600_v19 = vld [vmem:[%s18815_s16 + $0x3c] sm:$0xff]  }
 0x179   : > { %v16700_v13 = vpop.f32.mrf.mxu0  ;;  %16871 = vmatprep.mubr.msk.bf16.mxu1 %vm830_vm3, %v17599_v20  ;;  %v20050_v3 = vcombine.low %v5490_v39, %v5500_v63  ;;  %v2009_v57 = vpop.f32.mrf.mxu1  ;;  %v5509_v11 = vrot.slane %v5508_v51, 4  ;;  %v5523_v35 = vrot.slane %v5521_v9, 5  ;;  %v5526_v50 = vshrl.u32 %v5288_v33, 16  ;;  %v25145_v56 = vld [vmem:[#allocation12_spill] sm:$0xff] }
 0x17a   : > { %v5529_v40 = vshll.u32 %v5288_v33, 16  ;;  %v20055_v16 = vadd.f32 %v16699_v46, %v2126_v34  ;;  %v2124_v45 = vadd.f32 %v2009_v57, %v25145_v56  ;;  %v5518_v27 = vor.u32 %v5517_v14, %v5513_v6  ;;  %v17601_v34 = vld [vmem:[%s18815_s16 + $0x48] sm:$0xff]  }
 0x17b   : > { %v2738_v4 = vpop.f32.mrf.mxu0  ;;  %v5535_v20 = vshll.u32 %v20044_v44, 16  ;;  %v16666_v15 = vpop.f32.mrf.mxu1  ;;  %v5514_v5 = vsel %vm17904_vm4, %v5509_v11, %v5513_v6  ;;  %v5528_v9 = vrot.slane %v5526_v50, 4  ;;  %v5539_v33 = vshrl.u32 %v20044_v44, 16 }
 0x17c   : > { %v5531_v39 = vrot.slane %v5529_v40, 5  ;;  %v20064_v46 = vadd.f32 %v2735_v48, %v2124_v45  ;;  %v2127_v63 = vadd.f32 %v16666_v15, %v19726_v32  ;;  %v5519_v14 = vrot.slane %v5518_v27, 4  ;;  %v20073_v40 = vld [vmem:[%s18815_s16 + $0x7c] sm:$0xf] }
 0x17d   : > { %v16703_v51 = vpop.f32.mrf.mxu0  ;;  %v5537_v57 = vrot.slane %v5535_v20, 5  ;;  %v2012_v56 = vpop.f32.mrf.mxu1  ;;  %v5541_v11 = vrot.slane %v5539_v33, 4  ;;  %v5545_v50 = vshll.u32 %v20053_v25, 16  ;;  %25147 = vst [vmem:[#allocation18_spill] sm:$0xff] %v20073_v40  ;;  %v5550_v48 = vshrl.u32 %v5291_v21, 16 }
 0x17e   : > { %25146 = vst [vmem:[#allocation17_spill] sm:$0xff] %v20064_v46  ;;  %16906 = vmatmul.mubr.msk.bf16.gmra.mxu0 %vm830_vm3, %v19992_v8  ;;  %v5532_v6 = vor.u32 %v5531_v39, %v5528_v9  ;;  %v20075_v45 = vadd.f32 %v16700_v13, %v2127_v63  ;;  %v2125_v32 = vadd.f32 %v2012_v56, %v19741_v59  ;;  %v5553_v27 = vshll.u32 %v5291_v21, 16  ;;  %v20082_v46 = vld [vmem:[%s18815_s16 + $0x80] sm:$0x1] }
 0x17f   : > { %16909 = vmatprep.mubr.msk.bf16.mxu0 %vm830_vm3, %v15059_v28  ;;  %v2751_v15 = vpop.f32.mrf.mxu0  ;;  %v5524_v8 = vsel %vm17904_vm4, %v5519_v14, %v5523_v35  ;;  %v16669_v20 = vpop.f32.mrf.mxu1  ;;  %v5542_v39 = vor.u32 %v5541_v11, %v5537_v57  ;;  %v5547_v33 = vrot.slane %v5545_v50, 5  ;;  %25149 = vst [vmem:[#allocation24_spill] sm:$0xff] %v20082_v46  ;;  %v5552_v35 = vrot.slane %v5550_v48, 4  ;;  %v5294_v14 = vld [vmem:[%s18815_s16 + $0x84] sm:$0xf]  ;;  %v25153_v50 = vld [vmem:[#allocation8_spill] sm:$0xff] }
 0x180   : > { %25148 = vst [vmem:[#allocation20_spill] sm:$0xff] %v20075_v45  ;;  %16872 = vmatmul.mubr.msk.bf16.gmra.mxu1 %vm830_vm3, %v17600_v19  ;;  %v15061_v28 = vcombine.low %v5514_v5, %v5524_v8  ;;  %v5533_v9 = vrot.slane %v5532_v6, 4  ;;  %v20084_v13 = vadd.f32 %v2738_v4, %v2125_v32  ;;  %v2130_v59 = vadd.f32 %v16669_v20, %v19752_v22  ;;  %v20094_v11 = vld [vmem:[%s18815_s16 + $0x88] sm:$0xf]  ;;  %v17602_v20 = vld [vmem:[%s18815_s16 + $0x54] sm:$0xff]  }
 0x181   : > { %v16704_v63 = vpop.f32.mrf.mxu0  ;;  %16875 = vmatprep.mubr.msk.bf16.mxu1 %vm830_vm3, %v17601_v34  ;;  %v5555_v21 = vrot.slane %v5553_v27, 5  ;;  %v2025_v19 = vpop.f32.mrf.mxu1  ;;  %v5543_v56 = vrot.slane %v5542_v39, 4  ;;  %v5559_v6 = vshll.u32 %v20073_v40, 16  ;;  %v5563_v4 = vshrl.u32 %v20073_v40, 16  ;;  %25151 = vst [vmem:[#allocation7_spill] sm:$0xff] %v20094_v11 }
 0x182   : > { %25150 = vst [vmem:[#allocation25_spill] sm:$0xff] %v20084_v13  ;;  %v5538_v5 = vsel %vm17904_vm4, %v5533_v9, %v5537_v57  ;;  %v20096_v22 = vadd.f32 %v16703_v51, %v2130_v59  ;;  %v2128_v34 = vadd.f32 %v2025_v19, %v25153_v50  ;;  %v5569_v8 = vshll.u32 %v20082_v46, 16  ;;  %v20101_v27 = vld [vmem:[%s18815_s16 + $0x8c] sm:$0x1]  ;;  %v5297_v40 = vld [vmem:[%s18815_s16 + $0x90] sm:$0xf] }
 0x183   : > { %v2754_v48 = vpop.f32.mrf.mxu0  ;;  %v5556_v32 = vor.u32 %v5555_v21, %v5552_v35  ;;  %25154 = vst [vmem:[#allocation9_spill] sm:$0xff] %v20101_v27  ;;  %v16670_v57 = vpop.f32.mrf.mxu1  ;;  %v5548_v9 = vsel %vm17904_vm4, %v5543_v56, %v5547_v33  ;;  %v5561_v39 = vrot.slane %v5559_v6, 5  ;;  %v5565_v13 = vrot.slane %v5563_v4, 4  ;;  %v17603_v35 = vld [vmem:[%s18815_s16 + $0x60] sm:$0xff]  }
 0x184   : > { %25152 = vst [vmem:[#allocation28_spill] sm:$0xff] %v20096_v22  ;;  %v5574_v45 = vshrl.u32 %v5294_v14, 16  ;;  %v20107_v51 = vadd.f32 %v2751_v15, %v2128_v34  ;;  %v2131_v59 = vadd.f32 %v16670_v57, %v19781_v30  ;;  %v15062_v21 = vcombine.low %v5538_v5, %v5548_v9 }
 0x185   : > { %v16707_v19 = vpop.f32.mrf.mxu0  ;;  %v5557_v50 = vrot.slane %v5556_v32, 4  ;;  %v2028_v22 = vpop.f32.mrf.mxu1  ;;  %v5566_v46 = vor.u32 %v5565_v13, %v5561_v39  ;;  %v5571_v33 = vrot.slane %v5569_v8, 5  ;;  %v5577_v6 = vshll.u32 %v5294_v14, 16  ;;  %v20128_v8 = vld [vmem:[%s18815_s16 + $0x94] sm:$0xf] }
 0x186   : > { %25155 = vst [vmem:[#allocation10_spill] sm:$0xff] %v20107_v51  ;;  %16910 = vmatmul.mubr.msk.bf16.gmra.mxu0 %vm830_vm3, %v20050_v3  ;;  %v5576_v56 = vrot.slane %v5574_v45, 4  ;;  %v20114_v4 = vadd.f32 %v16704_v63, %v2131_v59  ;;  %v2129_v15 = vadd.f32 %v2028_v22, %v19794_v24  ;;  %v5583_v3 = vshll.u32 %v20094_v11, 16  ;;  %v20133_v59 = vld [vmem:[%s18815_s16 + $0x98] sm:$0x1] }
 0x187   : > { %16913 = vmatprep.mubr.msk.bf16.mxu0 %vm830_vm3, %v15061_v28  ;;  %v2767_v30 = vpop.f32.mrf.mxu0  ;;  %v5562_v34 = vsel %vm17904_vm4, %v5557_v50, %v5561_v39  ;;  %v16673_v5 = vpop.f32.mrf.mxu1  ;;  %v5567_v32 = vrot.slane %v5566_v46, 4  ;;  %v5579_v28 = vrot.slane %v5577_v6, 5  ;;  %v5587_v45 = vshrl.u32 %v20094_v11, 16  ;;  %v17604_v6 = vld [vmem:[%s18815_s16 + $0x6c] sm:$0xff]  }
 0x188   : > { %25156 = vst [vmem:[#allocation11_spill] sm:$0xff] %v20114_v4  ;;  %16876 = vmatmul.mubr.msk.bf16.gmra.mxu1 %vm830_vm3, %v17602_v20  ;;  %v5593_v13 = vshll.u32 %v20101_v27, 16  ;;  %v20123_v63 = vadd.f32 %v2754_v48, %v2129_v15  ;;  %v2134_v24 = vadd.f32 %v16673_v5, %v19802_v55  ;;  %v5585_v22 = vrot.slane %v5583_v3, 5  ;;  %v5300_v5 = vld [vmem:[%s18815_s16 + $0x9c] sm:$0xf] }
 0x189   : > { %v16708_v14 = vpop.f32.mrf.mxu0  ;;  %16879 = vmatprep.mubr.msk.bf16.mxu1 %vm830_vm3, %v17603_v35  ;;  %v5598_v46 = vshrl.u32 %v5297_v40, 16  ;;  %v2041_v57 = vpop.f32.mrf.mxu1  ;;  %v5572_v20 = vsel %vm17904_vm4, %v5567_v32, %v5571_v33  ;;  %v5580_v9 = vor.u32 %v5579_v28, %v5576_v56  ;;  %v5589_v39 = vrot.slane %v5587_v45, 4  ;;  %v17605_v4 = vld [vmem:[%s18815_s16 + $0x78] sm:$0xff]  }
 0x18a   : > { %25157 = vst [vmem:[#allocation14_spill] sm:$0xff] %v20123_v63  ;;  %v5595_v48 = vrot.slane %v5593_v13, 5  ;;  %v20135_v50 = vadd.f32 %v16707_v19, %v2134_v24  ;;  %v2132_v55 = vadd.f32 %v2041_v57, %v19808_v42  ;;  %v15063_v15 = vcombine.low %v5562_v34, %v5572_v20  ;;  %v20155_v57 = vld [vmem:[%s18815_s16 + $0xa0] sm:$0xf] }
 0x18b   : > { %v2770_v35 = vpop.f32.mrf.mxu0  ;;  %v5600_v3 = vrot.slane %v5598_v46, 4  ;;  %v16674_v63 = vpop.f32.mrf.mxu1  ;;  %v5581_v51 = vrot.slane %v5580_v9, 4  ;;  %v5590_v27 = vor.u32 %v5589_v39, %v5585_v22  ;;  %v5601_v11 = vshll.u32 %v5297_v40, 16 }
 0x18c   : > { %v5607_v33 = vshll.u32 %v20128_v8, 16  ;;  %v20142_v56 = vadd.f32 %v2767_v30, %v2132_v55  ;;  %v2135_v32 = vadd.f32 %v16674_v63, %v19820_v53  ;;  %v5611_v42 = vshrl.u32 %v20128_v8, 16 }
 0x18d   : > { %v16711_v19 = vpop.f32.mrf.mxu0  ;;  %v5617_v34 = vshll.u32 %v20133_v59, 16  ;;  %v2044_v28 = vpop.f32.mrf.mxu1  ;;  %v5586_v40 = vsel %vm17904_vm4, %v5581_v51, %v5585_v22  ;;  %v5591_v45 = vrot.slane %v5590_v27, 4  ;;  %v5603_v30 = vrot.slane %v5601_v11, 5  ;;  %v20161_v11 = vld [vmem:[%s18815_s16 + $0xa4] sm:$0x1] }
 0x18e   : > { %16914 = vmatmul.mubr.msk.bf16.gmra.mxu0 %vm830_vm3, %v15062_v21  ;;  %v5609_v13 = vrot.slane %v5607_v33, 5  ;;  %v20151_v24 = vadd.f32 %v16708_v14, %v2135_v32  ;;  %v2133_v53 = vadd.f32 %v2044_v28, %v19828_v2  ;;  %v5613_v21 = vrot.slane %v5611_v42, 4  ;;  %v5303_v33 = vld [vmem:[%s18815_s16 + $0xa8] sm:$0xf] }
 0x18f   : > { %16917 = vmatprep.mubr.msk.bf16.mxu0 %vm830_vm3, %v15063_v15  ;;  %v2783_v63 = vpop.f32.mrf.mxu0  ;;  %v5619_v46 = vrot.slane %v5617_v34, 5  ;;  %v16677_v20 = vpop.f32.mrf.mxu1  ;;  %v5596_v51 = vsel %vm17904_vm4, %v5591_v45, %v5595_v48  ;;  %v5604_v27 = vor.u32 %v5603_v30, %v5600_v3  ;;  %v5622_v14 = vshrl.u32 %v5300_v5, 16  ;;  %v17606_v32 = vld [vmem:[%s18815_s16 + $0x84] sm:$0xff]  }
 0x190   : > { %16880 = vmatmul.mubr.msk.bf16.gmra.mxu1 %vm830_vm3, %v17604_v6  ;;  %v5625_v22 = vshll.u32 %v5300_v5, 16  ;;  %v20163_v9 = vadd.f32 %v2770_v35, %v2133_v53  ;;  %v2138_v2 = vadd.f32 %v16677_v20, %v19844_v10  ;;  %v15064_v55 = vcombine.low %v5586_v40, %v5596_v51  ;;  %v20175_v40 = vld [vmem:[%s18815_s16 + $0xac] sm:$0xf] }
 0x191   : > { %v16712_v39 = vpop.f32.mrf.mxu0  ;;  %16883 = vmatprep.mubr.msk.bf16.mxu1 %vm830_vm3, %v17605_v4  ;;  %v5614_v15 = vor.u32 %v5613_v21, %v5609_v13  ;;  %v2057_v6 = vpop.f32.mrf.mxu1  ;;  %v5605_v42 = vrot.slane %v5604_v27, 4  ;;  %v5624_v48 = vrot.slane %v5622_v14, 4  ;;  %v5631_v34 = vshll.u32 %v20155_v57, 16  ;;  %v17607_v27 = vld [vmem:[%s18815_s16 + $0x90] sm:$0xff]  }
 0x192   : > { %v5627_v3 = vrot.slane %v5625_v22, 5  ;;  %v20170_v5 = vadd.f32 %v16711_v19, %v2138_v2  ;;  %v2136_v35 = vadd.f32 %v2057_v6, %v19853_v43  ;;  %v5635_v4 = vshrl.u32 %v20155_v57, 16  ;;  %v5306_v2 = vld [vmem:[%s18815_s16 + $0xb4] sm:$0xf] }
 0x193   : > { %v2786_v10 = vpop.f32.mrf.mxu0  ;;  %v5615_v28 = vrot.slane %v5614_v15, 4  ;;  %v16678_v45 = vpop.f32.mrf.mxu1  ;;  %v5610_v30 = vsel %vm17904_vm4, %v5605_v42, %v5609_v13  ;;  %v5633_v21 = vrot.slane %v5631_v34, 5  ;;  %v5641_v20 = vshll.u32 %v20161_v11, 16 }
 0x194   : > { %v5628_v53 = vor.u32 %v5627_v3, %v5624_v48  ;;  %v20180_v51 = vadd.f32 %v2783_v63, %v2136_v35  ;;  %v2139_v19 = vadd.f32 %v16678_v45, %v19866_v62  ;;  %v5637_v22 = vrot.slane %v5635_v4, 4  ;;  %v20192_v35 = vld [vmem:[%s18815_s16 + $0xb0] sm:$0x1] }
 0x195   : > { %v16715_v43 = vpop.f32.mrf.mxu0  ;;  %v5620_v14 = vsel %vm17904_vm4, %v5615_v28, %v5619_v46  ;;  %v2060_v15 = vpop.f32.mrf.mxu1  ;;  %v5643_v42 = vrot.slane %v5641_v20, 5  ;;  %v5646_v48 = vshrl.u32 %v5303_v33, 16  ;;  %v5655_v4 = vshll.u32 %v20175_v40, 16 }
 0x196   : > { %16918 = vmatmul.mubr.msk.bf16.gmra.mxu0 %vm830_vm3, %v15064_v55  ;;  %v15065_v13 = vcombine.low %v5610_v30, %v5620_v14  ;;  %v5629_v6 = vrot.slane %v5628_v53, 4  ;;  %v20188_v3 = vadd.f32 %v16712_v39, %v2139_v19  ;;  %v2137_v63 = vadd.f32 %v2060_v15, %v19874_v60 }
 0x197   : > { %v2799_v62 = vpop.f32.mrf.mxu0  ;;  %v5638_v34 = vor.u32 %v5637_v22, %v5633_v21  ;;  %v5649_v55 = vshll.u32 %v5303_v33, 16  ;;  %v16681_v45 = vpop.f32.mrf.mxu1  ;;  %v5648_v28 = vrot.slane %v5646_v48, 4  ;;  %v5659_v39 = vshrl.u32 %v20175_v40, 16  ;;  %v20214_v48 = vld [vmem:[%s18815_s16 + $0xbc] sm:$0x1] }
 0x198   : > { %16884 = vmatmul.mubr.msk.bf16.gmra.mxu1 %vm830_vm3, %v17606_v32  ;;  %16921 = vmatprep.mubr.msk.bf16.mxu0 %vm830_vm3, %v15065_v13  ;;  %v5634_v46 = vsel %vm17904_vm4, %v5629_v6, %v5633_v21  ;;  %v20200_v30 = vadd.f32 %v2786_v10, %v2137_v63  ;;  %v2142_v60 = vadd.f32 %v16681_v45, %v19880_v61  ;;  %v5657_v21 = vrot.slane %v5655_v4, 5  ;;  %v17609_v45 = vld [vmem:[%s18815_s16 + $0xa8] sm:$0xff]  }
 0x199   : > { %v16716_v33 = vpop.f32.mrf.mxu0  ;;  %16887 = vmatprep.mubr.msk.bf16.mxu1 %vm830_vm3, %v17607_v27  ;;  %v5639_v32 = vrot.slane %v5638_v34, 4  ;;  %v5651_v53 = vrot.slane %v5649_v55, 5  ;;  %v2073_v20 = vpop.f32.mrf.mxu1  ;;  %v5661_v19 = vrot.slane %v5659_v39, 4  ;;  %v5665_v14 = vshll.u32 %v20192_v35, 16  ;;  %v20211_v27 = vld [vmem:[%s18815_s16 + $0xb8] sm:$0xf] }
 0x19a   : > { %25158 = vst [vmem:[#allocation3_spill] sm:$0xff] %v20200_v30  ;;  %v5670_v22 = vshrl.u32 %v5306_v2, 16  ;;  %v20205_v15 = vadd.f32 %v16715_v43, %v2142_v60  ;;  %v2140_v10 = vadd.f32 %v2073_v20, %v19886_v54  ;;  %v17608_v34 = vld [vmem:[%s18815_s16 + $0x9c] sm:$0xff]  }
 0x19b   : > { %v2802_v13 = vpop.f32.mrf.mxu0  ;;  %v5644_v61 = vsel %vm17904_vm4, %v5639_v32, %v5643_v42  ;;  %v5652_v6 = vor.u32 %v5651_v53, %v5648_v28  ;;  %v16682_v63 = vpop.f32.mrf.mxu1  ;;  %v5662_v4 = vor.u32 %v5661_v19, %v5657_v21  ;;  %v5667_v39 = vrot.slane %v5665_v14, 5 }
 0x19c   : > { %v15066_v55 = vcombine.low %v5634_v46, %v5644_v61  ;;  %v5672_v30 = vrot.slane %v5670_v22, 4  ;;  %v20218_v43 = vadd.f32 %v2799_v62, %v2140_v10  ;;  %v2143_v54 = vadd.f32 %v16682_v63, %v19901_v18  ;;  %v5987_v10 = vld [vmem:[%s18815_s16] sm:$0xe] }
 0x19d   : > { %v16719_v60 = vpop.f32.mrf.mxu0  ;;  %v5653_v20 = vrot.slane %v5652_v6, 4  ;;  %v5673_v42 = vshll.u32 %v5306_v2, 16  ;;  %v2076_v28 = vpop.f32.mrf.mxu1  ;;  %v5663_v32 = vrot.slane %v5662_v4, 4  ;;  %v5679_v53 = vshll.u32 %v20211_v27, 16  ;;  %v5988_v4 = vld [vmem:[%s18815_s16 + $0xc] sm:$0xe] }
 0x19e   : > { %16922 = vmatmul.mubr.msk.bf16.gmra.mxu0 %vm830_vm3, %v15066_v55  ;;  %v5683_v46 = vshrl.u32 %v20211_v27, 16  ;;  %v5689_v19 = vshll.u32 %v20214_v48, 16  ;;  %v20225_v14 = vadd.f32 %v16716_v33, %v2143_v54  ;;  %v2141_v62 = vadd.f32 %v2076_v28, %v19910_v29 }
 0x19f   : > { %v2815_v22 = vpop.f32.mrf.mxu0  ;;  %v5658_v18 = vsel %vm17904_vm4, %v5653_v20, %v5657_v21  ;;  %v5675_v2 = vrot.slane %v5673_v42, 5  ;;  %v16685_v61 = vpop.f32.mrf.mxu1  ;;  %v5668_v6 = vsel %vm17904_vm4, %v5663_v32, %v5667_v39  ;;  %v5681_v63 = vrot.slane %v5679_v53, 5  ;;  %v17691_v39 = vld [vmem:[%s18815_s16 + $0x4] sm:$0xf]  ;;  %v17692_v53 = vld [vmem:[%s18815_s16 + $0x8] sm:$0x1] }
 0x1a0   : > { %25159 = vst [vmem:[#allocation16_spill] sm:$0xff] %v20225_v14  ;;  %16888 = vmatmul.mubr.msk.bf16.gmra.mxu1 %vm830_vm3, %v17608_v34  ;;  %v5685_v55 = vrot.slane %v5683_v46, 4  ;;  %v5691_v33 = vrot.slane %v5689_v19, 5  ;;  %v20235_v54 = vadd.f32 %v2802_v13, %v2141_v62  ;;  %v2146_v29 = vadd.f32 %v16685_v61, %v19918_v23 }
 0x1a1   : > { %v16720_v28 = vpop.f32.mrf.mxu0  ;;  %16891 = vmatprep.mubr.msk.bf16.mxu1 %vm830_vm3, %v17609_v45  ;;  %v15067_v21 = vcombine.low %v5658_v18, %v5668_v6  ;;  %v5676_v20 = vor.u32 %v5675_v2, %v5672_v30  ;;  %v2089_v42 = vpop.f32.mrf.mxu1  ;;  %v15085_v14 = vrot.slane %v5987_v10, 9  ;;  %v6053_v32 = vrot.slane %v17691_v39, 5  ;;  %v17610_v18 = vld [vmem:[%s18815_s16 + $0xb4] sm:$0xff]  }
 0x1a2   : > { %v5686_v34 = vor.u32 %v5685_v55, %v5681_v63  ;;  %v6056_v46 = vrot.slane %v17692_v53, 5  ;;  %v20241_v19 = vadd.f32 %v16719_v60, %v2146_v29  ;;  %v2144_v13 = vadd.f32 %v2089_v42, %v19924_v7  ;;  %v17693_v55 = vld [vmem:[%s18815_s16 + $0x10] sm:$0xf]  ;;  %v5989_v39 = vld [vmem:[%s18815_s16 + $0x18] sm:$0xe] }
 0x1a3   : > { %v2818_v23 = vpop.f32.mrf.mxu0  ;;  %16925 = vmatprep.mubr.msk.bf16.mxu0 %vm830_vm3, %v15067_v21  ;;  %v5677_v45 = vrot.slane %v5676_v20, 4  ;;  %v15086_v62 = vrot.slane %v5988_v4, 9  ;;  %v16686_v30 = vpop.f32.mrf.mxu1  ;;  %v6054_v61 = vsel %vm18183_vm7, %v15085_v14, %v6053_v32  ;;  %v6055_v6 = vrot.slane %v6053_v32, 4  ;;  %v17694_v4 = vld [vmem:[%s18815_s16 + $0x14] sm:$0x1]  ;;  %v17611_v32 = vld [vmem:[%s18815_s16 + $0xc] sm:$0xff]  }
 0x1a4   : > { %v5687_v2 = vrot.slane %v5686_v34, 4  ;;  %v6060_v60 = vrot.slane %v17693_v55, 5  ;;  %v20249_v29 = vadd.f32 %v2815_v22, %v2144_v13  ;;  %v2147_v7 = vadd.f32 %v16686_v30, %v19937_v49 }
 0x1a5   : > { %v16723_v42 = vpop.f32.mrf.mxu0  ;;  %v5682_v21 = vsel %vm17904_vm4, %v5677_v45, %v5681_v63  ;;  %v6063_v20 = vrot.slane %v17694_v4, 5  ;;  %v2092_v53 = vpop.f32.mrf.mxu1  ;;  %v6057_v14 = vsel %vm18183_vm7, %v6055_v6, %v6056_v46  ;;  %v5990_v4 = vld [vmem:[%s18815_s16 + $0x24] sm:$0xe] }
 0x1a6   : > { %v5692_v34 = vsel %vm17904_vm4, %v5687_v2, %v5691_v33  ;;  %v20263_v22 = vsel %vm18183_vm7, %v15086_v62, %v6060_v60  ;;  %v6062_v49 = vrot.slane %v6060_v60, 4  ;;  %v20265_v13 = vadd.f32 %v16720_v28, %v2147_v7  ;;  %v5991_v7 = vld [vmem:[%s18815_s16 + $0x30] sm:$0xe] }
 0x1a7   : > { %v2145_v63 = vadd.f32 %v2092_v53, %v19946_v58  ;;  %v15068_v45 = vcombine.low %v5682_v21, %v5692_v34  ;;  %v2831_v30 = vpop.f32.mrf.mxu0  ;;  %v15102_v55 = vcombine.low %v6054_v61, %v6057_v14  ;;  %v16689_v33 = vpop.f32.mrf.mxu1  ;;  %v20274_v62 = vsel %vm879_vm0, %v19987_v1, 0  ;;  %v17695_v1 = vld [vmem:[%s18815_s16 + $0x1c] sm:$0xf]  ;;  %v17698_v53 = vld [vmem:[%s18815_s16 + $0x2c] sm:$0x1] }
 0x1a8   : > { %16892 = vmatmul.mubr.msk.bf16.gmra.mxu1 %vm830_vm3, %v17610_v18  ;;  %v6064_v46 = vsel %vm18183_vm7, %v6062_v49, %v6063_v20  ;;  %v20278_v58 = vsel %vm879_vm0, %v19965_v52, 0  ;;  %v15087_v28 = vrot.slane %v5989_v39, 9  ;;  %v2150_v61 = vadd.f32 %v16689_v33, %v19957_v31  ;;  %v17696_v52 = vld [vmem:[%s18815_s16 + $0x20] sm:$0x1]  ;;  %v17697_v39 = vld [vmem:[%s18815_s16 + $0x28] sm:$0xf] }
 0x1a9   : > { %v20280_v2 = vadd.f32 %v2818_v23, %v2145_v63  ;;  %16926 = vmatmul.mubr.msk.bf16.gmra.mxu0 %vm830_vm3, %v15068_v45  ;;  %v16724_v18 = vpop.f32.mrf.mxu0  ;;  %16931 = vmatprep.mubr.msk.bf16.mxu1 %vm830_vm3, %v15102_v55  ;;  %v15103_v6 = vcombine.low %v20263_v22, %v6064_v46  ;;  %v6067_v60 = vrot.slane %v17695_v1, 5  ;;  %v2105_v21 = vpop.f32.mrf.mxu1  ;;  %v6070_v23 = vrot.slane %v17696_v52, 5  ;;  %v17699_v46 = vld [vmem:[%s18815_s16 + $0x34] sm:$0xf]  ;;  %v17612_v52 = vld [vmem:[%s18815_s16 + $0x18] sm:$0xff]  }
 0x1aa   : > { %16965 = vmatprep.mubr.msk.bf16.mxu0 %vm830_vm3, %v17611_v32  ;;  %v15088_v20 = vrot.slane %v5990_v4, 9  ;;  %v6074_v31 = vrot.slane %v17697_v39, 5  ;;  %v6077_v34 = vrot.slane %v17698_v53, 5  ;;  %v20292_v14 = vadd.f32 %v16723_v42, %v2150_v61  ;;  %v5992_v42 = vld [vmem:[%s18815_s16 + $0x3c] sm:$0xe] }
 0x1ab   : > { %v2148_v22 = vadd.f32 %v2105_v21, %v19967_v17  ;;  %v2834_v49 = vpop.f32.mrf.mxu0  ;;  %v6068_v63 = vsel %vm18183_vm7, %v15087_v28, %v6067_v60  ;;  %v6069_v32 = vrot.slane %v6067_v60, 4  ;;  %v16690_v45 = vpop.f32.mrf.mxu1  ;;  %v15089_v33 = vrot.slane %v5991_v7, 9  ;;  %v17700_v60 = vld [vmem:[%s18815_s16 + $0x38] sm:$0x1] }
 0x1ac   : > { %v20299_v55 = vsel %vm18183_vm7, %v15088_v20, %v6074_v31  ;;  %v6076_v4 = vrot.slane %v6074_v31, 4  ;;  %v6081_v1 = vrot.slane %v17699_v46, 5  ;;  %v2151_v17 = vadd.f32 %v16690_v45, %v19989_v38  ;;  %v5993_v20 = vld [vmem:[%s18815_s16 + $0x48] sm:$0xe]  ;;  %v20350_v46 = vld [vmem:[%s24893_s3 + $0x20] sm:$0x3] }
 0x1ad   : > { %v20303_v61 = vadd.f32 %v2831_v30, %v2148_v22  ;;  %v16763_v21 = vpop.f32.mrf.mxu0  ;;  %v6071_v28 = vsel %vm18183_vm7, %v6069_v32, %v6070_v23  ;;  %v6084_v39 = vrot.slane %v17700_v60, 5  ;;  %v2108_v31 = vpop.f32.mrf.mxu1  ;;  %v17613_v45 = vld [vmem:[%s18815_s16 + $0x24] sm:$0xff]  }
 0x1ae   : > { %v15104_v7 = vcombine.low %v6068_v63, %v6071_v28  ;;  %v20313_v30 = vsel %vm18183_vm7, %v6076_v4, %v6077_v34  ;;  %v20317_v38 = vsel %vm18183_vm7, %v15089_v33, %v6081_v1  ;;  %v6083_v53 = vrot.slane %v6081_v1, 4  ;;  %v5994_v28 = vld [vmem:[%s18815_s16 + $0x54] sm:$0xe]  ;;  %v17702_v33 = vld [vmem:[%s18815_s16 + $0x44] sm:$0x1] }
 0x1af   : > { %25161 = vst [vmem:[#allocation19_spill] sm:$0xff] %v20303_v61  ;;  %v20319_v22 = vadd.f32 %v16724_v18, %v2151_v17  ;;  %v2149_v23 = vadd.f32 %v2108_v31, %v20001_v47  ;;  %v3548_v32 = vpop.f32.mrf.mxu0  ;;  %v15090_v63 = vrot.slane %v5992_v42, 9  ;;  %v16729_v60 = vpop.f32.mrf.mxu1  ;;  %v17701_v18 = vld [vmem:[%s18815_s16 + $0x40] sm:$0xf]  ;;  %v6091_v47 = vrot.slane %v17702_v33, 5 }
 0x1b0   : > { %16932 = vmatmul.mubr.msk.bf16.vlgmr.msra.gmra.mxu1 %vm830_vm3, %v15103_v6  ;;  %v20329_v34 = vsel %vm18183_vm7, %v6083_v53, %v6084_v39  ;;  %v6088_v4 = vrot.slane %v17701_v18, 5  ;;  %v15091_v1 = vrot.slane %v5993_v20, 9  ;;  %v20336_v17 = vld [vmem:[%s24893_s3 + $0x1e] sm:$0x3]  ;;  %v25164_v31 = vld [vmem:[#allocation22_spill] sm:$0xff] }
 0x1b1   : > { %25162 = vst [vmem:[#allocation21_spill] sm:$0xff] %v20319_v22  ;;  %v20338_v42 = vadd.f32 %v2834_v49, %v2149_v23  ;;  %v3318_v6 = vadd.f32 %v16729_v60, %v25164_v31  ;;  %16966 = vmatmul.mubr.msk.bf16.vlgmr.msra.gmra.mxu0 %vm830_vm3, %v17612_v52  ;;  %16998 = vmatpush3.bf16.msra.mxu1 %v20274_v62  ;;  %v16764_v39 = vpop.f32.mrf.mxu0  ;;  %v17703_v18 = vld [vmem:[%s18815_s16 + $0x4c] sm:$0xf]  ;;  %v5995_v33 = vld [vmem:[%s18815_s16 + $0x60] sm:$0xe]  ;;  %v3189_v49 = vpop.f32.mrf.mxu1  ;;  %v15092_v60 = vrot.slane %v5994_v28, 9 }
 0x1b2   : > { %v15106_v53 = vcombine.low %v20317_v38, %v20329_v34  ;;  %v6095_v20 = vrot.slane %v17703_v18, 5  ;;  %17032 = vmatpush3.bf16.msra.mxu0 %v20278_v58  ;;  %16935 = vmatprep.mubr.msk.bf16.mxu1 %vm830_vm3, %v15104_v7  ;;  %v20356_v62 = vsel %vm18183_vm7, %v15090_v63, %v6088_v4  ;;  %v6090_v52 = vrot.slane %v6088_v4, 4  ;;  %v17704_v38 = vld [vmem:[%s18815_s16 + $0x50] sm:$0x1]  ;;  %v25166_v28 = vld [vmem:[#allocation13_spill] sm:$0xff] }
 0x1b3   : > { %25163 = vst [vmem:[#allocation23_spill] sm:$0xff] %v20338_v42  ;;  %v6098_v23 = vrot.slane %v17704_v38, 5  ;;  %v20359_v34 = vadd.f32 %v16763_v21, %v3318_v6  ;;  %v3316_v31 = vadd.f32 %v3189_v49, %v20023_v41  ;;  %v3551_v18 = vpop.f32.mrf.mxu0  ;;  %16969 = vmatprep.mubr.msk.bf16.mxu0 %vm830_vm3, %v17613_v45  ;;  %17491 = vmatprep.subr.msk.bf16.mxu1 %vm879_vm0, %v20336_v17  ;;  %v16730_v63 = vpop.f32.mrf.mxu1  ;;  %v6102_v41 = vrot.slane %v25166_v28, 5  ;;  %v25167_v4 = vld [vmem:[#allocation4_spill] sm:$0xff]  ;;  %v5996_v45 = vld [vmem:[%s18815_s16 + $0x6c] sm:$0xe] }
 0x1b4   : > { %v20365_v58 = vsel %vm18183_vm7, %v15091_v1, %v6095_v20  ;;  %v6097_v7 = vrot.slane %v6095_v20, 4  ;;  %v20371_v21 = vsel %vm18183_vm7, %v6090_v52, %v6091_v47  ;;  %v6105_v6 = vrot.slane %v25167_v4, 5  ;;  %17492 = vmatprep.subr.msk.bf16.mxu0 %vm879_vm0, %v20350_v46  ;;  %v5997_v42 = vld [vmem:[%s18815_s16 + $0x78] sm:$0xe] }
 0x1b5   : > { %25165 = vst [vmem:[#allocation26_spill] sm:$0xff] %v20359_v34  ;;  %v15093_v49 = vrot.slane %v5995_v33, 9  ;;  %v20378_v1 = vadd.f32 %v3548_v32, %v3316_v31  ;;  %v3319_v20 = vadd.f32 %v16730_v63, %v20033_v37  ;;  %v16767_v38 = vpop.f32.mrf.mxu0  ;;  %v17614_v34 = vld [vmem:[%s18815_s16 + $0x30] sm:$0xff]   ;;  %v3192_v28 = vpop.f32.mrf.mxu1  ;;  %v17615_v33 = vld [vmem:[%s18815_s16 + $0x3c] sm:$0xff]   ;;  %v20393_v32 = vsel %vm18183_vm7, %v15092_v60, %v6102_v41 }
 0x1b6   : > { %v20386_v52 = vsel %vm18183_vm7, %v6097_v7, %v6098_v23  ;;  %v6104_v37 = vrot.slane %v6102_v41, 4  ;;  %v6109_v31 = vrot.slane %v20015_v0, 5  ;;  %v3317_v47 = vadd.f32 %v3192_v28, %v20046_v26  ;;  %v25174_v28 = vld [vmem:[#allocation18_spill] sm:$0xff] }
 0x1b7   : > { %25168 = vst [vmem:[#allocation27_spill] sm:$0xff] %v20378_v1  ;;  %v20396_v63 = vadd.f32 %v16764_v39, %v3319_v20  ;;  %v3564_v1 = vpop.f32.mrf.mxu0  ;;  %v6112_v23 = vrot.slane %v20021_v12, 5  ;;  %v15094_v7 = vrot.slane %v5996_v45, 9  ;;  %v16733_v22 = vpop.f32.mrf.mxu1  ;;  %v25170_v4 = vcombine.low %v20299_v55, %v20313_v30  ;;  %v5998_v45 = vld [vmem:[%s18815_s16 + $0x84] sm:$0xe] }
 0x1b8   : > { %v20407_v60 = vsel %vm18183_vm7, %v6104_v37, %v6105_v6  ;;  %v20411_v0 = vsel %vm18183_vm7, %v15093_v49, %v6109_v31  ;;  %v6111_v26 = vrot.slane %v6109_v31, 4  ;;  %v6116_v12 = vrot.slane %v20044_v44, 5  ;;  %v25175_v31 = vld [vmem:[#allocation24_spill] sm:$0xff] }
 0x1b9   : > { %25169 = vst [vmem:[#allocation29_spill] sm:$0xff] %v20396_v63  ;;  %16936 = vmatmul.mubr.msk.bf16.gmra.mxu1 %vm830_vm3, %v25170_v4  ;;  %v20414_v39 = vadd.f32 %v3551_v18, %v3317_v47  ;;  %v3322_v41 = vadd.f32 %v16733_v22, %v20055_v16  ;;  %16970 = vmatmul.mubr.msk.bf16.gmra.mxu0 %vm830_vm3, %v17614_v34  ;;  %v16768_v55 = vpop.f32.mrf.mxu0  ;;  %v6119_v6 = vrot.slane %v20053_v25, 5  ;;  %v3205_v49 = vpop.f32.mrf.mxu1  ;;  %v25173_v18 = vld [vmem:[#allocation17_spill] sm:$0xff]  ;;  %v17616_v47 = vld [vmem:[%s18815_s16 + $0x48] sm:$0xff]  }
 0x1ba   : > { %16939 = vmatprep.mubr.msk.bf16.mxu1 %vm830_vm3, %v15106_v53  ;;  %16973 = vmatprep.mubr.msk.bf16.mxu0 %vm830_vm3, %v17615_v33  ;;  %v20426_v44 = vsel %vm18183_vm7, %v6111_v26, %v6112_v23  ;;  %v20430_v16 = vsel %vm18183_vm7, %v15094_v7, %v6116_v12  ;;  %v6118_v22 = vrot.slane %v6116_v12, 4  ;;  %v15095_v53 = vrot.slane %v5997_v42, 9  ;;  %v5999_v26 = vld [vmem:[%s18815_s16 + $0x90] sm:$0xe] }
 0x1bb   : > { %25171 = vst [vmem:[#allocation6_spill] sm:$0xff] %v20414_v39  ;;  %v20432_v34 = vadd.f32 %v16767_v38, %v3322_v41  ;;  %v3320_v25 = vadd.f32 %v3205_v49, %v25173_v18  ;;  %v3567_v20 = vpop.f32.mrf.mxu0  ;;  %v6123_v33 = vrot.slane %v25174_v28, 5  ;;  %v16734_v4 = vpop.f32.mrf.mxu1  ;;  %v6126_v23 = vrot.slane %v25175_v31, 5  ;;  %v25176_v38 = vld [vmem:[#allocation7_spill] sm:$0xff]  ;;  %v25178_v41 = vld [vmem:[#allocation20_spill] sm:$0xff] }
 0x1bc   : > { %v20440_v37 = vsel %vm18183_vm7, %v6118_v22, %v6119_v6  ;;  %v15096_v42 = vrot.slane %v5998_v45, 9  ;;  %v6130_v7 = vrot.slane %v25176_v38, 5  ;;  %v3323_v49 = vadd.f32 %v16734_v4, %v25178_v41  ;;  %v6000_v6 = vld [vmem:[%s18815_s16 + $0x9c] sm:$0xe]  ;;  %v17617_v31 = vld [vmem:[%s18815_s16 + $0x54] sm:$0xff]  }
 0x1bd   : > { %25172 = vst [vmem:[#allocation5_spill] sm:$0xff] %v20432_v34  ;;  %v20445_v12 = vadd.f32 %v3564_v1, %v3320_v25  ;;  %v16771_v18 = vpop.f32.mrf.mxu0  ;;  %v20453_v30 = vsel %vm18183_vm7, %v15095_v53, %v6123_v33  ;;  %v3208_v22 = vpop.f32.mrf.mxu1  ;;  %v6125_v45 = vrot.slane %v6123_v33, 4  ;;  %v25179_v4 = vld [vmem:[#allocation9_spill] sm:$0xff]  ;;  %v15097_v39 = vrot.slane %v5999_v26, 9  ;;  %v6001_v26 = vld [vmem:[%s18815_s16 + $0xa8] sm:$0xe] }
 0x1be   : > { %v20459_v1 = vsel %vm18183_vm7, %v15096_v42, %v6130_v7  ;;  %v6132_v25 = vrot.slane %v6130_v7, 4  ;;  %v6133_v38 = vrot.slane %v25179_v4, 5  ;;  %v20462_v41 = vadd.f32 %v16768_v55, %v3323_v49 }
 0x1bf   : > { %25177 = vst [vmem:[#allocation12_spill] sm:$0xff] %v20445_v12  ;;  %v25180_v12 = vld [vmem:[#allocation25_spill] sm:$0xff]  ;;  %v3580_v34 = vpop.f32.mrf.mxu0  ;;  %v6137_v53 = vrot.slane %v20128_v8, 5  ;;  %v16737_v63 = vpop.f32.mrf.mxu1  ;;  %v25181_v61 = vcombine.low %v20356_v62, %v20371_v21  ;;  %v20472_v33 = vsel %vm18183_vm7, %v6125_v45, %v6126_v23  ;;  %v6140_v42 = vrot.slane %v20133_v59, 5 }
 0x1c0   : > { %v3321_v28 = vadd.f32 %v3208_v22, %v25180_v12  ;;  %v20476_v55 = vsel %vm18183_vm7, %v6132_v25, %v6133_v38  ;;  %v15098_v7 = vrot.slane %v6000_v6, 9  ;;  %v25182_v12 = vld [vmem:[#allocation28_spill] sm:$0xff]  ;;  %v25183_v62 = vcombine.low %v20365_v58, %v20386_v52  ;;  %v25185_v6 = vld [vmem:[#allocation10_spill] sm:$0xff] }
 0x1c1   : > { %16940 = vmatmul.mubr.msk.bf16.gmra.mxu1 %vm830_vm3, %v25181_v61  ;;  %v3326_v49 = vadd.f32 %v16737_v63, %v25182_v12  ;;  %16974 = vmatmul.mubr.msk.bf16.gmra.mxu0 %vm830_vm3, %v17616_v47  ;;  %v16772_v61 = vpop.f32.mrf.mxu0  ;;  %v6139_v23 = vrot.slane %v6137_v53, 4  ;;  %v3221_v59 = vpop.f32.mrf.mxu1  ;;  %v20495_v63 = vsel %vm18183_vm7, %v15097_v39, %v6137_v53  ;;  %v6144_v47 = vrot.slane %v20155_v57, 5  ;;  %v6002_v52 = vld [vmem:[%s18815_s16 + $0xb4] sm:$0xe]  ;;  %v25187_v53 = vld [vmem:[#allocation11_spill] sm:$0xff] }
 0x1c2   : > { %v20480_v8 = vadd.f32 %v3567_v20, %v3321_v28  ;;  %16943 = vmatprep.mubr.msk.bf16.mxu1 %vm830_vm3, %v25183_v62  ;;  %16977 = vmatprep.mubr.msk.bf16.mxu0 %vm830_vm3, %v17617_v31  ;;  %v6147_v58 = vrot.slane %v20161_v11, 5  ;;  %v3324_v22 = vadd.f32 %v3221_v59, %v25185_v6  ;;  %v15099_v25 = vrot.slane %v6001_v26, 9  ;;  %v17619_v6 = vld [vmem:[%s18815_s16 + $0x6c] sm:$0xff]   ;;  %v17620_v20 = vld [vmem:[%s18815_s16 + $0x78] sm:$0xff]  }
 0x1c3   : > { %v20500_v28 = vadd.f32 %v16771_v18, %v3326_v49  ;;  %v3583_v45 = vpop.f32.mrf.mxu0  ;;  %v20505_v31 = vsel %vm18183_vm7, %v6139_v23, %v6140_v42  ;;  %v16738_v39 = vpop.f32.mrf.mxu1  ;;  %v20511_v11 = vsel %vm18183_vm7, %v15098_v7, %v6144_v47  ;;  %v6146_v18 = vrot.slane %v6144_v47, 4  ;;  %v17618_v42 = vld [vmem:[%s18815_s16 + $0x60] sm:$0xff]   ;;  %v15199_v23 = vld [vmem:[%s18815_s16 + $0xc] sm:$0xf] }
 0x1c4   : > { %v6151_v4 = vrot.slane %v20175_v40, 5  ;;  %v20514_v38 = vadd.f32 %v3580_v34, %v3324_v22  ;;  %v3327_v12 = vadd.f32 %v16738_v39, %v25187_v53  ;;  %v6154_v26 = vrot.slane %v20192_v35, 5  ;;  %v25189_v39 = vld [vmem:[#allocation14_spill] sm:$0xff] }
 0x1c5   : > { %25184 = vst [vmem:[#allocation8_spill] sm:$0xff] %v20500_v28  ;;  %v16775_v49 = vpop.f32.mrf.mxu0  ;;  %v15100_v62 = vrot.slane %v6002_v52, 9  ;;  %v3224_v59 = vpop.f32.mrf.mxu1  ;;  %v20523_v7 = vsel %vm18183_vm7, %v6146_v18, %v6147_v58  ;;  %v6158_v47 = vrot.slane %v20211_v27, 5  ;;  %v6161_v57 = vrot.slane %v20214_v48, 5  ;;  %v15200_v58 = vld [vmem:[%s18815_s16 + $0x10] sm:$0xf] }
 0x1c6   : > { %25186 = vst [vmem:[#allocation22_spill] sm:$0xff] %v20514_v38  ;;  %v20527_v40 = vsel %vm18183_vm7, %v15099_v25, %v6151_v4  ;;  %v6153_v34 = vrot.slane %v6151_v4, 4  ;;  %v20530_v22 = vadd.f32 %v16772_v61, %v3327_v12  ;;  %v3325_v53 = vadd.f32 %v3224_v59, %v25189_v39 }
 0x1c7   : > { %v3596_v35 = vpop.f32.mrf.mxu0  ;;  %v16741_v18 = vpop.f32.mrf.mxu1  ;;  %v25190_v25 = vcombine.low %v20393_v32, %v20407_v60  ;;  %v20547_v61 = vsel %vm18183_vm7, %v15100_v62, %v6158_v47  ;;  %v6160_v4 = vrot.slane %v6158_v47, 4  ;;  %v6865_v12 = vshrl.u32 %v15199_v23, 16 }
 0x1c8   : > { %25188 = vst [vmem:[#allocation13_spill] sm:$0xff] %v20530_v22  ;;  %v20543_v27 = vsel %vm18183_vm7, %v6153_v34, %v6154_v26  ;;  %v20549_v59 = vadd.f32 %v3583_v45, %v3325_v53  ;;  %v3330_v48 = vadd.f32 %v16741_v18, %v20135_v50  ;;  %v25192_v32 = vcombine.low %v20411_v0, %v20426_v44  ;;  %v15201_v26 = vld [vmem:[%s18815_s16 + $0x14] sm:$0x1]  ;;  %v15280_v34 = vld [vmem:[%s18815_s16 + $0xc] sm:$0xe] }
 0x1c9   : > { %16944 = vmatmul.mubr.msk.bf16.gmra.mxu1 %vm830_vm3, %v25190_v25  ;;  %16978 = vmatmul.mubr.msk.bf16.gmra.mxu0 %vm830_vm3, %v17618_v42  ;;  %v16776_v39 = vpop.f32.mrf.mxu0  ;;  %v6868_v62 = vshll.u32 %v15199_v23, 16  ;;  %v3237_v47 = vpop.f32.mrf.mxu1  ;;  %v20564_v50 = vsel %vm18183_vm7, %v6160_v4, %v6161_v57  ;;  %v6867_v45 = vrot.slane %v6865_v12, 4  ;;  %v6874_v42 = vshll.u32 %v15200_v58, 16  ;;  %v15203_v22 = vld [vmem:[%s18815_s16 + $0x1c] sm:$0xf] }
 0x1ca   : > { %25191 = vst [vmem:[#allocation4_spill] sm:$0xff] %v20549_v59  ;;  %16947 = vmatprep.mubr.msk.bf16.mxu1 %vm830_vm3, %v25192_v32  ;;  %16981 = vmatprep.mubr.msk.bf16.mxu0 %vm830_vm3, %v17619_v6  ;;  %v6878_v0 = vshrl.u32 %v15200_v58, 16  ;;  %v20566_v44 = vadd.f32 %v16775_v49, %v3330_v48  ;;  %v3328_v53 = vadd.f32 %v3237_v47, %v20142_v56  ;;  %v15202_v32 = vld [vmem:[%s18815_s16 + $0x18] sm:$0xf]  ;;  %v6884_v4 = vshll.u32 %v15201_v26, 16 }
 0x1cb   : > { %v3599_v18 = vpop.f32.mrf.mxu0  ;;  %v6870_v25 = vrot.slane %v6868_v62, 5  ;;  %v16742_v6 = vpop.f32.mrf.mxu1  ;;  %v6876_v60 = vrot.slane %v6874_v42, 5  ;;  %v15296_v12 = vrot.slane %v15280_v34, 9  ;;  %v7608_v47 = vrot.slane %v15200_v58, 5 }
 0x1cc   : > { %25193 = vst [vmem:[#allocation17_spill] sm:$0xff] %v20566_v44  ;;  %v6880_v57 = vrot.slane %v6878_v0, 4  ;;  %v20572_v52 = vadd.f32 %v3596_v35, %v3328_v53  ;;  %v3331_v49 = vadd.f32 %v16742_v6, %v20151_v24  ;;  %v17621_v44 = vld [vmem:[%s18815_s16 + $0x84] sm:$0xff]   ;;  %v6886_v23 = vrot.slane %v6884_v4, 5 }
 0x1cd   : > { %v16779_v48 = vpop.f32.mrf.mxu0  ;;  %v6871_v56 = vor.u32 %v6870_v25, %v6867_v45  ;;  %v3240_v21 = vpop.f32.mrf.mxu1  ;;  %v7611_v62 = vrot.slane %v15201_v26, 5  ;;  %v6889_v38 = vshrl.u32 %v15202_v32, 16  ;;  %v20583_v24 = vsel %vm18183_vm7, %v15296_v12, %v7608_v47 }
 0x1ce   : > { %v6881_v59 = vor.u32 %v6880_v57, %v6876_v60  ;;  %v20578_v28 = vadd.f32 %v16776_v39, %v3331_v49  ;;  %v3329_v42 = vadd.f32 %v3240_v21, %v20163_v9  ;;  %v25194_v58 = vcombine.low %v20430_v16, %v20440_v37  ;;  %v15204_v37 = vld [vmem:[%s18815_s16 + $0x20] sm:$0x1] }
 0x1cf   : > { %v3612_v35 = vpop.f32.mrf.mxu0  ;;  %v6872_v34 = vrot.slane %v6871_v56, 4  ;;  %v16745_v45 = vpop.f32.mrf.mxu1  ;;  %v7610_v0 = vrot.slane %v7608_v47, 4  ;;  %v6891_v53 = vrot.slane %v6889_v38, 4  ;;  %v6892_v39 = vshll.u32 %v15202_v32, 16 }
 0x1d0   : > { %v6882_v26 = vrot.slane %v6881_v59, 4  ;;  %v20589_v25 = vadd.f32 %v3599_v18, %v3329_v42  ;;  %v3334_v9 = vadd.f32 %v16745_v45, %v20170_v5  ;;  %v25195_v6 = vcombine.low %v20453_v30, %v20472_v33  ;;  %v15281_v33 = vld [vmem:[%s18815_s16 + $0x18] sm:$0xe] }
 0x1d1   : > { %16948 = vmatmul.mubr.msk.bf16.gmra.mxu1 %vm830_vm3, %v25194_v58  ;;  %16982 = vmatmul.mubr.msk.bf16.gmra.mxu0 %vm830_vm3, %v17620_v20  ;;  %v16780_v21 = vpop.f32.mrf.mxu0  ;;  %v6877_v16 = vsel %vm17904_vm4, %v6872_v34, %v6876_v60  ;;  %v6898_v59 = vshll.u32 %v15203_v22, 16  ;;  %v3253_v38 = vpop.f32.mrf.mxu1  ;;  %v20605_v5 = vsel %vm18183_vm7, %v7610_v0, %v7611_v62  ;;  %v6894_v20 = vrot.slane %v6892_v39, 5 }
 0x1d2   : > { %16951 = vmatprep.mubr.msk.bf16.mxu1 %vm830_vm3, %v25195_v6  ;;  %16985 = vmatprep.mubr.msk.bf16.mxu0 %vm830_vm3, %v17621_v44  ;;  %v6887_v18 = vsel %vm17904_vm4, %v6882_v26, %v6886_v23  ;;  %v6902_v30 = vshrl.u32 %v15203_v22, 16  ;;  %v20608_v32 = vadd.f32 %v16779_v48, %v3334_v9  ;;  %v3332_v60 = vadd.f32 %v3253_v38, %v20180_v51  ;;  %v17622_v51 = vld [vmem:[%s18815_s16 + $0x90] sm:$0xff]   ;;  %v17623_v26 = vld [vmem:[%s18815_s16 + $0x9c] sm:$0xff]  }
 0x1d3   : > { %v3615_v57 = vpop.f32.mrf.mxu0  ;;  %v20611_v4 = vcombine.low %v6877_v16, %v6887_v18  ;;  %v15313_v44 = vcombine.low %v20583_v24, %v20605_v5  ;;  %v16746_v23 = vpop.f32.mrf.mxu1  ;;  %v6895_v12 = vor.u32 %v6894_v20, %v6891_v53  ;;  %v6900_v49 = vrot.slane %v6898_v59, 5  ;;  %v15205_v53 = vld [vmem:[%s18815_s16 + $0x24] sm:$0xf]  ;;  %v25196_v59 = vld [vmem:[#allocation3_spill] sm:$0xff]  ;;  %v15284_v24 = vld [vmem:[%s18815_s16 + $0x3c] sm:$0xe] }
 0x1d4   : > { %v6904_v56 = vrot.slane %v6902_v30, 4  ;;  %v6908_v47 = vshll.u32 %v15204_v37, 16  ;;  %v20615_v62 = vadd.f32 %v3612_v35, %v3332_v60  ;;  %v3335_v48 = vadd.f32 %v16746_v23, %v20188_v3  ;;  %v15206_v20 = vld [vmem:[%s18815_s16 + $0x28] sm:$0xf] }
 0x1d5   : > { %v16783_v42 = vpop.f32.mrf.mxu0  ;;  %v15297_v34 = vrot.slane %v15281_v33, 9  ;;  %v7615_v45 = vrot.slane %v15203_v22, 5  ;;  %v3256_v58 = vpop.f32.mrf.mxu1  ;;  %v6896_v0 = vrot.slane %v6895_v12, 4  ;;  %v7618_v6 = vrot.slane %v15204_v37, 5 }
 0x1d6   : > { %v6905_v39 = vor.u32 %v6904_v56, %v6900_v49  ;;  %v6910_v9 = vrot.slane %v6908_v47, 5  ;;  %v20621_v16 = vadd.f32 %v16780_v21, %v3335_v48  ;;  %v3333_v38 = vadd.f32 %v3256_v58, %v25196_v59  ;;  %v25199_v59 = vld [vmem:[#allocation16_spill] sm:$0xff] }
 0x1d7   : > { %v3628_v35 = vpop.f32.mrf.mxu0  ;;  %v20626_v3 = vsel %vm18183_vm7, %v15297_v34, %v7615_v45  ;;  %v7617_v18 = vrot.slane %v7615_v45, 4  ;;  %v16749_v22 = vpop.f32.mrf.mxu1  ;;  %v25197_v30 = vcombine.low %v20459_v1, %v20476_v55  ;;  %v6901_v21 = vsel %vm17904_vm4, %v6896_v0, %v6900_v49  ;;  %v15207_v49 = vld [vmem:[%s18815_s16 + $0x2c] sm:$0x1] }
 0x1d8   : > { %v6906_v37 = vrot.slane %v6905_v39, 4  ;;  %v20637_v33 = vsel %vm879_vm0, %v20336_v17, 0  ;;  %v20641_v60 = vsel %vm879_vm0, %v20350_v46, 0  ;;  %v20643_v23 = vadd.f32 %v3615_v57, %v3333_v38 }
 0x1d9   : > { %16952 = vmatmul.mubr.msk.bf16.gmra.mxu1 %vm830_vm3, %v25197_v30  ;;  %v3338_v12 = vadd.f32 %v16749_v22, %v20205_v15  ;;  %16986 = vmatmul.mubr.msk.bf16.gmra.mxu0 %vm830_vm3, %v17622_v51  ;;  %v16784_v1 = vpop.f32.mrf.mxu0  ;;  %v25198_v55 = vcombine.low %v20495_v63, %v20505_v31  ;;  %v20653_v17 = vsel %vm18183_vm7, %v7617_v18, %v7618_v6  ;;  %v6913_v56 = vshrl.u32 %v15205_v53, 16  ;;  %v3269_v46 = vpop.f32.mrf.mxu1  ;;  %v15282_v31 = vld [vmem:[%s18815_s16 + $0x24] sm:$0xe]  ;;  %v17624_v18 = vld [vmem:[%s18815_s16 + $0xa8] sm:$0xff]  }
 0x1da   : > { %16989 = vmatprep.mubr.msk.bf16.mxu0 %vm830_vm3, %v17623_v26  ;;  %v6911_v15 = vsel %vm17904_vm4, %v6906_v37, %v6910_v9  ;;  %v15314_v57 = vcombine.low %v20626_v3, %v20653_v17  ;;  %v6916_v47 = vshll.u32 %v15205_v53, 16  ;;  %v6922_v63 = vshll.u32 %v15206_v20, 16 }
 0x1db   : > { %16955 = vmatprep.mubr.msk.bf16.mxu1 %vm830_vm3, %v25198_v55  ;;  %v20662_v48 = vadd.f32 %v16783_v42, %v3338_v12  ;;  %v3336_v51 = vadd.f32 %v3269_v46, %v20218_v43  ;;  %v3631_v34 = vpop.f32.mrf.mxu0  ;;  %v20665_v45 = vcombine.low %v6901_v21, %v6911_v15  ;;  %v6915_v58 = vrot.slane %v6913_v56, 4  ;;  %v16750_v26 = vpop.f32.mrf.mxu1  ;;  %v15208_v43 = vld [vmem:[%s18815_s16 + $0x30] sm:$0xf]  ;;  %v17625_v12 = vld [vmem:[%s18815_s16 + $0xb4] sm:$0xff]  }
 0x1dc   : > { %v6918_v0 = vrot.slane %v6916_v47, 5  ;;  %v6924_v39 = vrot.slane %v6922_v63, 5  ;;  %v6926_v9 = vshrl.u32 %v15206_v20, 16  ;;  %v6932_v6 = vshll.u32 %v15207_v49, 16  ;;  %v15209_v15 = vld [vmem:[%s18815_s16 + $0x34] sm:$0xf] }
 0x1dd   : > { %v20667_v53 = vadd.f32 %v3628_v35, %v3336_v51  ;;  %v3339_v38 = vadd.f32 %v16750_v26, %v25199_v59  ;;  %v16787_v42 = vpop.f32.mrf.mxu0  ;;  %v15298_v22 = vrot.slane %v15282_v31, 9  ;;  %v7622_v30 = vrot.slane %v15206_v20, 5  ;;  %v3272_v37 = vpop.f32.mrf.mxu1 }
 0x1de   : > { %v6919_v21 = vor.u32 %v6918_v0, %v6915_v58  ;;  %v6928_v55 = vrot.slane %v6926_v9, 4  ;;  %v6934_v56 = vrot.slane %v6932_v6, 5  ;;  %v7625_v46 = vrot.slane %v15207_v49, 5 }
 0x1df   : > { %v20674_v47 = vadd.f32 %v16784_v1, %v3339_v38  ;;  %v3337_v63 = vadd.f32 %v3272_v37, %v20235_v54  ;;  %v3644_v35 = vpop.f32.mrf.mxu0  ;;  %v20679_v51 = vsel %vm18183_vm7, %v15298_v22, %v7622_v30  ;;  %v7624_v20 = vrot.slane %v7622_v30, 4  ;;  %v16753_v31 = vpop.f32.mrf.mxu1  ;;  %v15283_v22 = vld [vmem:[%s18815_s16 + $0x30] sm:$0xe] }
 0x1e0   : > { %v25200_v58 = vcombine.low %v20511_v11, %v20523_v7  ;;  %v6920_v49 = vrot.slane %v6919_v21, 4  ;;  %v6929_v26 = vor.u32 %v6928_v55, %v6924_v39  ;;  %v6937_v1 = vshrl.u32 %v15208_v43, 16  ;;  %v15210_v7 = vld [vmem:[%s18815_s16 + $0x38] sm:$0x1] }
 0x1e1   : > { %v6940_v0 = vshll.u32 %v15208_v43, 16  ;;  %v20685_v9 = vadd.f32 %v3631_v34, %v3337_v63  ;;  %v3342_v54 = vadd.f32 %v16753_v31, %v20241_v19  ;;  %16990 = vmatmul.mubr.msk.bf16.gmra.mxu0 %vm830_vm3, %v17624_v18  ;;  %v16788_v6 = vpop.f32.mrf.mxu0  ;;  %v25201_v59 = vcombine.low %v20527_v40, %v20543_v27  ;;  %v3285_v30 = vpop.f32.mrf.mxu1  ;;  %v15211_v31 = vld [vmem:[%s18815_s16 + $0x3c] sm:$0xf] }
 0x1e2   : > { %16956 = vmatmul.mubr.msk.bf16.gmra.mxu1 %vm830_vm3, %v25200_v58  ;;  %v20695_v11 = vsel %vm18183_vm7, %v7624_v20, %v7625_v46  ;;  %v6946_v38 = vshll.u32 %v15209_v15, 16  ;;  %16993 = vmatprep.mubr.msk.bf16.mxu0 %vm830_vm3, %v17625_v12  ;;  %v6925_v19 = vsel %vm17904_vm4, %v6920_v49, %v6924_v39  ;;  %v6930_v34 = vrot.slane %v6929_v26, 4  ;;  %v17626_v26 = vld [vmem:[%s18815_s16 + $0xc0] sm:$0xff]  }
 0x1e3   : > { %16959 = vmatprep.mubr.msk.bf16.mxu1 %vm830_vm3, %v25201_v59  ;;  %v6939_v27 = vrot.slane %v6937_v1, 4  ;;  %v20704_v18 = vadd.f32 %v16787_v42, %v3342_v54  ;;  %v3340_v43 = vadd.f32 %v3285_v30, %v20249_v29  ;;  %v3647_v37 = vpop.f32.mrf.mxu0  ;;  %v6942_v21 = vrot.slane %v6940_v0, 5  ;;  %v16754_v46 = vpop.f32.mrf.mxu1 }
 0x1e4   : > { %v6948_v55 = vrot.slane %v6946_v38, 5  ;;  %v6935_v12 = vsel %vm17904_vm4, %v6930_v34, %v6934_v56  ;;  %v6950_v63 = vshrl.u32 %v15209_v15, 16  ;;  %v6956_v20 = vshll.u32 %v15210_v7, 16 }
 0x1e5   : > { %v15299_v39 = vrot.slane %v15283_v22, 9  ;;  %v20710_v58 = vadd.f32 %v3644_v35, %v3340_v43  ;;  %v3343_v49 = vadd.f32 %v16754_v46, %v20265_v13  ;;  %v16791_v42 = vpop.f32.mrf.mxu0  ;;  %v20714_v1 = vcombine.low %v6925_v19, %v6935_v12  ;;  %v3288_v0 = vpop.f32.mrf.mxu1  ;;  %v15212_v43 = vld [vmem:[%s18815_s16 + $0x40] sm:$0xf] }
 0x1e6   : > { %v6943_v29 = vor.u32 %v6942_v21, %v6939_v27  ;;  %v6952_v54 = vrot.slane %v6950_v63, 4  ;;  %v6958_v59 = vrot.slane %v6956_v20, 5  ;;  %v7629_v38 = vrot.slane %v15209_v15, 5 }
 0x1e7   : > { %v7632_v30 = vrot.slane %v15210_v7, 5  ;;  %v20716_v56 = vadd.f32 %v16788_v6, %v3343_v49  ;;  %v3341_v22 = vadd.f32 %v3288_v0, %v20280_v2  ;;  %v3660_v34 = vpop.f32.mrf.mxu0  ;;  %v6961_v40 = vshrl.u32 %v15211_v31, 16  ;;  %v16757_v13 = vpop.f32.mrf.mxu1 }
 0x1e8   : > { %v6944_v35 = vrot.slane %v6943_v29, 4  ;;  %v25202_v19 = vcombine.low %v20547_v61, %v20564_v50  ;;  %v6953_v27 = vor.u32 %v6952_v54, %v6948_v55  ;;  %v20726_v15 = vsel %vm18183_vm7, %v15299_v39, %v7629_v38  ;;  %v15213_v50 = vld [vmem:[%s18815_s16 + $0x44] sm:$0x1] }
 0x1e9   : > { %v7631_v6 = vrot.slane %v7629_v38, 4  ;;  %v6964_v7 = vshll.u32 %v15211_v31, 16  ;;  %v20728_v21 = vadd.f32 %v3647_v37, %v3341_v22  ;;  %v3346_v2 = vadd.f32 %v16757_v13, %v20292_v14  ;;  %16994 = vmatmul.mubr.msk.bf16.gmra.mxu0 %vm830_vm3, %v17626_v26  ;;  %v16792_v46 = vpop.f32.mrf.mxu0  ;;  %v3301_v63 = vpop.f32.mrf.mxu1 }
 0x1ea   : > { %16960 = vmatmul.mubr.msk.bf16.gmra.mxu1 %vm830_vm3, %v25202_v19  ;;  %v6949_v61 = vsel %vm17904_vm4, %v6944_v35, %v6948_v55  ;;  %v6963_v12 = vrot.slane %v6961_v40, 4  ;;  %17033 = vmatprep.mubr.msk.bf16.mxu0 %vm830_vm3, %v15313_v44  ;;  %v6954_v37 = vrot.slane %v6953_v27, 4  ;;  %v6970_v39 = vshll.u32 %v15212_v43, 16  ;;  %v15214_v19 = vld [vmem:[%s18815_s16 + $0x48] sm:$0xf] }
 0x1eb   : > { %16999 = vmatprep.mubr.msk.bf16.mxu1 %vm830_vm3, %v20611_v4  ;;  %v20743_v14 = vsel %vm18183_vm7, %v7631_v6, %v7632_v30  ;;  %v6966_v20 = vrot.slane %v6964_v7, 5  ;;  %v20745_v31 = vadd.f32 %v16791_v42, %v3346_v2  ;;  %v25203_v4 = vld [vmem:[#allocation19_spill] sm:$0xff]  ;;  %v3663_v49 = vpop.f32.mrf.mxu0  ;;  %v6974_v26 = vshrl.u32 %v15212_v43, 16  ;;  %v16758_v5 = vpop.f32.mrf.mxu1  ;;  %v25204_v42 = vld [vmem:[#allocation21_spill] sm:$0xff] }
 0x1ec   : > { %v3344_v55 = vadd.f32 %v3301_v63, %v25203_v4  ;;  %v15316_v40 = vcombine.low %v20726_v15, %v20743_v14  ;;  %v6959_v44 = vsel %vm17904_vm4, %v6954_v37, %v6958_v59  ;;  %v6972_v0 = vrot.slane %v6970_v39, 5  ;;  %v15215_v4 = vld [vmem:[%s18815_s16 + $0x4c] sm:$0xf] }
 0x1ed   : > { %v6967_v29 = vor.u32 %v6966_v20, %v6963_v12  ;;  %v6980_v54 = vshll.u32 %v15213_v50, 16  ;;  %v3347_v30 = vadd.f32 %v16758_v5, %v25204_v42  ;;  %v16831_v22 = vpop.f32.mrf.mxu0  ;;  %v20756_v35 = vcombine.low %v6949_v61, %v6959_v44  ;;  %v3304_v27 = vpop.f32.mrf.mxu1  ;;  %v25205_v12 = vld [vmem:[#allocation23_spill] sm:$0xff]  ;;  %v25206_v44 = vld [vmem:[#allocation26_spill] sm:$0xff] }
 0x1ee   : > { %v20753_v38 = vadd.f32 %v3660_v34, %v3344_v55  ;;  %v6976_v13 = vrot.slane %v6974_v26, 4  ;;  %v15300_v2 = vrot.slane %v15284_v24, 9  ;;  %v7636_v63 = vrot.slane %v15212_v43, 5 }
 0x1ef   : > { %v6968_v6 = vrot.slane %v6967_v29, 4  ;;  %v6982_v7 = vrot.slane %v6980_v54, 5  ;;  %v20759_v59 = vadd.f32 %v16792_v46, %v3347_v30  ;;  %v3345_v37 = vadd.f32 %v3304_v27, %v25205_v12  ;;  %v4744_v34 = vpop.f32.mrf.mxu0  ;;  %v16797_v55 = vpop.f32.mrf.mxu1  ;;  %v20772_v46 = vld [vmem:[%s18815_s16 + $0x50] sm:$0x1]  ;;  %v15523_v54 = vld [vmem:[%s24893_s3 + $0x22] sm:$0x3] }
 0x1f0   : > { %v6977_v20 = vor.u32 %v6976_v13, %v6972_v0  ;;  %v7639_v39 = vrot.slane %v15213_v50, 5  ;;  %v20769_v26 = vsel %vm18183_vm7, %v15300_v2, %v7636_v63  ;;  %v7638_v43 = vrot.slane %v7636_v63, 4  ;;  %v15285_v30 = vld [vmem:[%s18815_s16 + $0x48] sm:$0xe] }
 0x1f1   : > { %v6973_v61 = vsel %vm17904_vm4, %v6968_v6, %v6972_v0  ;;  %v6985_v24 = vshrl.u32 %v15214_v19, 16  ;;  %v20774_v5 = vadd.f32 %v3663_v49, %v3345_v37  ;;  %v4403_v50 = vadd.f32 %v16797_v55, %v25206_v44  ;;  %17034 = vmatmul.mubr.msk.bf16.vlgmr.msra.gmra.mxu0 %vm830_vm3, %v15314_v57  ;;  %v15556_v49 = vld [vmem:[%s24893_s3 + $0x24] sm:$0x3]  ;;  %v4274_v42 = vpop.f32.mrf.mxu1 }
 0x1f2   : > { %17000 = vmatmul.mubr.msk.bf16.vlgmr.msra.gmra.mxu1 %vm830_vm3, %v20665_v45  ;;  %v16832_v45 = vpop.f32.mrf.mxu0  ;;  %v6978_v29 = vrot.slane %v6977_v20, 4  ;;  %v6988_v0 = vshll.u32 %v15214_v19, 16  ;;  %17100 = vmatpush3.bf16.msra.mxu0 %v20641_v60  ;;  %v7640_v3 = vsel %vm18183_vm7, %v7638_v43, %v7639_v39  ;;  %v6994_v17 = vshll.u32 %v15215_v4, 16  ;;  %v25207_v19 = vld [vmem:[#allocation27_spill] sm:$0xff] }
 0x1f3   : > { %17066 = vmatpush3.bf16.msra.mxu1 %v20637_v33  ;;  %17003 = vmatprep.mubr.msk.bf16.mxu1 %vm830_vm3, %v20714_v1  ;;  %v6987_v33 = vrot.slane %v6985_v24, 4  ;;  %v6998_v57 = vshrl.u32 %v15215_v4, 16  ;;  %v20794_v13 = vadd.f32 %v16831_v22, %v4403_v50  ;;  %v4401_v27 = vadd.f32 %v4274_v42, %v25207_v19  ;;  %v16798_v63 = vpop.f32.mrf.mxu1  ;;  %v15217_v22 = vld [vmem:[%s18815_s16 + $0x54] sm:$0xf] }
 0x1f4   : > { %v4747_v6 = vpop.f32.mrf.mxu0  ;;  %v25208_v2 = vcombine.low %v20679_v51, %v20695_v11  ;;  %v6983_v60 = vsel %vm17904_vm4, %v6978_v29, %v6982_v7  ;;  %v15317_v1 = vcombine.low %v20769_v26, %v7640_v3  ;;  %v6990_v37 = vrot.slane %v6988_v0, 5  ;;  %17493 = vmatprep.subr.msk.bf16.mxu1 %vm879_vm0, %v15523_v54  ;;  %17494 = vmatprep.subr.msk.bf16.mxu0 %vm879_vm0, %v15556_v49  ;;  %v25209_v51 = vld [vmem:[#allocation29_spill] sm:$0xff]  ;;  %v25210_v54 = vld [vmem:[#allocation6_spill] sm:$0xff] }
 0x1f5   : > { %v15252_v12 = vcombine.low %v6973_v61, %v6983_v60  ;;  %v6996_v20 = vrot.slane %v6994_v17, 5  ;;  %v7000_v39 = vrot.slane %v6998_v57, 4  ;;  %v20807_v55 = vadd.f32 %v4744_v34, %v4401_v27  ;;  %v4277_v26 = vpop.f32.mrf.mxu1  ;;  %v15218_v3 = vld [vmem:[%s18815_s16 + $0x58] sm:$0xf] }
 0x1f6   : > { %17037 = vmatprep.mubr.msk.bf16.mxu0 %vm830_vm3, %v25208_v2  ;;  %v4404_v11 = vadd.f32 %v16798_v63, %v25209_v51  ;;  %v16835_v43 = vpop.f32.mrf.mxu0  ;;  %v7004_v7 = vshll.u32 %v20772_v46, 16  ;;  %v15301_v24 = vrot.slane %v15285_v30, 9  ;;  %v6991_v44 = vor.u32 %v6990_v37, %v6987_v33  ;;  %v25211_v33 = vld [vmem:[#allocation5_spill] sm:$0xff] }
 0x1f7   : > { %v7001_v61 = vor.u32 %v7000_v39, %v6996_v20  ;;  %v7643_v50 = vrot.slane %v15215_v4, 5  ;;  %v7646_v29 = vrot.slane %v20772_v46, 5  ;;  %v4402_v42 = vadd.f32 %v4277_v26, %v25210_v54  ;;  %v16801_v57 = vpop.f32.mrf.mxu1 }
 0x1f8   : > { %v20812_v0 = vadd.f32 %v16832_v45, %v4404_v11  ;;  %v4760_v49 = vpop.f32.mrf.mxu0  ;;  %v7006_v34 = vrot.slane %v7004_v7, 5  ;;  %v7009_v17 = vshrl.u32 %v15217_v22, 16  ;;  %v6992_v30 = vrot.slane %v6991_v44, 4 }
 0x1f9   : > { %v7002_v19 = vrot.slane %v7001_v61, 4  ;;  %v7644_v4 = vsel %vm18183_vm7, %v15301_v24, %v7643_v50  ;;  %v7645_v46 = vrot.slane %v7643_v50, 4  ;;  %v20820_v45 = vadd.f32 %v4747_v6, %v4402_v42  ;;  %17038 = vmatmul.mubr.msk.bf16.gmra.mxu0 %vm830_vm3, %v15316_v40  ;;  %v4290_v37 = vpop.f32.mrf.mxu1  ;;  %v15286_v40 = vld [vmem:[%s18815_s16 + $0x54] sm:$0xe] }
 0x1fa   : > { %17004 = vmatmul.mubr.msk.bf16.gmra.mxu1 %vm830_vm3, %v20756_v35  ;;  %v4407_v27 = vadd.f32 %v16801_v57, %v25211_v33  ;;  %v16836_v2 = vpop.f32.mrf.mxu0  ;;  %v15219_v35 = vld [vmem:[%s18815_s16 + $0x5c] sm:$0x1]  ;;  %v7011_v60 = vrot.slane %v7009_v17, 4  ;;  %v7012_v63 = vshll.u32 %v15217_v22, 16  ;;  %17041 = vmatprep.mubr.msk.bf16.mxu0 %vm830_vm3, %v15317_v1  ;;  %v6997_v6 = vsel %vm17904_vm4, %v6992_v30, %v6996_v20 }
 0x1fb   : > { %17007 = vmatprep.mubr.msk.bf16.mxu1 %vm830_vm3, %v15252_v12  ;;  %v7007_v39 = vsel %vm17904_vm4, %v7002_v19, %v7006_v34  ;;  %v7647_v15 = vsel %vm18183_vm7, %v7645_v46, %v7646_v29  ;;  %v7018_v14 = vshll.u32 %v15218_v3, 16  ;;  %v25212_v12 = vld [vmem:[#allocation12_spill] sm:$0xff]  ;;  %v16802_v1 = vpop.f32.mrf.mxu1  ;;  %v7022_v44 = vshrl.u32 %v15218_v3, 16 }
 0x1fc   : > { %v20837_v51 = vadd.f32 %v16835_v43, %v4407_v27  ;;  %v4405_v11 = vadd.f32 %v4290_v37, %v25212_v12  ;;  %v4763_v22 = vpop.f32.mrf.mxu0  ;;  %v15253_v7 = vcombine.low %v6997_v6, %v7007_v39  ;;  %v15318_v24 = vcombine.low %v7644_v4, %v7647_v15  ;;  %v15220_v43 = vld [vmem:[%s18815_s16 + $0x60] sm:$0xf]  ;;  %v15221_v4 = vld [vmem:[%s18815_s16 + $0x64] sm:$0xf] }
 0x1fd   : > { %v7014_v26 = vrot.slane %v7012_v63, 5  ;;  %v7020_v20 = vrot.slane %v7018_v14, 5  ;;  %v7028_v61 = vshll.u32 %v15219_v35, 16  ;;  %v4408_v29 = vadd.f32 %v16802_v1, %v20462_v41  ;;  %v4293_v17 = vpop.f32.mrf.mxu1 }
 0x1fe   : > { %v20840_v50 = vadd.f32 %v4760_v49, %v4405_v11  ;;  %v16839_v54 = vpop.f32.mrf.mxu0  ;;  %v15302_v42 = vrot.slane %v15286_v40, 9  ;;  %v7650_v34 = vrot.slane %v15218_v3, 5  ;;  %v7024_v30 = vrot.slane %v7022_v44, 4  ;;  %v15222_v40 = vld [vmem:[%s18815_s16 + $0x68] sm:$0x1] }
 0x1ff   : > { %v7015_v57 = vor.u32 %v7014_v26, %v7011_v60  ;;  %v7030_v19 = vrot.slane %v7028_v61, 5  ;;  %v7653_v46 = vrot.slane %v15219_v35, 5  ;;  %v20845_v33 = vadd.f32 %v16836_v2, %v4408_v29  ;;  %v16805_v37 = vpop.f32.mrf.mxu1  ;;  %v25213_v2 = vld [vmem:[#allocation8_spill] sm:$0xff]  ;;  %v15287_v11 = vld [vmem:[%s18815_s16 + $0x60] sm:$0xe] }
 0x200   : > { %v4406_v27 = vadd.f32 %v4293_v17, %v20480_v8  ;;  %v4776_v63 = vpop.f32.mrf.mxu0  ;;  %v7651_v41 = vsel %vm18183_vm7, %v15302_v42, %v7650_v34  ;;  %v7652_v49 = vrot.slane %v7650_v34, 4  ;;  %v7025_v60 = vor.u32 %v7024_v30, %v7020_v20  ;;  %v25214_v29 = vld [vmem:[#allocation22_spill] sm:$0xff] }
 0x201   : > { %v7016_v3 = vrot.slane %v7015_v57, 4  ;;  %v7033_v6 = vshrl.u32 %v15220_v43, 16  ;;  %v7036_v39 = vshll.u32 %v15220_v43, 16  ;;  %v4411_v15 = vadd.f32 %v16805_v37, %v25213_v2  ;;  %17042 = vmatmul.mubr.msk.bf16.gmra.mxu0 %vm830_vm3, %v15318_v24  ;;  %v4306_v1 = vpop.f32.mrf.mxu1 }
 0x202   : > { %17008 = vmatmul.mubr.msk.bf16.gmra.mxu1 %vm830_vm3, %v15253_v7  ;;  %v20851_v35 = vadd.f32 %v4763_v22, %v4406_v27  ;;  %v16840_v8 = vpop.f32.mrf.mxu0  ;;  %v7654_v14 = vsel %vm18183_vm7, %v7652_v49, %v7653_v46  ;;  %v7042_v12 = vshll.u32 %v15221_v4, 16  ;;  %v7026_v26 = vrot.slane %v7025_v60, 4 }
 0x203   : > { %v7021_v7 = vsel %vm17904_vm4, %v7016_v3, %v7020_v20  ;;  %v15319_v44 = vcombine.low %v7651_v41, %v7654_v14  ;;  %v7035_v22 = vrot.slane %v7033_v6, 4  ;;  %v20861_v61 = vadd.f32 %v16839_v54, %v4411_v15  ;;  %v16806_v17 = vpop.f32.mrf.mxu1  ;;  %v15223_v20 = vld [vmem:[%s18815_s16 + $0x6c] sm:$0xf]  ;;  %v25215_v54 = vld [vmem:[#allocation13_spill] sm:$0xff] }
 0x204   : > { %v4409_v42 = vadd.f32 %v4306_v1, %v25214_v29  ;;  %v4779_v24 = vpop.f32.mrf.mxu0  ;;  %v7038_v34 = vrot.slane %v7036_v39, 5  ;;  %v7044_v43 = vrot.slane %v7042_v12, 5  ;;  %v7031_v57 = vsel %vm17904_vm4, %v7026_v26, %v7030_v19  ;;  %v25216_v12 = vld [vmem:[#allocation4_spill] sm:$0xff] }
 0x205   : > { %17045 = vmatprep.mubr.msk.bf16.mxu0 %vm830_vm3, %v15319_v44  ;;  %v7046_v30 = vshrl.u32 %v15221_v4, 16  ;;  %v7052_v46 = vshll.u32 %v15222_v40, 16  ;;  %v15303_v27 = vrot.slane %v15287_v11, 9  ;;  %v4412_v49 = vadd.f32 %v16806_v17, %v25215_v54  ;;  %v4309_v6 = vpop.f32.mrf.mxu1  ;;  %v15224_v26 = vld [vmem:[%s18815_s16 + $0x70] sm:$0xf] }
 0x206   : > { %v20868_v41 = vadd.f32 %v4776_v63, %v4409_v42  ;;  %v15254_v37 = vcombine.low %v7021_v7, %v7031_v57  ;;  %v16843_v3 = vpop.f32.mrf.mxu0  ;;  %v7039_v60 = vor.u32 %v7038_v34, %v7035_v22  ;;  %v7657_v15 = vrot.slane %v15221_v4, 5 }
 0x207   : > { %v7048_v39 = vrot.slane %v7046_v30, 4  ;;  %v7054_v2 = vrot.slane %v7052_v46, 5  ;;  %v7660_v14 = vrot.slane %v15222_v40, 5  ;;  %v20871_v19 = vadd.f32 %v16840_v8, %v4412_v49  ;;  %v16809_v29 = vpop.f32.mrf.mxu1  ;;  %v25217_v8 = vld [vmem:[#allocation17_spill] sm:$0xff]  ;;  %v15225_v30 = vld [vmem:[%s18815_s16 + $0x74] sm:$0x1] }
 0x208   : > { %v4410_v1 = vadd.f32 %v4309_v6, %v25216_v12  ;;  %17011 = vmatprep.mubr.msk.bf16.mxu1 %vm830_vm3, %v15254_v37  ;;  %v7040_v11 = vrot.slane %v7039_v60, 4  ;;  %v4792_v63 = vpop.f32.mrf.mxu0  ;;  %v7057_v44 = vshrl.u32 %v15223_v20, 16  ;;  %v7658_v22 = vsel %vm18183_vm7, %v15303_v27, %v7657_v15  ;;  %v15288_v12 = vld [vmem:[%s18815_s16 + $0x6c] sm:$0xe] }
 0x209   : > { %v7049_v7 = vor.u32 %v7048_v39, %v7044_v43  ;;  %v7659_v42 = vrot.slane %v7657_v15, 4  ;;  %v7060_v34 = vshll.u32 %v15223_v20, 16  ;;  %v4415_v40 = vadd.f32 %v16809_v29, %v25217_v8  ;;  %v4322_v37 = vpop.f32.mrf.mxu1 }
 0x20a   : > { %v20878_v4 = vadd.f32 %v4779_v24, %v4410_v1  ;;  %v7045_v17 = vsel %vm17904_vm4, %v7040_v11, %v7044_v43  ;;  %v16844_v57 = vpop.f32.mrf.mxu0  ;;  %v7059_v46 = vrot.slane %v7057_v44, 4  ;;  %v7066_v27 = vshll.u32 %v15224_v26, 16 }
 0x20b   : > { %v7050_v54 = vrot.slane %v7049_v7, 4  ;;  %v7661_v49 = vsel %vm18183_vm7, %v7659_v42, %v7660_v14  ;;  %v7062_v60 = vrot.slane %v7060_v34, 5  ;;  %v20886_v6 = vadd.f32 %v16843_v3, %v4415_v40  ;;  %v16810_v1 = vpop.f32.mrf.mxu1  ;;  %v15226_v42 = vld [vmem:[%s18815_s16 + $0x78] sm:$0xf] }
 0x20c   : > { %v15320_v24 = vcombine.low %v7658_v22, %v7661_v49  ;;  %v4413_v20 = vadd.f32 %v4322_v37, %v20572_v52  ;;  %v4795_v39 = vpop.f32.mrf.mxu0  ;;  %v7070_v15 = vshrl.u32 %v15224_v26, 16  ;;  %v7068_v44 = vrot.slane %v7066_v27, 5  ;;  %v15227_v37 = vld [vmem:[%s18815_s16 + $0x7c] sm:$0xf] }
 0x20d   : > { %25218 = vst [vmem:[#allocation18_spill] sm:$0xff] %v20886_v6  ;;  %v7055_v43 = vsel %vm17904_vm4, %v7050_v54, %v7054_v2  ;;  %v7063_v11 = vor.u32 %v7062_v60, %v7059_v46  ;;  %v7076_v29 = vshll.u32 %v15225_v30, 16  ;;  %v4416_v7 = vadd.f32 %v16810_v1, %v20578_v28  ;;  %v4325_v34 = vpop.f32.mrf.mxu1 }
 0x20e   : > { %v15255_v14 = vcombine.low %v7045_v17, %v7055_v43  ;;  %17046 = vmatmul.mubr.msk.bf16.gmra.mxu0 %vm830_vm3, %v15320_v24  ;;  %v20893_v3 = vadd.f32 %v4792_v63, %v4413_v20  ;;  %v7072_v22 = vrot.slane %v7070_v15, 4  ;;  %v16847_v52 = vpop.f32.mrf.mxu0  ;;  %v15304_v49 = vrot.slane %v15288_v12, 9 }
 0x20f   : > { %v7064_v8 = vrot.slane %v7063_v11, 4  ;;  %v7078_v40 = vrot.slane %v7076_v29, 5  ;;  %v7664_v2 = vrot.slane %v15224_v26, 5  ;;  %v20898_v46 = vadd.f32 %v16844_v57, %v4416_v7  ;;  %v16813_v26 = vpop.f32.mrf.mxu1 }
 0x210   : > { %25219 = vst [vmem:[#allocation24_spill] sm:$0xff] %v20893_v3  ;;  %17012 = vmatmul.mubr.msk.bf16.gmra.mxu1 %vm830_vm3, %v15255_v14  ;;  %v4414_v17 = vadd.f32 %v4325_v34, %v20589_v25  ;;  %v7073_v54 = vor.u32 %v7072_v22, %v7068_v44  ;;  %v7667_v63 = vrot.slane %v15225_v30, 5  ;;  %v4808_v60 = vpop.f32.mrf.mxu0  ;;  %v7081_v20 = vshrl.u32 %v15226_v42, 16  ;;  %v15228_v25 = vld [vmem:[%s18815_s16 + $0x80] sm:$0x1] }
 0x211   : > { %25220 = vst [vmem:[#allocation7_spill] sm:$0xff] %v20898_v46  ;;  %v7069_v28 = vsel %vm17904_vm4, %v7064_v8, %v7068_v44  ;;  %v7665_v27 = vsel %vm18183_vm7, %v15304_v49, %v7664_v2  ;;  %v7666_v24 = vrot.slane %v7664_v2, 4  ;;  %v4419_v12 = vadd.f32 %v16813_v26, %v20608_v32  ;;  %v15289_v14 = vld [vmem:[%s18815_s16 + $0x78] sm:$0xe]  ;;  %v4338_v7 = vpop.f32.mrf.mxu1 }
 0x212   : > { %v20906_v15 = vadd.f32 %v4795_v39, %v4414_v17  ;;  %v7074_v57 = vrot.slane %v7073_v54, 4  ;;  %v7084_v43 = vshll.u32 %v15226_v42, 16  ;;  %v16848_v30 = vpop.f32.mrf.mxu0  ;;  %v7083_v11 = vrot.slane %v7081_v20, 4 }
 0x213   : > { %v7668_v1 = vsel %vm18183_vm7, %v7666_v24, %v7667_v63  ;;  %v7090_v29 = vshll.u32 %v15227_v37, 16  ;;  %v7094_v44 = vshrl.u32 %v15227_v37, 16  ;;  %v20915_v34 = vadd.f32 %v16847_v52, %v4419_v12  ;;  %v16814_v54 = vpop.f32.mrf.mxu1 }
 0x214   : > { %25221 = vst [vmem:[#allocation20_spill] sm:$0xff] %v20906_v15  ;;  %v7079_v22 = vsel %vm17904_vm4, %v7074_v57, %v7078_v40  ;;  %v15321_v39 = vcombine.low %v7665_v27, %v7668_v1  ;;  %v7086_v8 = vrot.slane %v7084_v43, 5  ;;  %v4811_v32 = vpop.f32.mrf.mxu0  ;;  %v7100_v17 = vshll.u32 %v15228_v25, 16  ;;  %v15229_v15 = vld [vmem:[%s18815_s16 + $0x84] sm:$0xf] }
 0x215   : > { %25222 = vst [vmem:[#allocation9_spill] sm:$0xff] %v20915_v34  ;;  %v15256_v49 = vcombine.low %v7069_v28, %v7079_v22  ;;  %v7092_v42 = vrot.slane %v7090_v29, 5  ;;  %v7096_v2 = vrot.slane %v7094_v44, 4  ;;  %v15305_v24 = vrot.slane %v15289_v14, 9  ;;  %v4341_v57 = vpop.f32.mrf.mxu1 }
 0x216   : > { %17049 = vmatprep.mubr.msk.bf16.mxu0 %vm830_vm3, %v15321_v39  ;;  %v7087_v63 = vor.u32 %v7086_v8, %v7083_v11  ;;  %v7671_v26 = vrot.slane %v15227_v37, 5  ;;  %v7674_v20 = vrot.slane %v15228_v25, 5  ;;  %v16851_v46 = vpop.f32.mrf.mxu0  ;;  %v7102_v40 = vrot.slane %v7100_v17, 5  ;;  %v15230_v25 = vld [vmem:[%s18815_s16 + $0x88] sm:$0xf] }
 0x217   : > { %17015 = vmatprep.mubr.msk.bf16.mxu1 %vm830_vm3, %v15256_v49  ;;  %v7097_v52 = vor.u32 %v7096_v2, %v7092_v42  ;;  %v4417_v28 = vadd.f32 %v4338_v7, %v20615_v62  ;;  %v4420_v27 = vadd.f32 %v16814_v54, %v20621_v16  ;;  %v4418_v37 = vadd.f32 %v4341_v57, %v20643_v23  ;;  %v15231_v62 = vld [vmem:[%s18815_s16 + $0x8c] sm:$0x1]  ;;  %v16817_v16 = vpop.f32.mrf.mxu1  ;;  %v15290_v49 = vld [vmem:[%s18815_s16 + $0x84] sm:$0xe] }
 0x218   : > { %v7088_v12 = vrot.slane %v7087_v63, 4  ;;  %v7672_v43 = vsel %vm18183_vm7, %v15305_v24, %v7671_v26  ;;  %v7673_v1 = vrot.slane %v7671_v26, 4  ;;  %v20926_v11 = vpop.f32.mrf.mxu0  ;;  %v7105_v7 = vshrl.u32 %v15229_v15, 16 }
 0x219   : > { %v7098_v29 = vrot.slane %v7097_v52, 4  ;;  %v20928_v44 = vadd.f32 %v4808_v60, %v4417_v28  ;;  %v20930_v14 = vadd.f32 %v16848_v30, %v4420_v27  ;;  %v20937_v8 = vadd.f32 %v4811_v32, %v4418_v37  ;;  %v4354_v63 = vpop.f32.mrf.mxu1  ;;  %v15232_v28 = vld [vmem:[%s18815_s16 + $0x90] sm:$0xf] }
 0x21a   : > { %v7093_v22 = vsel %vm17904_vm4, %v7088_v12, %v7092_v42  ;;  %v7675_v39 = vsel %vm18183_vm7, %v7673_v1, %v7674_v20  ;;  %v7108_v23 = vshll.u32 %v15229_v15, 16  ;;  %v20940_v2 = vpop.f32.mrf.mxu0  ;;  %v7107_v17 = vrot.slane %v7105_v7, 4  ;;  %v15233_v12 = vld [vmem:[%s18815_s16 + $0x94] sm:$0xf] }
 0x21b   : > { %25223 = vst [vmem:[#allocation25_spill] sm:$0xff] %v20928_v44  ;;  %25224 = vst [vmem:[#allocation28_spill] sm:$0xff] %v20930_v14  ;;  %v7103_v60 = vsel %vm17904_vm4, %v7098_v29, %v7102_v40  ;;  %v15322_v30 = vcombine.low %v7672_v43, %v7675_v39  ;;  %v7114_v54 = vshll.u32 %v15230_v25, 16  ;;  %v7118_v42 = vshrl.u32 %v15230_v25, 16  ;;  %v16818_v40 = vpop.f32.mrf.mxu1 }
 0x21c   : > { %25225 = vst [vmem:[#allocation10_spill] sm:$0xff] %v20937_v8  ;;  %v15257_v24 = vcombine.low %v7093_v22, %v7103_v60  ;;  %v7110_v26 = vrot.slane %v7108_v23, 5  ;;  %v7124_v52 = vshll.u32 %v15231_v62, 16  ;;  %v20945_v20 = vpop.f32.mrf.mxu0  ;;  %v15306_v32 = vrot.slane %v15290_v49, 9 }
 0x21d   : > { %17050 = vmatmul.mubr.msk.bf16.gmra.mxu0 %vm830_vm3, %v15322_v30  ;;  %v7116_v15 = vrot.slane %v7114_v54, 5  ;;  %v7678_v27 = vrot.slane %v15230_v25, 5  ;;  %v7681_v57 = vrot.slane %v15231_v62, 5  ;;  %v7120_v1 = vrot.slane %v7118_v42, 4  ;;  %v4357_v62 = vpop.f32.mrf.mxu1  ;;  %v15234_v54 = vld [vmem:[%s18815_s16 + $0x98] sm:$0x1] }
 0x21e   : > { %17016 = vmatmul.mubr.msk.bf16.gmra.mxu1 %vm830_vm3, %v15257_v24  ;;  %v7111_v43 = vor.u32 %v7110_v26, %v7107_v17  ;;  %v7126_v37 = vrot.slane %v7124_v52, 5  ;;  %v4423_v29 = vadd.f32 %v16817_v16, %v20662_v48  ;;  %v20951_v7 = vpop.f32.mrf.mxu0  ;;  %v7129_v23 = vshrl.u32 %v15232_v28, 16  ;;  %v15291_v17 = vld [vmem:[%s18815_s16 + $0x90] sm:$0xe] }
 0x21f   : > { %v7679_v22 = vsel %vm18183_vm7, %v15306_v32, %v7678_v27  ;;  %v7680_v39 = vrot.slane %v7678_v27, 4  ;;  %v7132_v25 = vshll.u32 %v15232_v28, 16  ;;  %v7121_v60 = vor.u32 %v7120_v1, %v7116_v15  ;;  %v16821_v32 = vpop.f32.mrf.mxu1 }
 0x220   : > { %v7112_v49 = vrot.slane %v7111_v43, 4  ;;  %v20955_v30 = vadd.f32 %v16851_v46, %v4423_v29  ;;  %v7138_v24 = vshll.u32 %v15233_v12, 16  ;;  %v20959_v26 = vpop.f32.mrf.mxu0  ;;  %v7131_v16 = vrot.slane %v7129_v23, 4 }
 0x221   : > { %v7682_v48 = vsel %vm18183_vm7, %v7680_v39, %v7681_v57  ;;  %v7134_v42 = vrot.slane %v7132_v25, 5  ;;  %v7142_v52 = vshrl.u32 %v15233_v12, 16  ;;  %v7122_v27 = vrot.slane %v7121_v60, 4  ;;  %v20967_v44 = vpop.f32.mrf.mxu1 }
 0x222   : > { %25226 = vst [vmem:[#allocation11_spill] sm:$0xff] %v20955_v30  ;;  %v7117_v28 = vsel %vm17904_vm4, %v7112_v49, %v7116_v15  ;;  %v15323_v43 = vcombine.low %v7679_v22, %v7682_v48  ;;  %v7140_v46 = vrot.slane %v7138_v24, 5  ;;  %v20965_v1 = vpop.f32.mrf.mxu0  ;;  %v7148_v8 = vshll.u32 %v15234_v54, 16  ;;  %v15235_v22 = vld [vmem:[%s18815_s16 + $0x9c] sm:$0xf] }
 0x223   : > { %v7135_v29 = vor.u32 %v7134_v42, %v7131_v16  ;;  %v7144_v30 = vrot.slane %v7142_v52, 4  ;;  %v15307_v14 = vrot.slane %v15291_v17, 9  ;;  %v7127_v57 = vsel %vm17904_vm4, %v7122_v27, %v7126_v37  ;;  %v15236_v17 = vld [vmem:[%s18815_s16 + $0xa0] sm:$0xf]  ;;  %v20977_v16 = vpop.f32.mrf.mxu1 }
 0x224   : > { %17053 = vmatprep.mubr.msk.bf16.mxu0 %vm830_vm3, %v15323_v43  ;;  %v7685_v39 = vrot.slane %v15233_v12, 5  ;;  %v7688_v23 = vrot.slane %v15234_v54, 5  ;;  %v4421_v15 = vadd.f32 %v4354_v63, %v20667_v53  ;;  %v20974_v25 = vpop.f32.mrf.mxu0  ;;  %v15258_v49 = vcombine.low %v7117_v28, %v7127_v57  ;;  %v15292_v43 = vld [vmem:[%s18815_s16 + $0x9c] sm:$0xe] }
 0x225   : > { %v7136_v60 = vrot.slane %v7135_v29, 4  ;;  %v7145_v24 = vor.u32 %v7144_v30, %v7140_v46  ;;  %v7150_v48 = vrot.slane %v7148_v8, 5  ;;  %v4424_v53 = vadd.f32 %v16818_v40, %v20674_v47  ;;  %v15237_v47 = vld [vmem:[%s18815_s16 + $0xa4] sm:$0x1] }
 0x226   : > { %v7686_v37 = vsel %vm18183_vm7, %v15307_v14, %v7685_v39  ;;  %v7687_v42 = vrot.slane %v7685_v39, 4  ;;  %v20982_v12 = vadd.f32 %v20926_v11, %v4421_v15  ;;  %v20985_v63 = vpop.f32.mrf.mxu0  ;;  %17019 = vmatprep.mubr.msk.bf16.mxu1 %vm830_vm3, %v15258_v49  ;;  %v4422_v54 = vadd.f32 %v4357_v62, %v20685_v9  ;;  %v20991_v14 = vpop.f32.mrf.mxu1  ;;  %v15238_v39 = vld [vmem:[%s18815_s16 + $0xa8] sm:$0xf] }
 0x227   : > { %v7141_v8 = vsel %vm17904_vm4, %v7136_v60, %v7140_v46  ;;  %v7146_v30 = vrot.slane %v7145_v24, 4  ;;  %v7153_v52 = vshrl.u32 %v15235_v22, 16  ;;  %v20996_v28 = vadd.f32 %v20940_v2, %v4424_v53 }
 0x228   : > { %25227 = vst [vmem:[#allocation14_spill] sm:$0xff] %v20982_v12  ;;  %v7689_v11 = vsel %vm18183_vm7, %v7687_v42, %v7688_v23  ;;  %v7156_v40 = vshll.u32 %v15235_v22, 16  ;;  %v7162_v27 = vshll.u32 %v15236_v17, 16  ;;  %v21000_v29 = vpop.f32.mrf.mxu0  ;;  %v21005_v9 = vadd.f32 %v20945_v20, %v4422_v54  ;;  %v21008_v15 = vpop.f32.mrf.mxu1  ;;  %v15239_v54 = vld [vmem:[%s18815_s16 + $0xac] sm:$0xf] }
 0x229   : > { %25228 = vst [vmem:[#allocation3_spill] sm:$0xff] %v20996_v28  ;;  %v7151_v46 = vsel %vm17904_vm4, %v7146_v30, %v7150_v48  ;;  %v15324_v57 = vcombine.low %v7686_v37, %v7689_v11  ;;  %v7155_v62 = vrot.slane %v7153_v52, 4  ;;  %v7166_v22 = vshrl.u32 %v15236_v17, 16 }
 0x22a   : > { %25229 = vst [vmem:[#allocation16_spill] sm:$0xff] %v21005_v9  ;;  %v15259_v2 = vcombine.low %v7141_v8, %v7151_v46  ;;  %v7158_v23 = vrot.slane %v7156_v40, 5  ;;  %v7164_v49 = vrot.slane %v7162_v27, 5  ;;  %v21010_v60 = vpop.f32.mrf.mxu0  ;;  %v7172_v24 = vshll.u32 %v15237_v47, 16  ;;  %v21013_v20 = vpop.f32.mrf.mxu1 }
 0x22b   : > { %17054 = vmatmul.mubr.msk.bf16.gmra.mxu0 %vm830_vm3, %v15324_v57  ;;  %v15308_v48 = vrot.slane %v15292_v43, 9  ;;  %v7692_v37 = vrot.slane %v15236_v17, 5  ;;  %v7695_v42 = vrot.slane %v15237_v47, 5  ;;  %v7168_v30 = vrot.slane %v7166_v22, 4  ;;  %v15240_v17 = vld [vmem:[%s18815_s16 + $0xb0] sm:$0x1] }
 0x22c   : > { %17020 = vmatmul.mubr.msk.bf16.gmra.mxu1 %vm830_vm3, %v15259_v2  ;;  %v7159_v53 = vor.u32 %v7158_v23, %v7155_v62  ;;  %v4427_v8 = vadd.f32 %v16821_v32, %v20704_v18  ;;  %v7177_v52 = vshrl.u32 %v15238_v39, 16  ;;  %v21018_v11 = vpop.f32.mrf.mxu0  ;;  %v7174_v40 = vrot.slane %v7172_v24, 5  ;;  %v21023_v46 = vpop.f32.mrf.mxu1  ;;  %v15293_v18 = vld [vmem:[%s18815_s16 + $0xa8] sm:$0xe] }
 0x22d   : > { %v7693_v27 = vsel %vm18183_vm7, %v15308_v48, %v7692_v37  ;;  %v7694_v43 = vrot.slane %v7692_v37, 4  ;;  %v7180_v47 = vshll.u32 %v15238_v39, 16  ;;  %v7169_v2 = vor.u32 %v7168_v30, %v7164_v49 }
 0x22e   : > { %v7160_v57 = vrot.slane %v7159_v53, 4  ;;  %v21026_v62 = vadd.f32 %v20951_v7, %v4427_v8  ;;  %v7179_v23 = vrot.slane %v7177_v52, 4  ;;  %v21029_v32 = vpop.f32.mrf.mxu0  ;;  %v7186_v9 = vshll.u32 %v15239_v54, 16  ;;  %v21033_v37 = vpop.f32.mrf.mxu1 }
 0x22f   : > { %v7696_v22 = vsel %vm18183_vm7, %v7694_v43, %v7695_v42  ;;  %v7182_v24 = vrot.slane %v7180_v47, 5  ;;  %v7190_v48 = vshrl.u32 %v15239_v54, 16  ;;  %v7170_v53 = vrot.slane %v7169_v2, 4 }
 0x230   : > { %25230 = vst [vmem:[#allocation19_spill] sm:$0xff] %v21026_v62  ;;  %v7165_v39 = vsel %vm17904_vm4, %v7160_v57, %v7164_v49  ;;  %v15325_v30 = vcombine.low %v7693_v27, %v7696_v22  ;;  %v7196_v7 = vshll.u32 %v15240_v17, 16  ;;  %v21037_v8 = vpop.f32.mrf.mxu0  ;;  %v7188_v62 = vrot.slane %v7186_v9, 5  ;;  %v21039_v34 = vpop.f32.mrf.mxu1  ;;  %v15241_v57 = vld [vmem:[%s18815_s16 + $0xb4] sm:$0xf] }
 0x231   : > { %v7183_v52 = vor.u32 %v7182_v24, %v7179_v23  ;;  %v7192_v28 = vrot.slane %v7190_v48, 4  ;;  %v15309_v12 = vrot.slane %v15293_v18, 9  ;;  %v7175_v42 = vsel %vm17904_vm4, %v7170_v53, %v7174_v40  ;;  %v15242_v48 = vld [vmem:[%s18815_s16 + $0xb8] sm:$0xf] }
 0x232   : > { %17057 = vmatprep.mubr.msk.bf16.mxu0 %vm830_vm3, %v15325_v30  ;;  %v7198_v43 = vrot.slane %v7196_v7, 5  ;;  %v7699_v47 = vrot.slane %v15239_v54, 5  ;;  %v7702_v49 = vrot.slane %v15240_v17, 5  ;;  %v21045_v27 = vpop.f32.mrf.mxu0  ;;  %v15260_v2 = vcombine.low %v7165_v39, %v7175_v42  ;;  %v21049_v22 = vpop.f32.mrf.mxu1 }
 0x233   : > { %v7184_v23 = vrot.slane %v7183_v52, 4  ;;  %v7193_v9 = vor.u32 %v7192_v28, %v7188_v62  ;;  %v4425_v18 = vadd.f32 %v20967_v44, %v20710_v58  ;;  %v4428_v54 = vadd.f32 %v20977_v16, %v20716_v56 }
 0x234   : > { %v7700_v40 = vsel %vm18183_vm7, %v15309_v12, %v7699_v47  ;;  %v7701_v24 = vrot.slane %v7699_v47, 4  ;;  %v4426_v17 = vadd.f32 %v20991_v14, %v20728_v21  ;;  %v21058_v39 = vpop.f32.mrf.mxu0  ;;  %17023 = vmatprep.mubr.msk.bf16.mxu1 %vm830_vm3, %v15260_v2  ;;  %v15243_v12 = vld [vmem:[%s18815_s16 + $0xbc] sm:$0x1]  ;;  %v7201_v53 = vshrl.u32 %v15241_v57, 16  ;;  %v21067_v30 = vpop.f32.mrf.mxu1 }
 0x235   : > { %v7189_v58 = vsel %vm17904_vm4, %v7184_v23, %v7188_v62  ;;  %v7194_v44 = vrot.slane %v7193_v9, 4  ;;  %v21064_v28 = vadd.f32 %v20959_v26, %v4425_v18  ;;  %v21072_v21 = vadd.f32 %v20965_v1, %v4428_v54  ;;  %v15294_v62 = vld [vmem:[%s18815_s16 + $0xb4] sm:$0xe]  ;;  %v15244_v18 = vld [vmem:[%s18815_s16 + $0xc0] sm:$0xf] }
 0x236   : > { %v7703_v56 = vsel %vm18183_vm7, %v7701_v24, %v7702_v49  ;;  %v21075_v16 = vadd.f32 %v20974_v25, %v4426_v17  ;;  %v7204_v14 = vshll.u32 %v15241_v57, 16  ;;  %v21078_v7 = vpop.f32.mrf.mxu0  ;;  %v7203_v42 = vrot.slane %v7201_v53, 4  ;;  %v21082_v2 = vpop.f32.mrf.mxu1 }
 0x237   : > { %25231 = vst [vmem:[#allocation21_spill] sm:$0xff] %v21064_v28  ;;  %25232 = vst [vmem:[#allocation23_spill] sm:$0xff] %v21072_v21  ;;  %v7199_v26 = vsel %vm17904_vm4, %v7194_v44, %v7198_v43  ;;  %v15326_v52 = vcombine.low %v7700_v40, %v7703_v56  ;;  %v7210_v47 = vshll.u32 %v15242_v48, 16  ;;  %v7214_v1 = vshrl.u32 %v15242_v48, 16  ;;  %v15245_v43 = vld [vmem:[%s18815_s16 + $0xc4] sm:$0xf] }
 0x238   : > { %25233 = vst [vmem:[#allocation26_spill] sm:$0xff] %v21075_v16  ;;  %v15261_v49 = vcombine.low %v7189_v58, %v7199_v26  ;;  %v7206_v23 = vrot.slane %v7204_v14, 5  ;;  %v7220_v9 = vshll.u32 %v15243_v12, 16  ;;  %v21085_v25 = vpop.f32.mrf.mxu0  ;;  %v15310_v24 = vrot.slane %v15294_v62, 9  ;;  %v21089_v40 = vpop.f32.mrf.mxu1 }
 0x239   : > { %17058 = vmatmul.mubr.msk.bf16.gmra.mxu0 %vm830_vm3, %v15326_v52  ;;  %v7212_v57 = vrot.slane %v7210_v47, 5  ;;  %v7706_v54 = vrot.slane %v15242_v48, 5  ;;  %v7709_v17 = vrot.slane %v15243_v12, 5  ;;  %v7216_v44 = vrot.slane %v7214_v1, 4  ;;  %v15295_v1 = vld [vmem:[%s18815_s16 + $0xc0] sm:$0xe] }
 0x23a   : > { %17024 = vmatmul.mubr.msk.bf16.gmra.mxu1 %vm830_vm3, %v15261_v49  ;;  %v7207_v58 = vor.u32 %v7206_v23, %v7203_v42  ;;  %v7222_v53 = vrot.slane %v7220_v9, 5  ;;  %v4431_v56 = vadd.f32 %v21008_v15, %v20745_v31  ;;  %v21094_v14 = vpop.f32.mrf.mxu0  ;;  %v7225_v12 = vshrl.u32 %v15244_v18, 16  ;;  %v21098_v52 = vpop.f32.mrf.mxu1  ;;  %v15246_v42 = vld [vmem:[%s18815_s16 + $0xc8] sm:$0x1] }
 0x23b   : > { %v7707_v62 = vsel %vm18183_vm7, %v15310_v24, %v7706_v54  ;;  %v7708_v48 = vrot.slane %v7706_v54, 4  ;;  %v7228_v26 = vshll.u32 %v15244_v18, 16  ;;  %v7217_v16 = vor.u32 %v7216_v44, %v7212_v57 }
 0x23c   : > { %v7208_v47 = vrot.slane %v7207_v58, 4  ;;  %v21101_v49 = vadd.f32 %v20985_v63, %v4431_v56  ;;  %v7234_v23 = vshll.u32 %v15245_v43, 16  ;;  %v21105_v9 = vpop.f32.mrf.mxu0  ;;  %v7227_v15 = vrot.slane %v7225_v12, 4  ;;  %v21109_v21 = vpop.f32.mrf.mxu1 }
 0x23d   : > { %v7710_v31 = vsel %vm18183_vm7, %v7708_v48, %v7709_v17  ;;  %v7230_v24 = vrot.slane %v7228_v26, 5  ;;  %v7238_v54 = vshrl.u32 %v15245_v43, 16  ;;  %v7218_v58 = vrot.slane %v7217_v16, 4 }
 0x23e   : > { %25234 = vst [vmem:[#allocation27_spill] sm:$0xff] %v21101_v49  ;;  %v7213_v18 = vsel %vm17904_vm4, %v7208_v47, %v7212_v57  ;;  %v15327_v63 = vcombine.low %v7707_v62, %v7710_v31  ;;  %v7236_v44 = vrot.slane %v7234_v23, 5  ;;  %v21113_v56 = vpop.f32.mrf.mxu0  ;;  %v7244_v3 = vshll.u32 %v15246_v42, 16  ;;  %v21115_v17 = vpop.f32.mrf.mxu1  ;;  %v15410_v57 = vld [vmem:[%s18815_s16 + $0x18] sm:$0xf] }
 0x23f   : > { %v7231_v49 = vor.u32 %v7230_v24, %v7227_v15  ;;  %v7240_v28 = vrot.slane %v7238_v54, 4  ;;  %v15311_v6 = vrot.slane %v15295_v1, 9  ;;  %v7223_v48 = vsel %vm17904_vm4, %v7218_v58, %v7222_v53  ;;  %v15411_v1 = vld [vmem:[%s18815_s16 + $0x1c] sm:$0xf] }
 0x240   : > { %17061 = vmatprep.mubr.msk.bf16.mxu0 %vm830_vm3, %v15327_v63  ;;  %v7713_v12 = vrot.slane %v15245_v43, 5  ;;  %v7716_v26 = vrot.slane %v15246_v42, 5  ;;  %v4429_v16 = vadd.f32 %v21013_v20, %v20753_v38  ;;  %v21123_v62 = vpop.f32.mrf.mxu0  ;;  %v15262_v47 = vcombine.low %v7213_v18, %v7223_v48  ;;  %v21126_v24 = vpop.f32.mrf.mxu1  ;;  %v15413_v63 = vld [vmem:[%s18815_s16 + $0x24] sm:$0xf] }
 0x241   : > { %v7232_v23 = vrot.slane %v7231_v49, 4  ;;  %v7241_v31 = vor.u32 %v7240_v28, %v7236_v44  ;;  %v7246_v15 = vrot.slane %v7244_v3, 5  ;;  %v4432_v38 = vadd.f32 %v21023_v46, %v20759_v59  ;;  %v15412_v46 = vld [vmem:[%s18815_s16 + $0x20] sm:$0x1] }
 0x242   : > { %v7714_v53 = vsel %vm18183_vm7, %v15311_v6, %v7713_v12  ;;  %v7715_v43 = vrot.slane %v7713_v12, 4  ;;  %v21131_v42 = vadd.f32 %v21000_v29, %v4429_v16  ;;  %v21135_v20 = vpop.f32.mrf.mxu0  ;;  %17027 = vmatprep.mubr.msk.bf16.mxu1 %vm830_vm3, %v15262_v47  ;;  %v4430_v6 = vadd.f32 %v21033_v37, %v20774_v5  ;;  %v21142_v54 = vpop.f32.mrf.mxu1  ;;  %v17627_v37 = vld [vmem:[%s18815_s16 + $0x18] sm:$0xff]   ;;  %v15414_v47 = vld [vmem:[%s18815_s16 + $0x28] sm:$0xf] }
 0x243   : > { %v7237_v3 = vsel %vm17904_vm4, %v7232_v23, %v7236_v44  ;;  %v7242_v28 = vrot.slane %v7241_v31, 4  ;;  %v8420_v49 = vshrl.u32 %v15410_v57, 16  ;;  %v21147_v59 = vadd.f32 %v21010_v60, %v4432_v38 }
 0x244   : > { %v7717_v29 = vsel %vm18183_vm7, %v7715_v43, %v7716_v26  ;;  %v8423_v18 = vshll.u32 %v15410_v57, 16  ;;  %v8429_v58 = vshll.u32 %v15411_v1, 16  ;;  %v21151_v48 = vpop.f32.mrf.mxu0  ;;  %v21156_v5 = vadd.f32 %v21018_v11, %v4430_v6  ;;  %v21160_v26 = vpop.f32.mrf.mxu1 }
 0x245   : > { %v7247_v44 = vsel %vm17904_vm4, %v7242_v28, %v7246_v15  ;;  %v15328_v12 = vcombine.low %v7714_v53, %v7717_v29  ;;  %v8422_v16 = vrot.slane %v8420_v49, 4  ;;  %v8433_v31 = vshrl.u32 %v15411_v1, 16 }
 0x246   : > { %v15263_v60 = vcombine.low %v7237_v3, %v7247_v44  ;;  %v8425_v23 = vrot.slane %v8423_v18, 5  ;;  %v8431_v57 = vrot.slane %v8429_v58, 5  ;;  %v21162_v43 = vpop.f32.mrf.mxu0  ;;  %v8439_v38 = vshll.u32 %v15412_v46, 16  ;;  %v21167_v28 = vpop.f32.mrf.mxu1  ;;  %v15415_v3 = vld [vmem:[%s18815_s16 + $0x2c] sm:$0x1] }
 0x247   : > { %17062 = vmatmul.mubr.msk.bf16.gmra.mxu0 %vm830_vm3, %v15328_v12  ;;  %v5231_v15 = vadd.f32 %v21039_v34, %v20794_v13  ;;  %v8444_v11 = vshrl.u32 %v15413_v63, 16  ;;  %v8447_v53 = vshll.u32 %v15413_v63, 16  ;;  %v8435_v49 = vrot.slane %v8433_v31, 4 }
 0x248   : > { %17028 = vmatmul.mubr.msk.bf16.gmra.mxu1 %vm830_vm3, %v15263_v60  ;;  %v8426_v6 = vor.u32 %v8425_v23, %v8422_v16  ;;  %v8453_v29 = vshll.u32 %v15414_v47, 16  ;;  %v8457_v18 = vshrl.u32 %v15414_v47, 16  ;;  %v21171_v1 = vpop.f32.mrf.mxu0  ;;  %v8441_v46 = vrot.slane %v8439_v38, 5  ;;  %v21177_v63 = vpop.f32.mrf.mxu1 }
 0x249   : > { %17067 = vmatprep.mubr.msk.bf16.mxu1 %vm830_vm3, %v17627_v37  ;;  %v21175_v58 = vadd.f32 %v21029_v32, %v5231_v15  ;;  %v8446_v13 = vrot.slane %v8444_v11, 4  ;;  %v8449_v34 = vrot.slane %v8447_v53, 5  ;;  %v8436_v12 = vor.u32 %v8435_v49, %v8431_v57  ;;  %v17705_v37 = vld [vmem:[%s24893_s3 + $0x22] sm:$0x3]  ;;  %v15416_v15 = vld [vmem:[%s18815_s16 + $0x30] sm:$0xf] }
 0x24a   : > { %v8427_v44 = vrot.slane %v8426_v6, 4  ;;  %v8455_v16 = vrot.slane %v8453_v29, 5  ;;  %v8459_v60 = vrot.slane %v8457_v18, 4  ;;  %v21179_v23 = vpop.f32.mrf.mxu0  ;;  %v8463_v31 = vshll.u32 %v15415_v3, 16  ;;  %v21188_v11 = vpop.f32.mrf.mxu1  ;;  %v17628_v49 = vld [vmem:[%s18815_s16 + $0x24] sm:$0xff]  }
 0x24b   : > { %v8450_v47 = vor.u32 %v8449_v34, %v8446_v13  ;;  %v9372_v32 = vsel %vm879_vm0, %v17705_v37, 0  ;;  %v5229_v38 = vadd.f32 %v21049_v22, %v20807_v55  ;;  %v8437_v6 = vrot.slane %v8436_v12, 4  ;;  %v17706_v29 = vld [vmem:[%s24893_s3 + $0x24] sm:$0x3] }
 0x24c   : > { %v8432_v53 = vsel %vm17904_vm4, %v8427_v44, %v8431_v57  ;;  %v8460_v3 = vor.u32 %v8459_v60, %v8455_v16  ;;  %v9730_v18 = vsel %vm879_vm0, %v17706_v29, 0  ;;  %v21197_v13 = vpop.f32.mrf.mxu0  ;;  %v8465_v22 = vrot.slane %v8463_v31, 5  ;;  %v21205_v44 = vld [vmem:[%s18815_s16 + $0x34] sm:$0xf]  ;;  %v21207_v12 = vpop.f32.mrf.mxu1  ;;  %v21215_v31 = vld [vmem:[%s18815_s16 + $0x38] sm:$0x1] }
 0x24d   : > { %v8451_v55 = vrot.slane %v8450_v47, 4  ;;  %v21200_v34 = vadd.f32 %v21037_v8, %v5229_v38  ;;  %v5232_v57 = vadd.f32 %v21067_v30, %v20812_v0  ;;  %25236 = vst [vmem:[#allocation6_spill] sm:$0xff] %v21205_v44  ;;  %v8442_v60 = vsel %vm17904_vm4, %v8437_v6, %v8441_v46  ;;  %v17629_v47 = vld [vmem:[%s18815_s16 + $0x30] sm:$0xff]   ;;  %25237 = vst [vmem:[#allocation5_spill] sm:$0xff] %v21215_v31  ;;  %v15419_v46 = vld [vmem:[%s18815_s16 + $0x3c] sm:$0xf] }
 0x24e   : > { %v8461_v37 = vrot.slane %v8460_v3, 4  ;;  %v5230_v29 = vadd.f32 %v21082_v2, %v20820_v45  ;;  %v8468_v8 = vshrl.u32 %v15416_v15, 16  ;;  %v21217_v38 = vpop.f32.mrf.mxu0  ;;  %v8471_v10 = vshll.u32 %v15416_v15, 16  ;;  %v21225_v6 = vpop.f32.mrf.mxu1  ;;  %v21230_v45 = vld [vmem:[%s24893_s3 + $0x26] sm:$0x3] }
 0x24f   : > { %25235 = vst [vmem:[#allocation29_spill] sm:$0xff] %v21200_v34  ;;  %v15459_v34 = vcombine.low %v8432_v53, %v8442_v60  ;;  %v8456_v0 = vsel %vm17904_vm4, %v8451_v55, %v8455_v16  ;;  %v21222_v30 = vadd.f32 %v21045_v27, %v5232_v57  ;;  %25239 = vst [vmem:[#allocation8_spill] sm:$0xff] %v21230_v45  ;;  %v8477_v15 = vshll.u32 %v21205_v44, 16  ;;  %v21240_v53 = vld [vmem:[%s18815_s16 + $0x40] sm:$0xf] }
 0x250   : > { %17068 = vmatmul.mubr.msk.bf16.vlgmr.msra.gmra.mxu1 %vm830_vm3, %v17628_v49  ;;  %v8466_v2 = vsel %vm17904_vm4, %v8461_v37, %v8465_v22  ;;  %v21236_v16 = vadd.f32 %v21058_v39, %v5230_v29  ;;  %v8470_v27 = vrot.slane %v8468_v8, 4  ;;  %25241 = vst [vmem:[#allocation13_spill] sm:$0xff] %v21240_v53  ;;  %v21242_v3 = vpop.f32.mrf.mxu0  ;;  %v8473_v57 = vrot.slane %v8471_v10, 5  ;;  %v21248_v22 = vld [vmem:[%s18815_s16 + $0x44] sm:$0x1]  ;;  %v21250_v39 = vpop.f32.mrf.mxu1 }
 0x251   : > { %25238 = vst [vmem:[#allocation12_spill] sm:$0xff] %v21222_v30  ;;  %17101 = vmatprep.mubr.msk.bf16.mxu0 %vm830_vm3, %v15459_v34  ;;  %v15460_v55 = vcombine.low %v8456_v0, %v8466_v2  ;;  %17134 = vmatpush3.bf16.msra.mxu1 %v9372_v32  ;;  %v8481_v49 = vshrl.u32 %v21205_v44, 16  ;;  %v8487_v60 = vshll.u32 %v21215_v31, 16  ;;  %25242 = vst [vmem:[#allocation4_spill] sm:$0xff] %v21248_v22  ;;  %v8479_v37 = vrot.slane %v8477_v15, 5  ;;  %v17630_v15 = vld [vmem:[%s18815_s16 + $0x3c] sm:$0xff]  }
 0x252   : > { %25240 = vst [vmem:[#allocation22_spill] sm:$0xff] %v21236_v16  ;;  %17071 = vmatprep.mubr.msk.bf16.mxu1 %vm830_vm3, %v17629_v47  ;;  %v5235_v29 = vadd.f32 %v21089_v40, %v20837_v51  ;;  %v8492_v8 = vshrl.u32 %v15419_v46, 16  ;;  %v8495_v34 = vshll.u32 %v15419_v46, 16  ;;  %v21255_v0 = vpop.f32.mrf.mxu0  ;;  %17495 = vmatprep.subr.msk.bf16.mxu1 %vm879_vm0, %v21230_v45  ;;  %v21262_v10 = vld [vmem:[%s24893_s3 + $0x28] sm:$0x3]  ;;  %v8474_v32 = vor.u32 %v8473_v57, %v8470_v27  ;;  %v21266_v40 = vpop.f32.mrf.mxu1 }
 0x253   : > { %17102 = vmatmul.mubr.msk.bf16.vlgmr.msra.gmra.mxu0 %vm830_vm3, %v15460_v55  ;;  %v8483_v47 = vrot.slane %v8481_v49, 4  ;;  %v8489_v2 = vrot.slane %v8487_v60, 5  ;;  %v8501_v51 = vshll.u32 %v21240_v53, 16  ;;  %v8505_v16 = vshrl.u32 %v21240_v53, 16  ;;  %v17631_v60 = vld [vmem:[%s18815_s16 + $0x48] sm:$0xff]  }
 0x254   : > { %17168 = vmatpush3.bf16.msra.mxu0 %v9730_v18  ;;  %v21269_v46 = vadd.f32 %v21078_v7, %v5235_v29  ;;  %v8494_v31 = vrot.slane %v8492_v8, 4  ;;  %v8497_v44 = vrot.slane %v8495_v34, 5  ;;  %v21273_v30 = vpop.f32.mrf.mxu0  ;;  %v8475_v27 = vrot.slane %v8474_v32, 4  ;;  %v21277_v45 = vpop.f32.mrf.mxu1  ;;  %v15422_v34 = vld [vmem:[%s18815_s16 + $0x48] sm:$0xf] }
 0x255   : > { %v8484_v55 = vor.u32 %v8483_v47, %v8479_v37  ;;  %v8503_v57 = vrot.slane %v8501_v51, 5  ;;  %v8511_v49 = vshll.u32 %v21248_v22, 16  ;;  %17496 = vmatprep.subr.msk.bf16.mxu0 %vm879_vm0, %v21262_v10  ;;  %v8507_v18 = vrot.slane %v8505_v16, 4 }
 0x256   : > { %v8498_v7 = vor.u32 %v8497_v44, %v8494_v31  ;;  %v5233_v29 = vadd.f32 %v21098_v52, %v20840_v50  ;;  %v5236_v8 = vadd.f32 %v21109_v21, %v20845_v33  ;;  %v21286_v32 = vpop.f32.mrf.mxu0  ;;  %v8480_v47 = vsel %vm17904_vm4, %v8475_v27, %v8479_v37  ;;  %v21293_v31 = vld [vmem:[%s18815_s16 + $0x4c] sm:$0xf]  ;;  %v21295_v16 = vpop.f32.mrf.mxu1  ;;  %v21305_v37 = vld [vmem:[%s18815_s16 + $0x50] sm:$0x1] }
 0x257   : > { %v8485_v51 = vrot.slane %v8484_v55, 4  ;;  %v8513_v22 = vrot.slane %v8511_v49, 5  ;;  %v5234_v44 = vadd.f32 %v21115_v17, %v20851_v35  ;;  %25243 = vst [vmem:[#allocation17_spill] sm:$0xff] %v21293_v31  ;;  %v8508_v33 = vor.u32 %v8507_v18, %v8503_v57  ;;  %25246 = vst [vmem:[#allocation32_spill] sm:$0xff] %v21305_v37 }
 0x258   : > { %17072 = vmatmul.mubr.msk.bf16.gmra.mxu1 %vm830_vm3, %v17630_v15  ;;  %v8499_v50 = vrot.slane %v8498_v7, 4  ;;  %v21299_v21 = vadd.f32 %v21085_v25, %v5233_v29  ;;  %v21302_v52 = vadd.f32 %v21094_v14, %v5236_v8  ;;  %v21307_v27 = vpop.f32.mrf.mxu0  ;;  %v8516_v15 = vshrl.u32 %v15422_v34, 16  ;;  %v15425_v25 = vld [vmem:[%s18815_s16 + $0x54] sm:$0xf]  ;;  %v21316_v49 = vpop.f32.mrf.mxu1 }
 0x259   : > { %v8490_v35 = vsel %vm17904_vm4, %v8485_v51, %v8489_v2  ;;  %v21312_v17 = vadd.f32 %v21105_v9, %v5234_v44  ;;  %17075 = vmatprep.mubr.msk.bf16.mxu1 %vm830_vm3, %v17631_v60  ;;  %v8519_v55 = vshll.u32 %v15422_v34, 16  ;;  %v8509_v18 = vrot.slane %v8508_v33, 4  ;;  %v21326_v51 = vld [vmem:[%s18815_s16 + $0x58] sm:$0xf] }
 0x25a   : > { %25244 = vst [vmem:[#allocation30_spill] sm:$0xff] %v21299_v21  ;;  %25245 = vst [vmem:[#allocation31_spill] sm:$0xff] %v21302_v52  ;;  %v15461_v14 = vcombine.low %v8480_v47, %v8490_v35  ;;  %v8504_v7 = vsel %vm17904_vm4, %v8499_v50, %v8503_v57  ;;  %v8525_v2 = vshll.u32 %v21293_v31, 16  ;;  %v21321_v29 = vpop.f32.mrf.mxu0  ;;  %v8518_v9 = vrot.slane %v8516_v15, 4  ;;  %v21328_v44 = vpop.f32.mrf.mxu1  ;;  %v17632_v33 = vld [vmem:[%s18815_s16 + $0x54] sm:$0xff]   ;;  %v17633_v21 = vld [vmem:[%s18815_s16 + $0x60] sm:$0xff]  }
 0x25b   : > { %25247 = vst [vmem:[#allocation33_spill] sm:$0xff] %v21312_v17  ;;  %v8521_v8 = vrot.slane %v8519_v55, 5  ;;  %v8529_v60 = vshrl.u32 %v21293_v31, 16  ;;  %v8535_v34 = vshll.u32 %v21305_v37, 16  ;;  %25248 = vst [vmem:[#allocation34_spill] sm:$0xff] %v21326_v51  ;;  %v8514_v57 = vsel %vm17904_vm4, %v8509_v18, %v8513_v22 }
 0x25c   : > { %17105 = vmatprep.mubr.msk.bf16.mxu0 %vm830_vm3, %v15461_v14  ;;  %v8527_v47 = vrot.slane %v8525_v2, 5  ;;  %v5239_v50 = vadd.f32 %v21126_v24, %v20861_v61  ;;  %v21337_v35 = vld [vmem:[%s18815_s16 + $0x5c] sm:$0x1]  ;;  %v8540_v15 = vshrl.u32 %v15425_v25, 16  ;;  %v21339_v55 = vpop.f32.mrf.mxu0  ;;  %v15462_v37 = vcombine.low %v8504_v7, %v8514_v57  ;;  %v21342_v53 = vpop.f32.mrf.mxu1 }
 0x25d   : > { %25249 = vst [vmem:[#allocation35_spill] sm:$0xff] %v21337_v35  ;;  %v8522_v31 = vor.u32 %v8521_v8, %v8518_v9  ;;  %v8531_v17 = vrot.slane %v8529_v60, 4  ;;  %v8537_v52 = vrot.slane %v8535_v34, 5  ;;  %v8543_v18 = vshll.u32 %v15425_v25, 16 }
 0x25e   : > { %v21345_v14 = vadd.f32 %v21113_v56, %v5239_v50  ;;  %v8542_v22 = vrot.slane %v8540_v15, 4  ;;  %v8549_v61 = vshll.u32 %v21326_v51, 16  ;;  %17106 = vmatmul.mubr.msk.bf16.gmra.mxu0 %vm830_vm3, %v15462_v37  ;;  %v8553_v7 = vshrl.u32 %v21326_v51, 16  ;;  %v21351_v8 = vpop.f32.mrf.mxu1  ;;  %v21353_v60 = vpop.f32.mrf.mxu0  ;;  %v15428_v37 = vld [vmem:[%s18815_s16 + $0x60] sm:$0xf] }
 0x25f   : > { %v8523_v24 = vrot.slane %v8522_v31, 4  ;;  %v8532_v2 = vor.u32 %v8531_v17, %v8527_v47  ;;  %v8559_v9 = vshll.u32 %v21337_v35, 16  ;;  %v8545_v56 = vrot.slane %v8543_v18, 5  ;;  %v21365_v35 = vld [vmem:[%s18815_s16 + $0x64] sm:$0xf] }
 0x260   : > { %25250 = vst [vmem:[#allocation36_spill] sm:$0xff] %v21345_v14  ;;  %17076 = vmatmul.mubr.msk.bf16.gmra.mxu1 %vm830_vm3, %v17632_v33  ;;  %v8551_v34 = vrot.slane %v8549_v61, 5  ;;  %v5237_v25 = vadd.f32 %v21142_v54, %v20868_v41  ;;  %v5240_v31 = vadd.f32 %v21160_v26, %v20871_v19  ;;  %v8555_v50 = vrot.slane %v8553_v7, 4  ;;  %25251 = vst [vmem:[#allocation37_spill] sm:$0xff] %v21365_v35  ;;  %v21367_v33 = vpop.f32.mrf.mxu1  ;;  %v21369_v18 = vpop.f32.mrf.mxu0  ;;  %v21382_v61 = vld [vmem:[%s18815_s16 + $0x68] sm:$0x1] }
 0x261   : > { %v8528_v17 = vsel %vm17904_vm4, %v8523_v24, %v8527_v47  ;;  %v8533_v57 = vrot.slane %v8532_v2, 4  ;;  %v8561_v15 = vrot.slane %v8559_v9, 5  ;;  %17079 = vmatprep.mubr.msk.bf16.mxu1 %vm830_vm3, %v17633_v21  ;;  %v8546_v41 = vor.u32 %v8545_v56, %v8542_v22  ;;  %25254 = vst [vmem:[#allocation40_spill] sm:$0xff] %v21382_v61 }
 0x262   : > { %v21372_v19 = vadd.f32 %v21123_v62, %v5237_v25  ;;  %v21375_v54 = vadd.f32 %v21135_v20, %v5240_v31  ;;  %v5238_v26 = vadd.f32 %v21167_v28, %v20878_v4  ;;  %v8556_v47 = vor.u32 %v8555_v50, %v8551_v34  ;;  %v21384_v22 = vpop.f32.mrf.mxu1  ;;  %v21386_v7 = vpop.f32.mrf.mxu0  ;;  %v17634_v28 = vld [vmem:[%s18815_s16 + $0x6c] sm:$0xff]  }
 0x263   : > { %v8538_v21 = vsel %vm17904_vm4, %v8533_v57, %v8537_v52  ;;  %v8564_v24 = vshrl.u32 %v15428_v37, 16  ;;  %v8567_v2 = vshll.u32 %v15428_v37, 16  ;;  %v8547_v9 = vrot.slane %v8546_v41, 4  ;;  %v15431_v52 = vld [vmem:[%s18815_s16 + $0x6c] sm:$0xf]  ;;  %v17635_v57 = vld [vmem:[%s18815_s16 + $0x78] sm:$0xff]  }
 0x264   : > { %25252 = vst [vmem:[#allocation38_spill] sm:$0xff] %v21372_v19  ;;  %25253 = vst [vmem:[#allocation39_spill] sm:$0xff] %v21375_v54  ;;  %v15463_v62 = vcombine.low %v8528_v17, %v8538_v21  ;;  %v21389_v20 = vadd.f32 %v21151_v48, %v5238_v26  ;;  %v8573_v4 = vshll.u32 %v21365_v35, 16  ;;  %v8557_v56 = vrot.slane %v8556_v47, 4  ;;  %v21396_v50 = vpop.f32.mrf.mxu1  ;;  %v25256_v26 = vld [vmem:[#allocation18_spill] sm:$0xff] }
 0x265   : > { %v8566_v25 = vrot.slane %v8564_v24, 4  ;;  %v8569_v31 = vrot.slane %v8567_v2, 5  ;;  %v8577_v37 = vshrl.u32 %v21365_v35, 16  ;;  %v8552_v17 = vsel %vm17904_vm4, %v8547_v9, %v8551_v34  ;;  %v21405_v47 = vld [vmem:[%s18815_s16 + $0x70] sm:$0xf]  ;;  %v21407_v24 = vpop.f32.mrf.mxu0 }
 0x266   : > { %25255 = vst [vmem:[#allocation41_spill] sm:$0xff] %v21389_v20  ;;  %17109 = vmatprep.mubr.msk.bf16.mxu0 %vm830_vm3, %v15463_v62  ;;  %v8575_v48 = vrot.slane %v8573_v4, 5  ;;  %v8583_v41 = vshll.u32 %v21382_v61, 16  ;;  %v5243_v21 = vadd.f32 %v21177_v63, %v25256_v26  ;;  %25257 = vst [vmem:[#allocation18_spill] sm:$0xff] %v21405_v47  ;;  %v8562_v2 = vsel %vm17904_vm4, %v8557_v56, %v8561_v15  ;;  %v21412_v54 = vld [vmem:[%s18815_s16 + $0x74] sm:$0x1]  ;;  %v21414_v19 = vpop.f32.mrf.mxu1 }
 0x267   : > { %v8570_v35 = vor.u32 %v8569_v31, %v8566_v25  ;;  %v8579_v20 = vrot.slane %v8577_v37, 4  ;;  %25258 = vst [vmem:[#allocation42_spill] sm:$0xff] %v21412_v54  ;;  %v8588_v62 = vshrl.u32 %v15431_v52, 16  ;;  %v15464_v34 = vcombine.low %v8552_v17, %v8562_v2 }
 0x268   : > { %v8585_v9 = vrot.slane %v8583_v41, 5  ;;  %v21417_v4 = vadd.f32 %v21162_v43, %v5243_v21  ;;  %17080 = vmatmul.mubr.msk.bf16.gmra.mxu1 %vm830_vm3, %v17634_v28  ;;  %v8591_v63 = vshll.u32 %v15431_v52, 16  ;;  %v8597_v15 = vshll.u32 %v21405_v47, 16  ;;  %v21422_v56 = vpop.f32.mrf.mxu1  ;;  %v25260_v28 = vld [vmem:[#allocation24_spill] sm:$0xff]  ;;  %v25261_v41 = vld [vmem:[#allocation7_spill] sm:$0xff] }
 0x269   : > { %v8571_v26 = vrot.slane %v8570_v35, 4  ;;  %v8580_v61 = vor.u32 %v8579_v20, %v8575_v48  ;;  %v8590_v51 = vrot.slane %v8588_v62, 4  ;;  %17083 = vmatprep.mubr.msk.bf16.mxu1 %vm830_vm3, %v17635_v57  ;;  %17110 = vmatmul.mubr.msk.bf16.gmra.mxu0 %vm830_vm3, %v15464_v34  ;;  %v8601_v43 = vshrl.u32 %v21405_v47, 16  ;;  %v15434_v20 = vld [vmem:[%s18815_s16 + $0x78] sm:$0xf]  ;;  %v21430_v52 = vpop.f32.mrf.mxu0 }
 0x26a   : > { %25259 = vst [vmem:[#allocation43_spill] sm:$0xff] %v21417_v4  ;;  %v8593_v25 = vrot.slane %v8591_v63, 5  ;;  %v8607_v31 = vshll.u32 %v21412_v54, 16  ;;  %v5241_v35 = vadd.f32 %v21188_v11, %v25260_v28  ;;  %v8599_v17 = vrot.slane %v8597_v15, 5  ;;  %v21436_v2 = vpop.f32.mrf.mxu1  ;;  %v21442_v28 = vld [vmem:[%s18815_s16 + $0x7c] sm:$0xf] }
 0x26b   : > { %v8576_v37 = vsel %vm17904_vm4, %v8571_v26, %v8575_v48  ;;  %v8581_v57 = vrot.slane %v8580_v61, 4  ;;  %v5244_v21 = vadd.f32 %v21207_v12, %v25261_v41  ;;  %v8603_v34 = vrot.slane %v8601_v43, 4  ;;  %25263 = vst [vmem:[#allocation7_spill] sm:$0xff] %v21442_v28  ;;  %v17636_v54 = vld [vmem:[%s18815_s16 + $0x84] sm:$0xff]   ;;  %v21445_v47 = vpop.f32.mrf.mxu0  ;;  %v25265_v12 = vld [vmem:[#allocation20_spill] sm:$0xff] }
 0x26c   : > { %v8594_v62 = vor.u32 %v8593_v25, %v8590_v51  ;;  %v8609_v63 = vrot.slane %v8607_v31, 5  ;;  %v21439_v11 = vadd.f32 %v21171_v1, %v5241_v35  ;;  %v5242_v51 = vadd.f32 %v21225_v6, %v25265_v12  ;;  %v21455_v26 = vld [vmem:[%s18815_s16 + $0x80] sm:$0x1]  ;;  %v17637_v25 = vld [vmem:[%s18815_s16 + $0x90] sm:$0xff]   ;;  %v21458_v1 = vpop.f32.mrf.mxu1 }
 0x26d   : > { %v8586_v61 = vsel %vm17904_vm4, %v8581_v57, %v8585_v9  ;;  %v21450_v48 = vadd.f32 %v21179_v23, %v5244_v21  ;;  %25266 = vst [vmem:[#allocation20_spill] sm:$0xff] %v21455_v26  ;;  %v8612_v15 = vshrl.u32 %v15434_v20, 16  ;;  %v8604_v35 = vor.u32 %v8603_v34, %v8599_v17  ;;  %v21461_v4 = vpop.f32.mrf.mxu0 }
 0x26e   : > { %25262 = vst [vmem:[#allocation24_spill] sm:$0xff] %v21439_v11  ;;  %v15465_v43 = vcombine.low %v8576_v37, %v8586_v61  ;;  %v8595_v31 = vrot.slane %v8594_v62, 4  ;;  %v8615_v41 = vshll.u32 %v15434_v20, 16  ;;  %v15437_v11 = vld [vmem:[%s18815_s16 + $0x84] sm:$0xf]  ;;  %v21464_v23 = vadd.f32 %v21197_v13, %v5242_v51  ;;  %v21468_v21 = vpop.f32.mrf.mxu1  ;;  %v25268_v51 = vld [vmem:[#allocation9_spill] sm:$0xff] }
 0x26f   : > { %25264 = vst [vmem:[#allocation44_spill] sm:$0xff] %v21450_v48  ;;  %v8614_v9 = vrot.slane %v8612_v15, 4  ;;  %v8621_v6 = vshll.u32 %v21442_v28, 16  ;;  %v8625_v57 = vshrl.u32 %v21442_v28, 16  ;;  %v8605_v20 = vrot.slane %v8604_v35, 4  ;;  %v21475_v13 = vpop.f32.mrf.mxu0 }
 0x270   : > { %25267 = vst [vmem:[#allocation45_spill] sm:$0xff] %v21464_v23  ;;  %17113 = vmatprep.mubr.msk.bf16.mxu0 %vm830_vm3, %v15465_v43  ;;  %v8600_v37 = vsel %vm17904_vm4, %v8595_v31, %v8599_v17  ;;  %v8617_v62 = vrot.slane %v8615_v41, 5  ;;  %v8631_v34 = vshll.u32 %v21455_v26, 16  ;;  %17084 = vmatmul.mubr.msk.bf16.gmra.mxu1 %vm830_vm3, %v17636_v54  ;;  %v5247_v15 = vadd.f32 %v21250_v39, %v25268_v51  ;;  %v21480_v28 = vld [vmem:[%s18815_s16 + $0x88] sm:$0xf]  ;;  %v21483_v17 = vpop.f32.mrf.mxu1 }
 0x271   : > { %v8623_v61 = vrot.slane %v8621_v6, 5  ;;  %v8627_v12 = vrot.slane %v8625_v57, 4  ;;  %25269 = vst [vmem:[#allocation9_spill] sm:$0xff] %v21480_v28  ;;  %v8636_v43 = vshrl.u32 %v15437_v11, 16  ;;  %17087 = vmatprep.mubr.msk.bf16.mxu1 %vm830_vm3, %v17637_v25  ;;  %v8610_v31 = vsel %vm17904_vm4, %v8605_v20, %v8609_v63  ;;  %v21488_v41 = vld [vmem:[%s18815_s16 + $0x8c] sm:$0x1]  ;;  %v21490_v57 = vpop.f32.mrf.mxu0 }
 0x272   : > { %v8618_v35 = vor.u32 %v8617_v62, %v8614_v9  ;;  %v8633_v54 = vrot.slane %v8631_v34, 5  ;;  %25270 = vst [vmem:[#allocation46_spill] sm:$0xff] %v21488_v41  ;;  %v8639_v6 = vshll.u32 %v15437_v11, 16  ;;  %v15466_v26 = vcombine.low %v8600_v37, %v8610_v31  ;;  %v21495_v23 = vpop.f32.mrf.mxu1  ;;  %v17638_v11 = vld [vmem:[%s18815_s16 + $0x9c] sm:$0xff]  }
 0x273   : > { %v8628_v39 = vor.u32 %v8627_v12, %v8623_v61  ;;  %v21493_v51 = vadd.f32 %v21217_v38, %v5247_v15  ;;  %v8638_v25 = vrot.slane %v8636_v43, 4  ;;  %v8645_v63 = vshll.u32 %v21480_v28, 16  ;;  %v21500_v20 = vpop.f32.mrf.mxu0  ;;  %v25272_v62 = vld [vmem:[#allocation25_spill] sm:$0xff]  ;;  %v25273_v12 = vld [vmem:[#allocation28_spill] sm:$0xff]  ;;  %v17639_v43 = vld [vmem:[%s18815_s16 + $0xa8] sm:$0xff]  }
 0x274   : > { %v8619_v48 = vrot.slane %v8618_v35, 4  ;;  %v8641_v14 = vrot.slane %v8639_v6, 5  ;;  %v8649_v9 = vshrl.u32 %v21480_v28, 16  ;;  %17114 = vmatmul.mubr.msk.bf16.gmra.mxu0 %vm830_vm3, %v15466_v26  ;;  %v8655_v38 = vshll.u32 %v21488_v41, 16  ;;  %v21509_v31 = vpop.f32.mrf.mxu1  ;;  %v15440_v26 = vld [vmem:[%s18815_s16 + $0x90] sm:$0xf] }
 0x275   : > { %25271 = vst [vmem:[#allocation47_spill] sm:$0xff] %v21493_v51  ;;  %v8629_v37 = vrot.slane %v8628_v39, 4  ;;  %v5245_v34 = vadd.f32 %v21266_v40, %v25272_v62  ;;  %v5248_v15 = vadd.f32 %v21277_v45, %v25273_v12  ;;  %v8647_v28 = vrot.slane %v8645_v63, 5  ;;  %v21515_v39 = vld [vmem:[%s18815_s16 + $0x94] sm:$0xf]  ;;  %v21517_v41 = vpop.f32.mrf.mxu0 }
 0x276   : > { %v8624_v35 = vsel %vm17904_vm4, %v8619_v48, %v8623_v61  ;;  %v8642_v6 = vor.u32 %v8641_v14, %v8638_v25  ;;  %v8651_v51 = vrot.slane %v8649_v9, 4  ;;  %25274 = vst [vmem:[#allocation25_spill] sm:$0xff] %v21515_v39  ;;  %25275 = vst [vmem:[#allocation28_spill] sm:$0xff] %v21517_v41  ;;  %v8657_v62 = vrot.slane %v8655_v38, 5  ;;  %v21528_v48 = vld [vmem:[%s18815_s16 + $0x98] sm:$0x1]  ;;  %v21530_v14 = vpop.f32.mrf.mxu1 }
 0x277   : > { %v8634_v40 = vsel %vm17904_vm4, %v8629_v37, %v8633_v54  ;;  %v21522_v45 = vadd.f32 %v21242_v3, %v5245_v34  ;;  %v21525_v12 = vadd.f32 %v21255_v0, %v5248_v15  ;;  %25278 = vst [vmem:[#allocation50_spill] sm:$0xff] %v21528_v48  ;;  %v25279_v9 = vld [vmem:[#allocation10_spill] sm:$0xff]  ;;  %v21535_v54 = vpop.f32.mrf.mxu0  ;;  %v8660_v37 = vshrl.u32 %v15440_v26, 16  ;;  %v15443_v34 = vld [vmem:[%s18815_s16 + $0x9c] sm:$0xf] }
 0x278   : > { %v15467_v61 = vcombine.low %v8624_v35, %v8634_v40  ;;  %v8643_v25 = vrot.slane %v8642_v6, 4  ;;  %v8652_v63 = vor.u32 %v8651_v51, %v8647_v28  ;;  %v5246_v41 = vadd.f32 %v21295_v16, %v25279_v9  ;;  %17088 = vmatmul.mubr.msk.bf16.gmra.mxu1 %vm830_vm3, %v17638_v11 }
 0x279   : > { %25276 = vst [vmem:[#allocation48_spill] sm:$0xff] %v21522_v45  ;;  %25277 = vst [vmem:[#allocation49_spill] sm:$0xff] %v21525_v12  ;;  %v8663_v3 = vshll.u32 %v15440_v26, 16  ;;  %v8669_v0 = vshll.u32 %v21515_v39, 16  ;;  %v8673_v38 = vshrl.u32 %v21515_v39, 16  ;;  %17091 = vmatprep.mubr.msk.bf16.mxu1 %vm830_vm3, %v17639_v43  ;;  %v21541_v15 = vpop.f32.mrf.mxu1  ;;  %v8679_v35 = vshll.u32 %v21528_v48, 16  ;;  %v21550_v6 = vpop.f32.mrf.mxu0 }
 0x27a   : > { %17117 = vmatprep.mubr.msk.bf16.mxu0 %vm830_vm3, %v15467_v61  ;;  %v8648_v16 = vsel %vm17904_vm4, %v8643_v25, %v8647_v28  ;;  %v8653_v51 = vrot.slane %v8652_v63, 4  ;;  %v21547_v11 = vadd.f32 %v21273_v30, %v5246_v41  ;;  %25281 = vst [vmem:[#allocation51_spill] sm:$0xff] %v21550_v6  ;;  %v8662_v26 = vrot.slane %v8660_v37, 4  ;;  %v21553_v39 = vld [vmem:[%s18815_s16 + $0xa0] sm:$0xf]  ;;  %v25283_v63 = vld [vmem:[#allocation11_spill] sm:$0xff] }
 0x27b   : > { %v8665_v40 = vrot.slane %v8663_v3, 5  ;;  %v8671_v43 = vrot.slane %v8669_v0, 5  ;;  %v8675_v9 = vrot.slane %v8673_v38, 4  ;;  %25282 = vst [vmem:[#allocation52_spill] sm:$0xff] %v21553_v39  ;;  %v21555_v61 = vpop.f32.mrf.mxu1  ;;  %v8681_v25 = vrot.slane %v8679_v35, 5  ;;  %v21565_v37 = vpop.f32.mrf.mxu0  ;;  %v17641_v45 = vld [vmem:[%s18815_s16 + $0xc0] sm:$0xff]  }
 0x27c   : > { %25280 = vst [vmem:[#allocation10_spill] sm:$0xff] %v21547_v11  ;;  %v8658_v28 = vsel %vm17904_vm4, %v8653_v51, %v8657_v62  ;;  %v5251_v30 = vadd.f32 %v21316_v49, %v25283_v63  ;;  %v21562_v41 = vld [vmem:[%s18815_s16 + $0xa4] sm:$0x1]  ;;  %v8684_v48 = vshrl.u32 %v15443_v34, 16  ;;  %v17640_v11 = vld [vmem:[%s18815_s16 + $0xb4] sm:$0xff]   ;;  %v8687_v12 = vshll.u32 %v15443_v34, 16 }
 0x27d   : > { %25284 = vst [vmem:[#allocation11_spill] sm:$0xff] %v21562_v41  ;;  %v15468_v3 = vcombine.low %v8648_v16, %v8658_v28  ;;  %v8666_v0 = vor.u32 %v8665_v40, %v8662_v26  ;;  %v8676_v38 = vor.u32 %v8675_v9, %v8671_v43  ;;  %v21568_v6 = vpop.f32.mrf.mxu1  ;;  %v8693_v49 = vshll.u32 %v21553_v39, 16  ;;  %v21575_v63 = vpop.f32.mrf.mxu0 }
 0x27e   : > { %v21571_v62 = vadd.f32 %v21286_v32, %v5251_v30  ;;  %v8686_v51 = vrot.slane %v8684_v48, 4  ;;  %v8697_v35 = vshrl.u32 %v21553_v39, 16  ;;  %25286 = vst [vmem:[#allocation54_spill] sm:$0xff] %v21575_v63  ;;  %v8689_v34 = vrot.slane %v8687_v12, 5  ;;  %v25287_v48 = vld [vmem:[#allocation14_spill] sm:$0xff] }
 0x27f   : > { %17118 = vmatmul.mubr.msk.bf16.gmra.mxu0 %vm830_vm3, %v15468_v3  ;;  %v8667_v16 = vrot.slane %v8666_v0, 4  ;;  %v8677_v26 = vrot.slane %v8676_v38, 4  ;;  %v8703_v40 = vshll.u32 %v21562_v41, 16  ;;  %v21579_v9 = vpop.f32.mrf.mxu1  ;;  %v8695_v32 = vrot.slane %v8693_v49, 5  ;;  %v15446_v63 = vld [vmem:[%s18815_s16 + $0xa8] sm:$0xf]  ;;  %v21587_v3 = vpop.f32.mrf.mxu0 }
 0x280   : > { %25285 = vst [vmem:[#allocation53_spill] sm:$0xff] %v21571_v62  ;;  %v8699_v28 = vrot.slane %v8697_v35, 4  ;;  %v5249_v30 = vadd.f32 %v21328_v44, %v25287_v48  ;;  %v25288_v62 = vld [vmem:[#allocation3_spill] sm:$0xff]  ;;  %17092 = vmatmul.mubr.msk.bf16.gmra.mxu1 %vm830_vm3, %v17640_v11  ;;  %v8690_v38 = vor.u32 %v8689_v34, %v8686_v51  ;;  %v21597_v44 = vld [vmem:[%s18815_s16 + $0xb0] sm:$0x1]  ;;  %v8708_v34 = vshrl.u32 %v15446_v63, 16 }
 0x281   : > { %v5252_v39 = vadd.f32 %v21342_v53, %v25288_v62  ;;  %v8672_v12 = vsel %vm17904_vm4, %v8667_v16, %v8671_v43  ;;  %v8682_v0 = vsel %vm17904_vm4, %v8677_v26, %v8681_v25  ;;  %v8705_v49 = vrot.slane %v8703_v40, 5  ;;  %v21594_v35 = vld [vmem:[%s18815_s16 + $0xac] sm:$0xf]  ;;  %25290 = vst [vmem:[#allocation3_spill] sm:$0xff] %v21597_v44  ;;  %17095 = vmatprep.mubr.msk.bf16.mxu1 %vm830_vm3, %v17641_v45  ;;  %v21600_v53 = vpop.f32.mrf.mxu1  ;;  %v21608_v25 = vpop.f32.mrf.mxu0  ;;  %v25293_v16 = vld [vmem:[#allocation16_spill] sm:$0xff] }
 0x282   : > { %25289 = vst [vmem:[#allocation14_spill] sm:$0xff] %v21594_v35  ;;  %v15469_v11 = vcombine.low %v8672_v12, %v8682_v0  ;;  %v8700_v62 = vor.u32 %v8699_v28, %v8695_v32  ;;  %v21603_v48 = vadd.f32 %v21307_v27, %v5249_v30  ;;  %v8691_v51 = vrot.slane %v8690_v38, 4  ;;  %v15449_v40 = vld [vmem:[%s18815_s16 + $0xb4] sm:$0xf]  ;;  %v17642_v30 = vld [vmem:[%s18815_s16 + $0xcc] sm:$0xff]  }
 0x283   : > { %v21606_v43 = vadd.f32 %v21321_v29, %v5252_v39  ;;  %v5250_v26 = vadd.f32 %v21351_v8, %v25293_v16  ;;  %v8711_v45 = vshll.u32 %v15446_v63, 16  ;;  %v21613_v41 = vpop.f32.mrf.mxu1  ;;  %v8717_v27 = vshll.u32 %v21594_v35, 16  ;;  %v21620_v12 = vpop.f32.mrf.mxu0 }
 0x284   : > { %25291 = vst [vmem:[#allocation55_spill] sm:$0xff] %v21603_v48  ;;  %17121 = vmatprep.mubr.msk.bf16.mxu0 %vm830_vm3, %v15469_v11  ;;  %v8701_v28 = vrot.slane %v8700_v62, 4  ;;  %v8721_v29 = vshrl.u32 %v21594_v35, 16  ;;  %v8727_v39 = vshll.u32 %v21597_v44, 16  ;;  %25294 = vst [vmem:[#allocation16_spill] sm:$0xff] %v21620_v12  ;;  %v8696_v8 = vsel %vm17904_vm4, %v8691_v51, %v8695_v32 }
 0x285   : > { %25292 = vst [vmem:[#allocation56_spill] sm:$0xff] %v21606_v43  ;;  %v21625_v63 = vadd.f32 %v21339_v55, %v5250_v26  ;;  %v8710_v0 = vrot.slane %v8708_v34, 4  ;;  %v8713_v38 = vrot.slane %v8711_v45, 5  ;;  %v21628_v11 = vld [vmem:[%s18815_s16 + $0xb8] sm:$0xf]  ;;  %v21630_v62 = vpop.f32.mrf.mxu1  ;;  %v8719_v35 = vrot.slane %v8717_v27, 5  ;;  %v21637_v12 = vpop.f32.mrf.mxu0 }
 0x286   : > { %25296 = vst [vmem:[#allocation58_spill] sm:$0xff] %v21628_v11  ;;  %25297 = vst [vmem:[#allocation59_spill] sm:$0xff] %v21630_v62  ;;  %v8706_v16 = vsel %vm17904_vm4, %v8701_v28, %v8705_v49  ;;  %v8723_v44 = vrot.slane %v8721_v29, 4  ;;  %v8729_v43 = vrot.slane %v8727_v39, 5  ;;  %v21635_v48 = vld [vmem:[%s18815_s16 + $0xbc] sm:$0x1] }
 0x287   : > { %25295 = vst [vmem:[#allocation57_spill] sm:$0xff] %v21625_v63  ;;  %25298 = vst [vmem:[#allocation60_spill] sm:$0xff] %v21635_v48  ;;  %v15470_v32 = vcombine.low %v8696_v8, %v8706_v16  ;;  %v8714_v51 = vor.u32 %v8713_v38, %v8710_v0  ;;  %v25299_v55 = vld [vmem:[#allocation19_spill] sm:$0xff]  ;;  %v8732_v34 = vshrl.u32 %v15449_v40, 16  ;;  %v21641_v45 = vpop.f32.mrf.mxu1  ;;  %v8735_v62 = vshll.u32 %v15449_v40, 16  ;;  %v21646_v27 = vpop.f32.mrf.mxu0 }
 0x288   : > { %v5255_v26 = vadd.f32 %v21367_v33, %v25299_v55  ;;  %v8724_v63 = vor.u32 %v8723_v44, %v8719_v35  ;;  %v8741_v49 = vshll.u32 %v21628_v11, 16  ;;  %v8745_v28 = vshrl.u32 %v21628_v11, 16  ;;  %17096 = vmatmul.mubr.msk.bf16.gmra.mxu1 %vm830_vm3, %v17642_v30  ;;  %v15452_v30 = vld [vmem:[%s18815_s16 + $0xc0] sm:$0xf] }
 0x289   : > { %17122 = vmatmul.mubr.msk.bf16.gmra.mxu0 %vm830_vm3, %v15470_v32  ;;  %v8715_v29 = vrot.slane %v8714_v51, 4  ;;  %v8734_v33 = vrot.slane %v8732_v34, 4  ;;  %v8751_v8 = vshll.u32 %v21635_v48, 16  ;;  %v21653_v44 = vpop.f32.mrf.mxu1  ;;  %v8737_v0 = vrot.slane %v8735_v62, 5  ;;  %v21656_v55 = vpop.f32.mrf.mxu0  ;;  %v25303_v34 = vld [vmem:[#allocation23_spill] sm:$0xff] }
 0x28a   : > { %v21650_v39 = vadd.f32 %v21353_v60, %v5255_v26  ;;  %v8725_v40 = vrot.slane %v8724_v63, 4  ;;  %v8743_v38 = vrot.slane %v8741_v49, 5  ;;  %v8747_v16 = vrot.slane %v8745_v28, 4  ;;  %25301 = vst [vmem:[#allocation61_spill] sm:$0xff] %v21656_v55  ;;  %v25302_v60 = vld [vmem:[#allocation21_spill] sm:$0xff]  ;;  %v25304_v28 = vld [vmem:[#allocation26_spill] sm:$0xff] }
 0x28b   : > { %v8720_v32 = vsel %vm17904_vm4, %v8715_v29, %v8719_v35  ;;  %v8753_v51 = vrot.slane %v8751_v8, 5  ;;  %v5253_v26 = vadd.f32 %v21384_v22, %v25302_v60  ;;  %v5256_v48 = vadd.f32 %v21396_v50, %v25303_v34  ;;  %v21664_v11 = vpop.f32.mrf.mxu1  ;;  %v21671_v55 = vld [vmem:[%s18815_s16 + $0xc4] sm:$0xf]  ;;  %v21674_v35 = vld [vmem:[%s18815_s16 + $0xc8] sm:$0x1]  ;;  %v21676_v29 = vpop.f32.mrf.mxu0 }
 0x28c   : > { %25300 = vst [vmem:[#allocation19_spill] sm:$0xff] %v21650_v39  ;;  %v8730_v63 = vsel %vm17904_vm4, %v8725_v40, %v8729_v43  ;;  %v8738_v62 = vor.u32 %v8737_v0, %v8734_v33  ;;  %v8748_v49 = vor.u32 %v8747_v16, %v8743_v38  ;;  %v5254_v39 = vadd.f32 %v21414_v19, %v25304_v28  ;;  %v21708_v28 = vld [vmem:[%s18815_s16 + $0xd4] sm:$0x1] }
 0x28d   : > { %25305 = vst [vmem:[#allocation21_spill] sm:$0xff] %v21671_v55  ;;  %25306 = vst [vmem:[#allocation23_spill] sm:$0xff] %v21674_v35  ;;  %v15471_v22 = vcombine.low %v8720_v32, %v8730_v63  ;;  %v21679_v50 = vadd.f32 %v21369_v18, %v5253_v26  ;;  %v21682_v8 = vadd.f32 %v21386_v7, %v5256_v48  ;;  %v8756_v43 = vshrl.u32 %v15452_v30, 16  ;;  %v21684_v33 = vpop.f32.mrf.mxu1  ;;  %v21689_v60 = vpop.f32.mrf.mxu0  ;;  %v15455_v26 = vld [vmem:[%s18815_s16 + $0xcc] sm:$0xf] }
 0x28e   : > { %v8739_v40 = vrot.slane %v8738_v62, 4  ;;  %v8749_v19 = vrot.slane %v8748_v49, 4  ;;  %v21687_v0 = vadd.f32 %v21407_v24, %v5254_v39  ;;  %v8759_v16 = vshll.u32 %v15452_v30, 16  ;;  %v25309_v30 = vld [vmem:[#allocation27_spill] sm:$0xff]  ;;  %v21705_v49 = vld [vmem:[%s18815_s16 + $0xd0] sm:$0xf] }
 0x28f   : > { %25307 = vst [vmem:[#allocation26_spill] sm:$0xff] %v21682_v8  ;;  %17125 = vmatprep.mubr.msk.bf16.mxu0 %vm830_vm3, %v15471_v22  ;;  %v8758_v18 = vrot.slane %v8756_v43, 4  ;;  %v8765_v32 = vshll.u32 %v21671_v55, 16  ;;  %v8769_v7 = vshrl.u32 %v21671_v55, 16  ;;  %v8775_v48 = vshll.u32 %v21674_v35, 16  ;;  %v21696_v34 = vpop.f32.mrf.mxu1  ;;  %25310 = vst [vmem:[#allocation27_spill] sm:$0xff] %v21705_v49  ;;  %v21710_v22 = vpop.f32.mrf.mxu0 }
 0x290   : > { %25308 = vst [vmem:[#allocation62_spill] sm:$0xff] %v21687_v0  ;;  %v8744_v63 = vsel %vm17904_vm4, %v8739_v40, %v8743_v38  ;;  %v8754_v24 = vsel %vm17904_vm4, %v8749_v19, %v8753_v51  ;;  %v8761_v39 = vrot.slane %v8759_v16, 5  ;;  %v5259_v62 = vadd.f32 %v21422_v56, %v25309_v30  ;;  %25311 = vst [vmem:[#allocation63_spill] sm:$0xff] %v21708_v28 }
 0x291   : > { %v15472_v43 = vcombine.low %v8744_v63, %v8754_v24  ;;  %v8767_v35 = vrot.slane %v8765_v32, 5  ;;  %v8771_v55 = vrot.slane %v8769_v7, 4  ;;  %v8777_v0 = vrot.slane %v8775_v48, 5  ;;  %v21712_v8 = vpop.f32.mrf.mxu1  ;;  %v21717_v56 = vpop.f32.mrf.mxu0 }
 0x292   : > { %v8762_v38 = vor.u32 %v8761_v39, %v8758_v18  ;;  %v21715_v51 = vadd.f32 %v21430_v52, %v5259_v62  ;;  %v8780_v40 = vshrl.u32 %v15455_v26, 16  ;;  %v8783_v19 = vshll.u32 %v15455_v26, 16  ;;  %v15491_v26 = vld [vmem:[%s18815_s16 + $0x18] sm:$0xe] }
 0x293   : > { %17126 = vmatmul.mubr.msk.bf16.gmra.mxu0 %vm830_vm3, %v15472_v43  ;;  %v8772_v16 = vor.u32 %v8771_v55, %v8767_v35  ;;  %v8789_v30 = vshll.u32 %v21705_v49, 16  ;;  %v8793_v32 = vshrl.u32 %v21705_v49, 16  ;;  %v8799_v7 = vshll.u32 %v21708_v28, 16  ;;  %v21723_v48 = vpop.f32.mrf.mxu1  ;;  %v21728_v39 = vpop.f32.mrf.mxu0 }
 0x294   : > { %25312 = vst [vmem:[#allocation64_spill] sm:$0xff] %v21715_v51  ;;  %v8763_v63 = vrot.slane %v8762_v38, 4  ;;  %v8782_v18 = vrot.slane %v8780_v40, 4  ;;  %v8785_v24 = vrot.slane %v8783_v19, 5  ;;  %v5257_v52 = vadd.f32 %v21436_v2, %v21131_v42 }
 0x295   : > { %v8773_v62 = vrot.slane %v8772_v16, 4  ;;  %v8791_v55 = vrot.slane %v8789_v30, 5  ;;  %v8795_v43 = vrot.slane %v8793_v32, 4  ;;  %v8801_v51 = vrot.slane %v8799_v7, 5  ;;  %v21730_v49 = vpop.f32.mrf.mxu1  ;;  %v21739_v2 = vpop.f32.mrf.mxu0  ;;  %v15492_v7 = vld [vmem:[%s18815_s16 + $0x24] sm:$0xe] }
 0x296   : > { %v8768_v28 = vsel %vm17904_vm4, %v8763_v63, %v8767_v35  ;;  %v8786_v38 = vor.u32 %v8785_v24, %v8782_v18  ;;  %v21735_v40 = vadd.f32 %v21445_v47, %v5257_v52  ;;  %v5260_v42 = vadd.f32 %v21458_v1, %v21147_v59  ;;  %v17707_v59 = vld [vmem:[%s18815_s16 + $0x1c] sm:$0xf] }
 0x297   : > { %v8778_v19 = vsel %vm17904_vm4, %v8773_v62, %v8777_v0  ;;  %v8796_v16 = vor.u32 %v8795_v43, %v8791_v55  ;;  %v5258_v30 = vadd.f32 %v21468_v21, %v21156_v5  ;;  %v15507_v32 = vrot.slane %v15491_v26, 9  ;;  %v21746_v35 = vpop.f32.mrf.mxu1  ;;  %v21752_v24 = vpop.f32.mrf.mxu0  ;;  %v17708_v5 = vld [vmem:[%s18815_s16 + $0x20] sm:$0x1] }
 0x298   : > { %v15473_v63 = vcombine.low %v8768_v28, %v8778_v19  ;;  %v8787_v47 = vrot.slane %v8786_v38, 4  ;;  %v21749_v18 = vadd.f32 %v21461_v4, %v5260_v42  ;;  %v9163_v1 = vrot.slane %v17707_v59, 5 }
 0x299   : > { %v8797_v0 = vrot.slane %v8796_v16, 4  ;;  %v21755_v52 = vadd.f32 %v21475_v13, %v5258_v30  ;;  %v9166_v21 = vrot.slane %v17708_v5, 5  ;;  %v6427_v28 = vadd.f32 %v21483_v17, %v21175_v58  ;;  %v21760_v26 = vpop.f32.mrf.mxu1  ;;  %v21767_v42 = vpop.f32.mrf.mxu0  ;;  %v17643_v16 = vld [vmem:[%s19775_s14] sm:$0xff]   ;;  %v17709_v17 = vld [vmem:[%s18815_s16 + $0x28] sm:$0xf] }
 0x29a   : > { %17129 = vmatprep.mubr.msk.bf16.mxu0 %vm830_vm3, %v15473_v63  ;;  %v8792_v4 = vsel %vm17904_vm4, %v8787_v47, %v8791_v55  ;;  %v9164_v43 = vsel %vm18183_vm7, %v15507_v32, %v9163_v1  ;;  %v9165_v38 = vrot.slane %v9163_v1, 4  ;;  %v15508_v13 = vrot.slane %v15492_v7, 9  ;;  %v17710_v63 = vld [vmem:[%s18815_s16 + $0x2c] sm:$0x1]  ;;  %v15493_v55 = vld [vmem:[%s18815_s16 + $0x30] sm:$0xe] }
 0x29b   : > { %v8802_v19 = vsel %vm17904_vm4, %v8797_v0, %v8801_v51  ;;  %v21773_v58 = vadd.f32 %v21490_v57, %v6427_v28  ;;  %v9170_v30 = vrot.slane %v17709_v17, 5  ;;  %v9173_v59 = vrot.slane %v17710_v63, 5  ;;  %v21778_v47 = vpop.f32.mrf.mxu1  ;;  %v25315_v1 = vld [vmem:[#allocation8_spill] sm:$0xff]  ;;  %v25316_v51 = vld [vmem:[#allocation29_spill] sm:$0xff]  ;;  %v21786_v57 = vpop.f32.mrf.mxu0 }
 0x29c   : > { %v15474_v32 = vcombine.low %v8792_v4, %v8802_v19  ;;  %v9167_v7 = vsel %vm18183_vm7, %v9165_v38, %v9166_v21  ;;  %v10456_v5 = vsel %vm879_vm0, %v25315_v1, 0  ;;  %v6425_v0 = vadd.f32 %v21495_v23, %v25316_v51  ;;  %v15494_v4 = vld [vmem:[%s18815_s16 + $0x3c] sm:$0xe]  ;;  %v25318_v38 = vld [vmem:[#allocation12_spill] sm:$0xff] }
 0x29d   : > { %25314 = vst [vmem:[#allocation65_spill] sm:$0xff] %v21773_v58  ;;  %v15524_v28 = vcombine.low %v9164_v43, %v9167_v7  ;;  %v9171_v17 = vsel %vm18183_vm7, %v15508_v13, %v9170_v30  ;;  %v9172_v63 = vrot.slane %v9170_v30, 4  ;;  %v10926_v36 = vsel %vm879_vm0, %v21262_v10, 0  ;;  %v21793_v19 = vpop.f32.mrf.mxu1  ;;  %v25319_v43 = vld [vmem:[#allocation22_spill] sm:$0xff]  ;;  %v21803_v30 = vpop.f32.mrf.mxu0  ;;  %v25321_v1 = vld [vmem:[#allocation5_spill] sm:$0xff] }
 0x29e   : > { %17130 = vmatmul.mubr.msk.bf16.gmra.mxu0 %vm830_vm3, %v15474_v32  ;;  %v21797_v21 = vadd.f32 %v21500_v20, %v6425_v0  ;;  %v6428_v23 = vadd.f32 %v21509_v31, %v25318_v38  ;;  %v6426_v7 = vadd.f32 %v21530_v14, %v25319_v43  ;;  %v15509_v13 = vrot.slane %v15493_v55, 9  ;;  %v25320_v32 = vld [vmem:[#allocation6_spill] sm:$0xff]  ;;  %v25322_v55 = vld [vmem:[#allocation28_spill] sm:$0xff]  ;;  %v15495_v43 = vld [vmem:[%s18815_s16 + $0x48] sm:$0xe] }
 0x29f   : > { %17135 = vmatprep.mubr.msk.bf16.mxu1 %vm830_vm3, %v15524_v28  ;;  %17169 = vmatprep.mubr.msk.bf16.mxu0 %vm830_vm3, %v17643_v16  ;;  %v9174_v10 = vsel %vm18183_vm7, %v9172_v63, %v9173_v59  ;;  %v9177_v20 = vrot.slane %v25320_v32, 5  ;;  %v9180_v51 = vrot.slane %v25321_v1, 5  ;;  %v6431_v31 = vadd.f32 %v21541_v15, %v21269_v46  ;;  %v21813_v0 = vpop.f32.mrf.mxu1  ;;  %v21822_v59 = vpop.f32.mrf.mxu0  ;;  %v25325_v1 = vld [vmem:[#allocation51_spill] sm:$0xff]  ;;  %v25327_v15 = vld [vmem:[#allocation13_spill] sm:$0xff]  ;;  %v15496_v58 = vld [vmem:[%s18815_s16 + $0x54] sm:$0xe] }
 0x2a0   : > { %25317 = vst [vmem:[#allocation8_spill] sm:$0xff] %v21797_v21  ;;  %v15525_v14 = vcombine.low %v9171_v17, %v9174_v10  ;;  %v21816_v38 = vadd.f32 %v25322_v55, %v6428_v23  ;;  %v21819_v28 = vadd.f32 %v21535_v54, %v6426_v7  ;;  %v15510_v16 = vrot.slane %v15494_v4, 9  ;;  %v21835_v54 = vld [vmem:[%s24893_s3 + $0x2a] sm:$0x3]  ;;  %v17644_v4 = vld [vmem:[%s19775_s14 + $0xc] sm:$0xff]  }
 0x2a1   : > { %v9178_v63 = vsel %vm18183_vm7, %v15509_v13, %v9177_v20  ;;  %v9179_v32 = vrot.slane %v9177_v20, 4  ;;  %v21827_v46 = vadd.f32 %v25325_v1, %v6431_v31  ;;  %v9184_v17 = vrot.slane %v25327_v15, 5  ;;  %v25328_v7 = vld [vmem:[#allocation4_spill] sm:$0xff]  ;;  %v25329_v13 = vld [vmem:[#allocation30_spill] sm:$0xff]  ;;  %v25330_v31 = vld [vmem:[#allocation31_spill] sm:$0xff] }
 0x2a2   : > { %25323 = vst [vmem:[#allocation29_spill] sm:$0xff] %v21816_v38  ;;  %25324 = vst [vmem:[#allocation12_spill] sm:$0xff] %v21819_v28  ;;  %v21830_v23 = vpop.f32.mrf.mxu1  ;;  %17136 = vmatmul.mubr.msk.bf16.vlgmr.msra.gmra.mxu1 %vm830_vm3, %v15525_v14  ;;  %v9187_v10 = vrot.slane %v25328_v7, 5  ;;  %v6429_v20 = vadd.f32 %v21555_v61, %v25329_v13  ;;  %v6432_v55 = vadd.f32 %v21568_v6, %v25330_v31  ;;  %v25331_v1 = vld [vmem:[#allocation33_spill] sm:$0xff]  ;;  %v15511_v21 = vrot.slane %v15495_v43, 9 }
 0x2a3   : > { %25326 = vst [vmem:[#allocation22_spill] sm:$0xff] %v21827_v46  ;;  %v6430_v15 = vadd.f32 %v21579_v9, %v25331_v1  ;;  %v21846_v46 = vpop.f32.mrf.mxu0  ;;  %17202 = vmatpush3.bf16.msra.mxu1 %v10456_v5  ;;  %v9181_v28 = vsel %vm18183_vm7, %v9179_v32, %v9180_v51  ;;  %v17645_v38 = vld [vmem:[%s19775_s14 + $0x18] sm:$0xff]   ;;  %v9185_v14 = vsel %vm18183_vm7, %v15510_v16, %v9184_v17  ;;  %v9186_v7 = vrot.slane %v9184_v17, 4  ;;  %v25332_v9 = vld [vmem:[#allocation54_spill] sm:$0xff]  ;;  %v25337_v32 = vld [vmem:[#allocation36_spill] sm:$0xff] }
 0x2a4   : > { %v21854_v61 = vpop.f32.mrf.mxu1  ;;  %v15526_v13 = vcombine.low %v9178_v63, %v9181_v28  ;;  %v21857_v6 = vadd.f32 %v21565_v37, %v6429_v20  ;;  %v21860_v31 = vadd.f32 %v25332_v9, %v6432_v55  ;;  %17497 = vmatprep.subr.msk.bf16.mxu1 %vm879_vm0, %v21835_v54  ;;  %v25335_v43 = vld [vmem:[#allocation17_spill] sm:$0xff]  ;;  %v25336_v63 = vld [vmem:[#allocation32_spill] sm:$0xff]  ;;  %v6435_v17 = vadd.f32 %v21600_v53, %v25337_v32  ;;  %v25338_v1 = vld [vmem:[#allocation34_spill] sm:$0xff] }
 0x2a5   : > { %v21863_v5 = vadd.f32 %v21587_v3, %v6430_v15  ;;  %v21865_v51 = vpop.f32.mrf.mxu0  ;;  %v9188_v16 = vsel %vm18183_vm7, %v9186_v7, %v9187_v10  ;;  %v9191_v28 = vrot.slane %v25335_v43, 5  ;;  %v9194_v37 = vrot.slane %v25336_v63, 5  ;;  %v21880_v3 = vld [vmem:[%s24893_s3 + $0x2c] sm:$0x3]  ;;  %v15497_v43 = vld [vmem:[%s18815_s16 + $0x60] sm:$0xe] }
 0x2a6   : > { %25333 = vst [vmem:[#allocation6_spill] sm:$0xff] %v21860_v31  ;;  %v21875_v20 = vpop.f32.mrf.mxu1  ;;  %17170 = vmatmul.mubr.msk.bf16.vlgmr.msra.gmra.mxu0 %vm830_vm3, %v17644_v4  ;;  %17139 = vmatprep.mubr.msk.bf16.mxu1 %vm830_vm3, %v15526_v13  ;;  %v15527_v55 = vcombine.low %v9185_v14, %v9188_v16  ;;  %v15512_v10 = vrot.slane %v15496_v58, 9  ;;  %v9198_v15 = vrot.slane %v25338_v1, 5  ;;  %v25339_v7 = vld [vmem:[#allocation35_spill] sm:$0xff]  ;;  %v21893_v4 = vadd.f32 %v21608_v25, %v6435_v17  ;;  %v25341_v14 = vld [vmem:[#allocation38_spill] sm:$0xff]  ;;  %v25345_v25 = vld [vmem:[#allocation16_spill] sm:$0xff] }
 0x2a7   : > { %25334 = vst [vmem:[#allocation5_spill] sm:$0xff] %v21863_v5  ;;  %v9201_v9 = vrot.slane %v25339_v7, 5  ;;  %v21887_v63 = vpop.f32.mrf.mxu0  ;;  %17236 = vmatpush3.bf16.msra.mxu0 %v10926_v36  ;;  %17173 = vmatprep.mubr.msk.bf16.mxu0 %vm830_vm3, %v17645_v38  ;;  %v9192_v53 = vsel %vm18183_vm7, %v15511_v21, %v9191_v28  ;;  %v9193_v32 = vrot.slane %v9191_v28, 4  ;;  %v6433_v58 = vadd.f32 %v21613_v41, %v25341_v14  ;;  %v25342_v1 = vld [vmem:[#allocation39_spill] sm:$0xff]  ;;  %v25344_v5 = vld [vmem:[#allocation41_spill] sm:$0xff] }
 0x2a8   : > { %25340 = vst [vmem:[#allocation28_spill] sm:$0xff] %v21893_v4  ;;  %v21897_v13 = vpop.f32.mrf.mxu1  ;;  %v9199_v16 = vsel %vm18183_vm7, %v15512_v10, %v9198_v15  ;;  %v9200_v36 = vrot.slane %v9198_v15, 4  ;;  %v25343_v38 = vld [vmem:[#allocation59_spill] sm:$0xff]  ;;  %v6434_v21 = vadd.f32 %v21641_v45, %v25344_v5  ;;  %17498 = vmatprep.subr.msk.bf16.mxu0 %vm879_vm0, %v21880_v3  ;;  %v15513_v10 = vrot.slane %v15497_v43, 9  ;;  %v25347_v15 = vld [vmem:[#allocation37_spill] sm:$0xff] }
 0x2a9   : > { %v6436_v7 = vadd.f32 %v25343_v38, %v25342_v1  ;;  %v21905_v28 = vpop.f32.mrf.mxu0  ;;  %v9195_v41 = vsel %vm18183_vm7, %v9193_v32, %v9194_v37  ;;  %v21912_v17 = vadd.f32 %v25345_v25, %v6433_v58  ;;  %v9205_v14 = vrot.slane %v25347_v15, 5  ;;  %v15498_v4 = vld [vmem:[%s18815_s16 + $0x6c] sm:$0xe]  ;;  %v17646_v45 = vld [vmem:[%s19775_s14 + $0x24] sm:$0xff]   ;;  %v17647_v32 = vld [vmem:[%s19775_s14 + $0x30] sm:$0xff]  }
 0x2aa   : > { %v21916_v1 = vpop.f32.mrf.mxu1  ;;  %17140 = vmatmul.mubr.msk.bf16.gmra.mxu1 %vm830_vm3, %v15527_v55  ;;  %v15528_v5 = vcombine.low %v9192_v53, %v9195_v41  ;;  %v9202_v38 = vsel %vm18183_vm7, %v9200_v36, %v9201_v9  ;;  %v21926_v37 = vadd.f32 %v21646_v27, %v6434_v21  ;;  %v25350_v15 = vld [vmem:[#allocation40_spill] sm:$0xff]  ;;  %v25351_v9 = vld [vmem:[#allocation43_spill] sm:$0xff]  ;;  %v15514_v27 = vrot.slane %v15498_v4, 9  ;;  %v25352_v36 = vld [vmem:[#allocation18_spill] sm:$0xff] }
 0x2ab   : > { %25346 = vst [vmem:[#allocation51_spill] sm:$0xff] %v21912_v17  ;;  %v21923_v31 = vadd.f32 %v21637_v12, %v6436_v7  ;;  %v21928_v43 = vpop.f32.mrf.mxu0  ;;  %v15529_v58 = vcombine.low %v9199_v16, %v9202_v38  ;;  %v9206_v25 = vsel %vm18183_vm7, %v15513_v10, %v9205_v14  ;;  %v9207_v55 = vrot.slane %v9205_v14, 4  ;;  %v25353_v21 = vld [vmem:[#allocation42_spill] sm:$0xff]  ;;  %v15499_v16 = vld [vmem:[%s18815_s16 + $0x78] sm:$0xe]  ;;  %v25354_v14 = vld [vmem:[#allocation24_spill] sm:$0xff] }
 0x2ac   : > { %25349 = vst [vmem:[#allocation4_spill] sm:$0xff] %v21926_v37  ;;  %v9208_v53 = vrot.slane %v25350_v15, 5  ;;  %v21934_v41 = vpop.f32.mrf.mxu1  ;;  %17143 = vmatprep.mubr.msk.bf16.mxu1 %vm830_vm3, %v15528_v5  ;;  %v6439_v12 = vadd.f32 %v21653_v44, %v25351_v9  ;;  %v9212_v7 = vrot.slane %v25352_v36, 5  ;;  %v9215_v37 = vrot.slane %v25353_v21, 5  ;;  %v25356_v17 = vld [vmem:[#allocation45_spill] sm:$0xff] }
 0x2ad   : > { %25348 = vst [vmem:[#allocation13_spill] sm:$0xff] %v21923_v31  ;;  %v21942_v38 = vpop.f32.mrf.mxu0  ;;  %v6437_v15 = vadd.f32 %v21664_v11, %v25354_v14  ;;  %v25355_v31 = vld [vmem:[#allocation44_spill] sm:$0xff]  ;;  %v6438_v44 = vadd.f32 %v21696_v34, %v25356_v17  ;;  %v25357_v36 = vld [vmem:[#allocation61_spill] sm:$0xff]  ;;  %v15500_v11 = vld [vmem:[%s18815_s16 + $0x84] sm:$0xe]  ;;  %v15515_v17 = vrot.slane %v15499_v16, 9 }
 0x2ae   : > { %v9209_v10 = vsel %vm18183_vm7, %v9207_v55, %v9208_v53  ;;  %v6440_v5 = vadd.f32 %v21684_v33, %v25355_v31  ;;  %v21952_v4 = vpop.f32.mrf.mxu1  ;;  %17174 = vmatmul.mubr.msk.bf16.gmra.mxu0 %vm830_vm3, %v17646_v45  ;;  %v21956_v21 = vadd.f32 %v25357_v36, %v6439_v12  ;;  %v21960_v55 = vsel %vm18183_vm7, %v15514_v27, %v9212_v7  ;;  %v25361_v12 = vld [vmem:[#allocation7_spill] sm:$0xff] }
 0x2af   : > { %v15530_v9 = vcombine.low %v9206_v25, %v9209_v10  ;;  %v9214_v53 = vrot.slane %v9212_v7, 4  ;;  %v21963_v14 = vpop.f32.mrf.mxu0  ;;  %17177 = vmatprep.mubr.msk.bf16.mxu0 %vm830_vm3, %v17647_v32  ;;  %v21967_v33 = vadd.f32 %v21676_v29, %v6437_v15  ;;  %v21973_v31 = vadd.f32 %v21710_v22, %v6438_v44  ;;  %v25362_v7 = vld [vmem:[#allocation20_spill] sm:$0xff]  ;;  %v25363_v10 = vld [vmem:[#allocation47_spill] sm:$0xff]  ;;  %v25365_v44 = vld [vmem:[#allocation46_spill] sm:$0xff] }
 0x2b0   : > { %v21970_v34 = vadd.f32 %v21689_v60, %v6440_v5  ;;  %v21975_v45 = vpop.f32.mrf.mxu1  ;;  %v9219_v27 = vrot.slane %v25361_v12, 5  ;;  %v9222_v32 = vrot.slane %v25362_v7, 5  ;;  %v6443_v29 = vadd.f32 %v21712_v8, %v25363_v10  ;;  %v25364_v5 = vld [vmem:[#allocation9_spill] sm:$0xff]  ;;  %v17649_v7 = vld [vmem:[%s19775_s14 + $0x48] sm:$0xff]  }
 0x2b1   : > { %25358 = vst [vmem:[#allocation30_spill] sm:$0xff] %v21967_v33  ;;  %25360 = vst [vmem:[#allocation33_spill] sm:$0xff] %v21973_v31  ;;  %v9216_v25 = vsel %vm18183_vm7, %v9214_v53, %v9215_v37  ;;  %v21983_v60 = vpop.f32.mrf.mxu0  ;;  %v15516_v22 = vrot.slane %v15500_v11, 9  ;;  %v9226_v16 = vrot.slane %v25364_v5, 5  ;;  %v9229_v36 = vrot.slane %v25365_v44, 5  ;;  %v17648_v37 = vld [vmem:[%s19775_s14 + $0x3c] sm:$0xff]  }
 0x2b2   : > { %25359 = vst [vmem:[#allocation31_spill] sm:$0xff] %v21970_v34  ;;  %v15531_v15 = vcombine.low %v21960_v55, %v9216_v25  ;;  %v15501_v31 = vld [vmem:[%s18815_s16 + $0x90] sm:$0xe]  ;;  %v21989_v34 = vpop.f32.mrf.mxu1  ;;  %17144 = vmatmul.mubr.msk.bf16.gmra.mxu1 %vm830_vm3, %v15529_v58  ;;  %v9220_v53 = vsel %vm18183_vm7, %v15515_v17, %v9219_v27  ;;  %v9221_v8 = vrot.slane %v9219_v27, 4  ;;  %v21996_v12 = vadd.f32 %v21717_v56, %v6443_v29  ;;  %v25368_v5 = vld [vmem:[#allocation49_spill] sm:$0xff]  ;;  %v25369_v27 = vld [vmem:[#allocation10_spill] sm:$0xff] }
 0x2b3   : > { %v25367_v55 = vld [vmem:[#allocation48_spill] sm:$0xff]  ;;  %v22000_v25 = vpop.f32.mrf.mxu0  ;;  %17147 = vmatprep.mubr.msk.bf16.mxu1 %vm830_vm3, %v15530_v9  ;;  %v22006_v58 = vsel %vm18183_vm7, %v15516_v22, %v9226_v16  ;;  %v9228_v10 = vrot.slane %v9226_v16, 4  ;;  %v6444_v17 = vadd.f32 %v21730_v49, %v25368_v5  ;;  %v6442_v56 = vadd.f32 %v21746_v35, %v25369_v27  ;;  %v15502_v22 = vld [vmem:[%s18815_s16 + $0x9c] sm:$0xe]  ;;  %v25374_v27 = vld [vmem:[#allocation11_spill] sm:$0xff] }
 0x2b4   : > { %25366 = vst [vmem:[#allocation54_spill] sm:$0xff] %v21996_v12  ;;  %v6441_v11 = vadd.f32 %v21723_v48, %v25367_v55  ;;  %v22012_v29 = vpop.f32.mrf.mxu1  ;;  %v9223_v48 = vsel %vm18183_vm7, %v9221_v8, %v9222_v32  ;;  %v15517_v9 = vrot.slane %v15501_v31, 9  ;;  %v25370_v55 = vld [vmem:[#allocation25_spill] sm:$0xff]  ;;  %v15518_v5 = vrot.slane %v15502_v22, 9 }
 0x2b5   : > { %v9233_v12 = vrot.slane %v25370_v55, 5  ;;  %v22021_v33 = vpop.f32.mrf.mxu0  ;;  %v15532_v16 = vcombine.low %v9220_v53, %v9223_v48  ;;  %v22025_v49 = vsel %vm18183_vm7, %v9228_v10, %v9229_v36  ;;  %v22028_v35 = vadd.f32 %v21739_v2, %v6444_v17  ;;  %v25371_v36 = vld [vmem:[#allocation50_spill] sm:$0xff]  ;;  %v25372_v2 = vld [vmem:[#allocation53_spill] sm:$0xff]  ;;  %v15503_v48 = vld [vmem:[%s18815_s16 + $0xa8] sm:$0xe] }
 0x2b6   : > { %v22017_v44 = vadd.f32 %v21728_v39, %v6441_v11  ;;  %v22031_v32 = vadd.f32 %v21752_v24, %v6442_v56  ;;  %v22033_v39 = vpop.f32.mrf.mxu1  ;;  %17178 = vmatmul.mubr.msk.bf16.gmra.mxu0 %vm830_vm3, %v17648_v37  ;;  %v9236_v11 = vrot.slane %v25371_v36, 5  ;;  %v6447_v24 = vadd.f32 %v21760_v26, %v25372_v2  ;;  %v25373_v37 = vld [vmem:[#allocation52_spill] sm:$0xff]  ;;  %v25375_v55 = vld [vmem:[#allocation55_spill] sm:$0xff]  ;;  %v25377_v26 = vld [vmem:[#allocation57_spill] sm:$0xff] }
 0x2b7   : > { %v22040_v53 = vsel %vm18183_vm7, %v15517_v9, %v9233_v12  ;;  %v9235_v8 = vrot.slane %v9233_v12, 4  ;;  %v22043_v10 = vpop.f32.mrf.mxu0  ;;  %17181 = vmatprep.mubr.msk.bf16.mxu0 %vm830_vm3, %v17649_v7  ;;  %v9240_v17 = vrot.slane %v25373_v37, 5  ;;  %v9243_v56 = vrot.slane %v25374_v27, 5  ;;  %v25376_v36 = vld [vmem:[#allocation56_spill] sm:$0xff] }
 0x2b8   : > { %v22051_v9 = vpop.f32.mrf.mxu1  ;;  %v6445_v7 = vadd.f32 %v21778_v47, %v25375_v55  ;;  %v6448_v31 = vadd.f32 %v21793_v19, %v25376_v36  ;;  %v6446_v22 = vadd.f32 %v21813_v0, %v25377_v26  ;;  %v22068_v27 = vadd.f32 %v21767_v42, %v6447_v24  ;;  %v17650_v19 = vld [vmem:[%s19775_s14 + $0x54] sm:$0xff]   ;;  %v25384_v26 = vld [vmem:[#allocation19_spill] sm:$0xff] }
 0x2b9   : > { %v22055_v12 = vsel %vm18183_vm7, %v9235_v8, %v9236_v11  ;;  %v22063_v2 = vpop.f32.mrf.mxu0  ;;  %v22072_v8 = vsel %vm18183_vm7, %v15518_v5, %v9240_v17  ;;  %v9242_v47 = vrot.slane %v9240_v17, 4  ;;  %v15504_v11 = vld [vmem:[%s18815_s16 + $0xb4] sm:$0xe]  ;;  %v15519_v24 = vrot.slane %v15503_v48, 9  ;;  %v17651_v17 = vld [vmem:[%s19775_s14 + $0x60] sm:$0xff]  }
 0x2ba   : > { %v15534_v37 = vcombine.low %v22040_v53, %v22055_v12  ;;  %25378 = vst [vmem:[#allocation17_spill] sm:$0xff] %v22068_v27  ;;  %v22075_v55 = vpop.f32.mrf.mxu1  ;;  %17148 = vmatmul.mubr.msk.bf16.gmra.mxu1 %vm830_vm3, %v15531_v15  ;;  %v22080_v0 = vadd.f32 %v21786_v57, %v6445_v7  ;;  %v22083_v53 = vadd.f32 %v21803_v30, %v6448_v31  ;;  %v25382_v12 = vld [vmem:[#allocation14_spill] sm:$0xff]  ;;  %v25383_v7 = vld [vmem:[#allocation3_spill] sm:$0xff]  ;;  %v15520_v48 = vrot.slane %v15504_v11, 9 }
 0x2bb   : > { %v22086_v42 = vadd.f32 %v21822_v59, %v6446_v22  ;;  %v22088_v5 = vpop.f32.mrf.mxu0  ;;  %17151 = vmatprep.mubr.msk.bf16.mxu1 %vm830_vm3, %v15532_v16  ;;  %v22094_v15 = vsel %vm18183_vm7, %v9242_v47, %v9243_v56  ;;  %v9247_v57 = vrot.slane %v25382_v12, 5  ;;  %v9250_v36 = vrot.slane %v25383_v7, 5  ;;  %v25385_v22 = vld [vmem:[#allocation58_spill] sm:$0xff] }
 0x2bc   : > { %25379 = vst [vmem:[#allocation32_spill] sm:$0xff] %v22080_v0  ;;  %25380 = vst [vmem:[#allocation36_spill] sm:$0xff] %v22083_v53  ;;  %v6451_v30 = vadd.f32 %v21830_v23, %v25384_v26  ;;  %v22100_v31 = vpop.f32.mrf.mxu1  ;;  %v9254_v16 = vrot.slane %v25385_v22, 5  ;;  %v15505_v0 = vld [vmem:[%s18815_s16 + $0xc0] sm:$0xe]  ;;  %v6449_v7 = vadd.f32 %v21854_v61, %v21679_v50 }
 0x2bd   : > { %25381 = vst [vmem:[#allocation34_spill] sm:$0xff] %v22086_v42  ;;  %v25386_v42 = vld [vmem:[#allocation60_spill] sm:$0xff]  ;;  %v22107_v56 = vpop.f32.mrf.mxu0  ;;  %v22111_v47 = vsel %vm18183_vm7, %v15519_v24, %v9247_v57  ;;  %v9249_v12 = vrot.slane %v9247_v57, 4  ;;  %v25388_v22 = vld [vmem:[#allocation26_spill] sm:$0xff] }
 0x2be   : > { %v9257_v53 = vrot.slane %v25386_v42, 5  ;;  %v22114_v23 = vadd.f32 %v21846_v46, %v6451_v30  ;;  %v22118_v11 = vpop.f32.mrf.mxu1  ;;  %17182 = vmatmul.mubr.msk.bf16.gmra.mxu0 %vm830_vm3, %v17650_v19  ;;  %v22123_v42 = vsel %vm18183_vm7, %v15520_v48, %v9254_v16  ;;  %v9256_v26 = vrot.slane %v9254_v16, 4  ;;  %v25389_v59 = vld [vmem:[#allocation62_spill] sm:$0xff]  ;;  %v25391_v30 = vld [vmem:[#allocation21_spill] sm:$0xff]  ;;  %v15506_v16 = vld [vmem:[%s18815_s16 + $0xcc] sm:$0xe] }
 0x2bf   : > { %v6452_v24 = vadd.f32 %v21875_v20, %v25388_v22  ;;  %v6450_v57 = vadd.f32 %v21897_v13, %v25389_v59  ;;  %v22129_v46 = vpop.f32.mrf.mxu0  ;;  %17185 = vmatprep.mubr.msk.bf16.mxu0 %vm830_vm3, %v17651_v17  ;;  %v22134_v50 = vsel %vm18183_vm7, %v9249_v12, %v9250_v36  ;;  %v22137_v61 = vadd.f32 %v21865_v51, %v6449_v7  ;;  %v25394_v22 = vld [vmem:[#allocation23_spill] sm:$0xff] }
 0x2c0   : > { %25387 = vst [vmem:[#allocation35_spill] sm:$0xff] %v22114_v23  ;;  %v15521_v19 = vrot.slane %v15505_v0, 9  ;;  %v9261_v48 = vrot.slane %v25391_v30, 5  ;;  %v22141_v20 = vpop.f32.mrf.mxu1  ;;  %v22147_v17 = vsel %vm18183_vm7, %v9256_v26, %v9257_v53  ;;  %v9264_v53 = vrot.slane %v25394_v22, 5  ;;  %v25397_v59 = vld [vmem:[#allocation27_spill] sm:$0xff] }
 0x2c1   : > { %25390 = vst [vmem:[#allocation38_spill] sm:$0xff] %v22137_v61  ;;  %v22150_v36 = vadd.f32 %v21887_v63, %v6452_v24  ;;  %v22153_v51 = vadd.f32 %v21905_v28, %v6450_v57  ;;  %v22155_v0 = vpop.f32.mrf.mxu0  ;;  %v25395_v63 = vcombine.low %v22006_v58, %v22025_v49  ;;  %v17652_v28 = vld [vmem:[%s19775_s14 + $0x6c] sm:$0xff]   ;;  %v15522_v30 = vrot.slane %v15506_v16, 9  ;;  %v9925_v22 = vld [vmem:[%s19775_s14] sm:$0xf] }
 0x2c2   : > { %v22161_v12 = vsel %vm18183_vm7, %v15521_v19, %v9261_v48  ;;  %v9263_v7 = vrot.slane %v9261_v48, 4  ;;  %v22164_v26 = vpop.f32.mrf.mxu1  ;;  %v25396_v24 = vld [vmem:[#allocation64_spill] sm:$0xff]  ;;  %v9268_v19 = vrot.slane %v25397_v59, 5  ;;  %v25398_v13 = vld [vmem:[#allocation63_spill] sm:$0xff]  ;;  %v6456_v49 = vadd.f32 %v21952_v4, %v21749_v18 }
 0x2c3   : > { %25392 = vst [vmem:[#allocation39_spill] sm:$0xff] %v22150_v36  ;;  %25393 = vst [vmem:[#allocation59_spill] sm:$0xff] %v22153_v51  ;;  %17152 = vmatmul.mubr.msk.bf16.gmra.mxu1 %vm830_vm3, %v25395_v63  ;;  %v6455_v57 = vadd.f32 %v21916_v1, %v25396_v24  ;;  %v9271_v48 = vrot.slane %v25398_v13, 5  ;;  %v22176_v51 = vpop.f32.mrf.mxu0  ;;  %v17653_v36 = vld [vmem:[%s19775_s14 + $0x78] sm:$0xff]   ;;  %v6453_v1 = vadd.f32 %v21934_v41, %v21735_v40  ;;  %v9926_v13 = vld [vmem:[%s19775_s14 + $0x4] sm:$0xf] }
 0x2c4   : > { %17155 = vmatprep.mubr.msk.bf16.mxu1 %vm830_vm3, %v15534_v37  ;;  %v22182_v58 = vsel %vm18183_vm7, %v9263_v7, %v9264_v53  ;;  %v6454_v16 = vadd.f32 %v21975_v45, %v21755_v52  ;;  %v22198_v7 = vsel %vm18183_vm7, %v15522_v30, %v9268_v19  ;;  %v9270_v53 = vrot.slane %v9268_v19, 4  ;;  %v9927_v40 = vld [vmem:[%s19775_s14 + $0x8] sm:$0x1]  ;;  %v10651_v41 = vld [vmem:[%s19775_s14] sm:$0xe]  ;;  %v22202_v63 = vpop.f32.mrf.mxu1 }
 0x2c5   : > { %v22194_v37 = vadd.f32 %v21928_v43, %v6455_v57  ;;  %v22204_v18 = vpop.f32.mrf.mxu0  ;;  %v22207_v52 = vadd.f32 %v21942_v38, %v6453_v1  ;;  %v22210_v4 = vadd.f32 %v21963_v14, %v6456_v49  ;;  %v9974_v45 = vshrl.u32 %v9925_v22, 16  ;;  %v9928_v59 = vld [vmem:[%s19775_s14 + $0xc] sm:$0xf] }
 0x2c6   : > { %v22213_v43 = vadd.f32 %v21983_v60, %v6454_v16  ;;  %17186 = vmatmul.mubr.msk.bf16.gmra.mxu0 %vm830_vm3, %v17652_v28  ;;  %v22218_v24 = vsel %vm18183_vm7, %v9270_v53, %v9271_v48  ;;  %v9977_v57 = vshll.u32 %v9925_v22, 16  ;;  %v9983_v30 = vshll.u32 %v9926_v13, 16  ;;  %v9929_v22 = vld [vmem:[%s19775_s14 + $0x10] sm:$0xf] }
 0x2c7   : > { %25399 = vst [vmem:[#allocation41_spill] sm:$0xff] %v22194_v37  ;;  %25400 = vst [vmem:[#allocation16_spill] sm:$0xff] %v22207_v52  ;;  %v9987_v19 = vshrl.u32 %v9926_v13, 16  ;;  %v22221_v38 = vpop.f32.mrf.mxu0  ;;  %17189 = vmatprep.mubr.msk.bf16.mxu0 %vm830_vm3, %v17653_v36  ;;  %v9976_v60 = vrot.slane %v9974_v45, 4  ;;  %v9993_v1 = vshll.u32 %v9927_v40, 16  ;;  %v15622_v28 = vrot.slane %v10651_v41, 9 }
 0x2c8   : > { %25401 = vst [vmem:[#allocation37_spill] sm:$0xff] %v22210_v4  ;;  %25402 = vst [vmem:[#allocation40_spill] sm:$0xff] %v22213_v43  ;;  %v9979_v49 = vrot.slane %v9977_v57, 5  ;;  %v9985_v16 = vrot.slane %v9983_v30, 5  ;;  %v10717_v53 = vrot.slane %v9926_v13, 5  ;;  %v22227_v43 = vpop.f32.mrf.mxu1  ;;  %v10720_v52 = vrot.slane %v9927_v40, 5 }
 0x2c9   : > { %v9989_v48 = vrot.slane %v9987_v19, 4  ;;  %v9995_v4 = vrot.slane %v9993_v1, 5  ;;  %v25403_v37 = vld [vmem:[#allocation65_spill] sm:$0xff]  ;;  %v9998_v61 = vshrl.u32 %v9928_v59, 16  ;;  %v25404_v45 = vcombine.low %v22072_v8, %v22094_v15  ;;  %v17654_v41 = vld [vmem:[%s19775_s14 + $0x84] sm:$0xff]   ;;  %v22241_v40 = vpop.f32.mrf.mxu0 }
 0x2ca   : > { %v7512_v36 = vadd.f32 %v21989_v34, %v25403_v37  ;;  %v9980_v57 = vor.u32 %v9979_v49, %v9976_v60  ;;  %v22238_v13 = vsel %vm18183_vm7, %v15622_v28, %v10717_v53  ;;  %v10719_v19 = vrot.slane %v10717_v53, 4  ;;  %v9930_v1 = vld [vmem:[%s19775_s14 + $0x14] sm:$0x1]  ;;  %v22256_v23 = vpop.f32.mrf.mxu1 }
 0x2cb   : > { %17156 = vmatmul.mubr.msk.bf16.gmra.mxu1 %vm830_vm3, %v25404_v45  ;;  %v9990_v30 = vor.u32 %v9989_v48, %v9985_v16  ;;  %v25405_v34 = vcombine.low %v22111_v47, %v22134_v50  ;;  %v17655_v37 = vld [vmem:[%s19775_s14 + $0x90] sm:$0xff]   ;;  %v10000_v15 = vrot.slane %v9998_v61, 4  ;;  %v10001_v60 = vshll.u32 %v9928_v59, 16  ;;  %v10652_v48 = vld [vmem:[%s19775_s14 + $0xc] sm:$0xe] }
 0x2cc   : > { %v22249_v8 = vadd.f32 %v22000_v25, %v7512_v36  ;;  %v10007_v49 = vshll.u32 %v9929_v22, 16  ;;  %v9981_v45 = vrot.slane %v9980_v57, 4  ;;  %v22254_v53 = vsel %vm18183_vm7, %v10719_v19, %v10720_v52 }
 0x2cd   : > { %17159 = vmatprep.mubr.msk.bf16.mxu1 %vm830_vm3, %v25405_v34  ;;  %v9991_v28 = vrot.slane %v9990_v30, 4  ;;  %v10011_v14 = vshrl.u32 %v9929_v22, 16  ;;  %v10003_v50 = vrot.slane %v10001_v60, 5  ;;  %v10017_v25 = vshll.u32 %v9930_v1, 16 }
 0x2ce   : > { %25406 = vst [vmem:[#allocation43_spill] sm:$0xff] %v22249_v8  ;;  %v10009_v34 = vrot.slane %v10007_v49, 5  ;;  %17190 = vmatmul.mubr.msk.bf16.gmra.mxu0 %vm830_vm3, %v17654_v41  ;;  %v9986_v59 = vsel %vm17904_vm4, %v9981_v45, %v9985_v16  ;;  %v15623_v57 = vrot.slane %v10652_v48, 9  ;;  %v22265_v30 = vpop.f32.mrf.mxu0  ;;  %v10724_v47 = vrot.slane %v9929_v22, 5  ;;  %v9931_v48 = vld [vmem:[%s19775_s14 + $0x18] sm:$0xf] }
 0x2cf   : > { %v9996_v36 = vsel %vm17904_vm4, %v9991_v28, %v9995_v4  ;;  %v10013_v52 = vrot.slane %v10011_v14, 4  ;;  %17193 = vmatprep.mubr.msk.bf16.mxu0 %vm830_vm3, %v17655_v37  ;;  %v10004_v60 = vor.u32 %v10003_v50, %v10000_v15  ;;  %v10019_v49 = vrot.slane %v10017_v25, 5  ;;  %v25408_v4 = vld [vmem:[#allocation8_spill] sm:$0xff]  ;;  %v17657_v50 = vld [vmem:[%s19775_s14 + $0xa8] sm:$0xff]  }
 0x2d0   : > { %v22268_v19 = vcombine.low %v9986_v59, %v9996_v36  ;;  %v10727_v8 = vrot.slane %v9930_v1, 5  ;;  %v22272_v16 = vsel %vm879_vm0, %v21835_v54, 0  ;;  %v7510_v14 = vadd.f32 %v22012_v29, %v25408_v4  ;;  %v22277_v45 = vpop.f32.mrf.mxu1  ;;  %v22287_v54 = vpop.f32.mrf.mxu0  ;;  %v17656_v29 = vld [vmem:[%s19775_s14 + $0x9c] sm:$0xff]  }
 0x2d1   : > { %v10014_v41 = vor.u32 %v10013_v52, %v10009_v34  ;;  %v10005_v37 = vrot.slane %v10004_v60, 4  ;;  %v22281_v15 = vsel %vm18183_vm7, %v15623_v57, %v10724_v47  ;;  %v10726_v22 = vrot.slane %v10724_v47, 4  ;;  %v25411_v36 = vld [vmem:[#allocation29_spill] sm:$0xff]  ;;  %v25412_v52 = vld [vmem:[#allocation12_spill] sm:$0xff] }
 0x2d2   : > { %v22285_v1 = vsel %vm879_vm0, %v21880_v3, 0  ;;  %v25409_v28 = vcombine.low %v22123_v42, %v22147_v17  ;;  %v22296_v59 = vadd.f32 %v22021_v33, %v7510_v14  ;;  %v7513_v47 = vadd.f32 %v22033_v39, %v25411_v36  ;;  %v9932_v57 = vld [vmem:[%s19775_s14 + $0x1c] sm:$0xf]  ;;  %v22303_v60 = vpop.f32.mrf.mxu1 }
 0x2d3   : > { %v10015_v25 = vrot.slane %v10014_v41, 4  ;;  %v7511_v3 = vadd.f32 %v22051_v9, %v25412_v52  ;;  %v25413_v42 = vcombine.low %v22161_v12, %v22182_v58  ;;  %v10010_v17 = vsel %vm17904_vm4, %v10005_v37, %v10009_v34  ;;  %v9933_v41 = vld [vmem:[%s19775_s14 + $0x20] sm:$0x1]  ;;  %v10653_v9 = vld [vmem:[%s19775_s14 + $0x18] sm:$0xe] }
 0x2d4   : > { %17160 = vmatmul.mubr.msk.bf16.gmra.mxu1 %vm830_vm3, %v25409_v28  ;;  %25410 = vst [vmem:[#allocation18_spill] sm:$0xff] %v22296_v59  ;;  %v22313_v33 = vsel %vm18183_vm7, %v10726_v22, %v10727_v8  ;;  %v10022_v39 = vshrl.u32 %v9931_v48, 16  ;;  %v10025_v4 = vshll.u32 %v9931_v48, 16  ;;  %v22322_v58 = vadd.f32 %v22043_v10, %v7513_v47  ;;  %v22329_v28 = vpop.f32.mrf.mxu0  ;;  %v9934_v10 = vld [vmem:[%s19775_s14 + $0x24] sm:$0xf]  ;;  %v22333_v47 = vpop.f32.mrf.mxu1 }
 0x2d5   : > { %17163 = vmatprep.mubr.msk.bf16.mxu1 %vm830_vm3, %v25413_v42  ;;  %v10020_v14 = vsel %vm17904_vm4, %v10015_v25, %v10019_v49  ;;  %v22325_v34 = vadd.f32 %v22063_v2, %v7511_v3  ;;  %v10031_v48 = vshll.u32 %v9932_v57, 16  ;;  %v10035_v49 = vshrl.u32 %v9932_v57, 16 }
 0x2d6   : > { %25414 = vst [vmem:[#allocation42_spill] sm:$0xff] %v22322_v58  ;;  %v22327_v37 = vcombine.low %v10010_v17, %v10020_v14  ;;  %v10024_v8 = vrot.slane %v10022_v39, 4  ;;  %v10027_v22 = vrot.slane %v10025_v4, 5  ;;  %17194 = vmatmul.mubr.msk.bf16.gmra.mxu0 %vm830_vm3, %v17656_v29  ;;  %v10041_v25 = vshll.u32 %v9933_v41, 16  ;;  %v25416_v17 = vld [vmem:[#allocation22_spill] sm:$0xff] }
 0x2d7   : > { %25415 = vst [vmem:[#allocation24_spill] sm:$0xff] %v22325_v34  ;;  %v15624_v36 = vrot.slane %v10653_v9, 9  ;;  %v10731_v52 = vrot.slane %v9932_v57, 5  ;;  %17197 = vmatprep.mubr.msk.bf16.mxu0 %vm830_vm3, %v17657_v50  ;;  %v10033_v3 = vrot.slane %v10031_v48, 5  ;;  %v10734_v42 = vrot.slane %v9933_v41, 5  ;;  %v22347_v41 = vpop.f32.mrf.mxu0  ;;  %v17658_v48 = vld [vmem:[%s19775_s14 + $0xb4] sm:$0xff]  }
 0x2d8   : > { %v10028_v2 = vor.u32 %v10027_v22, %v10024_v8  ;;  %v7516_v39 = vadd.f32 %v22075_v55, %v25416_v17  ;;  %v9935_v4 = vld [vmem:[%s19775_s14 + $0x28] sm:$0xf]  ;;  %v10037_v14 = vrot.slane %v10035_v49, 4  ;;  %v10043_v29 = vrot.slane %v10041_v25, 5  ;;  %v9936_v50 = vld [vmem:[%s19775_s14 + $0x2c] sm:$0x1] }
 0x2d9   : > { %v22341_v9 = vsel %vm18183_vm7, %v15624_v36, %v10731_v52  ;;  %v10733_v57 = vrot.slane %v10731_v52, 4  ;;  %v10046_v8 = vshrl.u32 %v9934_v10, 16  ;;  %v10049_v22 = vshll.u32 %v9934_v10, 16 }
 0x2da   : > { %v10029_v12 = vrot.slane %v10028_v2, 4  ;;  %v22344_v34 = vadd.f32 %v22088_v5, %v7516_v39  ;;  %v25418_v55 = vcombine.low %v22198_v7, %v22218_v24  ;;  %v10038_v49 = vor.u32 %v10037_v14, %v10033_v3  ;;  %v10654_v5 = vld [vmem:[%s19775_s14 + $0x24] sm:$0xe]  ;;  %v22359_v2 = vpop.f32.mrf.mxu1 }
 0x2db   : > { %v22356_v25 = vsel %vm18183_vm7, %v10733_v57, %v10734_v42  ;;  %v10055_v36 = vshll.u32 %v9935_v4, 16  ;;  %v10059_v52 = vshrl.u32 %v9935_v4, 16  ;;  %v10048_v24 = vrot.slane %v10046_v8, 4 }
 0x2dc   : > { %25417 = vst [vmem:[#allocation44_spill] sm:$0xff] %v22344_v34  ;;  %17164 = vmatmul.mubr.msk.bf16.gmra.mxu1 %vm830_vm3, %v25418_v55  ;;  %v10034_v10 = vsel %vm17904_vm4, %v10029_v12, %v10033_v3  ;;  %v15641_v7 = vcombine.low %v22341_v9, %v22356_v25  ;;  %v10051_v17 = vrot.slane %v10049_v22, 5  ;;  %v10039_v39 = vrot.slane %v10038_v49, 4  ;;  %v9937_v22 = vld [vmem:[%s19775_s14 + $0x30] sm:$0xf] }
 0x2dd   : > { %17203 = vmatprep.mubr.msk.bf16.mxu1 %vm830_vm3, %v22268_v19  ;;  %v10057_v42 = vrot.slane %v10055_v36, 5  ;;  %v10061_v14 = vrot.slane %v10059_v52, 4  ;;  %v10065_v57 = vshll.u32 %v9936_v50, 16  ;;  %v15625_v34 = vrot.slane %v10654_v5, 9  ;;  %v22367_v27 = vpop.f32.mrf.mxu0 }
 0x2de   : > { %v10052_v55 = vor.u32 %v10051_v17, %v10048_v24  ;;  %v10738_v58 = vrot.slane %v9935_v4, 5  ;;  %v10741_v59 = vrot.slane %v9936_v50, 5  ;;  %17198 = vmatmul.mubr.msk.bf16.gmra.mxu0 %vm830_vm3, %v17658_v48  ;;  %v10044_v19 = vsel %vm17904_vm4, %v10039_v39, %v10043_v29  ;;  %v22375_v49 = vpop.f32.mrf.mxu1  ;;  %v9939_v17 = vld [vmem:[%s19775_s14 + $0x38] sm:$0x1] }
 0x2df   : > { %v10062_v12 = vor.u32 %v10061_v14, %v10057_v42  ;;  %v10067_v3 = vrot.slane %v10065_v57, 5  ;;  %v7514_v8 = vadd.f32 %v22100_v31, %v21857_v6  ;;  %v25419_v4 = vcombine.low %v22238_v13, %v22254_v53  ;;  %v22385_v52 = vpop.f32.mrf.mxu0  ;;  %v25420_v31 = vld [vmem:[#allocation6_spill] sm:$0xff]  ;;  %v25421_v13 = vld [vmem:[#allocation5_spill] sm:$0xff]  ;;  %v10655_v57 = vld [vmem:[%s19775_s14 + $0x30] sm:$0xe] }
 0x2e0   : > { %v15592_v50 = vcombine.low %v10034_v10, %v10044_v19  ;;  %v10053_v48 = vrot.slane %v10052_v55, 4  ;;  %v22383_v29 = vsel %vm18183_vm7, %v15625_v34, %v10738_v58  ;;  %v10740_v36 = vrot.slane %v10738_v58, 4  ;;  %v9938_v10 = vld [vmem:[%s19775_s14 + $0x34] sm:$0xf]  ;;  %v22396_v39 = vpop.f32.mrf.mxu1 }
 0x2e1   : > { %17237 = vmatprep.mubr.msk.bf16.mxu0 %vm830_vm3, %v25419_v4  ;;  %v10063_v5 = vrot.slane %v10062_v12, 4  ;;  %v22388_v6 = vadd.f32 %v22107_v56, %v7514_v8  ;;  %v7517_v24 = vadd.f32 %v22118_v11, %v25420_v31  ;;  %v7515_v53 = vadd.f32 %v22141_v20, %v25421_v13  ;;  %v15849_v11 = vld [vmem:[%s24893_s3 + $0x2e] sm:$0x3]  ;;  %v25422_v31 = vld [vmem:[#allocation28_spill] sm:$0xff]  ;;  %v9941_v13 = vld [vmem:[%s19775_s14 + $0x40] sm:$0xf] }
 0x2e2   : > { %v10058_v34 = vsel %vm17904_vm4, %v10053_v48, %v10057_v42  ;;  %v22402_v58 = vsel %vm18183_vm7, %v10740_v36, %v10741_v59  ;;  %v10070_v14 = vshrl.u32 %v9937_v22, 16  ;;  %v10073_v56 = vshll.u32 %v9937_v22, 16  ;;  %v22422_v22 = vpop.f32.mrf.mxu0 }
 0x2e3   : > { %v10068_v20 = vsel %vm17904_vm4, %v10063_v5, %v10067_v3  ;;  %v15642_v42 = vcombine.low %v22383_v29, %v22402_v58  ;;  %v22415_v59 = vadd.f32 %v22129_v46, %v7517_v24  ;;  %v22418_v55 = vadd.f32 %v22155_v0, %v7515_v53  ;;  %v9940_v46 = vld [vmem:[%s19775_s14 + $0x3c] sm:$0xf]  ;;  %v22425_v5 = vpop.f32.mrf.mxu1  ;;  %v22434_v53 = vld [vmem:[%s24893_s3 + $0x30] sm:$0x3] }
 0x2e4   : > { %17204 = vmatmul.mubr.msk.bf16.vlgmr.msra.gmra.mxu1 %vm830_vm3, %v22327_v37  ;;  %v15593_v19 = vcombine.low %v10058_v34, %v10068_v20  ;;  %v10072_v37 = vrot.slane %v10070_v14, 4  ;;  %v10075_v12 = vrot.slane %v10073_v56, 5  ;;  %v10079_v8 = vshll.u32 %v9938_v10, 16  ;;  %v22451_v20 = vpop.f32.mrf.mxu0  ;;  %v9945_v58 = vld [vmem:[%s19775_s14 + $0x50] sm:$0x1] }
 0x2e5   : > { %17270 = vmatpush3.bf16.msra.mxu1 %v22272_v16  ;;  %17207 = vmatprep.mubr.msk.bf16.mxu1 %vm830_vm3, %v15592_v50  ;;  %v10083_v3 = vshrl.u32 %v9938_v10, 16  ;;  %v10089_v4 = vshll.u32 %v9939_v17, 16  ;;  %v15626_v48 = vrot.slane %v10655_v57, 9  ;;  %v10745_v36 = vrot.slane %v9938_v10, 5 }
 0x2e6   : > { %17499 = vmatprep.subr.msk.bf16.mxu1 %vm879_vm0, %v15849_v11  ;;  %v10076_v0 = vor.u32 %v10075_v12, %v10072_v37  ;;  %v10081_v16 = vrot.slane %v10079_v8, 5  ;;  %v10748_v50 = vrot.slane %v9939_v17, 5  ;;  %v7520_v24 = vadd.f32 %v22164_v26, %v25422_v31 }
 0x2e7   : > { %v25423_v10 = vcombine.low %v22281_v15, %v22313_v33  ;;  %v10085_v34 = vrot.slane %v10083_v3, 4  ;;  %v10091_v14 = vrot.slane %v10089_v4, 5  ;;  %v10746_v17 = vsel %vm18183_vm7, %v15626_v48, %v10745_v36  ;;  %v9942_v15 = vld [vmem:[%s19775_s14 + $0x44] sm:$0x1]  ;;  %v10656_v3 = vld [vmem:[%s19775_s14 + $0x3c] sm:$0xe]  ;;  %v22456_v4 = vpop.f32.mrf.mxu1 }
 0x2e8   : > { %v10747_v56 = vrot.slane %v10745_v36, 4  ;;  %v10077_v26 = vrot.slane %v10076_v0, 4  ;;  %v22448_v57 = vadd.f32 %v22176_v51, %v7520_v24  ;;  %v10094_v33 = vshrl.u32 %v9940_v46, 16 }
 0x2e9   : > { %17238 = vmatmul.mubr.msk.bf16.vlgmr.msra.gmra.mxu0 %vm830_vm3, %v25423_v10  ;;  %v10097_v11 = vshll.u32 %v9940_v46, 16  ;;  %v10086_v37 = vor.u32 %v10085_v34, %v10081_v16  ;;  %v10103_v8 = vshll.u32 %v9941_v13, 16  ;;  %v10113_v0 = vshll.u32 %v9942_v15, 16 }
 0x2ea   : > { %17304 = vmatpush3.bf16.msra.mxu0 %v22285_v1  ;;  %17241 = vmatprep.mubr.msk.bf16.mxu0 %vm830_vm3, %v15641_v7  ;;  %v10749_v12 = vsel %vm18183_vm7, %v10747_v56, %v10748_v50  ;;  %v10107_v1 = vshrl.u32 %v9941_v13, 16  ;;  %v10082_v51 = vsel %vm17904_vm4, %v10077_v26, %v10081_v16  ;;  %v10096_v25 = vrot.slane %v10094_v33, 4  ;;  %v25424_v26 = vld [vmem:[#allocation51_spill] sm:$0xff] }
 0x2eb   : > { %17500 = vmatprep.subr.msk.bf16.mxu0 %vm879_vm0, %v22434_v53  ;;  %v15643_v9 = vcombine.low %v10746_v17, %v10749_v12  ;;  %v10099_v7 = vrot.slane %v10097_v11, 5  ;;  %v10087_v48 = vrot.slane %v10086_v37, 4  ;;  %v10105_v36 = vrot.slane %v10103_v8, 5  ;;  %v22463_v34 = vpop.f32.mrf.mxu0 }
 0x2ec   : > { %17208 = vmatmul.mubr.msk.bf16.gmra.mxu1 %vm830_vm3, %v15593_v19  ;;  %v10109_v46 = vrot.slane %v10107_v1, 4  ;;  %v15627_v31 = vrot.slane %v10656_v3, 9  ;;  %v10752_v24 = vrot.slane %v9941_v13, 5  ;;  %v10755_v10 = vrot.slane %v9942_v15, 5  ;;  %v9943_v19 = vld [vmem:[%s19775_s14 + $0x48] sm:$0xf]  ;;  %v22470_v11 = vpop.f32.mrf.mxu1 }
 0x2ed   : > { %v10100_v50 = vor.u32 %v10099_v7, %v10096_v25  ;;  %v10092_v56 = vsel %vm17904_vm4, %v10087_v48, %v10091_v14  ;;  %v10115_v17 = vrot.slane %v10113_v0, 5  ;;  %v7518_v33 = vadd.f32 %v22202_v63, %v25424_v26  ;;  %v22474_v8 = vpop.f32.mrf.mxu0  ;;  %v25425_v1 = vld [vmem:[#allocation13_spill] sm:$0xff]  ;;  %v9944_v7 = vld [vmem:[%s19775_s14 + $0x4c] sm:$0xf] }
 0x2ee   : > { %v10110_v16 = vor.u32 %v10109_v46, %v10105_v36  ;;  %v15594_v37 = vcombine.low %v10082_v51, %v10092_v56  ;;  %v10753_v13 = vsel %vm18183_vm7, %v15627_v31, %v10752_v24  ;;  %v10754_v15 = vrot.slane %v10752_v24, 4  ;;  %v25426_v51 = vld [vmem:[#allocation4_spill] sm:$0xff]  ;;  %v22488_v48 = vpop.f32.mrf.mxu1  ;;  %v10657_v46 = vld [vmem:[%s19775_s14 + $0x48] sm:$0xe] }
 0x2ef   : > { %v10101_v12 = vrot.slane %v10100_v50, 4  ;;  %v22481_v63 = vadd.f32 %v22204_v18, %v7518_v33  ;;  %v7521_v3 = vadd.f32 %v22227_v43, %v25425_v1  ;;  %v7519_v25 = vadd.f32 %v22256_v23, %v25426_v51  ;;  %v22506_v56 = vpop.f32.mrf.mxu0 }
 0x2f0   : > { %v10111_v14 = vrot.slane %v10110_v16, 4  ;;  %17211 = vmatprep.mubr.msk.bf16.mxu1 %vm830_vm3, %v15594_v37  ;;  %v10756_v18 = vsel %vm18183_vm7, %v10754_v15, %v10755_v10  ;;  %v10121_v43 = vshll.u32 %v9943_v19, 16  ;;  %v10127_v10 = vshll.u32 %v9944_v7, 16  ;;  %v22509_v37 = vpop.f32.mrf.mxu1  ;;  %v9947_v15 = vld [vmem:[%s19775_s14 + $0x58] sm:$0xf] }
 0x2f1   : > { %17242 = vmatmul.mubr.msk.bf16.gmra.mxu0 %vm830_vm3, %v15642_v42  ;;  %v10106_v29 = vsel %vm17904_vm4, %v10101_v12, %v10105_v36  ;;  %v10118_v42 = vshrl.u32 %v9943_v19, 16  ;;  %v15644_v0 = vcombine.low %v10753_v13, %v10756_v18  ;;  %v22501_v50 = vadd.f32 %v22221_v38, %v7521_v3 }
 0x2f2   : > { %17245 = vmatprep.mubr.msk.bf16.mxu0 %vm830_vm3, %v15643_v9  ;;  %v10116_v23 = vsel %vm17904_vm4, %v10111_v14, %v10115_v17  ;;  %v22504_v9 = vadd.f32 %v22241_v40, %v7519_v25  ;;  %v10123_v24 = vrot.slane %v10121_v43, 5  ;;  %v10131_v16 = vshrl.u32 %v9944_v7, 16  ;;  %v9946_v17 = vld [vmem:[%s19775_s14 + $0x54] sm:$0xf]  ;;  %v22521_v43 = vpop.f32.mrf.mxu0 }
 0x2f3   : > { %v15595_v31 = vcombine.low %v10106_v29, %v10116_v23  ;;  %v10120_v36 = vrot.slane %v10118_v42, 4  ;;  %v10137_v26 = vshll.u32 %v9945_v58, 16  ;;  %v15628_v33 = vrot.slane %v10657_v46, 9  ;;  %v9948_v29 = vld [vmem:[%s19775_s14 + $0x5c] sm:$0x1] }
 0x2f4   : > { %25427 = vst [vmem:[#allocation45_spill] sm:$0xff] %v22504_v9  ;;  %v10759_v19 = vrot.slane %v9944_v7, 5  ;;  %v10129_v40 = vrot.slane %v10127_v10, 5  ;;  %v10762_v12 = vrot.slane %v9945_v58, 5  ;;  %v7524_v13 = vadd.f32 %v22277_v45, %v21956_v21  ;;  %v10658_v23 = vld [vmem:[%s19775_s14 + $0x54] sm:$0xe] }
 0x2f5   : > { %17212 = vmatmul.mubr.msk.bf16.gmra.mxu1 %vm830_vm3, %v15595_v31  ;;  %v10124_v38 = vor.u32 %v10123_v24, %v10120_v36  ;;  %v10133_v14 = vrot.slane %v10131_v16, 4  ;;  %v10139_v1 = vrot.slane %v10137_v26, 5  ;;  %v10142_v18 = vshrl.u32 %v9946_v17, 16  ;;  %v22527_v31 = vpop.f32.mrf.mxu1 }
 0x2f6   : > { %v10760_v3 = vsel %vm18183_vm7, %v15628_v33, %v10759_v19  ;;  %v10761_v51 = vrot.slane %v10759_v19, 4  ;;  %v22518_v7 = vadd.f32 %v22265_v30, %v7524_v13  ;;  %v10145_v42 = vshll.u32 %v9946_v17, 16 }
 0x2f7   : > { %v10125_v25 = vrot.slane %v10124_v38, 4  ;;  %v10134_v21 = vor.u32 %v10133_v14, %v10129_v40  ;;  %v10151_v58 = vshll.u32 %v9947_v15, 16  ;;  %v10155_v46 = vshrl.u32 %v9947_v15, 16 }
 0x2f8   : > { %25428 = vst [vmem:[#allocation61_spill] sm:$0xff] %v22518_v7  ;;  %v10763_v45 = vsel %vm18183_vm7, %v10761_v51, %v10762_v12  ;;  %v10144_v24 = vrot.slane %v10142_v18, 4  ;;  %v10147_v10 = vrot.slane %v10145_v42, 5  ;;  %v15629_v17 = vrot.slane %v10658_v23, 9  ;;  %v25429_v51 = vld [vmem:[#allocation30_spill] sm:$0xff]  ;;  %v25431_v23 = vld [vmem:[#allocation31_spill] sm:$0xff] }
 0x2f9   : > { %17246 = vmatmul.mubr.msk.bf16.gmra.mxu0 %vm830_vm3, %v15644_v0  ;;  %v10130_v30 = vsel %vm17904_vm4, %v10125_v25, %v10129_v40  ;;  %v15645_v36 = vcombine.low %v10760_v3, %v10763_v45  ;;  %v10135_v16 = vrot.slane %v10134_v21, 4  ;;  %v10153_v26 = vrot.slane %v10151_v58, 5  ;;  %v22532_v13 = vpop.f32.mrf.mxu0  ;;  %v9949_v18 = vld [vmem:[%s19775_s14 + $0x60] sm:$0xf] }
 0x2fa   : > { %v10157_v33 = vrot.slane %v10155_v46, 4  ;;  %v10161_v0 = vshll.u32 %v9948_v29, 16  ;;  %v10148_v19 = vor.u32 %v10147_v10, %v10144_v24  ;;  %v10766_v38 = vrot.slane %v9947_v15, 5  ;;  %v22539_v42 = vpop.f32.mrf.mxu1  ;;  %v9950_v10 = vld [vmem:[%s19775_s14 + $0x64] sm:$0xf] }
 0x2fb   : > { %17249 = vmatprep.mubr.msk.bf16.mxu0 %vm830_vm3, %v15645_v36  ;;  %v10769_v12 = vrot.slane %v9948_v29, 5  ;;  %v10140_v40 = vsel %vm17904_vm4, %v10135_v16, %v10139_v1  ;;  %v7522_v25 = vadd.f32 %v22303_v60, %v25429_v51  ;;  %v22543_v58 = vpop.f32.mrf.mxu0  ;;  %v7525_v60 = vadd.f32 %v22333_v47, %v25431_v23  ;;  %v25432_v36 = vld [vmem:[#allocation33_spill] sm:$0xff]  ;;  %v25435_v23 = vld [vmem:[#allocation54_spill] sm:$0xff] }
 0x2fc   : > { %v10158_v14 = vor.u32 %v10157_v33, %v10153_v26  ;;  %v10163_v3 = vrot.slane %v10161_v0, 5  ;;  %v15596_v21 = vcombine.low %v10130_v30, %v10140_v40  ;;  %v10149_v45 = vrot.slane %v10148_v19, 4  ;;  %v22553_v30 = vpop.f32.mrf.mxu1  ;;  %v9951_v0 = vld [vmem:[%s19775_s14 + $0x68] sm:$0x1] }
 0x2fd   : > { %v10767_v15 = vsel %vm18183_vm7, %v15629_v17, %v10766_v38  ;;  %v10768_v29 = vrot.slane %v10766_v38, 4  ;;  %v22546_v1 = vadd.f32 %v22287_v54, %v7522_v25  ;;  %v7523_v24 = vadd.f32 %v22359_v2, %v25432_v36  ;;  %v10659_v17 = vld [vmem:[%s19775_s14 + $0x60] sm:$0xe]  ;;  %v22570_v25 = vpop.f32.mrf.mxu0  ;;  %v9953_v36 = vld [vmem:[%s19775_s14 + $0x70] sm:$0xf] }
 0x2fe   : > { %v10159_v46 = vrot.slane %v10158_v14, 4  ;;  %17215 = vmatprep.mubr.msk.bf16.mxu1 %vm830_vm3, %v15596_v21  ;;  %v10154_v16 = vsel %vm17904_vm4, %v10149_v45, %v10153_v26  ;;  %v10166_v54 = vshrl.u32 %v9949_v18, 16  ;;  %v10169_v19 = vshll.u32 %v9949_v18, 16 }
 0x2ff   : > { %25430 = vst [vmem:[#allocation7_spill] sm:$0xff] %v22546_v1  ;;  %v10770_v33 = vsel %vm18183_vm7, %v10768_v29, %v10769_v12  ;;  %v22565_v38 = vadd.f32 %v22329_v28, %v7525_v60  ;;  %v22568_v40 = vadd.f32 %v22347_v41, %v7523_v24  ;;  %v10175_v12 = vshll.u32 %v9950_v10, 16  ;;  %v22574_v28 = vpop.f32.mrf.mxu1 }
 0x300   : > { %v10164_v47 = vsel %vm17904_vm4, %v10159_v46, %v10163_v3  ;;  %v15646_v2 = vcombine.low %v10767_v15, %v10770_v33  ;;  %v10168_v26 = vrot.slane %v10166_v54, 4  ;;  %v10171_v51 = vrot.slane %v10169_v19, 5  ;;  %v9952_v15 = vld [vmem:[%s19775_s14 + $0x6c] sm:$0xf] }
 0x301   : > { %25433 = vst [vmem:[#allocation20_spill] sm:$0xff] %v22565_v38  ;;  %25434 = vst [vmem:[#allocation47_spill] sm:$0xff] %v22568_v40  ;;  %v15597_v14 = vcombine.low %v10154_v16, %v10164_v47  ;;  %v10179_v18 = vshrl.u32 %v9950_v10, 16  ;;  %v10185_v21 = vshll.u32 %v9951_v0, 16  ;;  %v15630_v45 = vrot.slane %v10659_v17, 9 }
 0x302   : > { %17250 = vmatmul.mubr.msk.bf16.gmra.mxu0 %vm830_vm3, %v15646_v2  ;;  %v10773_v3 = vrot.slane %v9950_v10, 5  ;;  %v10172_v41 = vor.u32 %v10171_v51, %v10168_v26  ;;  %v10177_v29 = vrot.slane %v10175_v12, 5  ;;  %v10776_v46 = vrot.slane %v9951_v0, 5  ;;  %v9954_v17 = vld [vmem:[%s19775_s14 + $0x74] sm:$0x1] }
 0x303   : > { %17216 = vmatmul.mubr.msk.bf16.gmra.mxu1 %vm830_vm3, %v15597_v14  ;;  %v7528_v60 = vadd.f32 %v22375_v49, %v25435_v23  ;;  %v10181_v24 = vrot.slane %v10179_v18, 4  ;;  %v10187_v16 = vrot.slane %v10185_v21, 5  ;;  %v10190_v47 = vshrl.u32 %v9952_v15, 16  ;;  %v22586_v14 = vpop.f32.mrf.mxu0  ;;  %v10660_v12 = vld [vmem:[%s19775_s14 + $0x6c] sm:$0xe]  ;;  %v22591_v18 = vpop.f32.mrf.mxu1 }
 0x304   : > { %v10774_v33 = vsel %vm18183_vm7, %v15630_v45, %v10773_v3  ;;  %v10775_v54 = vrot.slane %v10773_v3, 4  ;;  %v10173_v10 = vrot.slane %v10172_v41, 4  ;;  %v10193_v2 = vshll.u32 %v9952_v15, 16 }
 0x305   : > { %v22583_v19 = vadd.f32 %v22367_v27, %v7528_v60  ;;  %v10182_v0 = vor.u32 %v10181_v24, %v10177_v29  ;;  %v10199_v26 = vshll.u32 %v9953_v36, 16  ;;  %v10203_v51 = vshrl.u32 %v9953_v36, 16 }
 0x306   : > { %v10777_v49 = vsel %vm18183_vm7, %v10775_v54, %v10776_v46  ;;  %v10178_v21 = vsel %vm17904_vm4, %v10173_v10, %v10177_v29  ;;  %v10192_v27 = vrot.slane %v10190_v47, 4  ;;  %v10195_v3 = vrot.slane %v10193_v2, 5  ;;  %v9955_v2 = vld [vmem:[%s19775_s14 + $0x78] sm:$0xf] }
 0x307   : > { %25436 = vst [vmem:[#allocation9_spill] sm:$0xff] %v22583_v19  ;;  %v15647_v45 = vcombine.low %v10774_v33, %v10777_v49  ;;  %v10183_v41 = vrot.slane %v10182_v0, 4  ;;  %v10201_v15 = vrot.slane %v10199_v26, 5  ;;  %v10205_v23 = vrot.slane %v10203_v51, 4  ;;  %v22596_v40 = vpop.f32.mrf.mxu0 }
 0x308   : > { %v10209_v60 = vshll.u32 %v9954_v17, 16  ;;  %v10196_v24 = vor.u32 %v10195_v3, %v10192_v27  ;;  %v15631_v46 = vrot.slane %v10660_v12, 9  ;;  %v10780_v54 = vrot.slane %v9953_v36, 5  ;;  %v22603_v0 = vpop.f32.mrf.mxu1 }
 0x309   : > { %17253 = vmatprep.mubr.msk.bf16.mxu0 %vm830_vm3, %v15647_v45  ;;  %v10783_v19 = vrot.slane %v9954_v17, 5  ;;  %v10188_v29 = vsel %vm17904_vm4, %v10183_v41, %v10187_v16  ;;  %v10206_v33 = vor.u32 %v10205_v23, %v10201_v15  ;;  %v7526_v47 = vadd.f32 %v22396_v39, %v22017_v44  ;;  %v22607_v51 = vpop.f32.mrf.mxu0  ;;  %v9956_v45 = vld [vmem:[%s19775_s14 + $0x7c] sm:$0xf]  ;;  %v9957_v41 = vld [vmem:[%s19775_s14 + $0x80] sm:$0x1] }
 0x30a   : > { %v10211_v10 = vrot.slane %v10209_v60, 5  ;;  %v15598_v49 = vcombine.low %v10178_v21, %v10188_v29  ;;  %v10197_v26 = vrot.slane %v10196_v24, 4  ;;  %v10781_v36 = vsel %vm18183_vm7, %v15631_v46, %v10780_v54  ;;  %v22617_v21 = vpop.f32.mrf.mxu1  ;;  %v10661_v60 = vld [vmem:[%s19775_s14 + $0x78] sm:$0xe] }
 0x30b   : > { %v10782_v17 = vrot.slane %v10780_v54, 4  ;;  %v10207_v12 = vrot.slane %v10206_v33, 4  ;;  %v22610_v16 = vadd.f32 %v22385_v52, %v7526_v47  ;;  %v7529_v44 = vadd.f32 %v22425_v5, %v22028_v35  ;;  %v22626_v35 = vpop.f32.mrf.mxu0 }
 0x30c   : > { %v7527_v39 = vadd.f32 %v22456_v4, %v22031_v32  ;;  %17219 = vmatprep.mubr.msk.bf16.mxu1 %vm830_vm3, %v15598_v49  ;;  %v10202_v27 = vsel %vm17904_vm4, %v10197_v26, %v10201_v15  ;;  %v10214_v52 = vshrl.u32 %v9955_v2, 16  ;;  %v10217_v23 = vshll.u32 %v9955_v2, 16  ;;  %v22636_v15 = vpop.f32.mrf.mxu1  ;;  %v9958_v49 = vld [vmem:[%s19775_s14 + $0x84] sm:$0xf] }
 0x30d   : > { %25437 = vst [vmem:[#allocation46_spill] sm:$0xff] %v22610_v16  ;;  %v10784_v3 = vsel %vm18183_vm7, %v10782_v17, %v10783_v19  ;;  %v10212_v32 = vsel %vm17904_vm4, %v10207_v12, %v10211_v10  ;;  %v22631_v4 = vadd.f32 %v22422_v22, %v7529_v44  ;;  %v10223_v29 = vshll.u32 %v9956_v45, 16  ;;  %v25440_v17 = vld [vmem:[#allocation17_spill] sm:$0xff]  ;;  %v9959_v44 = vld [vmem:[%s19775_s14 + $0x88] sm:$0xf] }
 0x30e   : > { %v15648_v5 = vcombine.low %v10781_v36, %v10784_v3  ;;  %v22634_v24 = vadd.f32 %v22451_v20, %v7527_v39  ;;  %v15599_v19 = vcombine.low %v10202_v27, %v10212_v32  ;;  %v10216_v46 = vrot.slane %v10214_v52, 4  ;;  %v22640_v22 = vpop.f32.mrf.mxu1  ;;  %v22646_v39 = vpop.f32.mrf.mxu0 }
 0x30f   : > { %25438 = vst [vmem:[#allocation48_spill] sm:$0xff] %v22631_v4  ;;  %v10219_v54 = vrot.slane %v10217_v23, 5  ;;  %v10227_v33 = vshrl.u32 %v9956_v45, 16  ;;  %v10233_v47 = vshll.u32 %v9957_v41, 16  ;;  %v15632_v2 = vrot.slane %v10661_v60, 9 }
 0x310   : > { %25439 = vst [vmem:[#allocation49_spill] sm:$0xff] %v22634_v24  ;;  %17254 = vmatmul.mubr.msk.bf16.gmra.mxu0 %vm830_vm3, %v15648_v5  ;;  %v10787_v10 = vrot.slane %v9956_v45, 5  ;;  %17220 = vmatmul.mubr.msk.bf16.gmra.mxu1 %vm830_vm3, %v15599_v19  ;;  %v10225_v26 = vrot.slane %v10223_v29, 5  ;;  %v10790_v36 = vrot.slane %v9957_v41, 5  ;;  %v7532_v12 = vadd.f32 %v22470_v11, %v25440_v17  ;;  %v22650_v23 = vpop.f32.mrf.mxu1  ;;  %v9960_v41 = vld [vmem:[%s19775_s14 + $0x8c] sm:$0x1] }
 0x311   : > { %v10220_v20 = vor.u32 %v10219_v54, %v10216_v46  ;;  %v10229_v27 = vrot.slane %v10227_v33, 4  ;;  %v10235_v3 = vrot.slane %v10233_v47, 5  ;;  %v10238_v5 = vshrl.u32 %v9958_v49, 16  ;;  %v10662_v33 = vld [vmem:[%s19775_s14 + $0x84] sm:$0xe] }
 0x312   : > { %v10788_v45 = vsel %vm18183_vm7, %v15632_v2, %v10787_v10  ;;  %v10789_v52 = vrot.slane %v10787_v10, 4  ;;  %v22653_v32 = vadd.f32 %v22463_v34, %v7532_v12  ;;  %v10241_v19 = vshll.u32 %v9958_v49, 16  ;;  %v22659_v47 = vpop.f32.mrf.mxu1 }
 0x313   : > { %v10221_v60 = vrot.slane %v10220_v20, 4  ;;  %v10230_v11 = vor.u32 %v10229_v27, %v10225_v26  ;;  %v10247_v54 = vshll.u32 %v9959_v44, 16  ;;  %v10251_v29 = vshrl.u32 %v9959_v44, 16  ;;  %v22663_v34 = vpop.f32.mrf.mxu0 }
 0x314   : > { %25441 = vst [vmem:[#allocation10_spill] sm:$0xff] %v22653_v32  ;;  %v10791_v46 = vsel %vm18183_vm7, %v10789_v52, %v10790_v36  ;;  %v10240_v20 = vrot.slane %v10238_v5, 4  ;;  %v10243_v17 = vrot.slane %v10241_v19, 5  ;;  %v10257_v32 = vshll.u32 %v9960_v41, 16  ;;  %v22665_v24 = vpop.f32.mrf.mxu1  ;;  %v25442_v5 = vld [vmem:[#allocation32_spill] sm:$0xff] }
 0x315   : > { %v10226_v2 = vsel %vm17904_vm4, %v10221_v60, %v10225_v26  ;;  %v15649_v10 = vcombine.low %v10788_v45, %v10791_v46  ;;  %v10231_v12 = vrot.slane %v10230_v11, 4  ;;  %v10249_v49 = vrot.slane %v10247_v54, 5  ;;  %v22668_v38 = vpop.f32.mrf.mxu0  ;;  %v9961_v11 = vld [vmem:[%s19775_s14 + $0x90] sm:$0xf] }
 0x316   : > { %v10253_v27 = vrot.slane %v10251_v29, 4  ;;  %v10244_v36 = vor.u32 %v10243_v17, %v10240_v20  ;;  %v15633_v52 = vrot.slane %v10662_v33, 9  ;;  %v10794_v4 = vrot.slane %v9959_v44, 5  ;;  %v22675_v46 = vpop.f32.mrf.mxu1  ;;  %v25445_v20 = vld [vmem:[#allocation34_spill] sm:$0xff] }
 0x317   : > { %17257 = vmatprep.mubr.msk.bf16.mxu0 %vm830_vm3, %v15649_v10  ;;  %v10797_v16 = vrot.slane %v9960_v41, 5  ;;  %v10236_v26 = vsel %vm17904_vm4, %v10231_v12, %v10235_v3  ;;  %v10259_v60 = vrot.slane %v10257_v32, 5  ;;  %v7530_v19 = vadd.f32 %v22488_v48, %v25442_v5  ;;  %v22679_v33 = vpop.f32.mrf.mxu0  ;;  %v25444_v32 = vld [vmem:[#allocation36_spill] sm:$0xff] }
 0x318   : > { %v10254_v45 = vor.u32 %v10253_v27, %v10249_v49  ;;  %v15600_v54 = vcombine.low %v10226_v2, %v10236_v26  ;;  %v10245_v29 = vrot.slane %v10244_v36, 4  ;;  %v10795_v44 = vsel %vm18183_vm7, %v15633_v52, %v10794_v4  ;;  %v9962_v12 = vld [vmem:[%s19775_s14 + $0x94] sm:$0xf]  ;;  %v22689_v2 = vpop.f32.mrf.mxu1  ;;  %v9963_v36 = vld [vmem:[%s19775_s14 + $0x98] sm:$0x1] }
 0x319   : > { %v10796_v41 = vrot.slane %v10794_v4, 4  ;;  %v22682_v3 = vadd.f32 %v22474_v8, %v7530_v19  ;;  %v7533_v48 = vadd.f32 %v22509_v37, %v25444_v32  ;;  %v7531_v17 = vadd.f32 %v22527_v31, %v25445_v20  ;;  %v10663_v26 = vld [vmem:[%s19775_s14 + $0x90] sm:$0xe] }
 0x31a   : > { %v10255_v10 = vrot.slane %v10254_v45, 4  ;;  %17223 = vmatprep.mubr.msk.bf16.mxu1 %vm830_vm3, %v15600_v54  ;;  %v10250_v4 = vsel %vm17904_vm4, %v10245_v29, %v10249_v49  ;;  %v10262_v8 = vshrl.u32 %v9961_v11, 16  ;;  %v10265_v52 = vshll.u32 %v9961_v11, 16  ;;  %v22706_v19 = vpop.f32.mrf.mxu1  ;;  %v22708_v11 = vpop.f32.mrf.mxu0 }
 0x31b   : > { %25443 = vst [vmem:[#allocation25_spill] sm:$0xff] %v22682_v3  ;;  %v10798_v27 = vsel %vm18183_vm7, %v10796_v41, %v10797_v16  ;;  %v22701_v45 = vadd.f32 %v22506_v56, %v7533_v48  ;;  %v22704_v5 = vadd.f32 %v22521_v43, %v7531_v17  ;;  %v10271_v29 = vshll.u32 %v9962_v12, 16  ;;  %v9964_v56 = vld [vmem:[%s19775_s14 + $0x9c] sm:$0xf]  ;;  %v25448_v17 = vld [vmem:[#allocation35_spill] sm:$0xff] }
 0x31c   : > { %v10260_v37 = vsel %vm17904_vm4, %v10255_v10, %v10259_v60  ;;  %v15650_v31 = vcombine.low %v10795_v44, %v10798_v27  ;;  %v10264_v54 = vrot.slane %v10262_v8, 4  ;;  %v10267_v16 = vrot.slane %v10265_v52, 5  ;;  %v22712_v32 = vpop.f32.mrf.mxu1  ;;  %v9965_v27 = vld [vmem:[%s19775_s14 + $0xa0] sm:$0xf] }
 0x31d   : > { %25446 = vst [vmem:[#allocation50_spill] sm:$0xff] %v22701_v45  ;;  %25447 = vst [vmem:[#allocation53_spill] sm:$0xff] %v22704_v5  ;;  %v15601_v49 = vcombine.low %v10250_v4, %v10260_v37  ;;  %v10275_v41 = vshrl.u32 %v9962_v12, 16  ;;  %v10281_v60 = vshll.u32 %v9963_v36, 16  ;;  %v15634_v44 = vrot.slane %v10663_v26, 9 }
 0x31e   : > { %17258 = vmatmul.mubr.msk.bf16.gmra.mxu0 %vm830_vm3, %v15650_v31  ;;  %v10801_v10 = vrot.slane %v9962_v12, 5  ;;  %v10268_v43 = vor.u32 %v10267_v16, %v10264_v54  ;;  %v10273_v48 = vrot.slane %v10271_v29, 5  ;;  %v10804_v20 = vrot.slane %v9963_v36, 5  ;;  %v22720_v37 = vpop.f32.mrf.mxu1  ;;  %v22726_v16 = vpop.f32.mrf.mxu0 }
 0x31f   : > { %17224 = vmatmul.mubr.msk.bf16.gmra.mxu1 %vm830_vm3, %v15601_v49  ;;  %v7536_v4 = vadd.f32 %v22539_v42, %v25448_v17  ;;  %v10277_v8 = vrot.slane %v10275_v41, 4  ;;  %v10283_v52 = vrot.slane %v10281_v60, 5  ;;  %v9966_v49 = vld [vmem:[%s19775_s14 + $0xa4] sm:$0x1]  ;;  %v10286_v54 = vshrl.u32 %v9964_v56, 16 }
 0x320   : > { %v10802_v26 = vsel %vm18183_vm7, %v15634_v44, %v10801_v10  ;;  %v10803_v12 = vrot.slane %v10801_v10, 4  ;;  %v10269_v31 = vrot.slane %v10268_v43, 4  ;;  %v10289_v36 = vshll.u32 %v9964_v56, 16  ;;  %v10664_v17 = vld [vmem:[%s19775_s14 + $0x9c] sm:$0xe]  ;;  %v22731_v44 = vpop.f32.mrf.mxu1 }
 0x321   : > { %v22723_v5 = vadd.f32 %v22532_v13, %v7536_v4  ;;  %v10278_v42 = vor.u32 %v10277_v8, %v10273_v48  ;;  %v10295_v41 = vshll.u32 %v9965_v27, 16  ;;  %v10299_v60 = vshrl.u32 %v9965_v27, 16 }
 0x322   : > { %v10805_v29 = vsel %vm18183_vm7, %v10803_v12, %v10804_v20  ;;  %v10274_v10 = vsel %vm17904_vm4, %v10269_v31, %v10273_v48  ;;  %v10288_v13 = vrot.slane %v10286_v54, 4  ;;  %v10291_v4 = vrot.slane %v10289_v36, 5  ;;  %v22737_v1 = vpop.f32.mrf.mxu1  ;;  %v25450_v36 = vld [vmem:[#allocation38_spill] sm:$0xff] }
 0x323   : > { %25449 = vst [vmem:[#allocation52_spill] sm:$0xff] %v22723_v5  ;;  %v15651_v43 = vcombine.low %v10802_v26, %v10805_v29  ;;  %v22735_v5 = vpop.f32.mrf.mxu0  ;;  %v10279_v56 = vrot.slane %v10278_v42, 4  ;;  %v10297_v45 = vrot.slane %v10295_v41, 5  ;;  %v10301_v8 = vrot.slane %v10299_v60, 4  ;;  %v9967_v29 = vld [vmem:[%s19775_s14 + $0xa8] sm:$0xf] }
 0x324   : > { %v10305_v3 = vshll.u32 %v9966_v49, 16  ;;  %v10292_v20 = vor.u32 %v10291_v4, %v10288_v13  ;;  %v15635_v12 = vrot.slane %v10664_v17, 9  ;;  %v10808_v7 = vrot.slane %v9965_v27, 5  ;;  %v22747_v41 = vpop.f32.mrf.mxu1  ;;  %v25453_v4 = vld [vmem:[#allocation59_spill] sm:$0xff] }
 0x325   : > { %17261 = vmatprep.mubr.msk.bf16.mxu0 %vm830_vm3, %v15651_v43  ;;  %v10811_v9 = vrot.slane %v9966_v49, 5  ;;  %v22740_v48 = vpop.f32.mrf.mxu0  ;;  %v10284_v26 = vsel %vm17904_vm4, %v10279_v56, %v10283_v52  ;;  %v10302_v31 = vor.u32 %v10301_v8, %v10297_v45  ;;  %v7534_v42 = vadd.f32 %v22553_v30, %v25450_v36  ;;  %v25452_v52 = vld [vmem:[#allocation39_spill] sm:$0xff] }
 0x326   : > { %v10307_v54 = vrot.slane %v10305_v3, 5  ;;  %v15602_v60 = vcombine.low %v10274_v10, %v10284_v26  ;;  %v10293_v43 = vrot.slane %v10292_v20, 4  ;;  %v10809_v27 = vsel %vm18183_vm7, %v15635_v12, %v10808_v7  ;;  %v9968_v56 = vld [vmem:[%s19775_s14 + $0xac] sm:$0xf]  ;;  %v22761_v10 = vpop.f32.mrf.mxu1  ;;  %v9969_v20 = vld [vmem:[%s19775_s14 + $0xb0] sm:$0x1] }
 0x327   : > { %v10810_v49 = vrot.slane %v10808_v7, 4  ;;  %v10303_v17 = vrot.slane %v10302_v31, 4  ;;  %v22752_v13 = vadd.f32 %v22543_v58, %v7534_v42  ;;  %v7537_v3 = vadd.f32 %v22574_v28, %v25452_v52  ;;  %v22759_v8 = vpop.f32.mrf.mxu0  ;;  %25454 = vst [vmem:[#allocation55_spill] sm:$0xff] %v22761_v10  ;;  %v10665_v28 = vld [vmem:[%s19775_s14 + $0xa8] sm:$0xe] }
 0x328   : > { %v7535_v30 = vadd.f32 %v22591_v18, %v25453_v4  ;;  %17227 = vmatprep.mubr.msk.bf16.mxu1 %vm830_vm3, %v15602_v60  ;;  %v10298_v7 = vsel %vm17904_vm4, %v10293_v43, %v10297_v45  ;;  %v10310_v12 = vshrl.u32 %v9967_v29, 16  ;;  %v10313_v26 = vshll.u32 %v9967_v29, 16  ;;  %v22778_v60 = vpop.f32.mrf.mxu1 }
 0x329   : > { %25451 = vst [vmem:[#allocation11_spill] sm:$0xff] %v22752_v13  ;;  %v10812_v58 = vsel %vm18183_vm7, %v10810_v49, %v10811_v9  ;;  %v10308_v18 = vsel %vm17904_vm4, %v10303_v17, %v10307_v54  ;;  %v22773_v36 = vadd.f32 %v22570_v25, %v7537_v3  ;;  %25457 = vst [vmem:[#allocation14_spill] sm:$0xff] %v22778_v60  ;;  %v10319_v49 = vshll.u32 %v9968_v56, 16  ;;  %v22782_v17 = vpop.f32.mrf.mxu0 }
 0x32a   : > { %v15652_v31 = vcombine.low %v10809_v27, %v10812_v58  ;;  %v22776_v42 = vadd.f32 %v22586_v14, %v7535_v30  ;;  %v15603_v45 = vcombine.low %v10298_v7, %v10308_v18  ;;  %v10312_v43 = vrot.slane %v10310_v12, 4  ;;  %v9970_v27 = vld [vmem:[%s19775_s14 + $0xb4] sm:$0xf]  ;;  %v22784_v25 = vpop.f32.mrf.mxu1  ;;  %v25459_v7 = vld [vmem:[#allocation41_spill] sm:$0xff] }
 0x32b   : > { %25455 = vst [vmem:[#allocation56_spill] sm:$0xff] %v22773_v36  ;;  %v10315_v9 = vrot.slane %v10313_v26, 5  ;;  %v10323_v29 = vshrl.u32 %v9968_v56, 16  ;;  %v10329_v52 = vshll.u32 %v9969_v20, 16  ;;  %v15636_v4 = vrot.slane %v10665_v28, 9  ;;  %25458 = vst [vmem:[#allocation3_spill] sm:$0xff] %v22784_v25 }
 0x32c   : > { %25456 = vst [vmem:[#allocation57_spill] sm:$0xff] %v22776_v42  ;;  %17262 = vmatmul.mubr.msk.bf16.gmra.mxu0 %vm830_vm3, %v15652_v31  ;;  %v10815_v54 = vrot.slane %v9968_v56, 5  ;;  %17228 = vmatmul.mubr.msk.bf16.gmra.mxu1 %vm830_vm3, %v15603_v45  ;;  %v10321_v3 = vrot.slane %v10319_v49, 5  ;;  %v10818_v30 = vrot.slane %v9969_v20, 5  ;;  %v7540_v58 = vadd.f32 %v22603_v0, %v25459_v7  ;;  %v9971_v12 = vld [vmem:[%s19775_s14 + $0xb8] sm:$0xf]  ;;  %v22792_v31 = vpop.f32.mrf.mxu0  ;;  %v22794_v42 = vpop.f32.mrf.mxu1 }
 0x32d   : > { %v10316_v14 = vor.u32 %v10315_v9, %v10312_v43  ;;  %v10325_v26 = vrot.slane %v10323_v29, 4  ;;  %v10331_v18 = vrot.slane %v10329_v52, 5  ;;  %25460 = vst [vmem:[#allocation19_spill] sm:$0xff] %v22794_v42  ;;  %v9972_v20 = vld [vmem:[%s19775_s14 + $0xbc] sm:$0x1]  ;;  %v10334_v43 = vshrl.u32 %v9970_v27, 16 }
 0x32e   : > { %v10816_v56 = vsel %vm18183_vm7, %v15636_v4, %v10815_v54  ;;  %v10817_v28 = vrot.slane %v10815_v54, 4  ;;  %v22797_v45 = vadd.f32 %v22596_v40, %v7540_v58  ;;  %v10337_v9 = vshll.u32 %v9970_v27, 16  ;;  %v10666_v7 = vld [vmem:[%s19775_s14 + $0xb4] sm:$0xe]  ;;  %v22803_v4 = vpop.f32.mrf.mxu0  ;;  %v22805_v54 = vpop.f32.mrf.mxu1 }
 0x32f   : > { %v10317_v36 = vrot.slane %v10316_v14, 4  ;;  %v10326_v0 = vor.u32 %v10325_v26, %v10321_v3  ;;  %v10343_v29 = vshll.u32 %v9971_v12, 16  ;;  %v10347_v52 = vshrl.u32 %v9971_v12, 16  ;;  %25462 = vst [vmem:[#allocation60_spill] sm:$0xff] %v22805_v54 }
 0x330   : > { %25461 = vst [vmem:[#allocation58_spill] sm:$0xff] %v22797_v45  ;;  %v10819_v49 = vsel %vm18183_vm7, %v10817_v28, %v10818_v30  ;;  %v10336_v40 = vrot.slane %v10334_v43, 4  ;;  %v10339_v58 = vrot.slane %v10337_v9, 5  ;;  %v10353_v42 = vshll.u32 %v9972_v20, 16  ;;  %v22809_v25 = vpop.f32.mrf.mxu1  ;;  %v22812_v54 = vpop.f32.mrf.mxu0  ;;  %v25463_v43 = vld [vmem:[#allocation16_spill] sm:$0xff] }
 0x331   : > { %v10322_v14 = vsel %vm17904_vm4, %v10317_v36, %v10321_v3  ;;  %v15653_v13 = vcombine.low %v10816_v56, %v10819_v49  ;;  %v10327_v45 = vrot.slane %v10326_v0, 4  ;;  %v10345_v27 = vrot.slane %v10343_v29, 5  ;;  %v15736_v0 = vld [vmem:[%s19775_s14 + $0xc] sm:$0xf] }
 0x332   : > { %v10349_v26 = vrot.slane %v10347_v52, 4  ;;  %v10340_v30 = vor.u32 %v10339_v58, %v10336_v40  ;;  %v15637_v28 = vrot.slane %v10666_v7, 9  ;;  %v10822_v60 = vrot.slane %v9971_v12, 5  ;;  %v22819_v49 = vpop.f32.mrf.mxu1  ;;  %v15737_v40 = vld [vmem:[%s19775_s14 + $0x10] sm:$0xf] }
 0x333   : > { %17265 = vmatprep.mubr.msk.bf16.mxu0 %vm830_vm3, %v15653_v13  ;;  %v10825_v10 = vrot.slane %v9972_v20, 5  ;;  %v10332_v36 = vsel %vm17904_vm4, %v10327_v45, %v10331_v18  ;;  %v10355_v56 = vrot.slane %v10353_v42, 5  ;;  %v7538_v9 = vadd.f32 %v22617_v21, %v25463_v43  ;;  %v25465_v18 = vld [vmem:[#allocation37_spill] sm:$0xff]  ;;  %v25466_v45 = vld [vmem:[#allocation40_spill] sm:$0xff] }
 0x334   : > { %v10350_v3 = vor.u32 %v10349_v26, %v10345_v27  ;;  %v15604_v13 = vcombine.low %v10322_v14, %v10332_v36  ;;  %v10341_v29 = vrot.slane %v10340_v30, 4  ;;  %v10823_v12 = vsel %vm18183_vm7, %v15637_v28, %v10822_v60  ;;  %v22831_v14 = vpop.f32.mrf.mxu1  ;;  %v15738_v58 = vld [vmem:[%s19775_s14 + $0x14] sm:$0x1]  ;;  %v22840_v28 = vpop.f32.mrf.mxu0 }
 0x335   : > { %v10824_v20 = vrot.slane %v10822_v60, 4  ;;  %v22824_v7 = vadd.f32 %v22607_v51, %v7538_v9  ;;  %v7541_v42 = vadd.f32 %v22636_v15, %v25465_v18  ;;  %v7539_v21 = vadd.f32 %v22640_v22, %v25466_v45  ;;  %v15739_v15 = vld [vmem:[%s19775_s14 + $0x18] sm:$0xf]  ;;  %v15740_v9 = vld [vmem:[%s19775_s14 + $0x1c] sm:$0xf] }
 0x336   : > { %v10351_v52 = vrot.slane %v10350_v3, 4  ;;  %17231 = vmatprep.mubr.msk.bf16.mxu1 %vm830_vm3, %v15604_v13  ;;  %v10346_v60 = vsel %vm17904_vm4, %v10341_v29, %v10345_v27  ;;  %v11529_v26 = vshrl.u32 %v15736_v0, 16  ;;  %v11532_v30 = vshll.u32 %v15736_v0, 16  ;;  %v17659_v27 = vld [vmem:[%s19775_s14 + $0xc] sm:$0xff]   ;;  %v22854_v18 = vpop.f32.mrf.mxu0 }
 0x337   : > { %25464 = vst [vmem:[#allocation26_spill] sm:$0xff] %v22824_v7  ;;  %v10826_v51 = vsel %vm18183_vm7, %v10824_v20, %v10825_v10  ;;  %v22845_v3 = vadd.f32 %v22626_v35, %v7541_v42  ;;  %v22848_v43 = vadd.f32 %v22646_v39, %v7539_v21  ;;  %v22852_v10 = vpop.f32.mrf.mxu1  ;;  %v11538_v20 = vshll.u32 %v15737_v40, 16  ;;  %v25469_v35 = vld [vmem:[#allocation43_spill] sm:$0xff]  ;;  %v15745_v7 = vld [vmem:[%s19775_s14 + $0x30] sm:$0xf] }
 0x338   : > { %v10356_v22 = vsel %vm17904_vm4, %v10351_v52, %v10355_v56  ;;  %v15654_v36 = vcombine.low %v10823_v12, %v10826_v51  ;;  %v11531_v0 = vrot.slane %v11529_v26, 4  ;;  %v11534_v29 = vrot.slane %v11532_v30, 5  ;;  %v22865_v30 = vpop.f32.mrf.mxu0 }
 0x339   : > { %25467 = vst [vmem:[#allocation62_spill] sm:$0xff] %v22845_v3  ;;  %25468 = vst [vmem:[#allocation21_spill] sm:$0xff] %v22848_v43  ;;  %v15605_v13 = vcombine.low %v10346_v60, %v10356_v22  ;;  %v11542_v56 = vshrl.u32 %v15737_v40, 16  ;;  %v11548_v12 = vshll.u32 %v15738_v58, 16  ;;  %v8341_v52 = vadd.f32 %v22650_v23, %v25469_v35  ;;  %v22859_v42 = vpop.f32.mrf.mxu1  ;;  %v22863_v60 = vld [vmem:[%s19775_s14 + $0x20] sm:$0x1] }
 0x33a   : > { %17266 = vmatmul.mubr.msk.bf16.gmra.mxu0 %vm830_vm3, %v15654_v36  ;;  %v11553_v39 = vshrl.u32 %v15739_v15, 16  ;;  %v11535_v45 = vor.u32 %v11534_v29, %v11531_v0  ;;  %v11540_v21 = vrot.slane %v11538_v20, 5  ;;  %25470 = vst [vmem:[#allocation23_spill] sm:$0xff] %v22863_v60  ;;  %v11556_v51 = vshll.u32 %v15739_v15, 16  ;;  %v22873_v20 = vpop.f32.mrf.mxu0  ;;  %v17661_v3 = vld [vmem:[%s19775_s14 + $0x24] sm:$0xff]  }
 0x33b   : > { %17232 = vmatmul.mubr.msk.bf16.gmra.mxu1 %vm830_vm3, %v15605_v13  ;;  %v11562_v26 = vshll.u32 %v15740_v9, 16  ;;  %v11544_v40 = vrot.slane %v11542_v56, 4  ;;  %v11550_v58 = vrot.slane %v11548_v12, 5  ;;  %v22869_v23 = vadd.f32 %v22663_v34, %v8341_v52  ;;  %v22871_v36 = vpop.f32.mrf.mxu1  ;;  %v17711_v34 = vld [vmem:[%s24893_s3 + $0x2e] sm:$0x3]  ;;  %v25472_v12 = vld [vmem:[#allocation18_spill] sm:$0xff] }
 0x33c   : > { %17271 = vmatprep.mubr.msk.bf16.mxu1 %vm830_vm3, %v17659_v27  ;;  %v11555_v22 = vrot.slane %v11553_v39, 4  ;;  %v11536_v13 = vrot.slane %v11535_v45, 4  ;;  %v11558_v0 = vrot.slane %v11556_v51, 5  ;;  %v11566_v15 = vshrl.u32 %v15740_v9, 16  ;;  %v15742_v39 = vld [vmem:[%s19775_s14 + $0x24] sm:$0xf] }
 0x33d   : > { %25471 = vst [vmem:[#allocation64_spill] sm:$0xff] %v22869_v23  ;;  %v11564_v29 = vrot.slane %v11562_v26, 5  ;;  %v11545_v35 = vor.u32 %v11544_v40, %v11540_v21  ;;  %v11572_v27 = vshll.u32 %v22863_v60, 16  ;;  %v12481_v56 = vsel %vm879_vm0, %v17711_v34, 0  ;;  %v22883_v45 = vpop.f32.mrf.mxu1  ;;  %v17660_v51 = vld [vmem:[%s19775_s14 + $0x18] sm:$0xff]  }
 0x33e   : > { %v8339_v52 = vadd.f32 %v22659_v47, %v25472_v12  ;;  %25473 = vst [vmem:[#allocation27_spill] sm:$0xff] %v22883_v45  ;;  %v11541_v9 = vsel %vm17904_vm4, %v11536_v13, %v11540_v21  ;;  %v11559_v26 = vor.u32 %v11558_v0, %v11555_v22  ;;  %v11568_v40 = vrot.slane %v11566_v15, 4  ;;  %v22891_v23 = vld [vmem:[%s19775_s14 + $0x28] sm:$0xf]  ;;  %v25475_v12 = vld [vmem:[#allocation42_spill] sm:$0xff]  ;;  %v25476_v0 = vld [vmem:[#allocation24_spill] sm:$0xff] }
 0x33f   : > { %v12840_v60 = vsel %vm879_vm0, %v22434_v53, 0  ;;  %25474 = vst [vmem:[#allocation63_spill] sm:$0xff] %v22891_v23  ;;  %v11546_v34 = vrot.slane %v11545_v35, 4  ;;  %v11574_v62 = vrot.slane %v11572_v27, 5  ;;  %v8342_v43 = vadd.f32 %v22665_v24, %v25475_v12  ;;  %v22899_v21 = vpop.f32.mrf.mxu1  ;;  %v22904_v45 = vpop.f32.mrf.mxu0  ;;  %v22912_v27 = vld [vmem:[%s19775_s14 + $0x2c] sm:$0x1] }
 0x340   : > { %v22894_v47 = vadd.f32 %v22668_v38, %v8339_v52  ;;  %v11560_v13 = vrot.slane %v11559_v26, 4  ;;  %v11569_v22 = vor.u32 %v11568_v40, %v11564_v29  ;;  %v8340_v15 = vadd.f32 %v22675_v46, %v25476_v0  ;;  %25477 = vst [vmem:[#allocation65_spill] sm:$0xff] %v22912_v27  ;;  %v22918_v46 = vld [vmem:[%s24893_s3 + $0x32] sm:$0x3]  ;;  %v22931_v0 = vld [vmem:[%s19775_s14 + $0x34] sm:$0xf] }
 0x341   : > { %v11577_v53 = vshrl.u32 %v15742_v39, 16  ;;  %v11551_v35 = vsel %vm17904_vm4, %v11546_v34, %v11550_v58  ;;  %v22909_v38 = vadd.f32 %v22679_v33, %v8342_v43  ;;  %v11580_v24 = vshll.u32 %v15742_v39, 16  ;;  %v22926_v43 = vpop.f32.mrf.mxu0  ;;  %25478 = vst [vmem:[#allocation8_spill] sm:$0xff] %v22931_v0 }
 0x342   : > { %v11586_v52 = vshll.u32 %v22891_v23, 16  ;;  %v15785_v26 = vcombine.low %v11541_v9, %v11551_v35  ;;  %v11565_v58 = vsel %vm17904_vm4, %v11560_v13, %v11564_v29  ;;  %v11570_v40 = vrot.slane %v11569_v22, 4 }
 0x343   : > { %17272 = vmatmul.mubr.msk.bf16.vlgmr.msra.gmra.mxu1 %vm830_vm3, %v17660_v51  ;;  %v22924_v33 = vadd.f32 %v22708_v11, %v8340_v15  ;;  %v11579_v39 = vrot.slane %v11577_v53, 4  ;;  %v11582_v34 = vrot.slane %v11580_v24, 5  ;;  %v11590_v9 = vshrl.u32 %v22891_v23, 16  ;;  %v22933_v51 = vpop.f32.mrf.mxu1  ;;  %v22941_v22 = vpop.f32.mrf.mxu0  ;;  %v22946_v24 = vld [vmem:[%s19775_s14 + $0x38] sm:$0x1] }
 0x344   : > { %17338 = vmatpush3.bf16.msra.mxu1 %v12481_v56  ;;  %17275 = vmatprep.mubr.msk.bf16.mxu1 %vm830_vm3, %v17661_v3  ;;  %v11588_v12 = vrot.slane %v11586_v52, 5  ;;  %v11575_v11 = vsel %vm17904_vm4, %v11570_v40, %v11574_v62  ;;  %v11596_v29 = vshll.u32 %v22912_v27, 16  ;;  %v25479_v56 = vld [vmem:[#allocation44_spill] sm:$0xff]  ;;  %v11601_v13 = vshrl.u32 %v15745_v7, 16  ;;  %v22974_v23 = vld [vmem:[%s19775_s14 + $0x40] sm:$0xf] }
 0x345   : > { %17305 = vmatprep.mubr.msk.bf16.mxu0 %vm830_vm3, %v15785_v26  ;;  %v8345_v3 = vadd.f32 %v22689_v2, %v25479_v56  ;;  %17501 = vmatprep.subr.msk.bf16.mxu1 %vm879_vm0, %v22918_v46  ;;  %v15786_v15 = vcombine.low %v11565_v58, %v11575_v11  ;;  %v11583_v53 = vor.u32 %v11582_v34, %v11579_v39  ;;  %v11592_v35 = vrot.slane %v11590_v9, 4  ;;  %v17662_v40 = vld [vmem:[%s19775_s14 + $0x30] sm:$0xff]   ;;  %v22953_v56 = vpop.f32.mrf.mxu0  ;;  %v17663_v9 = vld [vmem:[%s19775_s14 + $0x3c] sm:$0xff]   ;;  %v22963_v11 = vpop.f32.mrf.mxu1 }
 0x346   : > { %v11604_v52 = vshll.u32 %v15745_v7, 16  ;;  %v11598_v26 = vrot.slane %v11596_v29, 5  ;;  %v11603_v27 = vrot.slane %v11601_v13, 4  ;;  %v11610_v2 = vshll.u32 %v22931_v0, 16  ;;  %v22958_v58 = vld [vmem:[%s24893_s3 + $0x34] sm:$0x3] }
 0x347   : > { %v22949_v62 = vadd.f32 %v22726_v16, %v8345_v3  ;;  %17306 = vmatmul.mubr.msk.bf16.vlgmr.msra.gmra.mxu0 %vm830_vm3, %v15786_v15  ;;  %v11584_v39 = vrot.slane %v11583_v53, 4  ;;  %v11593_v7 = vor.u32 %v11592_v35, %v11588_v12  ;;  %v11614_v16 = vshrl.u32 %v22931_v0, 16  ;;  %v15748_v15 = vld [vmem:[%s19775_s14 + $0x3c] sm:$0xf]  ;;  %25481 = vst [vmem:[#allocation12_spill] sm:$0xff] %v22974_v23 }
 0x348   : > { %v11606_v34 = vrot.slane %v11604_v52, 5  ;;  %17372 = vmatpush3.bf16.msra.mxu0 %v12840_v60  ;;  %v11612_v29 = vrot.slane %v11610_v2, 5  ;;  %v11620_v3 = vshll.u32 %v22946_v24, 16  ;;  %v8343_v13 = vadd.f32 %v22706_v19, %v22388_v6 }
 0x349   : > { %25480 = vst [vmem:[#allocation29_spill] sm:$0xff] %v22949_v62  ;;  %v8346_v62 = vadd.f32 %v22712_v32, %v22415_v59  ;;  %v11589_v53 = vsel %vm17904_vm4, %v11584_v39, %v11588_v12  ;;  %v11594_v35 = vrot.slane %v11593_v7, 4  ;;  %v11616_v0 = vrot.slane %v11614_v16, 4  ;;  %17502 = vmatprep.subr.msk.bf16.mxu0 %vm879_vm0, %v22958_v58  ;;  %v22987_v32 = vpop.f32.mrf.mxu0  ;;  %v15751_v7 = vld [vmem:[%s19775_s14 + $0x48] sm:$0xf] }
 0x34a   : > { %v11607_v52 = vor.u32 %v11606_v34, %v11603_v27  ;;  %v11622_v60 = vrot.slane %v11620_v3, 5  ;;  %v22980_v6 = vadd.f32 %v22735_v5, %v8343_v13  ;;  %v8344_v19 = vadd.f32 %v22720_v37, %v22418_v55  ;;  %v22995_v5 = vpop.f32.mrf.mxu1 }
 0x34b   : > { %17276 = vmatmul.mubr.msk.bf16.gmra.mxu1 %vm830_vm3, %v17662_v40  ;;  %v22983_v59 = vadd.f32 %v22740_v48, %v8346_v62  ;;  %v11599_v27 = vsel %vm17904_vm4, %v11594_v35, %v11598_v26  ;;  %v11617_v2 = vor.u32 %v11616_v0, %v11612_v29  ;;  %v22993_v40 = vld [vmem:[%s19775_s14 + $0x44] sm:$0x1]  ;;  %v11625_v39 = vshrl.u32 %v15748_v15, 16  ;;  %v23002_v26 = vpop.f32.mrf.mxu0  ;;  %v23013_v35 = vld [vmem:[%s19775_s14 + $0x4c] sm:$0xf] }
 0x34c   : > { %25482 = vst [vmem:[#allocation22_spill] sm:$0xff] %v22980_v6  ;;  %v11608_v12 = vrot.slane %v11607_v52, 4  ;;  %17279 = vmatprep.mubr.msk.bf16.mxu1 %vm830_vm3, %v17663_v9  ;;  %25484 = vst [vmem:[#allocation5_spill] sm:$0xff] %v22993_v40  ;;  %v15787_v48 = vcombine.low %v11589_v53, %v11599_v27  ;;  %v22998_v62 = vadd.f32 %v22759_v8, %v8344_v19  ;;  %v11628_v55 = vshll.u32 %v15748_v15, 16  ;;  %v17664_v53 = vld [vmem:[%s19775_s14 + $0x48] sm:$0xff]  }
 0x34d   : > { %25483 = vst [vmem:[#allocation6_spill] sm:$0xff] %v22983_v59  ;;  %v11634_v37 = vshll.u32 %v22974_v23, 16  ;;  %v11618_v34 = vrot.slane %v11617_v2, 4  ;;  %v11627_v16 = vrot.slane %v11625_v39, 4  ;;  %v11638_v9 = vshrl.u32 %v22974_v23, 16  ;;  %25486 = vst [vmem:[#allocation51_spill] sm:$0xff] %v23013_v35  ;;  %v23015_v52 = vpop.f32.mrf.mxu0 }
 0x34e   : > { %25485 = vst [vmem:[#allocation28_spill] sm:$0xff] %v22998_v62  ;;  %v11613_v0 = vsel %vm17904_vm4, %v11608_v12, %v11612_v29  ;;  %17309 = vmatprep.mubr.msk.bf16.mxu0 %vm830_vm3, %v15787_v48  ;;  %v11630_v3 = vrot.slane %v11628_v55, 5  ;;  %v11644_v13 = vshll.u32 %v22993_v40, 16  ;;  %v8349_v15 = vadd.f32 %v22731_v44, %v22448_v57  ;;  %v23020_v27 = vld [vmem:[%s19775_s14 + $0x50] sm:$0x1]  ;;  %v17665_v39 = vld [vmem:[%s19775_s14 + $0x54] sm:$0xff]   ;;  %v23023_v48 = vpop.f32.mrf.mxu1 }
 0x34f   : > { %v11636_v8 = vrot.slane %v11634_v37, 5  ;;  %v11623_v29 = vsel %vm17904_vm4, %v11618_v34, %v11622_v60  ;;  %v11640_v19 = vrot.slane %v11638_v9, 4  ;;  %25487 = vst [vmem:[#allocation13_spill] sm:$0xff] %v23020_v27  ;;  %v11649_v12 = vshrl.u32 %v15751_v7, 16  ;;  %v23028_v44 = vpop.f32.mrf.mxu0  ;;  %v23188_v59 = vld [vmem:[%s19775_s14 + $0x88] sm:$0xf] }
 0x350   : > { %v11652_v2 = vshll.u32 %v15751_v7, 16  ;;  %v15788_v55 = vcombine.low %v11613_v0, %v11623_v29  ;;  %v11631_v37 = vor.u32 %v11630_v3, %v11627_v16  ;;  %v11646_v40 = vrot.slane %v11644_v13, 5  ;;  %v15754_v29 = vld [vmem:[%s19775_s14 + $0x54] sm:$0xf]  ;;  %25518 = vst [vmem:[#allocation43_spill] sm:$0xff] %v23188_v59 }
 0x351   : > { %v23026_v57 = vadd.f32 %v22782_v17, %v8349_v15  ;;  %v11641_v23 = vor.u32 %v11640_v19, %v11636_v8  ;;  %v11651_v62 = vrot.slane %v11649_v12, 4  ;;  %v11658_v34 = vshll.u32 %v23013_v35, 16  ;;  %v23041_v19 = vpop.f32.mrf.mxu1  ;;  %v23191_v6 = vld [vmem:[%s19775_s14 + $0x8c] sm:$0x1] }
 0x352   : > { %v11654_v60 = vrot.slane %v11652_v2, 5  ;;  %17310 = vmatmul.mubr.msk.bf16.gmra.mxu0 %vm830_vm3, %v15788_v55  ;;  %v11632_v7 = vrot.slane %v11631_v37, 4  ;;  %v11662_v0 = vshrl.u32 %v23013_v35, 16  ;;  %v11668_v16 = vshll.u32 %v23020_v27, 16  ;;  %v23061_v37 = vld [vmem:[%s19775_s14 + $0x5c] sm:$0x1] }
 0x353   : > { %25488 = vst [vmem:[#allocation4_spill] sm:$0xff] %v23026_v57  ;;  %17280 = vmatmul.mubr.msk.bf16.gmra.mxu1 %vm830_vm3, %v17664_v53  ;;  %v8347_v17 = vadd.f32 %v22737_v1, %v22481_v63  ;;  %v11642_v9 = vrot.slane %v11641_v23, 4  ;;  %v11660_v13 = vrot.slane %v11658_v34, 5  ;;  %v8350_v15 = vadd.f32 %v22747_v41, %v22501_v50  ;;  %v23049_v1 = vld [vmem:[%s19775_s14 + $0x58] sm:$0xf]  ;;  %v23051_v23 = vpop.f32.mrf.mxu0  ;;  %25494 = vst [vmem:[#allocation54_spill] sm:$0xff] %v23061_v37 }
 0x354   : > { %v11655_v3 = vor.u32 %v11654_v60, %v11651_v62  ;;  %17283 = vmatprep.mubr.msk.bf16.mxu1 %vm830_vm3, %v17665_v39  ;;  %v11637_v53 = vsel %vm17904_vm4, %v11632_v7, %v11636_v8  ;;  %v11664_v12 = vrot.slane %v11662_v0, 4  ;;  %v11670_v2 = vrot.slane %v11668_v16, 5  ;;  %25490 = vst [vmem:[#allocation31_spill] sm:$0xff] %v23049_v1  ;;  %v25492_v39 = vld [vmem:[#allocation45_spill] sm:$0xff]  ;;  %v25493_v8 = vld [vmem:[#allocation55_spill] sm:$0xff]  ;;  %v17666_v0 = vld [vmem:[%s19775_s14 + $0x60] sm:$0xff]  }
 0x355   : > { %v23046_v63 = vadd.f32 %v22792_v31, %v8347_v17  ;;  %v11647_v50 = vsel %vm17904_vm4, %v11642_v9, %v11646_v40  ;;  %v23056_v62 = vadd.f32 %v22803_v4, %v8350_v15  ;;  %v8348_v55 = vadd.f32 %v25493_v8, %v25492_v39  ;;  %v15757_v16 = vld [vmem:[%s19775_s14 + $0x60] sm:$0xf]  ;;  %v23065_v17 = vpop.f32.mrf.mxu0  ;;  %v17667_v15 = vld [vmem:[%s19775_s14 + $0x6c] sm:$0xff]   ;;  %25519 = vst [vmem:[#allocation18_spill] sm:$0xff] %v23191_v6 }
 0x356   : > { %v11656_v41 = vrot.slane %v11655_v3, 4  ;;  %v15789_v60 = vcombine.low %v11637_v53, %v11647_v50  ;;  %v11665_v31 = vor.u32 %v11664_v12, %v11660_v13  ;;  %v11673_v34 = vshrl.u32 %v15754_v29, 16  ;;  %v23075_v53 = vpop.f32.mrf.mxu1 }
 0x357   : > { %25489 = vst [vmem:[#allocation30_spill] sm:$0xff] %v23046_v63  ;;  %25491 = vst [vmem:[#allocation33_spill] sm:$0xff] %v23056_v62  ;;  %v11676_v7 = vshll.u32 %v15754_v29, 16  ;;  %v23070_v4 = vadd.f32 %v22812_v54, %v8348_v55  ;;  %v11682_v9 = vshll.u32 %v23049_v1, 16  ;;  %v11686_v3 = vshrl.u32 %v23049_v1, 16  ;;  %v23079_v8 = vpop.f32.mrf.mxu0  ;;  %v25497_v55 = vld [vmem:[#allocation14_spill] sm:$0xff] }
 0x358   : > { %v11661_v40 = vsel %vm17904_vm4, %v11656_v41, %v11660_v13  ;;  %17313 = vmatprep.mubr.msk.bf16.mxu0 %vm830_vm3, %v15789_v60  ;;  %v11666_v29 = vrot.slane %v11665_v31, 4  ;;  %v11675_v12 = vrot.slane %v11673_v34, 4  ;;  %v11692_v39 = vshll.u32 %v23061_v37, 16  ;;  %v25496_v41 = vld [vmem:[#allocation61_spill] sm:$0xff]  ;;  %v23084_v62 = vld [vmem:[%s19775_s14 + $0x64] sm:$0xf] }
 0x359   : > { %25495 = vst [vmem:[#allocation17_spill] sm:$0xff] %v23070_v4  ;;  %v11678_v50 = vrot.slane %v11676_v7, 5  ;;  %v11684_v13 = vrot.slane %v11682_v9, 5  ;;  %v11688_v54 = vrot.slane %v11686_v3, 4  ;;  %v8353_v4 = vadd.f32 %v25497_v55, %v25496_v41  ;;  %25498 = vst [vmem:[#allocation32_spill] sm:$0xff] %v23084_v62  ;;  %v23096_v55 = vpop.f32.mrf.mxu0 }
 0x35a   : > { %v11697_v1 = vshrl.u32 %v15757_v16, 16  ;;  %v11671_v63 = vsel %vm17904_vm4, %v11666_v29, %v11670_v2  ;;  %v11694_v60 = vrot.slane %v11692_v39, 5  ;;  %v23090_v31 = vld [vmem:[%s19775_s14 + $0x68] sm:$0x1]  ;;  %v11700_v34 = vshll.u32 %v15757_v16, 16  ;;  %v23098_v2 = vpop.f32.mrf.mxu1 }
 0x35b   : > { %v11679_v27 = vor.u32 %v11678_v50, %v11675_v12  ;;  %17284 = vmatmul.mubr.msk.bf16.gmra.mxu1 %vm830_vm3, %v17666_v0  ;;  %25499 = vst [vmem:[#allocation36_spill] sm:$0xff] %v23090_v31  ;;  %v15790_v7 = vcombine.low %v11661_v40, %v11671_v63  ;;  %v11689_v9 = vor.u32 %v11688_v54, %v11684_v13  ;;  %v11706_v12 = vshll.u32 %v23084_v62, 16  ;;  %v25501_v16 = vld [vmem:[#allocation7_spill] sm:$0xff]  ;;  %v23112_v37 = vld [vmem:[%s19775_s14 + $0x70] sm:$0xf] }
 0x35c   : > { %v23093_v3 = vadd.f32 %v22840_v28, %v8353_v4  ;;  %v11699_v41 = vrot.slane %v11697_v1, 4  ;;  %17287 = vmatprep.mubr.msk.bf16.mxu1 %vm830_vm3, %v17667_v15  ;;  %v11702_v0 = vrot.slane %v11700_v34, 5  ;;  %v11710_v63 = vshrl.u32 %v23084_v62, 16  ;;  %v25502_v40 = vld [vmem:[#allocation3_spill] sm:$0xff]  ;;  %v25503_v15 = vld [vmem:[#allocation20_spill] sm:$0xff]  ;;  %25505 = vst [vmem:[#allocation35_spill] sm:$0xff] %v23112_v37 }
 0x35d   : > { %v11680_v29 = vrot.slane %v11679_v27, 4  ;;  %17314 = vmatmul.mubr.msk.bf16.gmra.mxu0 %vm830_vm3, %v15790_v7  ;;  %v11690_v28 = vrot.slane %v11689_v9, 4  ;;  %v11716_v1 = vshll.u32 %v23090_v31, 16  ;;  %v8351_v4 = vadd.f32 %v25502_v40, %v25501_v16  ;;  %v25504_v50 = vld [vmem:[#allocation19_spill] sm:$0xff]  ;;  %v17668_v7 = vld [vmem:[%s19775_s14 + $0x78] sm:$0xff]  }
 0x35e   : > { %25500 = vst [vmem:[#allocation34_spill] sm:$0xff] %v23093_v3  ;;  %v8354_v39 = vadd.f32 %v25504_v50, %v25503_v15  ;;  %v15760_v54 = vld [vmem:[%s19775_s14 + $0x6c] sm:$0xf]  ;;  %v11703_v34 = vor.u32 %v11702_v0, %v11699_v41  ;;  %v11708_v3 = vrot.slane %v11706_v12, 5  ;;  %v11712_v62 = vrot.slane %v11710_v63, 4  ;;  %v23127_v41 = vpop.f32.mrf.mxu0 }
 0x35f   : > { %v11685_v27 = vsel %vm17904_vm4, %v11680_v29, %v11684_v13  ;;  %v11695_v9 = vsel %vm17904_vm4, %v11690_v28, %v11694_v60  ;;  %v11718_v31 = vrot.slane %v11716_v1, 5  ;;  %v23118_v16 = vadd.f32 %v22854_v18, %v8351_v4  ;;  %v23124_v15 = vld [vmem:[%s19775_s14 + $0x74] sm:$0x1]  ;;  %v17669_v13 = vld [vmem:[%s19775_s14 + $0x84] sm:$0xff]   ;;  %v23129_v29 = vpop.f32.mrf.mxu1 }
 0x360   : > { %v23121_v40 = vadd.f32 %v22865_v30, %v8354_v39  ;;  %25508 = vst [vmem:[#allocation59_spill] sm:$0xff] %v23124_v15  ;;  %v15791_v0 = vcombine.low %v11685_v27, %v11695_v9  ;;  %v11704_v12 = vrot.slane %v11703_v34, 4  ;;  %v11713_v63 = vor.u32 %v11712_v62, %v11708_v3  ;;  %v25509_v50 = vld [vmem:[#allocation47_spill] sm:$0xff]  ;;  %v25510_v60 = vld [vmem:[#allocation60_spill] sm:$0xff]  ;;  %v15763_v39 = vld [vmem:[%s19775_s14 + $0x78] sm:$0xf] }
 0x361   : > { %25506 = vst [vmem:[#allocation38_spill] sm:$0xff] %v23118_v16  ;;  %v8352_v28 = vadd.f32 %v25510_v60, %v25509_v50  ;;  %v11721_v1 = vshrl.u32 %v15760_v54, 16  ;;  %v11724_v18 = vshll.u32 %v15760_v54, 16  ;;  %v11730_v4 = vshll.u32 %v23112_v37, 16  ;;  %v23147_v16 = vld [vmem:[%s19775_s14 + $0x7c] sm:$0xf] }
 0x362   : > { %25507 = vst [vmem:[#allocation39_spill] sm:$0xff] %v23121_v40  ;;  %v11734_v30 = vshrl.u32 %v23112_v37, 16  ;;  %v23136_v40 = vpop.f32.mrf.mxu0  ;;  %17317 = vmatprep.mubr.msk.bf16.mxu0 %vm830_vm3, %v15791_v0  ;;  %v11709_v27 = vsel %vm17904_vm4, %v11704_v12, %v11708_v3  ;;  %v11714_v62 = vrot.slane %v11713_v63, 4  ;;  %v11740_v9 = vshll.u32 %v23124_v15, 16  ;;  %25512 = vst [vmem:[#allocation16_spill] sm:$0xff] %v23147_v16  ;;  %v23152_v3 = vpop.f32.mrf.mxu1  ;;  %v25513_v63 = vld [vmem:[#allocation9_spill] sm:$0xff] }
 0x363   : > { %v23142_v34 = vadd.f32 %v22873_v20, %v8352_v28  ;;  %17288 = vmatmul.mubr.msk.bf16.gmra.mxu1 %vm830_vm3, %v17668_v7  ;;  %v11723_v54 = vrot.slane %v11721_v1, 4  ;;  %v11726_v50 = vrot.slane %v11724_v18, 5  ;;  %v11732_v60 = vrot.slane %v11730_v4, 5  ;;  %v23159_v28 = vld [vmem:[%s19775_s14 + $0x80] sm:$0x1] }
 0x364   : > { %v11736_v37 = vrot.slane %v11734_v30, 4  ;;  %17291 = vmatprep.mubr.msk.bf16.mxu1 %vm830_vm3, %v17669_v13  ;;  %v23150_v0 = vpop.f32.mrf.mxu0  ;;  %v11719_v20 = vsel %vm17904_vm4, %v11714_v62, %v11718_v31  ;;  %v11742_v12 = vrot.slane %v11740_v9, 5  ;;  %v8357_v7 = vadd.f32 %v22809_v25, %v25513_v63  ;;  %25514 = vst [vmem:[#allocation37_spill] sm:$0xff] %v23159_v28  ;;  %v17670_v9 = vld [vmem:[%s19775_s14 + $0x90] sm:$0xff]  }
 0x365   : > { %25511 = vst [vmem:[#allocation41_spill] sm:$0xff] %v23142_v34  ;;  %v11745_v1 = vshrl.u32 %v15763_v39, 16  ;;  %v15792_v18 = vcombine.low %v11709_v27, %v11719_v20  ;;  %v11727_v4 = vor.u32 %v11726_v50, %v11723_v54  ;;  %v11748_v13 = vshll.u32 %v15763_v39, 16  ;;  %v23163_v34 = vpop.f32.mrf.mxu1  ;;  %v17671_v50 = vld [vmem:[%s19775_s14 + $0x9c] sm:$0xff]  }
 0x366   : > { %v11737_v30 = vor.u32 %v11736_v37, %v11732_v60  ;;  %v23161_v15 = vpop.f32.mrf.mxu0  ;;  %v23166_v35 = vadd.f32 %v22904_v45, %v8357_v7  ;;  %v11754_v62 = vshll.u32 %v23147_v16, 16  ;;  %v11758_v25 = vshrl.u32 %v23147_v16, 16 }
 0x367   : > { %v11747_v31 = vrot.slane %v11745_v1, 4  ;;  %17318 = vmatmul.mubr.msk.bf16.gmra.mxu0 %vm830_vm3, %v15792_v18  ;;  %v11728_v27 = vrot.slane %v11727_v4, 4  ;;  %v11750_v39 = vrot.slane %v11748_v13, 5  ;;  %v11764_v54 = vshll.u32 %v23159_v28, 16  ;;  %v23176_v45 = vpop.f32.mrf.mxu1  ;;  %v25516_v1 = vld [vmem:[#allocation46_spill] sm:$0xff] }
 0x368   : > { %25515 = vst [vmem:[#allocation40_spill] sm:$0xff] %v23166_v35  ;;  %v11738_v37 = vrot.slane %v11737_v30, 4  ;;  %v23174_v20 = vpop.f32.mrf.mxu0  ;;  %v11756_v63 = vrot.slane %v11754_v62, 5  ;;  %v11760_v7 = vrot.slane %v11758_v25, 4  ;;  %v8355_v16 = vadd.f32 %v22819_v49, %v25516_v1  ;;  %v25517_v35 = vld [vmem:[#allocation48_spill] sm:$0xff] }
 0x369   : > { %v8358_v18 = vadd.f32 %v22831_v14, %v25517_v35  ;;  %v15766_v4 = vld [vmem:[%s19775_s14 + $0x84] sm:$0xf]  ;;  %v11733_v30 = vsel %vm17904_vm4, %v11728_v27, %v11732_v60  ;;  %v11751_v28 = vor.u32 %v11750_v39, %v11747_v31  ;;  %v11766_v57 = vrot.slane %v11764_v54, 5  ;;  %v23195_v25 = vpop.f32.mrf.mxu1 }
 0x36a   : > { %v11743_v13 = vsel %vm17904_vm4, %v11738_v37, %v11742_v12  ;;  %v23193_v62 = vpop.f32.mrf.mxu0  ;;  %v11761_v1 = vor.u32 %v11760_v7, %v11756_v63  ;;  %v23198_v14 = vadd.f32 %v22926_v43, %v8355_v16  ;;  %v25522_v12 = vld [vmem:[#allocation49_spill] sm:$0xff]  ;;  %v11769_v27 = vshrl.u32 %v15766_v4, 16 }
 0x36b   : > { %v15793_v49 = vcombine.low %v11733_v30, %v11743_v13  ;;  %v23201_v35 = vadd.f32 %v22941_v22, %v8358_v18  ;;  %17292 = vmatmul.mubr.msk.bf16.gmra.mxu1 %vm830_vm3, %v17670_v9  ;;  %v11752_v60 = vrot.slane %v11751_v28, 4  ;;  %v8356_v31 = vadd.f32 %v22852_v10, %v25522_v12  ;;  %v23209_v54 = vpop.f32.mrf.mxu1  ;;  %v15769_v28 = vld [vmem:[%s19775_s14 + $0x90] sm:$0xf] }
 0x36c   : > { %25520 = vst [vmem:[#allocation42_spill] sm:$0xff] %v23198_v14  ;;  %v11772_v37 = vshll.u32 %v15766_v4, 16  ;;  %17295 = vmatprep.mubr.msk.bf16.mxu1 %vm830_vm3, %v17671_v50  ;;  %v23207_v39 = vpop.f32.mrf.mxu0  ;;  %v11762_v43 = vrot.slane %v11761_v1, 4  ;;  %v11778_v22 = vshll.u32 %v23188_v59, 16  ;;  %v11782_v16 = vshrl.u32 %v23188_v59, 16 }
 0x36d   : > { %25521 = vst [vmem:[#allocation24_spill] sm:$0xff] %v23201_v35  ;;  %17321 = vmatprep.mubr.msk.bf16.mxu0 %vm830_vm3, %v15793_v49  ;;  %v11788_v10 = vshll.u32 %v23191_v6, 16  ;;  %v11757_v9 = vsel %vm17904_vm4, %v11752_v60, %v11756_v63  ;;  %v23219_v50 = vadd.f32 %v22953_v56, %v8356_v31  ;;  %v11771_v7 = vrot.slane %v11769_v27, 4  ;;  %v23222_v4 = vld [vmem:[%s19775_s14 + $0x94] sm:$0xf]  ;;  %v23226_v13 = vpop.f32.mrf.mxu1  ;;  %v17672_v63 = vld [vmem:[%s19775_s14 + $0xa8] sm:$0xff]  }
 0x36e   : > { %v11774_v18 = vrot.slane %v11772_v37, 5  ;;  %25524 = vst [vmem:[#allocation45_spill] sm:$0xff] %v23222_v4  ;;  %v23224_v30 = vpop.f32.mrf.mxu0  ;;  %25525 = vst [vmem:[#allocation55_spill] sm:$0xff] %v23226_v13  ;;  %v11767_v49 = vsel %vm17904_vm4, %v11762_v43, %v11766_v57  ;;  %v11780_v1 = vrot.slane %v11778_v22, 5  ;;  %v11784_v12 = vrot.slane %v11782_v16, 4  ;;  %v25527_v31 = vld [vmem:[#allocation10_spill] sm:$0xff] }
 0x36f   : > { %25523 = vst [vmem:[#allocation44_spill] sm:$0xff] %v23219_v50  ;;  %v11790_v6 = vrot.slane %v11788_v10, 5  ;;  %v23231_v59 = vld [vmem:[%s19775_s14 + $0x98] sm:$0x1]  ;;  %v15794_v56 = vcombine.low %v11757_v9, %v11767_v49  ;;  %v8361_v27 = vadd.f32 %v22859_v42, %v25527_v31  ;;  %v11793_v37 = vshrl.u32 %v15769_v28, 16  ;;  %v23239_v14 = vpop.f32.mrf.mxu1 }
 0x370   : > { %25526 = vst [vmem:[#allocation61_spill] sm:$0xff] %v23231_v59  ;;  %v11775_v60 = vor.u32 %v11774_v18, %v11771_v7  ;;  %v17673_v50 = vld [vmem:[%s19775_s14 + $0xb4] sm:$0xff]   ;;  %v23237_v35 = vpop.f32.mrf.mxu0  ;;  %v11785_v13 = vor.u32 %v11784_v12, %v11780_v1  ;;  %v11796_v57 = vshll.u32 %v15769_v28, 16  ;;  %v11802_v43 = vshll.u32 %v23222_v4, 16 }
 0x371   : > { %v11806_v22 = vshrl.u32 %v23222_v4, 16  ;;  %17322 = vmatmul.mubr.msk.bf16.gmra.mxu0 %vm830_vm3, %v15794_v56  ;;  %v23245_v10 = vadd.f32 %v22987_v32, %v8361_v27  ;;  %v11795_v42 = vrot.slane %v11793_v37, 4  ;;  %v11812_v9 = vshll.u32 %v23231_v59, 16  ;;  %v23250_v18 = vpop.f32.mrf.mxu1  ;;  %v15772_v4 = vld [vmem:[%s19775_s14 + $0x9c] sm:$0xf]  ;;  %v25530_v37 = vld [vmem:[#allocation50_spill] sm:$0xff] }
 0x372   : > { %v11776_v16 = vrot.slane %v11775_v60, 4  ;;  %v23248_v7 = vpop.f32.mrf.mxu0  ;;  %v11786_v49 = vrot.slane %v11785_v13, 4  ;;  %v11798_v12 = vrot.slane %v11796_v57, 5  ;;  %v11804_v28 = vrot.slane %v11802_v43, 5  ;;  %v25529_v60 = vld [vmem:[#allocation25_spill] sm:$0xff]  ;;  %v25531_v59 = vld [vmem:[#allocation27_spill] sm:$0xff] }
 0x373   : > { %25528 = vst [vmem:[#allocation14_spill] sm:$0xff] %v23245_v10  ;;  %v11808_v31 = vrot.slane %v11806_v22, 4  ;;  %17296 = vmatmul.mubr.msk.bf16.gmra.mxu1 %vm830_vm3, %v17672_v63  ;;  %v11814_v56 = vrot.slane %v11812_v9, 5  ;;  %v8359_v27 = vadd.f32 %v22871_v36, %v25529_v60  ;;  %v8362_v10 = vadd.f32 %v25531_v59, %v25530_v37  ;;  %v23263_v57 = vpop.f32.mrf.mxu1  ;;  %v23270_v9 = vld [vmem:[%s19775_s14 + $0xa0] sm:$0xf] }
 0x374   : > { %v11781_v32 = vsel %vm17904_vm4, %v11776_v16, %v11780_v1  ;;  %17299 = vmatprep.mubr.msk.bf16.mxu1 %vm830_vm3, %v17673_v50  ;;  %v23261_v13 = vpop.f32.mrf.mxu0  ;;  %v11791_v43 = vsel %vm17904_vm4, %v11786_v49, %v11790_v6  ;;  %v11799_v63 = vor.u32 %v11798_v12, %v11795_v42  ;;  %v25532_v1 = vld [vmem:[#allocation53_spill] sm:$0xff]  ;;  %25533 = vst [vmem:[#allocation7_spill] sm:$0xff] %v23270_v9  ;;  %v23273_v36 = vld [vmem:[%s19775_s14 + $0xa4] sm:$0x1]  ;;  %v11817_v37 = vshrl.u32 %v15772_v4, 16 }
 0x375   : > { %v11809_v22 = vor.u32 %v11808_v31, %v11804_v28  ;;  %v8360_v16 = vadd.f32 %v22899_v21, %v25532_v1  ;;  %25534 = vst [vmem:[#allocation3_spill] sm:$0xff] %v23273_v36  ;;  %v15795_v59 = vcombine.low %v11781_v32, %v11791_v43  ;;  %v23276_v50 = vadd.f32 %v23002_v26, %v8359_v27  ;;  %v23283_v42 = vpop.f32.mrf.mxu1  ;;  %v17674_v32 = vld [vmem:[%s19775_s14 + $0xc0] sm:$0xff]   ;;  %v15775_v43 = vld [vmem:[%s19775_s14 + $0xa8] sm:$0xf] }
 0x376   : > { %v23279_v60 = vadd.f32 %v23015_v52, %v8362_v10  ;;  %v23281_v6 = vpop.f32.mrf.mxu0  ;;  %25537 = vst [vmem:[#allocation47_spill] sm:$0xff] %v23283_v42  ;;  %v11800_v49 = vrot.slane %v11799_v63, 4  ;;  %v11820_v31 = vshll.u32 %v15772_v4, 16  ;;  %v11819_v26 = vrot.slane %v11817_v37, 4  ;;  %v23305_v37 = vld [vmem:[%s19775_s14 + $0xac] sm:$0xf] }
 0x377   : > { %25535 = vst [vmem:[#allocation20_spill] sm:$0xff] %v23276_v50  ;;  %v11810_v12 = vrot.slane %v11809_v22, 4  ;;  %v23286_v21 = vadd.f32 %v23028_v44, %v8360_v16  ;;  %17325 = vmatprep.mubr.msk.bf16.mxu0 %vm830_vm3, %v15795_v59  ;;  %v11826_v52 = vshll.u32 %v23270_v9, 16  ;;  %v11830_v10 = vshrl.u32 %v23270_v9, 16  ;;  %v23296_v63 = vpop.f32.mrf.mxu1  ;;  %v25540_v16 = vld [vmem:[#allocation52_spill] sm:$0xff]  ;;  %25541 = vst [vmem:[#allocation46_spill] sm:$0xff] %v23305_v37 }
 0x378   : > { %25536 = vst [vmem:[#allocation19_spill] sm:$0xff] %v23279_v60  ;;  %v11836_v27 = vshll.u32 %v23273_v36, 16  ;;  %v23294_v1 = vpop.f32.mrf.mxu0  ;;  %25539 = vst [vmem:[#allocation9_spill] sm:$0xff] %v23296_v63  ;;  %v11805_v44 = vsel %vm17904_vm4, %v11800_v49, %v11804_v28  ;;  %v11822_v22 = vrot.slane %v11820_v31, 5  ;;  %v8365_v59 = vadd.f32 %v22933_v51, %v25540_v16  ;;  %v23308_v9 = vld [vmem:[%s19775_s14 + $0xb0] sm:$0x1] }
 0x379   : > { %25538 = vst [vmem:[#allocation60_spill] sm:$0xff] %v23286_v21  ;;  %v11815_v4 = vsel %vm17904_vm4, %v11810_v12, %v11814_v56  ;;  %25542 = vst [vmem:[#allocation48_spill] sm:$0xff] %v23308_v9  ;;  %v11828_v21 = vrot.slane %v11826_v52, 5  ;;  %v11832_v60 = vrot.slane %v11830_v10, 4  ;;  %v23312_v63 = vpop.f32.mrf.mxu1  ;;  %v11841_v49 = vshrl.u32 %v15775_v43, 16 }
 0x37a   : > { %v15796_v36 = vcombine.low %v11805_v44, %v11815_v4  ;;  %v11838_v50 = vrot.slane %v11836_v27, 5  ;;  %v23310_v42 = vpop.f32.mrf.mxu0  ;;  %v11823_v28 = vor.u32 %v11822_v22, %v11819_v26  ;;  %v23315_v56 = vadd.f32 %v23051_v23, %v8365_v59 }
 0x37b   : > { %v11844_v12 = vshll.u32 %v15775_v43, 16  ;;  %17300 = vmatmul.mubr.msk.bf16.gmra.mxu1 %vm830_vm3, %v17674_v32  ;;  %v11833_v51 = vor.u32 %v11832_v60, %v11828_v21  ;;  %v11850_v31 = vshll.u32 %v23305_v37, 16  ;;  %v11854_v52 = vshrl.u32 %v23305_v37, 16  ;;  %v23324_v26 = vpop.f32.mrf.mxu1  ;;  %v25544_v43 = vld [vmem:[#allocation11_spill] sm:$0xff] }
 0x37c   : > { %25543 = vst [vmem:[#allocation49_spill] sm:$0xff] %v23315_v56  ;;  %17326 = vmatmul.mubr.msk.bf16.gmra.mxu0 %vm830_vm3, %v15796_v36  ;;  %v11860_v10 = vshll.u32 %v23308_v9, 16  ;;  %v23322_v27 = vpop.f32.mrf.mxu0  ;;  %v11824_v23 = vrot.slane %v11823_v28, 4  ;;  %v11843_v44 = vrot.slane %v11841_v49, 4  ;;  %v8363_v32 = vadd.f32 %v22963_v11, %v25544_v43  ;;  %v15778_v36 = vld [vmem:[%s19775_s14 + $0xb4] sm:$0xf] }
 0x37d   : > { %v11846_v4 = vrot.slane %v11844_v12, 5  ;;  %v11834_v60 = vrot.slane %v11833_v51, 4  ;;  %v11852_v22 = vrot.slane %v11850_v31, 5  ;;  %v11856_v16 = vrot.slane %v11854_v52, 4  ;;  %v23331_v9 = vpop.f32.mrf.mxu1  ;;  %v25547_v12 = vld [vmem:[#allocation56_spill] sm:$0xff]  ;;  %v25549_v52 = vld [vmem:[#allocation57_spill] sm:$0xff] }
 0x37e   : > { %v11862_v59 = vrot.slane %v11860_v10, 5  ;;  %v23329_v37 = vpop.f32.mrf.mxu0  ;;  %25545 = vst [vmem:[#allocation10_spill] sm:$0xff] %v23331_v9  ;;  %v11829_v56 = vsel %vm17904_vm4, %v11824_v23, %v11828_v21  ;;  %v23336_v49 = vadd.f32 %v23065_v17, %v8363_v32  ;;  %v8366_v11 = vadd.f32 %v22995_v5, %v25547_v12  ;;  %v23341_v43 = vld [vmem:[%s19775_s14 + $0xb8] sm:$0xf]  ;;  %v23348_v9 = vld [vmem:[%s19775_s14 + $0xbc] sm:$0x1] }
 0x37f   : > { %v11847_v28 = vor.u32 %v11846_v4, %v11843_v44  ;;  %25548 = vst [vmem:[#allocation50_spill] sm:$0xff] %v23341_v43  ;;  %v11839_v51 = vsel %vm17904_vm4, %v11834_v60, %v11838_v50  ;;  %v11857_v31 = vor.u32 %v11856_v16, %v11852_v22  ;;  %v8364_v10 = vadd.f32 %v23023_v48, %v25549_v52  ;;  %v23352_v44 = vpop.f32.mrf.mxu1  ;;  %v15781_v12 = vld [vmem:[%s19775_s14 + $0xc0] sm:$0xf] }
 0x380   : > { %25546 = vst [vmem:[#allocation25_spill] sm:$0xff] %v23336_v49  ;;  %25550 = vst [vmem:[#allocation27_spill] sm:$0xff] %v23348_v9  ;;  %v11865_v21 = vshrl.u32 %v15778_v36, 16  ;;  %v23350_v23 = vpop.f32.mrf.mxu0  ;;  %v15797_v17 = vcombine.low %v11829_v56, %v11839_v51  ;;  %v23355_v5 = vadd.f32 %v23079_v8, %v8366_v11  ;;  %v11868_v32 = vshll.u32 %v15778_v36, 16  ;;  %v23372_v11 = vld [vmem:[%s19775_s14 + $0xc4] sm:$0xf] }
 0x381   : > { %v11848_v4 = vrot.slane %v11847_v28, 4  ;;  %v11858_v50 = vrot.slane %v11857_v31, 4  ;;  %v23359_v60 = vadd.f32 %v23096_v55, %v8364_v10  ;;  %v11874_v16 = vshll.u32 %v23341_v43, 16  ;;  %v23364_v49 = vpop.f32.mrf.mxu1  ;;  %25553 = vst [vmem:[#allocation11_spill] sm:$0xff] %v23372_v11  ;;  %v25554_v31 = vld [vmem:[#allocation58_spill] sm:$0xff] }
 0x382   : > { %25551 = vst [vmem:[#allocation53_spill] sm:$0xff] %v23355_v5  ;;  %v11867_v48 = vrot.slane %v11865_v21, 4  ;;  %v23362_v52 = vpop.f32.mrf.mxu0  ;;  %17329 = vmatprep.mubr.msk.bf16.mxu0 %vm830_vm3, %v15797_v17  ;;  %v11870_v56 = vrot.slane %v11868_v32, 5  ;;  %v11878_v36 = vshrl.u32 %v23341_v43, 16  ;;  %v11884_v28 = vshll.u32 %v23348_v9, 16 }
 0x383   : > { %25552 = vst [vmem:[#allocation52_spill] sm:$0xff] %v23359_v60  ;;  %v11853_v8 = vsel %vm17904_vm4, %v11848_v4, %v11852_v22  ;;  %v11863_v55 = vsel %vm17904_vm4, %v11858_v50, %v11862_v59  ;;  %v11876_v51 = vrot.slane %v11874_v16, 5  ;;  %v8369_v10 = vadd.f32 %v23041_v19, %v25554_v31  ;;  %v23379_v21 = vld [vmem:[%s19775_s14 + $0xc8] sm:$0x1]  ;;  %v23383_v22 = vpop.f32.mrf.mxu1 }
 0x384   : > { %25555 = vst [vmem:[#allocation56_spill] sm:$0xff] %v23379_v21  ;;  %v11889_v17 = vshrl.u32 %v15781_v12, 16  ;;  %v23381_v60 = vpop.f32.mrf.mxu0  ;;  %25557 = vst [vmem:[#allocation58_spill] sm:$0xff] %v23383_v22  ;;  %v15798_v4 = vcombine.low %v11853_v8, %v11863_v55  ;;  %v11871_v32 = vor.u32 %v11870_v56, %v11867_v48  ;;  %v11880_v43 = vrot.slane %v11878_v36, 4 }
 0x385   : > { %25556 = vst [vmem:[#allocation57_spill] sm:$0xff] %v23381_v60  ;;  %v11886_v9 = vrot.slane %v11884_v28, 5  ;;  %v23386_v5 = vadd.f32 %v23127_v41, %v8369_v10  ;;  %v11892_v50 = vshll.u32 %v15781_v12, 16  ;;  %v11898_v16 = vshll.u32 %v23372_v11, 16  ;;  %v23391_v31 = vpop.f32.mrf.mxu1  ;;  %v25559_v41 = vld [vmem:[#allocation26_spill] sm:$0xff] }
 0x386   : > { %v11891_v59 = vrot.slane %v11889_v17, 4  ;;  %v23389_v19 = vpop.f32.mrf.mxu0  ;;  %17330 = vmatmul.mubr.msk.bf16.gmra.mxu0 %vm830_vm3, %v15798_v4  ;;  %v11872_v60 = vrot.slane %v11871_v32, 4  ;;  %v11881_v22 = vor.u32 %v11880_v43, %v11876_v51  ;;  %v11902_v48 = vshrl.u32 %v23372_v11, 16  ;;  %v25560_v12 = vld [vmem:[#allocation62_spill] sm:$0xff]  ;;  %v15817_v10 = vld [vmem:[%s19775_s14 + $0xc] sm:$0xe] }
 0x387   : > { %25558 = vst [vmem:[#allocation66_spill] sm:$0xff] %v23386_v5  ;;  %v11908_v8 = vshll.u32 %v23379_v21, 16  ;;  %v11894_v56 = vrot.slane %v11892_v50, 5  ;;  %v11900_v36 = vrot.slane %v11898_v16, 5  ;;  %v8367_v28 = vadd.f32 %v23075_v53, %v25559_v41  ;;  %v23403_v5 = vpop.f32.mrf.mxu1  ;;  %v25562_v41 = vld [vmem:[#allocation21_spill] sm:$0xff] }
 0x388   : > { %v8370_v55 = vadd.f32 %v23098_v2, %v25560_v12  ;;  %v23401_v17 = vpop.f32.mrf.mxu0  ;;  %v11877_v43 = vsel %vm17904_vm4, %v11872_v60, %v11876_v51  ;;  %v11882_v4 = vrot.slane %v11881_v22, 4  ;;  %v11904_v32 = vrot.slane %v11902_v48, 4  ;;  %v17712_v48 = vld [vmem:[%s19775_s14 + $0x10] sm:$0xf] }
 0x389   : > { %v11910_v50 = vrot.slane %v11908_v8, 5  ;;  %v11895_v16 = vor.u32 %v11894_v56, %v11891_v59  ;;  %v23408_v53 = vadd.f32 %v23136_v40, %v8367_v28  ;;  %v8368_v12 = vadd.f32 %v23129_v29, %v25562_v41  ;;  %v23417_v11 = vpop.f32.mrf.mxu1  ;;  %v15818_v40 = vld [vmem:[%s19775_s14 + $0x18] sm:$0xe]  ;;  %v17713_v28 = vld [vmem:[%s19775_s14 + $0x14] sm:$0x1] }
 0x38a   : > { %v23411_v2 = vadd.f32 %v23150_v0, %v8370_v55  ;;  %v23415_v21 = vpop.f32.mrf.mxu0  ;;  %v11887_v60 = vsel %vm17904_vm4, %v11882_v4, %v11886_v9  ;;  %v11905_v51 = vor.u32 %v11904_v32, %v11900_v36  ;;  %v15833_v22 = vrot.slane %v15817_v10, 9  ;;  %v25565_v32 = vld [vmem:[#allocation64_spill] sm:$0xff] }
 0x38b   : > { %v12272_v59 = vrot.slane %v17712_v48, 5  ;;  %v15799_v8 = vcombine.low %v11877_v43, %v11887_v60  ;;  %v11896_v56 = vrot.slane %v11895_v16, 4  ;;  %v23424_v0 = vadd.f32 %v23161_v15, %v8368_v12  ;;  %v23429_v41 = vpop.f32.mrf.mxu1  ;;  %v17714_v12 = vld [vmem:[%s19775_s14 + $0x1c] sm:$0xf]  ;;  %v25566_v48 = vld [vmem:[#allocation23_spill] sm:$0xff] }
 0x38c   : > { %25561 = vst [vmem:[#allocation26_spill] sm:$0xff] %v23411_v2  ;;  %v12275_v29 = vrot.slane %v17713_v28, 5  ;;  %v23427_v55 = vpop.f32.mrf.mxu0  ;;  %v11906_v2 = vrot.slane %v11905_v51, 4  ;;  %v9537_v43 = vadd.f32 %v23152_v3, %v25565_v32  ;;  %v15834_v16 = vrot.slane %v15818_v40, 9  ;;  %v15819_v40 = vld [vmem:[%s19775_s14 + $0x24] sm:$0xe] }
 0x38d   : > { %25563 = vst [vmem:[#allocation62_spill] sm:$0xff] %v23424_v0  ;;  %v12273_v10 = vsel %vm18183_vm7, %v15833_v22, %v12272_v59  ;;  %v12274_v4 = vrot.slane %v12272_v59, 4  ;;  %17333 = vmatprep.mubr.msk.bf16.mxu0 %vm830_vm3, %v15799_v8  ;;  %v11901_v15 = vsel %vm17904_vm4, %v11896_v56, %v11900_v36  ;;  %v12279_v60 = vrot.slane %v17714_v12, 5  ;;  %v23442_v51 = vpop.f32.mrf.mxu1  ;;  %v17675_v59 = vld [vmem:[%s19775_s14 + $0x18] sm:$0xff]  }
 0x38e   : > { %v12282_v28 = vrot.slane %v25566_v48, 5  ;;  %v23440_v0 = vpop.f32.mrf.mxu0  ;;  %v11911_v22 = vsel %vm17904_vm4, %v11906_v2, %v11910_v50  ;;  %v23450_v8 = vadd.f32 %v23174_v20, %v9537_v43  ;;  %v13566_v36 = vsel %vm879_vm0, %v22918_v46, 0 }
 0x38f   : > { %v12276_v3 = vsel %vm18183_vm7, %v12274_v4, %v12275_v29  ;;  %v15800_v56 = vcombine.low %v11901_v15, %v11911_v22  ;;  %v12280_v12 = vsel %vm18183_vm7, %v15834_v16, %v12279_v60  ;;  %v12281_v48 = vrot.slane %v12279_v60, 4  ;;  %v23459_v50 = vpop.f32.mrf.mxu1  ;;  %v25568_v15 = vld [vmem:[#allocation65_spill] sm:$0xff] }
 0x390   : > { %v15850_v32 = vcombine.low %v12273_v10, %v12276_v3  ;;  %v23457_v61 = vpop.f32.mrf.mxu0  ;;  %v9535_v2 = vadd.f32 %v23163_v34, %v22894_v47  ;;  %v14036_v20 = vsel %vm879_vm0, %v22958_v58, 0  ;;  %v9538_v46 = vadd.f32 %v23176_v45, %v22909_v38  ;;  %v15820_v10 = vld [vmem:[%s19775_s14 + $0x30] sm:$0xe]  ;;  %v25567_v47 = vld [vmem:[#allocation63_spill] sm:$0xff] }
 0x391   : > { %v9536_v29 = vadd.f32 %v23195_v25, %v22924_v33  ;;  %17334 = vmatmul.mubr.msk.bf16.gmra.mxu0 %vm830_vm3, %v15800_v56  ;;  %v12283_v4 = vsel %vm18183_vm7, %v12281_v48, %v12282_v28  ;;  %v15835_v43 = vrot.slane %v15819_v40, 9  ;;  %v12286_v34 = vrot.slane %v25567_v47, 5  ;;  %v23478_v38 = vpop.f32.mrf.mxu1  ;;  %v15821_v28 = vld [vmem:[%s19775_s14 + $0x3c] sm:$0xe]  ;;  %v25571_v48 = vld [vmem:[#allocation22_spill] sm:$0xff]  ;;  %v25574_v47 = vld [vmem:[#allocation28_spill] sm:$0xff] }
 0x392   : > { %17339 = vmatprep.mubr.msk.bf16.mxu1 %vm830_vm3, %v15850_v32  ;;  %v12289_v58 = vrot.slane %v25568_v15, 5  ;;  %v23476_v16 = vpop.f32.mrf.mxu0  ;;  %17373 = vmatprep.mubr.msk.bf16.mxu0 %vm830_vm3, %v17675_v59  ;;  %v15851_v33 = vcombine.low %v12280_v12, %v12283_v4  ;;  %v23482_v45 = vadd.f32 %v23193_v62, %v9535_v2  ;;  %v23485_v25 = vadd.f32 %v23207_v39, %v9538_v46  ;;  %v25569_v40 = vld [vmem:[#allocation29_spill] sm:$0xff]  ;;  %v25570_v39 = vld [vmem:[#allocation8_spill] sm:$0xff]  ;;  %v25572_v2 = vld [vmem:[#allocation55_spill] sm:$0xff] }
 0x393   : > { %v23488_v60 = vadd.f32 %v23224_v30, %v9536_v29  ;;  %v12287_v22 = vsel %vm18183_vm7, %v15835_v43, %v12286_v34  ;;  %v12288_v3 = vrot.slane %v12286_v34, 4  ;;  %v9541_v59 = vadd.f32 %v23209_v54, %v25569_v40  ;;  %v25573_v29 = vld [vmem:[#allocation6_spill] sm:$0xff] }
 0x394   : > { %v15836_v56 = vrot.slane %v15820_v10, 9  ;;  %v23495_v32 = vpop.f32.mrf.mxu0  ;;  %v23497_v62 = vpop.f32.mrf.mxu1  ;;  %17340 = vmatmul.mubr.msk.bf16.vlgmr.msra.gmra.mxu1 %vm830_vm3, %v15851_v33  ;;  %v12293_v30 = vrot.slane %v25570_v39, 5  ;;  %v12296_v12 = vrot.slane %v22946_v24, 5  ;;  %v9539_v46 = vadd.f32 %v25572_v2, %v25571_v48  ;;  %v17676_v43 = vld [vmem:[%s19775_s14 + $0x24] sm:$0xff]  }
 0x395   : > { %v9542_v4 = vadd.f32 %v23239_v14, %v25573_v29  ;;  %17406 = vmatpush3.bf16.msra.mxu1 %v13566_v36  ;;  %v12290_v54 = vsel %vm18183_vm7, %v12288_v3, %v12289_v58  ;;  %v23510_v10 = vadd.f32 %v23237_v35, %v9541_v59  ;;  %v9540_v34 = vadd.f32 %v23250_v18, %v25574_v47  ;;  %v15822_v33 = vld [vmem:[%s19775_s14 + $0x48] sm:$0xe]  ;;  %v17677_v14 = vld [vmem:[%s19775_s14 + $0x30] sm:$0xff]   ;;  %v25577_v59 = vld [vmem:[#allocation5_spill] sm:$0xff] }
 0x396   : > { %v15837_v15 = vrot.slane %v15821_v28, 9  ;;  %v23515_v24 = vpop.f32.mrf.mxu0  ;;  %v23517_v40 = vpop.f32.mrf.mxu1  ;;  %v15852_v39 = vcombine.low %v12287_v22, %v12290_v54  ;;  %v12294_v36 = vsel %vm18183_vm7, %v15836_v56, %v12293_v30  ;;  %v12295_v48 = vrot.slane %v12293_v30, 4  ;;  %v25576_v28 = vld [vmem:[#allocation12_spill] sm:$0xff] }
 0x397   : > { %v23523_v58 = vadd.f32 %v23248_v7, %v9539_v46  ;;  %v23526_v35 = vadd.f32 %v23261_v13, %v9542_v4  ;;  %v23529_v18 = vadd.f32 %v23281_v6, %v9540_v34  ;;  %v12300_v3 = vrot.slane %v25576_v28, 5  ;;  %v25578_v56 = vld [vmem:[#allocation4_spill] sm:$0xff]  ;;  %v25579_v46 = vld [vmem:[#allocation51_spill] sm:$0xff]  ;;  %v25580_v28 = vld [vmem:[#allocation13_spill] sm:$0xff] }
 0x398   : > { %v12303_v2 = vrot.slane %v25577_v59, 5  ;;  %v23533_v22 = vpop.f32.mrf.mxu0  ;;  %v23535_v29 = vpop.f32.mrf.mxu1  ;;  %17343 = vmatprep.mubr.msk.bf16.mxu1 %vm830_vm3, %v15852_v39  ;;  %v12297_v7 = vsel %vm18183_vm7, %v12295_v48, %v12296_v12  ;;  %v9545_v13 = vadd.f32 %v23263_v57, %v25578_v56  ;;  %v15838_v30 = vrot.slane %v15822_v33, 9  ;;  %v15823_v4 = vld [vmem:[%s19775_s14 + $0x54] sm:$0xe]  ;;  %v25585_v56 = vld [vmem:[#allocation9_spill] sm:$0xff] }
 0x399   : > { %25575 = vst [vmem:[#allocation21_spill] sm:$0xff] %v23529_v18  ;;  %v12307_v6 = vrot.slane %v25579_v46, 5  ;;  %17374 = vmatmul.mubr.msk.bf16.vlgmr.msra.gmra.mxu0 %vm830_vm3, %v17676_v43  ;;  %v15853_v54 = vcombine.low %v12294_v36, %v12297_v7  ;;  %v12301_v47 = vsel %vm18183_vm7, %v15837_v15, %v12300_v3  ;;  %v12302_v34 = vrot.slane %v12300_v3, 4  ;;  %v25582_v36 = vld [vmem:[#allocation30_spill] sm:$0xff]  ;;  %v25583_v15 = vld [vmem:[#allocation47_spill] sm:$0xff]  ;;  %v25584_v7 = vld [vmem:[#allocation33_spill] sm:$0xff] }
 0x39a   : > { %v12310_v39 = vrot.slane %v25580_v28, 5  ;;  %v23548_v59 = vpop.f32.mrf.mxu0  ;;  %v23550_v12 = vpop.f32.mrf.mxu1  ;;  %17440 = vmatpush3.bf16.msra.mxu0 %v14036_v20  ;;  %17377 = vmatprep.mubr.msk.bf16.mxu0 %vm830_vm3, %v17677_v14  ;;  %v23554_v57 = vadd.f32 %v23294_v1, %v9545_v13  ;;  %v9543_v48 = vadd.f32 %v25583_v15, %v25582_v36  ;;  %v9546_v46 = vadd.f32 %v25585_v56, %v25584_v7  ;;  %v25586_v20 = vld [vmem:[#allocation17_spill] sm:$0xff]  ;;  %v15824_v13 = vld [vmem:[%s19775_s14 + $0x60] sm:$0xe]  ;;  %v25588_v36 = vld [vmem:[#allocation31_spill] sm:$0xff] }
 0x39b   : > { %v12308_v43 = vsel %vm18183_vm7, %v15838_v30, %v12307_v6  ;;  %v12309_v33 = vrot.slane %v12307_v6, 4  ;;  %v12304_v3 = vsel %vm18183_vm7, %v12302_v34, %v12303_v2  ;;  %v9544_v14 = vadd.f32 %v23312_v63, %v25586_v20  ;;  %v17678_v7 = vld [vmem:[%s19775_s14 + $0x3c] sm:$0xff]  }
 0x39c   : > { %25581 = vst [vmem:[#allocation15_spill] sm:$0xff] %v23554_v57  ;;  %v15839_v1 = vrot.slane %v15823_v4, 9  ;;  %v23567_v28 = vpop.f32.mrf.mxu0  ;;  %v23569_v30 = vpop.f32.mrf.mxu1  ;;  %17344 = vmatmul.mubr.msk.bf16.gmra.mxu1 %vm830_vm3, %v15853_v54  ;;  %v15854_v6 = vcombine.low %v12301_v47, %v12304_v3  ;;  %v23575_v34 = vadd.f32 %v23310_v42, %v9543_v48  ;;  %v12314_v15 = vrot.slane %v25588_v36, 5  ;;  %v25591_v20 = vld [vmem:[#allocation54_spill] sm:$0xff]  ;;  %v15825_v54 = vld [vmem:[%s19775_s14 + $0x6c] sm:$0xe] }
 0x39d   : > { %v12311_v2 = vsel %vm18183_vm7, %v12309_v33, %v12310_v39  ;;  %v23580_v4 = vadd.f32 %v23322_v27, %v9546_v46  ;;  %v23583_v56 = vadd.f32 %v23329_v37, %v9544_v14  ;;  %v12317_v57 = vrot.slane %v25591_v20, 5  ;;  %v17679_v42 = vld [vmem:[%s19775_s14 + $0x48] sm:$0xff]   ;;  %v25592_v27 = vld [vmem:[#allocation34_spill] sm:$0xff]  ;;  %v25593_v48 = vld [vmem:[#allocation32_spill] sm:$0xff] }
 0x39e   : > { %25587 = vst [vmem:[#allocation64_spill] sm:$0xff] %v23575_v34  ;;  %v15855_v63 = vcombine.low %v12308_v43, %v12311_v2  ;;  %v23587_v47 = vpop.f32.mrf.mxu0  ;;  %v23589_v3 = vpop.f32.mrf.mxu1  ;;  %17347 = vmatprep.mubr.msk.bf16.mxu1 %vm830_vm3, %v15854_v6  ;;  %v12315_v39 = vsel %vm18183_vm7, %v15839_v1, %v12314_v15  ;;  %v12316_v43 = vrot.slane %v12314_v15, 4  ;;  %v9549_v33 = vadd.f32 %v23324_v26, %v25592_v27  ;;  %v25594_v14 = vld [vmem:[#allocation36_spill] sm:$0xff]  ;;  %v25595_v36 = vld [vmem:[#allocation38_spill] sm:$0xff] }
 0x39f   : > { %25589 = vst [vmem:[#allocation23_spill] sm:$0xff] %v23580_v4  ;;  %25590 = vst [vmem:[#allocation63_spill] sm:$0xff] %v23583_v56  ;;  %v15840_v37 = vrot.slane %v15824_v13, 9  ;;  %v12321_v46 = vrot.slane %v25593_v48, 5  ;;  %v12324_v2 = vrot.slane %v25594_v14, 5  ;;  %v25596_v20 = vld [vmem:[#allocation10_spill] sm:$0xff] }
 0x3a0   : > { %v9547_v56 = vadd.f32 %v25596_v20, %v25595_v36  ;;  %v25597_v4 = vld [vmem:[#allocation39_spill] sm:$0xff]  ;;  %v23603_v34 = vpop.f32.mrf.mxu0  ;;  %v23605_v18 = vpop.f32.mrf.mxu1  ;;  %v12318_v1 = vsel %vm18183_vm7, %v12316_v43, %v12317_v57  ;;  %v23610_v26 = vadd.f32 %v23350_v23, %v9549_v33  ;;  %v25599_v13 = vld [vmem:[#allocation41_spill] sm:$0xff]  ;;  %v15841_v27 = vrot.slane %v15825_v54, 9 }
 0x3a1   : > { %v9550_v6 = vadd.f32 %v23352_v44, %v25597_v4  ;;  %v9548_v15 = vadd.f32 %v23364_v49, %v25599_v13  ;;  %v15826_v48 = vld [vmem:[%s19775_s14 + $0x78] sm:$0xe]  ;;  %17378 = vmatmul.mubr.msk.bf16.gmra.mxu0 %vm830_vm3, %v17678_v7  ;;  %v15856_v14 = vcombine.low %v12315_v39, %v12318_v1  ;;  %v23618_v44 = vsel %vm18183_vm7, %v15840_v37, %v12321_v46  ;;  %v25604_v39 = vld [vmem:[#allocation35_spill] sm:$0xff]  ;;  %v25608_v13 = vld [vmem:[#allocation16_spill] sm:$0xff] }
 0x3a2   : > { %25598 = vst [vmem:[#allocation65_spill] sm:$0xff] %v23610_v26  ;;  %v12323_v4 = vrot.slane %v12321_v46, 4  ;;  %v23621_v36 = vadd.f32 %v23362_v52, %v9547_v56  ;;  %v23623_v57 = vpop.f32.mrf.mxu0  ;;  %v23625_v23 = vpop.f32.mrf.mxu1  ;;  %17381 = vmatprep.mubr.msk.bf16.mxu0 %vm830_vm3, %v17679_v42  ;;  %v25601_v49 = vld [vmem:[#allocation57_spill] sm:$0xff]  ;;  %v12328_v43 = vrot.slane %v25604_v39, 5  ;;  %v25605_v33 = vld [vmem:[#allocation59_spill] sm:$0xff]  ;;  %v25606_v56 = vld [vmem:[#allocation40_spill] sm:$0xff] }
 0x3a3   : > { %v23629_v54 = vadd.f32 %v25601_v49, %v9550_v6  ;;  %v23632_v7 = vadd.f32 %v23389_v19, %v9548_v15  ;;  %v12331_v37 = vrot.slane %v25605_v33, 5  ;;  %v25607_v46 = vld [vmem:[#allocation58_spill] sm:$0xff]  ;;  %v15842_v1 = vrot.slane %v15826_v48, 9  ;;  %v17680_v48 = vld [vmem:[%s19775_s14 + $0x54] sm:$0xff]  }
 0x3a4   : > { %25600 = vst [vmem:[#allocation29_spill] sm:$0xff] %v23621_v36  ;;  %v12325_v52 = vsel %vm18183_vm7, %v12323_v4, %v12324_v2  ;;  %v9553_v20 = vadd.f32 %v25607_v46, %v25606_v56  ;;  %v12335_v42 = vrot.slane %v25608_v13, 5  ;;  %v15827_v36 = vld [vmem:[%s19775_s14 + $0x84] sm:$0xe]  ;;  %v23642_v6 = vpop.f32.mrf.mxu0  ;;  %v23644_v49 = vpop.f32.mrf.mxu1  ;;  %17348 = vmatmul.mubr.msk.bf16.gmra.mxu1 %vm830_vm3, %v15855_v63  ;;  %v12329_v15 = vsel %vm18183_vm7, %v15841_v27, %v12328_v43  ;;  %v25609_v4 = vld [vmem:[#allocation37_spill] sm:$0xff]  ;;  %v25612_v13 = vld [vmem:[#allocation24_spill] sm:$0xff] }
 0x3a5   : > { %25602 = vst [vmem:[#allocation8_spill] sm:$0xff] %v23629_v54  ;;  %25603 = vst [vmem:[#allocation22_spill] sm:$0xff] %v23632_v7  ;;  %v15857_v19 = vcombine.low %v23618_v44, %v12325_v52  ;;  %v12330_v2 = vrot.slane %v12328_v43, 4  ;;  %v12338_v39 = vrot.slane %v25609_v4, 5  ;;  %17351 = vmatprep.mubr.msk.bf16.mxu1 %vm830_vm3, %v15856_v14  ;;  %v25611_v46 = vld [vmem:[#allocation42_spill] sm:$0xff]  ;;  %v15843_v4 = vrot.slane %v15827_v36, 9 }
 0x3a6   : > { %v23654_v33 = vadd.f32 %v23401_v17, %v9553_v20  ;;  %v23658_v56 = vsel %vm18183_vm7, %v15842_v1, %v12335_v42  ;;  %v12337_v63 = vrot.slane %v12335_v42, 4  ;;  %v9551_v44 = vadd.f32 %v23391_v31, %v25611_v46  ;;  %v23662_v52 = vpop.f32.mrf.mxu0  ;;  %v23664_v27 = vpop.f32.mrf.mxu1  ;;  %v17681_v43 = vld [vmem:[%s19775_s14 + $0x60] sm:$0xff]   ;;  %v25613_v20 = vld [vmem:[#allocation44_spill] sm:$0xff]  ;;  %v25615_v7 = vld [vmem:[#allocation43_spill] sm:$0xff] }
 0x3a7   : > { %v12332_v14 = vsel %vm18183_vm7, %v12330_v2, %v12331_v37  ;;  %v9554_v17 = vadd.f32 %v23403_v5, %v25612_v13  ;;  %v9552_v1 = vadd.f32 %v23417_v11, %v25613_v20  ;;  %v15828_v42 = vld [vmem:[%s19775_s14 + $0x90] sm:$0xe]  ;;  %v12342_v54 = vrot.slane %v25615_v7, 5  ;;  %v25621_v20 = vld [vmem:[#allocation61_spill] sm:$0xff]  ;;  %v15830_v5 = vld [vmem:[%s19775_s14 + $0xa8] sm:$0xe] }
 0x3a8   : > { %25610 = vst [vmem:[#allocation55_spill] sm:$0xff] %v23654_v33  ;;  %v15858_v33 = vcombine.low %v12329_v15, %v12332_v14  ;;  %v23676_v31 = vsel %vm18183_vm7, %v12337_v63, %v12338_v39  ;;  %v23679_v46 = vadd.f32 %v23415_v21, %v9551_v44  ;;  %v23684_v37 = vpop.f32.mrf.mxu1  ;;  %v25618_v15 = vld [vmem:[#allocation18_spill] sm:$0xff]  ;;  %v15829_v39 = vld [vmem:[%s19775_s14 + $0x9c] sm:$0xe]  ;;  %v15844_v14 = vrot.slane %v15828_v42, 9 }
 0x3a9   : > { %v23682_v26 = vpop.f32.mrf.mxu0  ;;  %v23689_v11 = vadd.f32 %v23427_v55, %v9554_v17  ;;  %v23692_v36 = vadd.f32 %v23440_v0, %v9552_v1  ;;  %v12345_v2 = vrot.slane %v25618_v15, 5  ;;  %17382 = vmatmul.mubr.msk.bf16.gmra.mxu0 %vm830_vm3, %v17680_v48  ;;  %v23699_v21 = vsel %vm18183_vm7, %v15843_v4, %v12342_v54  ;;  %v25619_v63 = vld [vmem:[#allocation14_spill] sm:$0xff]  ;;  %v25620_v0 = vld [vmem:[#allocation45_spill] sm:$0xff]  ;;  %v25622_v1 = vld [vmem:[#allocation20_spill] sm:$0xff] }
 0x3aa   : > { %25614 = vst [vmem:[#allocation6_spill] sm:$0xff] %v23679_v46  ;;  %v12344_v7 = vrot.slane %v12342_v54, 4  ;;  %v9557_v44 = vadd.f32 %v23429_v41, %v25619_v63  ;;  %v23705_v13 = vpop.f32.mrf.mxu1  ;;  %17385 = vmatprep.mubr.msk.bf16.mxu0 %vm830_vm3, %v17681_v43  ;;  %v12349_v17 = vrot.slane %v25620_v0, 5  ;;  %v12352_v48 = vrot.slane %v25621_v20, 5  ;;  %v25623_v15 = vld [vmem:[#allocation19_spill] sm:$0xff]  ;;  %v25625_v63 = vld [vmem:[#allocation60_spill] sm:$0xff] }
 0x3ab   : > { %25616 = vst [vmem:[#allocation28_spill] sm:$0xff] %v23689_v11  ;;  %25617 = vst [vmem:[#allocation12_spill] sm:$0xff] %v23692_v36  ;;  %v23703_v55 = vpop.f32.mrf.mxu0  ;;  %v9555_v4 = vadd.f32 %v23442_v51, %v25622_v1  ;;  %v9558_v54 = vadd.f32 %v23459_v50, %v25623_v15  ;;  %v9556_v43 = vadd.f32 %v23478_v38, %v25625_v63  ;;  %v15845_v0 = vrot.slane %v15829_v39, 9 }
 0x3ac   : > { %v23716_v41 = vsel %vm18183_vm7, %v12344_v7, %v12345_v2  ;;  %v23719_v42 = vadd.f32 %v23457_v61, %v9557_v44  ;;  %v23726_v36 = vpop.f32.mrf.mxu1  ;;  %17352 = vmatmul.mubr.msk.bf16.gmra.mxu1 %vm830_vm3, %v15857_v19  ;;  %v23733_v50 = vsel %vm18183_vm7, %v15844_v14, %v12349_v17  ;;  %v12351_v61 = vrot.slane %v12349_v17, 4  ;;  %v17682_v2 = vld [vmem:[%s19775_s14 + $0x6c] sm:$0xff]   ;;  %v17683_v17 = vld [vmem:[%s19775_s14 + $0x78] sm:$0xff]  }
 0x3ad   : > { %v23724_v20 = vpop.f32.mrf.mxu0  ;;  %v15860_v51 = vcombine.low %v23699_v21, %v23716_v41  ;;  %v23736_v38 = vadd.f32 %v23476_v16, %v9555_v4  ;;  %17355 = vmatprep.mubr.msk.bf16.mxu1 %vm830_vm3, %v15858_v33  ;;  %v23741_v39 = vadd.f32 %v23495_v32, %v9558_v54  ;;  %v23744_v19 = vadd.f32 %v23515_v24, %v9556_v43  ;;  %v25629_v7 = vld [vmem:[#allocation7_spill] sm:$0xff]  ;;  %v25631_v33 = vld [vmem:[#allocation49_spill] sm:$0xff]  ;;  %v25632_v54 = vld [vmem:[#allocation46_spill] sm:$0xff] }
 0x3ae   : > { %25624 = vst [vmem:[#allocation5_spill] sm:$0xff] %v23719_v42  ;;  %v12356_v21 = vrot.slane %v25629_v7, 5  ;;  %v25630_v44 = vld [vmem:[#allocation3_spill] sm:$0xff]  ;;  %v23750_v15 = vpop.f32.mrf.mxu1  ;;  %v23755_v16 = vsel %vm18183_vm7, %v12351_v61, %v12352_v48  ;;  %v9561_v32 = vadd.f32 %v23497_v62, %v25631_v33  ;;  %v15846_v4 = vrot.slane %v15830_v5, 9  ;;  %v15831_v41 = vld [vmem:[%s19775_s14 + $0xb4] sm:$0xe] }
 0x3af   : > { %25626 = vst [vmem:[#allocation4_spill] sm:$0xff] %v23736_v38  ;;  %25627 = vst [vmem:[#allocation51_spill] sm:$0xff] %v23741_v39  ;;  %v12359_v1 = vrot.slane %v25630_v44, 5  ;;  %v23748_v14 = vpop.f32.mrf.mxu0  ;;  %v12363_v24 = vrot.slane %v25632_v54, 5  ;;  %v25633_v44 = vld [vmem:[#allocation48_spill] sm:$0xff]  ;;  %v25635_v54 = vld [vmem:[#allocation25_spill] sm:$0xff] }
 0x3b0   : > { %25628 = vst [vmem:[#allocation13_spill] sm:$0xff] %v23744_v19  ;;  %v23765_v43 = vsel %vm18183_vm7, %v15845_v0, %v12356_v21  ;;  %v12358_v7 = vrot.slane %v12356_v21, 4  ;;  %v12366_v19 = vrot.slane %v25633_v44, 5  ;;  %v23770_v61 = vpop.f32.mrf.mxu1  ;;  %v23773_v62 = vadd.f32 %v23533_v22, %v9561_v32  ;;  %v25636_v21 = vld [vmem:[#allocation53_spill] sm:$0xff]  ;;  %v25637_v22 = vld [vmem:[#allocation52_spill] sm:$0xff] }
 0x3b1   : > { %v23768_v48 = vpop.f32.mrf.mxu0  ;;  %v23777_v5 = vsel %vm18183_vm7, %v15846_v4, %v12363_v24  ;;  %v12365_v33 = vrot.slane %v12363_v24, 4  ;;  %v9559_v63 = vadd.f32 %v23517_v40, %v25635_v54  ;;  %17386 = vmatmul.mubr.msk.bf16.gmra.mxu0 %vm830_vm3, %v17682_v2  ;;  %v9562_v44 = vadd.f32 %v23535_v29, %v25636_v21  ;;  %v15832_v4 = vld [vmem:[%s19775_s14 + $0xc0] sm:$0xe]  ;;  %v25642_v54 = vld [vmem:[#allocation27_spill] sm:$0xff] }
 0x3b2   : > { %25634 = vst [vmem:[#allocation30_spill] sm:$0xff] %v23773_v62  ;;  %v23784_v0 = vsel %vm18183_vm7, %v12358_v7, %v12359_v1  ;;  %v9560_v32 = vadd.f32 %v23550_v12, %v25637_v22  ;;  %v15847_v62 = vrot.slane %v15831_v41, 9  ;;  %v23793_v24 = vpop.f32.mrf.mxu1  ;;  %17389 = vmatprep.mubr.msk.bf16.mxu0 %vm830_vm3, %v17683_v17  ;;  %v25639_v12 = vld [vmem:[#allocation50_spill] sm:$0xff]  ;;  %v12373_v21 = vrot.slane %v25642_v54, 5  ;;  %v15947_v22 = vld [vmem:[%s19775_s14 + $0x18] sm:$0xf] }
 0x3b3   : > { %v23791_v39 = vpop.f32.mrf.mxu0  ;;  %v23800_v2 = vsel %vm18183_vm7, %v12365_v33, %v12366_v19  ;;  %v23803_v29 = vadd.f32 %v23548_v59, %v9559_v63  ;;  %v12370_v1 = vrot.slane %v25639_v12, 5  ;;  %v23809_v7 = vadd.f32 %v23567_v28, %v9562_v44  ;;  %v25644_v33 = vld [vmem:[#allocation66_spill] sm:$0xff]  ;;  %v25645_v54 = vld [vmem:[#allocation11_spill] sm:$0xff] }
 0x3b4   : > { %v23812_v17 = vadd.f32 %v23587_v47, %v9560_v32  ;;  %v25643_v59 = vcombine.low %v23658_v56, %v23676_v31  ;;  %v9565_v47 = vadd.f32 %v23569_v30, %v25644_v33  ;;  %v15848_v44 = vrot.slane %v15832_v4, 9  ;;  %v17684_v12 = vld [vmem:[%s19775_s14 + $0x84] sm:$0xff]   ;;  %v25646_v31 = vld [vmem:[#allocation56_spill] sm:$0xff] }
 0x3b5   : > { %25638 = vst [vmem:[#allocation47_spill] sm:$0xff] %v23803_v29  ;;  %25640 = vst [vmem:[#allocation33_spill] sm:$0xff] %v23809_v7  ;;  %v23816_v19 = vpop.f32.mrf.mxu0  ;;  %v23824_v63 = vsel %vm18183_vm7, %v15847_v62, %v12370_v1  ;;  %v12372_v28 = vrot.slane %v12370_v1, 4  ;;  %v23828_v32 = vpop.f32.mrf.mxu1  ;;  %v12377_v56 = vrot.slane %v25645_v54, 5  ;;  %v9563_v62 = vadd.f32 %v23589_v3, %v23408_v53  ;;  %v25647_v41 = vld [vmem:[#allocation26_spill] sm:$0xff]  ;;  %v17685_v30 = vld [vmem:[%s19775_s14 + $0x90] sm:$0xff]  }
 0x3b6   : > { %25641 = vst [vmem:[#allocation9_spill] sm:$0xff] %v23812_v17  ;;  %17356 = vmatmul.mubr.msk.bf16.gmra.mxu1 %vm830_vm3, %v25643_v59  ;;  %v12380_v59 = vrot.slane %v25646_v31, 5  ;;  %v9566_v1 = vadd.f32 %v23605_v18, %v25647_v41  ;;  %v25649_v33 = vld [vmem:[#allocation62_spill] sm:$0xff]  ;;  %v15948_v31 = vld [vmem:[%s19775_s14 + $0x1c] sm:$0xf]  ;;  %v13084_v7 = vshrl.u32 %v15947_v22, 16 }
 0x3b7   : > { %17359 = vmatprep.mubr.msk.bf16.mxu1 %vm830_vm3, %v15860_v51  ;;  %v23838_v40 = vpop.f32.mrf.mxu0  ;;  %v23843_v4 = vsel %vm18183_vm7, %v12372_v28, %v12373_v21  ;;  %v23846_v51 = vadd.f32 %v23603_v34, %v9565_v47  ;;  %v9564_v54 = vadd.f32 %v23625_v23, %v25649_v33  ;;  %v15949_v17 = vld [vmem:[%s19775_s14 + $0x20] sm:$0x1]  ;;  %v23852_v53 = vpop.f32.mrf.mxu1  ;;  %v23858_v3 = vsel %vm18183_vm7, %v15848_v44, %v12377_v56  ;;  %v16028_v21 = vld [vmem:[%s19775_s14 + $0x18] sm:$0xe] }
 0x3b8   : > { %v12379_v41 = vrot.slane %v12377_v56, 4  ;;  %v23861_v34 = vadd.f32 %v23623_v57, %v9563_v62  ;;  %v23867_v23 = vadd.f32 %v23642_v6, %v9566_v1  ;;  %v13086_v33 = vrot.slane %v13084_v7, 4 }
 0x3b9   : > { %25648 = vst [vmem:[#allocation17_spill] sm:$0xff] %v23846_v51  ;;  %v23864_v28 = vpop.f32.mrf.mxu0  ;;  %v23870_v47 = vadd.f32 %v23662_v52, %v9564_v54  ;;  %v13087_v18 = vshll.u32 %v15947_v22, 16  ;;  %17390 = vmatmul.mubr.msk.bf16.gmra.mxu0 %vm830_vm3, %v17684_v12  ;;  %v13093_v57 = vshll.u32 %v15948_v31, 16  ;;  %v13097_v56 = vshrl.u32 %v15948_v31, 16  ;;  %v15951_v12 = vld [vmem:[%s19775_s14 + $0x28] sm:$0xf]  ;;  %v23884_v1 = vpop.f32.mrf.mxu1 }
 0x3ba   : > { %25650 = vst [vmem:[#allocation31_spill] sm:$0xff] %v23861_v34  ;;  %25651 = vst [vmem:[#allocation54_spill] sm:$0xff] %v23867_v23  ;;  %v23875_v44 = vsel %vm18183_vm7, %v12379_v41, %v12380_v59  ;;  %v13103_v62 = vshll.u32 %v15949_v17, 16  ;;  %v15950_v34 = vld [vmem:[%s19775_s14 + $0x24] sm:$0xf]  ;;  %17393 = vmatprep.mubr.msk.bf16.mxu0 %vm830_vm3, %v17685_v30  ;;  %v16044_v7 = vrot.slane %v16028_v21, 9  ;;  %v25653_v30 = vcombine.low %v23733_v50, %v23755_v16 }
 0x3bb   : > { %25652 = vst [vmem:[#allocation34_spill] sm:$0xff] %v23870_v47  ;;  %v23878_v51 = vpop.f32.mrf.mxu0  ;;  %v13089_v52 = vrot.slane %v13087_v18, 5  ;;  %v13827_v22 = vrot.slane %v15948_v31, 5  ;;  %v13095_v59 = vrot.slane %v13093_v57, 5  ;;  %v13099_v54 = vrot.slane %v13097_v56, 4  ;;  %v17686_v57 = vld [vmem:[%s19775_s14 + $0x9c] sm:$0xff]  }
 0x3bc   : > { %v13105_v41 = vrot.slane %v13103_v62, 5  ;;  %v13830_v47 = vrot.slane %v15949_v17, 5  ;;  %v10621_v21 = vadd.f32 %v23644_v49, %v23450_v8  ;;  %v25654_v17 = vcombine.low %v23765_v43, %v23784_v0  ;;  %v15952_v50 = vld [vmem:[%s19775_s14 + $0x2c] sm:$0x1]  ;;  %v16029_v43 = vld [vmem:[%s19775_s14 + $0x24] sm:$0xe]  ;;  %v23915_v0 = vpop.f32.mrf.mxu1 }
 0x3bd   : > { %v23886_v23 = vpop.f32.mrf.mxu0  ;;  %v13090_v6 = vor.u32 %v13089_v52, %v13086_v33  ;;  %v23894_v31 = vsel %vm18183_vm7, %v16044_v7, %v13827_v22  ;;  %v13829_v18 = vrot.slane %v13827_v22, 4  ;;  %v13100_v56 = vor.u32 %v13099_v54, %v13095_v59  ;;  %v17687_v7 = vld [vmem:[%s19775_s14 + $0xa8] sm:$0xff]  }
 0x3be   : > { %17360 = vmatmul.mubr.msk.bf16.gmra.mxu1 %vm830_vm3, %v25653_v30  ;;  %v13108_v16 = vshrl.u32 %v15950_v34, 16  ;;  %v13111_v62 = vshll.u32 %v15950_v34, 16  ;;  %v13117_v33 = vshll.u32 %v15951_v12, 16  ;;  %v23912_v8 = vadd.f32 %v23682_v26, %v10621_v21 }
 0x3bf   : > { %17363 = vmatprep.mubr.msk.bf16.mxu1 %vm830_vm3, %v25654_v17  ;;  %v23904_v52 = vpop.f32.mrf.mxu0  ;;  %v13091_v30 = vrot.slane %v13090_v6, 4  ;;  %v23909_v22 = vsel %vm18183_vm7, %v13829_v18, %v13830_v47  ;;  %v13121_v49 = vshrl.u32 %v15951_v12, 16  ;;  %v13101_v54 = vrot.slane %v13100_v56, 4  ;;  %v15953_v56 = vld [vmem:[%s19775_s14 + $0x30] sm:$0xf] }
 0x3c0   : > { %25655 = vst [vmem:[#allocation32_spill] sm:$0xff] %v23912_v8  ;;  %v16061_v34 = vcombine.low %v23894_v31, %v23909_v22  ;;  %v13110_v17 = vrot.slane %v13108_v16, 4  ;;  %v13113_v29 = vrot.slane %v13111_v62, 5  ;;  %v13119_v42 = vrot.slane %v13117_v33, 5  ;;  %v15961_v22 = vld [vmem:[%s19775_s14 + $0x50] sm:$0x1] }
 0x3c1   : > { %v13096_v6 = vsel %vm17904_vm4, %v13091_v30, %v13095_v59  ;;  %v13123_v47 = vrot.slane %v13121_v49, 4  ;;  %v13127_v18 = vshll.u32 %v15952_v50, 16  ;;  %17394 = vmatmul.mubr.msk.bf16.gmra.mxu0 %vm830_vm3, %v17686_v57  ;;  %v13106_v26 = vsel %vm17904_vm4, %v13101_v54, %v13105_v41 }
 0x3c2   : > { %v13114_v21 = vor.u32 %v13113_v29, %v13110_v17  ;;  %v16045_v8 = vrot.slane %v16029_v43, 9  ;;  %v13834_v11 = vrot.slane %v15951_v12, 5  ;;  %v23925_v46 = vpop.f32.mrf.mxu0  ;;  %17397 = vmatprep.mubr.msk.bf16.mxu0 %vm830_vm3, %v17687_v7  ;;  %v23928_v16 = vcombine.low %v13096_v6, %v13106_v26  ;;  %v17689_v6 = vld [vmem:[%s19775_s14 + $0xc0] sm:$0xff]  }
 0x3c3   : > { %v13124_v59 = vor.u32 %v13123_v47, %v13119_v42  ;;  %v13129_v62 = vrot.slane %v13127_v18, 5  ;;  %v13837_v33 = vrot.slane %v15952_v50, 5  ;;  %v23930_v30 = vpop.f32.mrf.mxu1  ;;  %v10619_v41 = vadd.f32 %v23664_v27, %v23482_v45  ;;  %v17688_v45 = vld [vmem:[%s19775_s14 + $0xb4] sm:$0xff]  }
 0x3c4   : > { %v13115_v57 = vrot.slane %v13114_v21, 4  ;;  %v23934_v29 = vsel %vm18183_vm7, %v16045_v8, %v13834_v11  ;;  %v13836_v12 = vrot.slane %v13834_v11, 4  ;;  %v23938_v7 = vpop.f32.mrf.mxu0  ;;  %v25657_v49 = vcombine.low %v23777_v5, %v23800_v2  ;;  %v15954_v11 = vld [vmem:[%s19775_s14 + $0x34] sm:$0xf] }
 0x3c5   : > { %v13125_v50 = vrot.slane %v13124_v59, 4  ;;  %v10622_v43 = vadd.f32 %v23684_v37, %v23485_v25  ;;  %v10620_v8 = vadd.f32 %v23705_v13, %v23488_v60  ;;  %v13132_v54 = vshrl.u32 %v15953_v56, 16  ;;  %v23949_v17 = vpop.f32.mrf.mxu1  ;;  %v15955_v60 = vld [vmem:[%s19775_s14 + $0x38] sm:$0x1]  ;;  %v16030_v13 = vld [vmem:[%s19775_s14 + $0x30] sm:$0xe] }
 0x3c6   : > { %17364 = vmatmul.mubr.msk.bf16.gmra.mxu1 %vm830_vm3, %v25657_v49  ;;  %v25658_v27 = vcombine.low %v23824_v63, %v23843_v4  ;;  %v13120_v5 = vsel %vm17904_vm4, %v13115_v57, %v13119_v42  ;;  %v23960_v2 = vsel %vm18183_vm7, %v13836_v12, %v13837_v33  ;;  %v23963_v25 = vadd.f32 %v23703_v55, %v10619_v41  ;;  %v15956_v12 = vld [vmem:[%s19775_s14 + $0x3c] sm:$0xf] }
 0x3c7   : > { %v13135_v37 = vshll.u32 %v15953_v56, 16  ;;  %v13130_v63 = vsel %vm17904_vm4, %v13125_v50, %v13129_v62  ;;  %v23973_v42 = vadd.f32 %v23724_v20, %v10622_v43  ;;  %v23976_v47 = vadd.f32 %v23748_v14, %v10620_v8  ;;  %v23980_v56 = vpop.f32.mrf.mxu0  ;;  %v23983_v41 = vpop.f32.mrf.mxu1  ;;  %v15957_v43 = vld [vmem:[%s19775_s14 + $0x40] sm:$0xf] }
 0x3c8   : > { %17367 = vmatprep.mubr.msk.bf16.mxu1 %vm830_vm3, %v25658_v27  ;;  %v23978_v18 = vcombine.low %v13120_v5, %v13130_v63  ;;  %v13134_v55 = vrot.slane %v13132_v54, 4  ;;  %v13141_v21 = vshll.u32 %v15954_v11, 16  ;;  %v13145_v59 = vshrl.u32 %v15954_v11, 16 }
 0x3c9   : > { %v13137_v26 = vrot.slane %v13135_v37, 5  ;;  %v13151_v33 = vshll.u32 %v15955_v60, 16  ;;  %v16046_v62 = vrot.slane %v16030_v13, 9  ;;  %v13841_v57 = vrot.slane %v15954_v11, 5  ;;  %17398 = vmatmul.mubr.msk.bf16.gmra.mxu0 %vm830_vm3, %v17688_v45 }
 0x3ca   : > { %v13143_v14 = vrot.slane %v13141_v21, 5  ;;  %v13844_v49 = vrot.slane %v15955_v60, 5  ;;  %v10625_v50 = vadd.f32 %v23726_v36, %v23510_v10  ;;  %17401 = vmatprep.mubr.msk.bf16.mxu0 %vm830_vm3, %v17689_v6  ;;  %v13147_v8 = vrot.slane %v13145_v59, 4  ;;  %v15958_v60 = vld [vmem:[%s19775_s14 + $0x44] sm:$0x1]  ;;  %v23998_v10 = vpop.f32.mrf.mxu0  ;;  %v17690_v59 = vld [vmem:[%s19775_s14 + $0xcc] sm:$0xff]  }
 0x3cb   : > { %v13138_v20 = vor.u32 %v13137_v26, %v13134_v55  ;;  %v13153_v54 = vrot.slane %v13151_v33, 5  ;;  %v23992_v11 = vsel %vm18183_vm7, %v16046_v62, %v13841_v57  ;;  %v13843_v27 = vrot.slane %v13841_v57, 4  ;;  %v16031_v21 = vld [vmem:[%s19775_s14 + $0x3c] sm:$0xe] }
 0x3cc   : > { %v23995_v45 = vadd.f32 %v23768_v48, %v10625_v50  ;;  %v13156_v37 = vshrl.u32 %v15956_v12, 16  ;;  %v13159_v13 = vshll.u32 %v15956_v12, 16  ;;  %v25659_v36 = vcombine.low %v23858_v3, %v23875_v44  ;;  %v24009_v48 = vpop.f32.mrf.mxu1 }
 0x3cd   : > { %v13139_v5 = vrot.slane %v13138_v20, 4  ;;  %v13148_v6 = vor.u32 %v13147_v8, %v13143_v14  ;;  %v24006_v63 = vsel %vm18183_vm7, %v13843_v27, %v13844_v49  ;;  %v13165_v55 = vshll.u32 %v15957_v43, 16 }
 0x3ce   : > { %17368 = vmatmul.mubr.msk.bf16.gmra.mxu1 %vm830_vm3, %v25659_v36  ;;  %v13169_v26 = vshrl.u32 %v15957_v43, 16  ;;  %v16063_v3 = vcombine.low %v23992_v11, %v24006_v63  ;;  %v13158_v44 = vrot.slane %v13156_v37, 4  ;;  %v13161_v62 = vrot.slane %v13159_v13, 5  ;;  %v15959_v13 = vld [vmem:[%s19775_s14 + $0x48] sm:$0xf] }
 0x3cf   : > { %17407 = vmatprep.mubr.msk.bf16.mxu1 %vm830_vm3, %v23928_v16  ;;  %v13144_v33 = vsel %vm17904_vm4, %v13139_v5, %v13143_v14  ;;  %v13149_v57 = vrot.slane %v13148_v6, 4  ;;  %v13167_v12 = vrot.slane %v13165_v55, 5  ;;  %v13175_v49 = vshll.u32 %v15958_v60, 16 }
 0x3d0   : > { %v13171_v20 = vrot.slane %v13169_v26, 4  ;;  %v13162_v50 = vor.u32 %v13161_v62, %v13158_v44  ;;  %v16047_v8 = vrot.slane %v16031_v21, 9  ;;  %v13848_v27 = vrot.slane %v15957_v43, 5  ;;  %v24018_v4 = vpop.f32.mrf.mxu0  ;;  %v24025_v6 = vpop.f32.mrf.mxu1  ;;  %v15960_v44 = vld [vmem:[%s19775_s14 + $0x4c] sm:$0xf] }
 0x3d1   : > { %v13851_v36 = vrot.slane %v15958_v60, 5  ;;  %v13154_v16 = vsel %vm17904_vm4, %v13149_v57, %v13153_v54  ;;  %v13177_v5 = vrot.slane %v13175_v49, 5  ;;  %v10623_v37 = vadd.f32 %v23750_v15, %v23523_v58  ;;  %17402 = vmatmul.mubr.msk.bf16.gmra.mxu0 %vm830_vm3, %v17690_v59  ;;  %v25660_v59 = vld [vmem:[#allocation21_spill] sm:$0xff] }
 0x3d2   : > { %v13172_v14 = vor.u32 %v13171_v20, %v13167_v12  ;;  %v15998_v55 = vcombine.low %v13144_v33, %v13154_v16  ;;  %v13163_v43 = vrot.slane %v13162_v50, 4  ;;  %v24030_v60 = vsel %vm18183_vm7, %v16047_v8, %v13848_v27  ;;  %v24032_v26 = vpop.f32.mrf.mxu0  ;;  %17441 = vmatprep.mubr.msk.bf16.mxu0 %vm830_vm3, %v16061_v34  ;;  %v24046_v62 = vpop.f32.mrf.mxu1  ;;  %v16032_v20 = vld [vmem:[%s19775_s14 + $0x48] sm:$0xe] }
 0x3d3   : > { %v13850_v54 = vrot.slane %v13848_v27, 4  ;;  %v24039_v15 = vadd.f32 %v23791_v39, %v10623_v37  ;;  %v10626_v21 = vadd.f32 %v23770_v61, %v23526_v35  ;;  %v10624_v33 = vadd.f32 %v23793_v24, %v25660_v59  ;;  %v15962_v37 = vld [vmem:[%s19775_s14 + $0x54] sm:$0xf] }
 0x3d4   : > { %v13173_v58 = vrot.slane %v13172_v14, 4  ;;  %v13168_v57 = vsel %vm17904_vm4, %v13163_v43, %v13167_v12  ;;  %v13180_v34 = vshrl.u32 %v15959_v13, 16  ;;  %v13183_v39 = vshll.u32 %v15959_v13, 16 }
 0x3d5   : > { %v24052_v31 = vsel %vm18183_vm7, %v13850_v54, %v13851_v36  ;;  %v24063_v24 = vadd.f32 %v23816_v19, %v10626_v21  ;;  %v24066_v12 = vadd.f32 %v23838_v40, %v10624_v33  ;;  %v13189_v27 = vshll.u32 %v15960_v44, 16  ;;  %v24072_v19 = vpop.f32.mrf.mxu1  ;;  %v25661_v54 = vld [vmem:[#allocation15_spill] sm:$0xff] }
 0x3d6   : > { %17408 = vmatmul.mubr.msk.bf16.vlgmr.msra.gmra.mxu1 %vm830_vm3, %v23978_v18  ;;  %v13178_v35 = vsel %vm17904_vm4, %v13173_v58, %v13177_v5  ;;  %v16064_v61 = vcombine.low %v24030_v60, %v24052_v31  ;;  %v13182_v50 = vrot.slane %v13180_v34, 4  ;;  %v13185_v8 = vrot.slane %v13183_v39, 5  ;;  %v24069_v18 = vpop.f32.mrf.mxu0  ;;  %v15963_v58 = vld [vmem:[%s19775_s14 + $0x58] sm:$0xf] }
 0x3d7   : > { %17411 = vmatprep.mubr.msk.bf16.mxu1 %vm830_vm3, %v15998_v55  ;;  %v15999_v49 = vcombine.low %v13168_v57, %v13178_v35  ;;  %v13193_v36 = vshrl.u32 %v15960_v44, 16  ;;  %v13199_v16 = vshll.u32 %v15961_v22, 16  ;;  %v16048_v14 = vrot.slane %v16032_v20, 9 }
 0x3d8   : > { %v13855_v5 = vrot.slane %v15960_v44, 5  ;;  %v13186_v13 = vor.u32 %v13185_v8, %v13182_v50  ;;  %v13191_v40 = vrot.slane %v13189_v27, 5  ;;  %v13858_v43 = vrot.slane %v15961_v22, 5  ;;  %v15964_v22 = vld [vmem:[%s19775_s14 + $0x5c] sm:$0x1]  ;;  %v24087_v35 = vpop.f32.mrf.mxu0 }
 0x3d9   : > { %v10629_v55 = vadd.f32 %v23828_v32, %v25661_v54  ;;  %v13195_v21 = vrot.slane %v13193_v36, 4  ;;  %v13201_v59 = vrot.slane %v13199_v16, 5  ;;  %v25662_v44 = vcombine.low %v23934_v29, %v23960_v2  ;;  %v16033_v27 = vld [vmem:[%s19775_s14 + $0x54] sm:$0xe]  ;;  %v24096_v36 = vpop.f32.mrf.mxu1 }
 0x3da   : > { %v13856_v33 = vsel %vm18183_vm7, %v16048_v14, %v13855_v5  ;;  %v13857_v57 = vrot.slane %v13855_v5, 4  ;;  %v13187_v34 = vrot.slane %v13186_v13, 4  ;;  %v13204_v20 = vshrl.u32 %v15962_v37, 16 }
 0x3db   : > { %17442 = vmatmul.mubr.msk.bf16.vlgmr.msra.gmra.mxu0 %vm830_vm3, %v25662_v44  ;;  %v24084_v39 = vadd.f32 %v23864_v28, %v10629_v55  ;;  %v13207_v32 = vshll.u32 %v15962_v37, 16  ;;  %v13196_v50 = vor.u32 %v13195_v21, %v13191_v40  ;;  %v13213_v2 = vshll.u32 %v15963_v58, 16  ;;  %v25663_v44 = vld [vmem:[#allocation64_spill] sm:$0xff] }
 0x3dc   : > { %17445 = vmatprep.mubr.msk.bf16.mxu0 %vm830_vm3, %v16063_v3  ;;  %v13859_v29 = vsel %vm18183_vm7, %v13857_v57, %v13858_v43  ;;  %v13217_v8 = vshrl.u32 %v15963_v58, 16  ;;  %v13192_v28 = vsel %vm17904_vm4, %v13187_v34, %v13191_v40  ;;  %v13206_v14 = vrot.slane %v13204_v20, 4 }
 0x3dd   : > { %v16065_v16 = vcombine.low %v13856_v33, %v13859_v29  ;;  %v13209_v5 = vrot.slane %v13207_v32, 5  ;;  %v13197_v11 = vrot.slane %v13196_v50, 4  ;;  %v13215_v63 = vrot.slane %v13213_v2, 5 }
 0x3de   : > { %17412 = vmatmul.mubr.msk.bf16.gmra.mxu1 %vm830_vm3, %v15999_v49  ;;  %v13219_v3 = vrot.slane %v13217_v8, 4  ;;  %v13223_v37 = vshll.u32 %v15964_v22, 16  ;;  %v16049_v43 = vrot.slane %v16033_v27, 9  ;;  %v13862_v54 = vrot.slane %v15963_v58, 5  ;;  %v24101_v21 = vpop.f32.mrf.mxu0  ;;  %v15965_v49 = vld [vmem:[%s19775_s14 + $0x60] sm:$0xf] }
 0x3df   : > { %v13210_v13 = vor.u32 %v13209_v5, %v13206_v14  ;;  %v13865_v55 = vrot.slane %v15964_v22, 5  ;;  %v13202_v40 = vsel %vm17904_vm4, %v13197_v11, %v13201_v59  ;;  %v10627_v34 = vadd.f32 %v23852_v53, %v25663_v44  ;;  %v24108_v20 = vpop.f32.mrf.mxu1  ;;  %v25664_v8 = vld [vmem:[#allocation23_spill] sm:$0xff]  ;;  %v15966_v5 = vld [vmem:[%s19775_s14 + $0x64] sm:$0xf] }
 0x3e0   : > { %v13220_v33 = vor.u32 %v13219_v3, %v13215_v63  ;;  %v13225_v57 = vrot.slane %v13223_v37, 5  ;;  %v16000_v32 = vcombine.low %v13192_v28, %v13202_v40  ;;  %v13863_v58 = vsel %vm18183_vm7, %v16049_v43, %v13862_v54  ;;  %v24112_v29 = vpop.f32.mrf.mxu0  ;;  %v25665_v27 = vld [vmem:[#allocation63_spill] sm:$0xff] }
 0x3e1   : > { %v13211_v50 = vrot.slane %v13210_v13, 4  ;;  %v13864_v22 = vrot.slane %v13862_v54, 4  ;;  %v24115_v59 = vadd.f32 %v23878_v51, %v10627_v34  ;;  %v10630_v53 = vadd.f32 %v23884_v1, %v25664_v8  ;;  %v24122_v28 = vpop.f32.mrf.mxu1  ;;  %v15967_v1 = vld [vmem:[%s19775_s14 + $0x68] sm:$0x1] }
 0x3e2   : > { %v13221_v2 = vrot.slane %v13220_v33, 4  ;;  %v10628_v14 = vadd.f32 %v23915_v0, %v25665_v27  ;;  %17415 = vmatprep.mubr.msk.bf16.mxu1 %vm830_vm3, %v16000_v32  ;;  %v13228_v3 = vshrl.u32 %v15965_v49, 16  ;;  %v13231_v37 = vshll.u32 %v15965_v49, 16  ;;  %v16034_v0 = vld [vmem:[%s19775_s14 + $0x60] sm:$0xe]  ;;  %v24144_v40 = vpop.f32.mrf.mxu0 }
 0x3e3   : > { %17446 = vmatmul.mubr.msk.bf16.gmra.mxu0 %vm830_vm3, %v16064_v61  ;;  %v13216_v51 = vsel %vm17904_vm4, %v13211_v50, %v13215_v63  ;;  %v13866_v11 = vsel %vm18183_vm7, %v13864_v22, %v13865_v55  ;;  %v24139_v61 = vadd.f32 %v23886_v23, %v10630_v53  ;;  %v13237_v55 = vshll.u32 %v15966_v5, 16  ;;  %v24147_v49 = vpop.f32.mrf.mxu1  ;;  %v25668_v50 = vld [vmem:[#allocation65_spill] sm:$0xff]  ;;  %v15969_v22 = vld [vmem:[%s19775_s14 + $0x70] sm:$0xf] }
 0x3e4   : > { %17449 = vmatprep.mubr.msk.bf16.mxu0 %vm830_vm3, %v16065_v16  ;;  %v13226_v60 = vsel %vm17904_vm4, %v13221_v2, %v13225_v57  ;;  %v16066_v31 = vcombine.low %v13863_v58, %v13866_v11  ;;  %v24142_v13 = vadd.f32 %v23904_v52, %v10628_v14  ;;  %v13230_v43 = vrot.slane %v13228_v3, 4  ;;  %v15968_v57 = vld [vmem:[%s19775_s14 + $0x6c] sm:$0xf] }
 0x3e5   : > { %25666 = vst [vmem:[#allocation36_spill] sm:$0xff] %v24139_v61  ;;  %v16001_v63 = vcombine.low %v13216_v51, %v13226_v60  ;;  %v13233_v54 = vrot.slane %v13231_v37, 5  ;;  %v13241_v33 = vshrl.u32 %v15966_v5, 16  ;;  %v13247_v44 = vshll.u32 %v15967_v1, 16  ;;  %v15970_v51 = vld [vmem:[%s19775_s14 + $0x74] sm:$0x1]  ;;  %v24159_v37 = vpop.f32.mrf.mxu0 }
 0x3e6   : > { %25667 = vst [vmem:[#allocation38_spill] sm:$0xff] %v24142_v13  ;;  %v16050_v16 = vrot.slane %v16034_v0, 9  ;;  %v13869_v34 = vrot.slane %v15966_v5, 5  ;;  %v13239_v52 = vrot.slane %v13237_v55, 5  ;;  %v13872_v32 = vrot.slane %v15967_v1, 5 }
 0x3e7   : > { %17416 = vmatmul.mubr.msk.bf16.gmra.mxu1 %vm830_vm3, %v16001_v63  ;;  %v13234_v23 = vor.u32 %v13233_v54, %v13230_v43  ;;  %v10633_v58 = vadd.f32 %v23930_v30, %v25668_v50  ;;  %v13243_v2 = vrot.slane %v13241_v33, 4  ;;  %v13249_v8 = vrot.slane %v13247_v44, 5  ;;  %v16035_v63 = vld [vmem:[%s19775_s14 + $0x6c] sm:$0xe]  ;;  %v24164_v43 = vpop.f32.mrf.mxu1 }
 0x3e8   : > { %v13870_v53 = vsel %vm18183_vm7, %v16050_v16, %v13869_v34  ;;  %v13871_v27 = vrot.slane %v13869_v34, 4  ;;  %v13252_v11 = vshrl.u32 %v15968_v57, 16  ;;  %v13255_v3 = vshll.u32 %v15968_v57, 16 }
 0x3e9   : > { %v13235_v14 = vrot.slane %v13234_v23, 4  ;;  %v24156_v5 = vadd.f32 %v23925_v46, %v10633_v58  ;;  %v13244_v1 = vor.u32 %v13243_v2, %v13239_v52  ;;  %v13261_v0 = vshll.u32 %v15969_v22, 16 }
 0x3ea   : > { %v13873_v30 = vsel %vm18183_vm7, %v13871_v27, %v13872_v32  ;;  %v13265_v60 = vshrl.u32 %v15969_v22, 16  ;;  %v13254_v55 = vrot.slane %v13252_v11, 4  ;;  %v13257_v33 = vrot.slane %v13255_v3, 5  ;;  %v25670_v27 = vld [vmem:[#allocation29_spill] sm:$0xff] }
 0x3eb   : > { %25669 = vst [vmem:[#allocation10_spill] sm:$0xff] %v24156_v5  ;;  %17450 = vmatmul.mubr.msk.bf16.gmra.mxu0 %vm830_vm3, %v16066_v31  ;;  %v13240_v46 = vsel %vm17904_vm4, %v13235_v14, %v13239_v52  ;;  %v16067_v54 = vcombine.low %v13870_v53, %v13873_v30  ;;  %v13245_v44 = vrot.slane %v13244_v1, 4  ;;  %v13263_v16 = vrot.slane %v13261_v0, 5  ;;  %v15971_v11 = vld [vmem:[%s19775_s14 + $0x78] sm:$0xf] }
 0x3ec   : > { %v13267_v34 = vrot.slane %v13265_v60, 4  ;;  %v13271_v57 = vshll.u32 %v15970_v51, 16  ;;  %v13258_v23 = vor.u32 %v13257_v33, %v13254_v55  ;;  %v16051_v32 = vrot.slane %v16035_v63, 9  ;;  %v24170_v2 = vpop.f32.mrf.mxu0  ;;  %v24177_v3 = vpop.f32.mrf.mxu1  ;;  %v25672_v63 = vld [vmem:[#allocation8_spill] sm:$0xff]  ;;  %v15972_v33 = vld [vmem:[%s19775_s14 + $0x7c] sm:$0xf] }
 0x3ed   : > { %17453 = vmatprep.mubr.msk.bf16.mxu0 %vm830_vm3, %v16067_v54  ;;  %v13876_v50 = vrot.slane %v15969_v22, 5  ;;  %v13879_v58 = vrot.slane %v15970_v51, 5  ;;  %v13250_v31 = vsel %vm17904_vm4, %v13245_v44, %v13249_v8  ;;  %v10631_v14 = vadd.f32 %v23949_v17, %v25670_v27  ;;  %v25673_v54 = vld [vmem:[#allocation22_spill] sm:$0xff] }
 0x3ee   : > { %v13268_v52 = vor.u32 %v13267_v34, %v13263_v16  ;;  %v13273_v53 = vrot.slane %v13271_v57, 5  ;;  %v16002_v1 = vcombine.low %v13240_v46, %v13250_v31  ;;  %v13259_v30 = vrot.slane %v13258_v23, 4  ;;  %v24181_v0 = vpop.f32.mrf.mxu0  ;;  %v24191_v46 = vpop.f32.mrf.mxu1  ;;  %v15973_v57 = vld [vmem:[%s19775_s14 + $0x80] sm:$0x1] }
 0x3ef   : > { %v13877_v22 = vsel %vm18183_vm7, %v16051_v32, %v13876_v50  ;;  %v13878_v51 = vrot.slane %v13876_v50, 4  ;;  %v24184_v8 = vadd.f32 %v23938_v7, %v10631_v14  ;;  %v10634_v17 = vadd.f32 %v23983_v41, %v25672_v63  ;;  %v16036_v32 = vld [vmem:[%s19775_s14 + $0x78] sm:$0xe]  ;;  %v25676_v63 = vld [vmem:[#allocation55_spill] sm:$0xff] }
 0x3f0   : > { %v13269_v60 = vrot.slane %v13268_v52, 4  ;;  %v10632_v55 = vadd.f32 %v24009_v48, %v25673_v54  ;;  %17419 = vmatprep.mubr.msk.bf16.mxu1 %vm830_vm3, %v16002_v1  ;;  %v13264_v44 = vsel %vm17904_vm4, %v13259_v30, %v13263_v16  ;;  %v13276_v7 = vshrl.u32 %v15971_v11, 16  ;;  %v24208_v14 = vpop.f32.mrf.mxu0  ;;  %v15975_v54 = vld [vmem:[%s19775_s14 + $0x88] sm:$0xf] }
 0x3f1   : > { %25671 = vst [vmem:[#allocation39_spill] sm:$0xff] %v24184_v8  ;;  %v13880_v34 = vsel %vm18183_vm7, %v13878_v51, %v13879_v58  ;;  %v13279_v23 = vshll.u32 %v15971_v11, 16  ;;  %v24203_v50 = vadd.f32 %v23980_v56, %v10634_v17  ;;  %v13285_v58 = vshll.u32 %v15972_v33, 16  ;;  %v24212_v56 = vpop.f32.mrf.mxu1 }
 0x3f2   : > { %v13274_v41 = vsel %vm17904_vm4, %v13269_v60, %v13273_v53  ;;  %v16068_v48 = vcombine.low %v13877_v22, %v13880_v34  ;;  %v24206_v31 = vadd.f32 %v23998_v10, %v10632_v55  ;;  %v13278_v16 = vrot.slane %v13276_v7, 4  ;;  %v15974_v22 = vld [vmem:[%s19775_s14 + $0x84] sm:$0xf] }
 0x3f3   : > { %25674 = vst [vmem:[#allocation41_spill] sm:$0xff] %v24203_v50  ;;  %v16003_v52 = vcombine.low %v13264_v44, %v13274_v41  ;;  %v13281_v27 = vrot.slane %v13279_v23, 5  ;;  %v13289_v11 = vshrl.u32 %v15972_v33, 16  ;;  %v13295_v1 = vshll.u32 %v15973_v57, 16 }
 0x3f4   : > { %25675 = vst [vmem:[#allocation57_spill] sm:$0xff] %v24206_v31  ;;  %17454 = vmatmul.mubr.msk.bf16.gmra.mxu0 %vm830_vm3, %v16068_v48  ;;  %v16052_v30 = vrot.slane %v16036_v32, 9  ;;  %v13883_v53 = vrot.slane %v15972_v33, 5  ;;  %v13287_v51 = vrot.slane %v13285_v58, 5  ;;  %v13886_v60 = vrot.slane %v15973_v57, 5 }
 0x3f5   : > { %17420 = vmatmul.mubr.msk.bf16.gmra.mxu1 %vm830_vm3, %v16003_v52  ;;  %v13282_v10 = vor.u32 %v13281_v27, %v13278_v16  ;;  %v10637_v17 = vadd.f32 %v24025_v6, %v25676_v63  ;;  %v13291_v55 = vrot.slane %v13289_v11, 4  ;;  %v13297_v44 = vrot.slane %v13295_v1, 5  ;;  %v15976_v32 = vld [vmem:[%s19775_s14 + $0x8c] sm:$0x1]  ;;  %v24224_v52 = vpop.f32.mrf.mxu0  ;;  %v16037_v58 = vld [vmem:[%s19775_s14 + $0x84] sm:$0xe]  ;;  %v24229_v11 = vpop.f32.mrf.mxu1 }
 0x3f6   : > { %v13884_v34 = vsel %vm18183_vm7, %v16052_v30, %v13883_v53  ;;  %v13885_v7 = vrot.slane %v13883_v53, 4  ;;  %v13300_v41 = vshrl.u32 %v15974_v22, 16  ;;  %v13303_v48 = vshll.u32 %v15974_v22, 16 }
 0x3f7   : > { %v13283_v33 = vrot.slane %v13282_v10, 4  ;;  %v24221_v23 = vadd.f32 %v24018_v4, %v10637_v17  ;;  %v13292_v57 = vor.u32 %v13291_v55, %v13287_v51  ;;  %v13309_v16 = vshll.u32 %v15975_v54, 16 }
 0x3f8   : > { %v13887_v6 = vsel %vm18183_vm7, %v13885_v7, %v13886_v60  ;;  %v13313_v27 = vshrl.u32 %v15975_v54, 16  ;;  %v13302_v4 = vrot.slane %v13300_v41, 4  ;;  %v13305_v53 = vrot.slane %v13303_v48, 5  ;;  %v25678_v41 = vld [vmem:[#allocation6_spill] sm:$0xff] }
 0x3f9   : > { %25677 = vst [vmem:[#allocation35_spill] sm:$0xff] %v24221_v23  ;;  %v13288_v1 = vsel %vm17904_vm4, %v13283_v33, %v13287_v51  ;;  %v16069_v30 = vcombine.low %v13884_v34, %v13887_v6  ;;  %v13293_v10 = vrot.slane %v13292_v57, 4  ;;  %v13311_v22 = vrot.slane %v13309_v16, 5  ;;  %v15977_v57 = vld [vmem:[%s19775_s14 + $0x90] sm:$0xf] }
 0x3fa   : > { %v13315_v63 = vrot.slane %v13313_v27, 4  ;;  %v13319_v17 = vshll.u32 %v15976_v32, 16  ;;  %v13306_v55 = vor.u32 %v13305_v53, %v13302_v4  ;;  %v16053_v60 = vrot.slane %v16037_v58, 9  ;;  %v24234_v31 = vpop.f32.mrf.mxu0  ;;  %v25680_v4 = vld [vmem:[#allocation28_spill] sm:$0xff] }
 0x3fb   : > { %17457 = vmatprep.mubr.msk.bf16.mxu0 %vm830_vm3, %v16069_v30  ;;  %v13890_v7 = vrot.slane %v15975_v54, 5  ;;  %v13893_v23 = vrot.slane %v15976_v32, 5  ;;  %v13298_v51 = vsel %vm17904_vm4, %v13293_v10, %v13297_v44  ;;  %v10635_v48 = vadd.f32 %v24046_v62, %v25678_v41  ;;  %v24241_v6 = vpop.f32.mrf.mxu1  ;;  %v25681_v53 = vld [vmem:[#allocation12_spill] sm:$0xff] }
 0x3fc   : > { %v13316_v34 = vor.u32 %v13315_v63, %v13311_v22  ;;  %v13321_v33 = vrot.slane %v13319_v17, 5  ;;  %v16004_v16 = vcombine.low %v13288_v1, %v13298_v51  ;;  %v13307_v27 = vrot.slane %v13306_v55, 4  ;;  %v24245_v58 = vpop.f32.mrf.mxu0  ;;  %v15978_v63 = vld [vmem:[%s19775_s14 + $0x94] sm:$0xf]  ;;  %v16038_v51 = vld [vmem:[%s19775_s14 + $0x90] sm:$0xe] }
 0x3fd   : > { %v13891_v54 = vsel %vm18183_vm7, %v16053_v60, %v13890_v7  ;;  %v13892_v32 = vrot.slane %v13890_v7, 4  ;;  %v24248_v44 = vadd.f32 %v24032_v26, %v10635_v48  ;;  %v10638_v62 = vadd.f32 %v24072_v19, %v25680_v4  ;;  %v24255_v1 = vpop.f32.mrf.mxu1  ;;  %v15979_v60 = vld [vmem:[%s19775_s14 + $0x98] sm:$0x1] }
 0x3fe   : > { %v13317_v30 = vrot.slane %v13316_v34, 4  ;;  %v10636_v10 = vadd.f32 %v24096_v36, %v25681_v53  ;;  %17423 = vmatprep.mubr.msk.bf16.mxu1 %vm830_vm3, %v16004_v16  ;;  %v13312_v17 = vsel %vm17904_vm4, %v13307_v27, %v13311_v22  ;;  %v13324_v26 = vshrl.u32 %v15977_v57, 16 }
 0x3ff   : > { %25679 = vst [vmem:[#allocation59_spill] sm:$0xff] %v24248_v44  ;;  %v13894_v55 = vsel %vm18183_vm7, %v13892_v32, %v13893_v23  ;;  %v13327_v7 = vshll.u32 %v15977_v57, 16  ;;  %v24267_v34 = vadd.f32 %v24069_v18, %v10638_v62  ;;  %v24272_v48 = vpop.f32.mrf.mxu1  ;;  %v13333_v27 = vshll.u32 %v15978_v63, 16  ;;  %v24274_v57 = vpop.f32.mrf.mxu0  ;;  %v15980_v18 = vld [vmem:[%s19775_s14 + $0x9c] sm:$0xf] }
 0x400   : > { %v13322_v19 = vsel %vm17904_vm4, %v13317_v30, %v13321_v33  ;;  %v16070_v36 = vcombine.low %v13891_v54, %v13894_v55  ;;  %v24270_v41 = vadd.f32 %v24087_v35, %v10636_v10  ;;  %v13326_v16 = vrot.slane %v13324_v26, 4  ;;  %v25684_v10 = vld [vmem:[#allocation5_spill] sm:$0xff]  ;;  %v15981_v55 = vld [vmem:[%s19775_s14 + $0xa0] sm:$0xf] }
 0x401   : > { %25682 = vst [vmem:[#allocation40_spill] sm:$0xff] %v24267_v34  ;;  %v16005_v22 = vcombine.low %v13312_v17, %v13322_v19  ;;  %v13329_v23 = vrot.slane %v13327_v7, 5  ;;  %v13337_v32 = vshrl.u32 %v15978_v63, 16  ;;  %v13343_v33 = vshll.u32 %v15979_v60, 16  ;;  %v24278_v4 = vpop.f32.mrf.mxu1 }
 0x402   : > { %25683 = vst [vmem:[#allocation58_spill] sm:$0xff] %v24270_v41  ;;  %17458 = vmatmul.mubr.msk.bf16.gmra.mxu0 %vm830_vm3, %v16070_v36  ;;  %v16054_v54 = vrot.slane %v16038_v51, 9  ;;  %v13897_v30 = vrot.slane %v15978_v63, 5  ;;  %v13335_v62 = vrot.slane %v13333_v27, 5  ;;  %v13900_v53 = vrot.slane %v15979_v60, 5 }
 0x403   : > { %17424 = vmatmul.mubr.msk.bf16.gmra.mxu1 %vm830_vm3, %v16005_v22  ;;  %v13330_v35 = vor.u32 %v13329_v23, %v13326_v16  ;;  %v10641_v17 = vadd.f32 %v24108_v20, %v25684_v10  ;;  %v13339_v26 = vrot.slane %v13337_v32, 4  ;;  %v13345_v7 = vrot.slane %v13343_v33, 5  ;;  %v24286_v19 = vpop.f32.mrf.mxu1  ;;  %v15982_v22 = vld [vmem:[%s19775_s14 + $0xa4] sm:$0x1]  ;;  %v24292_v23 = vpop.f32.mrf.mxu0  ;;  %v16039_v10 = vld [vmem:[%s19775_s14 + $0x9c] sm:$0xe] }
 0x404   : > { %v13898_v51 = vsel %vm18183_vm7, %v16054_v54, %v13897_v30  ;;  %v13899_v63 = vrot.slane %v13897_v30, 4  ;;  %v13348_v16 = vshrl.u32 %v15980_v18, 16  ;;  %v13351_v60 = vshll.u32 %v15980_v18, 16 }
 0x405   : > { %v13331_v36 = vrot.slane %v13330_v35, 4  ;;  %v24289_v41 = vadd.f32 %v24101_v21, %v10641_v17  ;;  %v13340_v20 = vor.u32 %v13339_v26, %v13335_v62  ;;  %v13357_v32 = vshll.u32 %v15981_v55, 16  ;;  %v24297_v54 = vpop.f32.mrf.mxu1 }
 0x406   : > { %v13901_v27 = vsel %vm18183_vm7, %v13899_v63, %v13900_v53  ;;  %v13361_v33 = vshrl.u32 %v15981_v55, 16  ;;  %v13350_v21 = vrot.slane %v13348_v16, 4  ;;  %v13353_v17 = vrot.slane %v13351_v60, 5  ;;  %v25686_v16 = vld [vmem:[#allocation4_spill] sm:$0xff] }
 0x407   : > { %25685 = vst [vmem:[#allocation16_spill] sm:$0xff] %v24289_v41  ;;  %v13336_v30 = vsel %vm17904_vm4, %v13331_v36, %v13335_v62  ;;  %v16071_v35 = vcombine.low %v13898_v51, %v13901_v27  ;;  %v13341_v41 = vrot.slane %v13340_v20, 4  ;;  %v13359_v18 = vrot.slane %v13357_v32, 5  ;;  %v24301_v26 = vpop.f32.mrf.mxu1  ;;  %v24304_v5 = vpop.f32.mrf.mxu0  ;;  %v15983_v20 = vld [vmem:[%s19775_s14 + $0xa8] sm:$0xf] }
 0x408   : > { %v13363_v34 = vrot.slane %v13361_v33, 4  ;;  %v13367_v44 = vshll.u32 %v15982_v22, 16  ;;  %v13354_v53 = vor.u32 %v13353_v17, %v13350_v21  ;;  %v16055_v63 = vrot.slane %v16039_v10, 9  ;;  %v15984_v21 = vld [vmem:[%s19775_s14 + $0xac] sm:$0xf] }
 0x409   : > { %17461 = vmatprep.mubr.msk.bf16.mxu0 %vm830_vm3, %v16071_v35  ;;  %v13904_v50 = vrot.slane %v15981_v55, 5  ;;  %v13907_v8 = vrot.slane %v15982_v22, 5  ;;  %v13346_v62 = vsel %vm17904_vm4, %v13341_v41, %v13345_v7  ;;  %v10639_v60 = vadd.f32 %v24122_v28, %v25686_v16  ;;  %v24311_v27 = vpop.f32.mrf.mxu1  ;;  %v24315_v10 = vpop.f32.mrf.mxu0  ;;  %v25689_v41 = vld [vmem:[#allocation13_spill] sm:$0xff] }
 0x40a   : > { %v13364_v51 = vor.u32 %v13363_v34, %v13359_v18  ;;  %v13369_v36 = vrot.slane %v13367_v44, 5  ;;  %v16006_v32 = vcombine.low %v13336_v30, %v13346_v62  ;;  %v13355_v33 = vrot.slane %v13354_v53, 4  ;;  %v25688_v44 = vld [vmem:[#allocation51_spill] sm:$0xff]  ;;  %v15985_v53 = vld [vmem:[%s19775_s14 + $0xb0] sm:$0x1] }
 0x40b   : > { %v13905_v55 = vsel %vm18183_vm7, %v16055_v63, %v13904_v50  ;;  %v13906_v22 = vrot.slane %v13904_v50, 4  ;;  %v24318_v34 = vadd.f32 %v24112_v29, %v10639_v60  ;;  %v10642_v28 = vadd.f32 %v24147_v49, %v25688_v44  ;;  %v24325_v30 = vpop.f32.mrf.mxu1  ;;  %v16040_v62 = vld [vmem:[%s19775_s14 + $0xa8] sm:$0xe]  ;;  %v24334_v49 = vpop.f32.mrf.mxu0 }
 0x40c   : > { %v13365_v35 = vrot.slane %v13364_v51, 4  ;;  %v10640_v7 = vadd.f32 %v24164_v43, %v25689_v41  ;;  %17427 = vmatprep.mubr.msk.bf16.mxu1 %vm830_vm3, %v16006_v32  ;;  %v13360_v50 = vsel %vm17904_vm4, %v13355_v33, %v13359_v18  ;;  %v13372_v29 = vshrl.u32 %v15983_v20, 16 }
 0x40d   : > { %25687 = vst [vmem:[#allocation37_spill] sm:$0xff] %v24318_v34  ;;  %v13908_v17 = vsel %vm18183_vm7, %v13906_v22, %v13907_v8  ;;  %v13375_v63 = vshll.u32 %v15983_v20, 16  ;;  %v24339_v16 = vadd.f32 %v24144_v40, %v10642_v28  ;;  %v24344_v18 = vpop.f32.mrf.mxu1  ;;  %v13381_v33 = vshll.u32 %v15984_v21, 16  ;;  %v24348_v40 = vpop.f32.mrf.mxu0 }
 0x40e   : > { %v13370_v43 = vsel %vm17904_vm4, %v13365_v35, %v13369_v36  ;;  %v16072_v51 = vcombine.low %v13905_v55, %v13908_v17  ;;  %v24342_v60 = vadd.f32 %v24159_v37, %v10640_v7  ;;  %v13374_v32 = vrot.slane %v13372_v29, 4  ;;  %v15986_v55 = vld [vmem:[%s19775_s14 + $0xb4] sm:$0xf]  ;;  %25692 = vst [vmem:[#allocation44_spill] sm:$0xff] %v24348_v40  ;;  %v15987_v29 = vld [vmem:[%s19775_s14 + $0xb8] sm:$0xf] }
 0x40f   : > { %25690 = vst [vmem:[#allocation42_spill] sm:$0xff] %v24339_v16  ;;  %v16007_v8 = vcombine.low %v13360_v50, %v13370_v43  ;;  %v13377_v20 = vrot.slane %v13375_v63, 5  ;;  %v13385_v22 = vshrl.u32 %v15984_v21, 16  ;;  %v13391_v44 = vshll.u32 %v15985_v53, 16  ;;  %v24350_v35 = vpop.f32.mrf.mxu1  ;;  %v25693_v50 = vld [vmem:[#allocation30_spill] sm:$0xff] }
 0x410   : > { %25691 = vst [vmem:[#allocation24_spill] sm:$0xff] %v24342_v60  ;;  %17462 = vmatmul.mubr.msk.bf16.gmra.mxu0 %vm830_vm3, %v16072_v51  ;;  %v16056_v41 = vrot.slane %v16040_v62, 9  ;;  %v13911_v36 = vrot.slane %v15984_v21, 5  ;;  %v13383_v28 = vrot.slane %v13381_v33, 5  ;;  %v13914_v7 = vrot.slane %v15985_v53, 5 }
 0x411   : > { %17428 = vmatmul.mubr.msk.bf16.gmra.mxu1 %vm830_vm3, %v16007_v8  ;;  %v13378_v37 = vor.u32 %v13377_v20, %v13374_v32  ;;  %v10645_v17 = vadd.f32 %v24177_v3, %v25693_v50  ;;  %v13387_v63 = vrot.slane %v13385_v22, 4  ;;  %v13393_v43 = vrot.slane %v13391_v44, 5  ;;  %v24358_v51 = vpop.f32.mrf.mxu1  ;;  %v15988_v8 = vld [vmem:[%s19775_s14 + $0xbc] sm:$0x1]  ;;  %v16041_v44 = vld [vmem:[%s19775_s14 + $0xb4] sm:$0xe] }
 0x412   : > { %v13912_v21 = vsel %vm18183_vm7, %v16056_v41, %v13911_v36  ;;  %v13913_v62 = vrot.slane %v13911_v36, 4  ;;  %v13396_v32 = vshrl.u32 %v15986_v55, 16  ;;  %v13399_v53 = vshll.u32 %v15986_v55, 16  ;;  %v24367_v50 = vpop.f32.mrf.mxu0 }
 0x413   : > { %v13379_v60 = vrot.slane %v13378_v37, 4  ;;  %v24361_v16 = vadd.f32 %v24170_v2, %v10645_v17  ;;  %v13388_v20 = vor.u32 %v13387_v63, %v13383_v28  ;;  %v13405_v33 = vshll.u32 %v15987_v29, 16  ;;  %25695 = vst [vmem:[#allocation18_spill] sm:$0xff] %v24367_v50  ;;  %v24369_v41 = vpop.f32.mrf.mxu1 }
 0x414   : > { %v13915_v3 = vsel %vm18183_vm7, %v13913_v62, %v13914_v7  ;;  %v13409_v22 = vshrl.u32 %v15987_v29, 16  ;;  %v13398_v2 = vrot.slane %v13396_v32, 4  ;;  %v13401_v17 = vrot.slane %v13399_v53, 5  ;;  %v24373_v13 = vpop.f32.mrf.mxu0  ;;  %v25696_v32 = vld [vmem:[#allocation47_spill] sm:$0xff] }
 0x415   : > { %25694 = vst [vmem:[#allocation43_spill] sm:$0xff] %v24361_v16  ;;  %v13384_v36 = vsel %vm17904_vm4, %v13379_v60, %v13383_v28  ;;  %v16073_v37 = vcombine.low %v13912_v21, %v13915_v3  ;;  %v13389_v16 = vrot.slane %v13388_v20, 4  ;;  %v13407_v55 = vrot.slane %v13405_v33, 5  ;;  %v24375_v7 = vpop.f32.mrf.mxu1  ;;  %v15989_v20 = vld [vmem:[%s19775_s14 + $0xc0] sm:$0xf] }
 0x416   : > { %v13411_v63 = vrot.slane %v13409_v22, 4  ;;  %v13415_v34 = vshll.u32 %v15988_v8, 16  ;;  %v13402_v62 = vor.u32 %v13401_v17, %v13398_v2  ;;  %v16057_v61 = vrot.slane %v16041_v44, 9  ;;  %v24383_v3 = vpop.f32.mrf.mxu0  ;;  %v15990_v17 = vld [vmem:[%s19775_s14 + $0xc4] sm:$0xf] }
 0x417   : > { %17465 = vmatprep.mubr.msk.bf16.mxu0 %vm830_vm3, %v16073_v37  ;;  %v13918_v50 = vrot.slane %v15987_v29, 5  ;;  %v13921_v40 = vrot.slane %v15988_v8, 5  ;;  %v13394_v60 = vsel %vm17904_vm4, %v13389_v16, %v13393_v43  ;;  %v10643_v53 = vadd.f32 %v24191_v46, %v25696_v32  ;;  %v24385_v33 = vpop.f32.mrf.mxu1  ;;  %v25699_v43 = vld [vmem:[#allocation9_spill] sm:$0xff] }
 0x418   : > { %v13412_v28 = vor.u32 %v13411_v63, %v13407_v55  ;;  %v13417_v21 = vrot.slane %v13415_v34, 5  ;;  %v16008_v22 = vcombine.low %v13384_v36, %v13394_v60  ;;  %v13403_v44 = vrot.slane %v13402_v62, 4  ;;  %v25698_v34 = vld [vmem:[#allocation33_spill] sm:$0xff]  ;;  %v16042_v60 = vld [vmem:[%s19775_s14 + $0xc0] sm:$0xe] }
 0x419   : > { %v13919_v29 = vsel %vm18183_vm7, %v16057_v61, %v13918_v50  ;;  %v13920_v8 = vrot.slane %v13918_v50, 4  ;;  %v24390_v16 = vadd.f32 %v24181_v0, %v10643_v53  ;;  %v10646_v46 = vadd.f32 %v24212_v56, %v25698_v34  ;;  %v24397_v63 = vpop.f32.mrf.mxu1  ;;  %v15991_v50 = vld [vmem:[%s19775_s14 + $0xc8] sm:$0x1]  ;;  %v24406_v56 = vpop.f32.mrf.mxu0 }
 0x41a   : > { %v13413_v37 = vrot.slane %v13412_v28, 4  ;;  %v10644_v2 = vadd.f32 %v24229_v11, %v25699_v43  ;;  %25700 = vst [vmem:[#allocation45_spill] sm:$0xff] %v24397_v63  ;;  %17431 = vmatprep.mubr.msk.bf16.mxu1 %vm830_vm3, %v16008_v22  ;;  %v13408_v36 = vsel %vm17904_vm4, %v13403_v44, %v13407_v55  ;;  %v13420_v0 = vshrl.u32 %v15989_v20, 16 }
 0x41b   : > { %25697 = vst [vmem:[#allocation14_spill] sm:$0xff] %v24390_v16  ;;  %v13922_v61 = vsel %vm18183_vm7, %v13920_v8, %v13921_v40  ;;  %v13423_v62 = vshll.u32 %v15989_v20, 16  ;;  %v24411_v32 = vadd.f32 %v24208_v14, %v10646_v46  ;;  %v24416_v55 = vpop.f32.mrf.mxu1  ;;  %v13429_v44 = vshll.u32 %v15990_v17, 16 }
 0x41c   : > { %v13418_v11 = vsel %vm17904_vm4, %v13413_v37, %v13417_v21  ;;  %v16074_v28 = vcombine.low %v13919_v29, %v13922_v61  ;;  %v24414_v53 = vadd.f32 %v24224_v52, %v10644_v2  ;;  %25703 = vst [vmem:[#allocation19_spill] sm:$0xff] %v24416_v55  ;;  %v13422_v22 = vrot.slane %v13420_v0, 4  ;;  %v15992_v29 = vld [vmem:[%s19775_s14 + $0xcc] sm:$0xf]  ;;  %v25705_v2 = vld [vmem:[#allocation17_spill] sm:$0xff] }
 0x41d   : > { %25701 = vst [vmem:[#allocation61_spill] sm:$0xff] %v24411_v32  ;;  %v16009_v40 = vcombine.low %v13408_v36, %v13418_v11  ;;  %v13425_v20 = vrot.slane %v13423_v62, 5  ;;  %v13433_v8 = vshrl.u32 %v15990_v17, 16  ;;  %v13439_v34 = vshll.u32 %v15991_v50, 16  ;;  %v24420_v14 = vpop.f32.mrf.mxu1  ;;  %v15993_v61 = vld [vmem:[%s19775_s14 + $0xd0] sm:$0xf]  ;;  %v24426_v0 = vpop.f32.mrf.mxu0 }
 0x41e   : > { %25702 = vst [vmem:[#allocation20_spill] sm:$0xff] %v24414_v53  ;;  %17466 = vmatmul.mubr.msk.bf16.gmra.mxu0 %vm830_vm3, %v16074_v28  ;;  %v16058_v43 = vrot.slane %v16042_v60, 9  ;;  %v13925_v21 = vrot.slane %v15990_v17, 5  ;;  %25704 = vst [vmem:[#allocation60_spill] sm:$0xff] %v24420_v14  ;;  %v13431_v37 = vrot.slane %v13429_v44, 5  ;;  %v13928_v46 = vrot.slane %v15991_v50, 5 }
 0x41f   : > { %17432 = vmatmul.mubr.msk.bf16.gmra.mxu1 %vm830_vm3, %v16009_v40  ;;  %v13426_v52 = vor.u32 %v13425_v20, %v13422_v22  ;;  %v10649_v36 = vadd.f32 %v24241_v6, %v25705_v2  ;;  %v13435_v62 = vrot.slane %v13433_v8, 4  ;;  %v13441_v11 = vrot.slane %v13439_v34, 5  ;;  %v24430_v28 = vpop.f32.mrf.mxu1  ;;  %v15994_v50 = vld [vmem:[%s19775_s14 + $0xd4] sm:$0x1]  ;;  %v24436_v6 = vpop.f32.mrf.mxu0  ;;  %v16043_v32 = vld [vmem:[%s19775_s14 + $0xcc] sm:$0xe] }
 0x420   : > { %v13926_v17 = vsel %vm18183_vm7, %v16058_v43, %v13925_v21  ;;  %v13927_v60 = vrot.slane %v13925_v21, 4  ;;  %25706 = vst [vmem:[#allocation7_spill] sm:$0xff] %v24430_v28  ;;  %v13444_v22 = vshrl.u32 %v15992_v29, 16  ;;  %v13447_v20 = vshll.u32 %v15992_v29, 16  ;;  %s14480_s14 = sshll.u32 %s25772_s18, 5 }
 0x421   : > { %v13427_v53 = vrot.slane %v13426_v52, 4  ;;  %v24433_v40 = vadd.f32 %v24234_v31, %v10649_v36  ;;  %v13436_v44 = vor.u32 %v13435_v62, %v13431_v37  ;;  %v13453_v34 = vshll.u32 %v15993_v61, 16  ;;  %v24441_v43 = vpop.f32.mrf.mxu1  ;;  %s340_s26 = sadd.s32 %s14481_s25, %s14480_s14 }
 0x422   : > { %v13929_v8 = vsel %vm18183_vm7, %v13927_v60, %v13928_v46  ;;  %v13457_v2 = vshrl.u32 %v15993_v61, 16  ;;  %25708 = vst [vmem:[#allocation49_spill] sm:$0xff] %v24441_v43  ;;  %v13446_v31 = vrot.slane %v13444_v22, 4  ;;  %v13449_v36 = vrot.slane %v13447_v20, 5  ;;  %v25709_v22 = vld [vmem:[#allocation31_spill] sm:$0xff]  ;;  %s14482_s27 = sshll.u32 %s340_s26, 3 }
 0x423   : > { %25707 = vst [vmem:[#allocation3_spill] sm:$0xff] %v24433_v40  ;;  %v13432_v21 = vsel %vm17904_vm4, %v13427_v53, %v13431_v37  ;;  %v16075_v52 = vcombine.low %v13926_v17, %v13929_v8  ;;  %v24445_v40 = vpop.f32.mrf.mxu0  ;;  %v13437_v29 = vrot.slane %v13436_v44, 4  ;;  %v13455_v16 = vrot.slane %v13453_v34, 5  ;;  %v24447_v14 = vpop.f32.mrf.mxu1  ;;  %s24744_s30 = scalar_lea.vmem %s24895_s5, %s14482_s27 }
 0x424   : > { %v13459_v28 = vrot.slane %v13457_v2, 4  ;;  %v13463_v62 = vshll.u32 %v15994_v50, 16  ;;  %v13450_v46 = vor.u32 %v13449_v36, %v13446_v31  ;;  %v16059_v60 = vrot.slane %v16043_v32, 9 }
 0x425   : > { %17469 = vmatprep.mubr.msk.bf16.mxu0 %vm830_vm3, %v16075_v52  ;;  %v13932_v55 = vrot.slane %v15993_v61, 5  ;;  %v13935_v43 = vrot.slane %v15994_v50, 5  ;;  %v12082_v63 = vpop.f32.mrf.mxu0  ;;  %v13442_v53 = vsel %vm17904_vm4, %v13437_v29, %v13441_v11  ;;  %v10647_v20 = vadd.f32 %v24255_v1, %v25709_v22  ;;  %v11385_v44 = vpop.f32.mrf.mxu1  ;;  %v25710_v61 = vld [vmem:[#allocation54_spill] sm:$0xff] }
 0x426   : > { %v13460_v37 = vor.u32 %v13459_v28, %v13455_v16  ;;  %v13465_v17 = vrot.slane %v13463_v62, 5  ;;  %v16010_v8 = vcombine.low %v13432_v21, %v13442_v53  ;;  %v13451_v34 = vrot.slane %v13450_v46, 4  ;;  %v25711_v11 = vld [vmem:[#allocation34_spill] sm:$0xff] }
 0x427   : > { %v13933_v2 = vsel %vm18183_vm7, %v16059_v60, %v13932_v55  ;;  %v13934_v52 = vrot.slane %v13932_v55, 4  ;;  %v24457_v32 = vadd.f32 %v24245_v58, %v10647_v20  ;;  %v10650_v50 = vadd.f32 %v24272_v48, %v25710_v61  ;;  %v17290_v36 = vpop.f32.mrf.mxu1  ;;  %v25712_v55 = vld [vmem:[#allocation32_spill] sm:$0xff]  ;;  %v17319_v62 = vpop.f32.mrf.mxu0  ;;  %v25718_v22 = vld [vmem:[#allocation10_spill] sm:$0xff]  ;;  %v25725_v61 = vld [vmem:[#allocation57_spill] sm:$0xff] }
 0x428   : > { %v13461_v31 = vrot.slane %v13460_v37, 4  ;;  %v10648_v28 = vadd.f32 %v24278_v4, %v25711_v11  ;;  %17435 = vmatprep.mubr.msk.bf16.mxu1 %vm830_vm3, %v16010_v8  ;;  %v13456_v1 = vsel %vm17904_vm4, %v13451_v34, %v13455_v16  ;;  %v11450_v29 = vadd.f32 %v24286_v19, %v25712_v55  ;;  %v25716_v37 = vld [vmem:[#allocation38_spill] sm:$0xff]  ;;  %v25720_v8 = vld [vmem:[#allocation39_spill] sm:$0xff]  ;;  %v25721_v34 = vld [vmem:[#allocation60_spill] sm:$0xff] }
 0x429   : > { %v13936_v21 = vsel %vm18183_vm7, %v13934_v52, %v13935_v43  ;;  %v11448_v58 = vadd.f32 %v24297_v54, %v23963_v25  ;;  %v24475_v46 = vadd.f32 %v24274_v57, %v10650_v50  ;;  %v11388_v16 = vpop.f32.mrf.mxu1  ;;  %v11451_v25 = vadd.f32 %v24301_v26, %v23973_v42  ;;  %v12095_v38 = vpop.f32.mrf.mxu0  ;;  %v25723_v52 = vld [vmem:[#allocation7_spill] sm:$0xff]  ;;  %v25726_v50 = vld [vmem:[#allocation49_spill] sm:$0xff] }
 0x42a   : > { %v13466_v48 = vsel %vm17904_vm4, %v13461_v31, %v13465_v17  ;;  %v16076_v4 = vcombine.low %v13933_v2, %v13936_v21  ;;  %v24478_v60 = vadd.f32 %v24292_v23, %v10648_v28  ;;  %v24481_v43 = vadd.f32 %v24304_v5, %v11450_v29  ;;  %v25722_v2 = vld [vmem:[#allocation41_spill] sm:$0xff]  ;;  %v25727_v11 = vld [vmem:[#allocation35_spill] sm:$0xff] }
 0x42b   : > { %v16011_v9 = vcombine.low %v13456_v1, %v13466_v48  ;;  %v24484_v19 = vadd.f32 %v24315_v10, %v11448_v58  ;;  %v11449_v57 = vadd.f32 %v24311_v27, %v23976_v47  ;;  %v11454_v23 = vadd.f32 %v24325_v30, %v23995_v45  ;;  %v17293_v10 = vpop.f32.mrf.mxu1  ;;  %v17320_v27 = vpop.f32.mrf.mxu0  ;;  %v25728_v1 = vld [vmem:[#allocation59_spill] sm:$0xff] }
 0x42c   : > { %17470 = vmatmul.mubr.msk.bf16.gmra.mxu0 %vm830_vm3, %v16076_v4  ;;  %v11452_v54 = vadd.f32 %v24344_v18, %v24039_v15  ;;  %v11455_v5 = vadd.f32 %v24350_v35, %v24063_v24  ;;  %v24499_v42 = vadd.f32 %v24334_v49, %v11451_v25  ;;  %v11453_v26 = vadd.f32 %v24358_v51, %v24066_v12  ;;  %v25713_v15 = vld [vmem:[#allocation44_spill] sm:$0xff]  ;;  %v25714_v24 = vld [vmem:[#allocation18_spill] sm:$0xff] }
 0x42d   : > { %17436 = vmatmul.mubr.msk.bf16.gmra.mxu1 %vm830_vm3, %v16011_v9  ;;  %v11458_v47 = vadd.f32 %v24369_v41, %v24084_v39  ;;  %v11456_v45 = vadd.f32 %v24375_v7, %v24115_v59  ;;  %v24508_v30 = vadd.f32 %v25713_v15, %v11449_v57  ;;  %v24511_v18 = vadd.f32 %v25714_v24, %v11454_v23  ;;  %v11401_v12 = vpop.f32.mrf.mxu1  ;;  %v25715_v41 = vld [vmem:[#allocation36_spill] sm:$0xff]  ;;  %v12098_v53 = vpop.f32.mrf.mxu0  ;;  %v25731_v23 = vld [vmem:[#allocation58_spill] sm:$0xff]  ;;  %v25736_v24 = vld [vmem:[#allocation43_spill] sm:$0xff] }
 0x42e   : > { %v24514_v35 = vadd.f32 %v24373_v13, %v11452_v54  ;;  %v24517_v49 = vadd.f32 %v24383_v3, %v11455_v5  ;;  %v24520_v51 = vadd.f32 %v24406_v56, %v11453_v26  ;;  %v11459_v7 = vadd.f32 %v24385_v33, %v25715_v41  ;;  %v25717_v13 = vld [vmem:[#allocation45_spill] sm:$0xff]  ;;  %v25719_v3 = vld [vmem:[#allocation19_spill] sm:$0xff]  ;;  %v25730_v25 = vld [vmem:[#allocation40_spill] sm:$0xff] }
 0x42f   : > { %v24523_v39 = vadd.f32 %v24426_v0, %v11458_v47  ;;  %v24526_v59 = vadd.f32 %v24436_v6, %v11456_v45  ;;  %v11457_v17 = vadd.f32 %v25717_v13, %v25716_v37  ;;  %v11462_v20 = vadd.f32 %v25719_v3, %v25718_v22  ;;  %v17294_v31 = vpop.f32.mrf.mxu1  ;;  %v25732_v5 = vld [vmem:[#allocation16_spill] sm:$0xff]  ;;  %v25737_v37 = vld [vmem:[#allocation14_spill] sm:$0xff]  ;;  %v25738_v22 = vld [vmem:[#allocation61_spill] sm:$0xff] }
 0x430   : > { %v11460_v56 = vadd.f32 %v25721_v34, %v25720_v8  ;;  %v11463_v0 = vadd.f32 %v25723_v52, %v25722_v2  ;;  %v24539_v6 = vadd.f32 %v24445_v40, %v11459_v7  ;;  %v11461_v33 = vadd.f32 %v25726_v50, %v25725_v61  ;;  %v25739_v8 = vld [vmem:[#allocation20_spill] sm:$0xff]  ;;  %v25740_v52 = vld [vmem:[#allocation3_spill] sm:$0xff] }
 0x431   : > { %v11466_v28 = vadd.f32 %v24447_v14, %v25727_v11  ;;  %v11464_v21 = vadd.f32 %v11385_v44, %v25728_v1  ;;  %v24546_v55 = vadd.f32 %v12082_v63, %v11457_v17  ;;  %v24548_v29 = vadd.f32 %v17319_v62, %v11462_v20  ;;  %v11404_v4 = vpop.f32.mrf.mxu1  ;;  %v17323_v40 = vpop.f32.mrf.mxu0  ;;  %v25733_v63 = vld [vmem:[#allocation37_spill] sm:$0xff]  ;;  %v25734_v62 = vld [vmem:[#allocation42_spill] sm:$0xff] }
 0x432   : > { %25724 = vst [vmem:[#allocation46_spill] sm:$0xff] %v24539_v6  ;;  %v24550_v58 = vadd.f32 %v12095_v38, %v11460_v56  ;;  %v24552_v48 = vadd.f32 %v17320_v27, %v11463_v0  ;;  %v24554_v9 = vadd.f32 %v12098_v53, %v11461_v33  ;;  %v11467_v57 = vadd.f32 %v17290_v36, %v25730_v25  ;;  %v25735_v38 = vld [vmem:[#allocation24_spill] sm:$0xff] }
 0x433   : > { %25729 = vst [vmem:[#allocation48_spill] sm:$0xff] %v24546_v55  ;;  %v11465_v54 = vadd.f32 %v11388_v16, %v25731_v23  ;;  %v11470_v14 = vadd.f32 %v17293_v10, %v25732_v5  ;;  %v24559_v26 = vadd.f32 %v17323_v40, %v11466_v28  ;;  %v11468_v44 = vadd.f32 %v11401_v12, %v25733_v63  ;;  %v17297_v27 = vpop.f32.mrf.mxu1  ;;  %v12111_v15 = vpop.f32.mrf.mxu0 }
 0x434   : > { %v11471_v47 = vadd.f32 %v17294_v31, %v25734_v62  ;;  %v11469_v45 = vadd.f32 %v11404_v4, %v25735_v38  ;;  %v11474_v41 = vadd.f32 %v17297_v27, %v25736_v24  ;;  %v24565_v7 = vadd.f32 %v12111_v15, %v11464_v21 }
 0x435   : > { %v11417_v53 = vpop.f32.mrf.mxu1  ;;  %v17324_v36 = vpop.f32.mrf.mxu0 }
 0x436   : > { %v11472_v16 = vadd.f32 %v11417_v53, %v25737_v37  ;;  %v24568_v13 = vadd.f32 %v17324_v36, %v11467_v57 }
 0x437   : > { %v17298_v10 = vpop.f32.mrf.mxu1  ;;  %v12114_v17 = vpop.f32.mrf.mxu0 }
 0x438   : > { %v11475_v12 = vadd.f32 %v17298_v10, %v25738_v22  ;;  %v24571_v3 = vadd.f32 %v12114_v17, %v11465_v54 }
 0x439   : > { %v11420_v20 = vpop.f32.mrf.mxu1 }
 0x43a   : > { %v11473_v34 = vadd.f32 %v11420_v20, %v25739_v8 }
 0x43b   : > { %v17301_v56 = vpop.f32.mrf.mxu1 }
 0x43c   : > { %v17327_v2 = vpop.f32.mrf.mxu0  ;;  %v11478_v0 = vadd.f32 %v17301_v56, %v25740_v52 }
 0x43d   : > { %v24575_v31 = vadd.f32 %v17327_v2, %v11470_v14  ;;  %v11433_v61 = vpop.f32.mrf.mxu1 }
 0x43e   : > { %v12127_v50 = vpop.f32.mrf.mxu0  ;;  %v11476_v33 = vadd.f32 %v11433_v61, %v24457_v32 }
 0x43f   : > { %v24578_v11 = vadd.f32 %v12127_v50, %v11468_v44  ;;  %v17302_v28 = vpop.f32.mrf.mxu1 }
 0x440   : > { %v17328_v1 = vpop.f32.mrf.mxu0  ;;  %v11479_v21 = vadd.f32 %v17302_v28, %v24475_v46 }
 0x441   : > { %v24581_v4 = vadd.f32 %v17328_v1, %v11471_v47  ;;  %v11436_v40 = vpop.f32.mrf.mxu1 }
 0x442   : > { %v12130_v25 = vpop.f32.mrf.mxu0  ;;  %v11477_v57 = vadd.f32 %v11436_v40, %v24478_v60 }
 0x443   : > { %v24584_v23 = vadd.f32 %v12130_v25, %v11469_v45 }
 0x446   : > { %v17331_v54 = vpop.f32.mrf.mxu0 }
 0x447   : > { %v24586_v5 = vadd.f32 %v17331_v54, %v11474_v41 }
 0x448   : > { %v12143_v14 = vpop.f32.mrf.mxu0 }
 0x449   : > { %v24588_v63 = vadd.f32 %v12143_v14, %v11472_v16 }
 0x44a   : > { %v17332_v32 = vpop.f32.mrf.mxu0 }
 0x44b   : > { %v24590_v44 = vadd.f32 %v17332_v32, %v11475_v12 }
 0x44c   : > { %v12146_v62 = vpop.f32.mrf.mxu0 }
 0x44d   : > { %v24592_v38 = vadd.f32 %v12146_v62, %v11473_v34 }
 0x451   : > { %v17335_v46 = vpop.f32.mrf.mxu0 }
 0x452   : > { %v24594_v47 = vadd.f32 %v17335_v46, %v11478_v0 }
 0x453   : > { %v12159_v27 = vpop.f32.mrf.mxu0 }
 0x454   : > { %v24596_v15 = vadd.f32 %v12159_v27, %v11476_v33  ;;  %v24598_v60 = vpop.f32.mrf.mxu1 }
 0x455   : > { %v17336_v45 = vpop.f32.mrf.mxu0 }
 0x456   : > { %v24600_v24 = vadd.f32 %v17336_v45, %v11479_v21  ;;  %v24602_v41 = vpop.f32.mrf.mxu1 }
 0x457   : > { %v12162_v53 = vpop.f32.mrf.mxu0 }
 0x458   : > { %v24604_v36 = vadd.f32 %v12162_v53, %v11477_v57  ;;  %v24606_v37 = vpop.f32.mrf.mxu1 }
 0x459   : > { %v24608_v16 = vpop.f32.mrf.mxu0 }
 0x45a   : > { %v24610_v10 = vpop.f32.mrf.mxu1 }
 0x45b   : > { %v24612_v17 = vpop.f32.mrf.mxu0 }
 0x45c   : > { %v24614_v22 = vpop.f32.mrf.mxu1 }
 0x45d   : > { %v24616_v12 = vpop.f32.mrf.mxu0 }
 0x45e   : > { %v24618_v20 = vpop.f32.mrf.mxu1 }
 0x45f   : > { %v24620_v8 = vpop.f32.mrf.mxu0 }
 0x460   : > { %v24622_v34 = vpop.f32.mrf.mxu1 }
 0x461   : > { %v24624_v56 = vpop.f32.mrf.mxu0 }
 0x462   : > { %v24626_v2 = vpop.f32.mrf.mxu1 }
 0x463   : > { %v24628_v52 = vpop.f32.mrf.mxu0 }
 0x464   : > { %v24630_v0 = vpop.f32.mrf.mxu1 }
 0x465   : > { %v24632_v61 = vpop.f32.mrf.mxu0 }
 0x466   : > { %v24634_v50 = vpop.f32.mrf.mxu1 }
 0x467   : > { %v24636_v33 = vpop.f32.mrf.mxu0 }
 0x468   : > { %v24638_v28 = vpop.f32.mrf.mxu1 }
 0x469   : > { %25741 = vst [vmem:[#allocation25_spill] sm:$0xff] %v24638_v28  ;;  %v24640_v1 = vpop.f32.mrf.mxu0 }
 0x46a   : > { %25742 = vst [vmem:[#allocation53_spill] sm:$0xff] %v24640_v1  ;;  %v24642_v21 = vpop.f32.mrf.mxu1 }
 0x46b   : > { %25743 = vst [vmem:[#allocation52_spill] sm:$0xff] %v24642_v21  ;;  %v24644_v40 = vpop.f32.mrf.mxu0 }
 0x46c   : > { %25744 = vst [vmem:[#allocation50_spill] sm:$0xff] %v24644_v40  ;;  %v17353_v25 = vpop.f32.mrf.mxu1 }
 0x46d   : > { %v24646_v57 = vpop.f32.mrf.mxu0  ;;  %v12658_v54 = vadd.f32 %v17353_v25, %v24548_v29 }
 0x46e   : > { %25745 = vst [vmem:[#allocation27_spill] sm:$0xff] %v24646_v57  ;;  %v12565_v14 = vpop.f32.mrf.mxu1 }
 0x46f   : > { %v24649_v32 = vpop.f32.mrf.mxu0  ;;  %v12656_v62 = vadd.f32 %v12565_v14, %v24550_v58 }
 0x470   : > { %25746 = vst [vmem:[#allocation66_spill] sm:$0xff] %v24649_v32  ;;  %v17354_v46 = vpop.f32.mrf.mxu1 }
 0x471   : > { %v17387_v27 = vpop.f32.mrf.mxu0  ;;  %v12659_v45 = vadd.f32 %v17354_v46, %v24552_v48 }
 0x472   : > { %v24653_v53 = vadd.f32 %v17387_v27, %v12658_v54  ;;  %v12568_v55 = vpop.f32.mrf.mxu1 }
 0x473   : > { %v12924_v21 = vpop.f32.mrf.mxu0  ;;  %v12657_v40 = vadd.f32 %v12568_v55, %v24554_v9 }
 0x474   : > { %v24656_v28 = vadd.f32 %v12924_v21, %v12656_v62 }
 0x475   : > { %v17388_v6 = vpop.f32.mrf.mxu0 }
 0x476   : > { %v17357_v57 = vpop.f32.mrf.mxu1  ;;  %v24659_v25 = vadd.f32 %v17388_v6, %v12659_v45 }
 0x477   : > { %v12662_v29 = vadd.f32 %v17357_v57, %v24559_v26  ;;  %v12927_v58 = vpop.f32.mrf.mxu0 }
 0x478   : > { %v12581_v32 = vpop.f32.mrf.mxu1  ;;  %v24662_v1 = vadd.f32 %v12927_v58, %v12657_v40 }
 0x479   : > { %v12660_v14 = vadd.f32 %v12581_v32, %v24565_v7  ;;  %v17391_v54 = vpop.f32.mrf.mxu0 }
 0x47a   : > { %v17358_v48 = vpop.f32.mrf.mxu1  ;;  %v24665_v27 = vadd.f32 %v17391_v54, %v12662_v29 }
 0x47b   : > { %v12663_v46 = vadd.f32 %v17358_v48, %v24568_v13  ;;  %v12940_v9 = vpop.f32.mrf.mxu0 }
 0x47c   : > { %v12584_v55 = vpop.f32.mrf.mxu1  ;;  %v24668_v62 = vadd.f32 %v12940_v9, %v12660_v14 }
 0x47d   : > { %v12661_v21 = vadd.f32 %v12584_v55, %v24571_v3  ;;  %v17392_v26 = vpop.f32.mrf.mxu0 }
 0x47e   : > { %v17361_v6 = vpop.f32.mrf.mxu1  ;;  %v24671_v45 = vadd.f32 %v17392_v26, %v12663_v46 }
 0x47f   : > { %v12666_v57 = vadd.f32 %v17361_v6, %v24575_v31  ;;  %v12943_v40 = vpop.f32.mrf.mxu0 }
 0x480   : > { %v12597_v7 = vpop.f32.mrf.mxu1  ;;  %v24674_v58 = vadd.f32 %v12943_v40, %v12661_v21 }
 0x481   : > { %v12664_v32 = vadd.f32 %v12597_v7, %v24578_v11  ;;  %v17395_v29 = vpop.f32.mrf.mxu0 }
 0x482   : > { %v17362_v13 = vpop.f32.mrf.mxu1  ;;  %v24677_v54 = vadd.f32 %v17395_v29, %v12666_v57 }
 0x483   : > { %v12667_v48 = vadd.f32 %v17362_v13, %v24581_v4  ;;  %v12956_v14 = vpop.f32.mrf.mxu0 }
 0x484   : > { %v12600_v3 = vpop.f32.mrf.mxu1  ;;  %v24680_v9 = vadd.f32 %v12956_v14, %v12664_v32 }
 0x485   : > { %v12665_v55 = vadd.f32 %v12600_v3, %v24584_v23  ;;  %v17396_v46 = vpop.f32.mrf.mxu0 }
 0x486   : > { %v17365_v31 = vpop.f32.mrf.mxu1  ;;  %v24683_v11 = vadd.f32 %v17396_v46, %v12667_v48 }
 0x487   : > { %v12670_v6 = vadd.f32 %v17365_v31, %v24586_v5  ;;  %v12959_v26 = vpop.f32.mrf.mxu0 }
 0x488   : > { %v12613_v21 = vpop.f32.mrf.mxu1  ;;  %v24686_v4 = vadd.f32 %v12959_v26, %v12665_v55 }
 0x489   : > { %v12668_v7 = vadd.f32 %v12613_v21, %v24588_v63  ;;  %v17399_v40 = vpop.f32.mrf.mxu0 }
 0x48a   : > { %v17366_v57 = vpop.f32.mrf.mxu1  ;;  %v24689_v23 = vadd.f32 %v17399_v40, %v12670_v6  ;;  %v12646_v6 = vadd.f32 %v24598_v60, %v24481_v43  ;;  %v12647_v43 = vadd.f32 %v24606_v37, %v24499_v42  ;;  %v12650_v42 = vadd.f32 %v24614_v22, %v24511_v18 }
 0x48b   : > { %v12671_v13 = vadd.f32 %v17366_v57, %v24590_v44  ;;  %v12972_v29 = vpop.f32.mrf.mxu0  ;;  %v12651_v18 = vadd.f32 %v24622_v34, %v24517_v49 }
 0x48c   : > { %v12616_v32 = vpop.f32.mrf.mxu1  ;;  %v24692_v5 = vadd.f32 %v12972_v29, %v12668_v7 }
 0x48d   : > { %v12669_v3 = vadd.f32 %v12616_v32, %v24592_v38  ;;  %v17400_v14 = vpop.f32.mrf.mxu0  ;;  %v13005_v32 = vadd.f32 %v24608_v16, %v12646_v6  ;;  %v13006_v16 = vadd.f32 %v24616_v12, %v12647_v43 }
 0x48e   : > { %v17369_v48 = vpop.f32.mrf.mxu1  ;;  %v24696_v55 = vadd.f32 %v17400_v14, %v12671_v13 }
 0x48f   : > { %v12674_v63 = vadd.f32 %v17369_v48, %v24594_v47  ;;  %v12975_v46 = vpop.f32.mrf.mxu0  ;;  %v12644_v47 = vadd.f32 %v24602_v41, %v24484_v19  ;;  %v12645_v19 = vadd.f32 %v24610_v10, %v24508_v30  ;;  %v24731_v30 = vld [vmem:[%s24894_s4] ss:$0 sm:$0xff] }
 0x490   : > { %v12629_v31 = vpop.f32.mrf.mxu1  ;;  %v24701_v21 = vadd.f32 %v12975_v46, %v12669_v3 }
 0x491   : > { %v12672_v44 = vadd.f32 %v12629_v31, %v24596_v15  ;;  %v17403_v26 = vpop.f32.mrf.mxu0  ;;  %v13003_v3 = vadd.f32 %v24612_v17, %v12644_v47  ;;  %v12648_v17 = vadd.f32 %v24618_v20, %v24514_v35  ;;  %v13004_v10 = vadd.f32 %v24620_v8, %v12645_v19 }
 0x492   : > { %v17370_v38 = vpop.f32.mrf.mxu1  ;;  %v24707_v57 = vadd.f32 %v17403_v26, %v12674_v63  ;;  %v12649_v8 = vadd.f32 %v24626_v2, %v24520_v51  ;;  %v12654_v51 = vadd.f32 %v24630_v0, %v24523_v39 }
 0x493   : > { %v12675_v7 = vadd.f32 %v17370_v38, %v24600_v24  ;;  %v12988_v13 = vpop.f32.mrf.mxu0  ;;  %v13009_v38 = vadd.f32 %v24624_v56, %v12650_v42  ;;  %v13007_v47 = vadd.f32 %v24628_v52, %v12648_v17  ;;  %v13010_v52 = vadd.f32 %v24632_v61, %v12651_v18  ;;  %v25747_v42 = vld [vmem:[#allocation53_spill] sm:$0xff]  ;;  %v25751_v18 = vld [vmem:[#allocation48_spill] sm:$0xff] }
 0x494   : > { %v12632_v40 = vpop.f32.mrf.mxu1  ;;  %v24713_v60 = vadd.f32 %v12988_v13, %v12672_v44  ;;  %v13008_v19 = vadd.f32 %v24636_v33, %v12649_v8  ;;  %v25749_v17 = vld [vmem:[#allocation25_spill] sm:$0xff] }
 0x495   : > { %v12673_v15 = vadd.f32 %v12632_v40, %v24604_v36  ;;  %v17404_v24 = vpop.f32.mrf.mxu0 }
 0x496   : > { %v17409_v29 = vpop.f32.mrf.mxu1  ;;  %v24719_v41 = vadd.f32 %v17404_v24, %v12675_v7 }
 0x497   : > { %v13731_v48 = vadd.f32 %v17409_v29, %v13005_v32  ;;  %v12991_v14 = vpop.f32.mrf.mxu0 }
 0x498   : > { %v13602_v36 = vpop.f32.mrf.mxu1  ;;  %v24724_v37 = vadd.f32 %v12991_v14, %v12673_v15 }
 0x499   : > { %v13729_v63 = vadd.f32 %v13602_v36, %v13003_v3 }
 0x49a   : > { %v17410_v31 = vpop.f32.mrf.mxu1 }
 0x49b   : > { %v17443_v46 = vpop.f32.mrf.mxu0  ;;  %v13732_v44 = vadd.f32 %v17410_v31, %v13006_v16  ;;  %v25748_v31 = vld [vmem:[#allocation46_spill] sm:$0xff] }
 0x49c   : > { %v14201_v12 = vadd.f32 %v17443_v46, %v13731_v48  ;;  %v13605_v6 = vpop.f32.mrf.mxu1  ;;  %v12652_v48 = vadd.f32 %v24634_v50, %v24526_v59  ;;  %v12655_v46 = vadd.f32 %v25749_v17, %v25748_v31 }
 0x49d   : > { %v14072_v22 = vpop.f32.mrf.mxu0  ;;  %v13730_v26 = vadd.f32 %v13605_v6, %v13004_v10 }
 0x49e   : > { %v14240_v35 = vadd.f32 %v24731_v30, %v14201_v12  ;;  %v14199_v20 = vadd.f32 %v14072_v22, %v13729_v63  ;;  %v17413_v7 = vpop.f32.mrf.mxu1  ;;  %v13013_v63 = vadd.f32 %v25747_v42, %v12654_v51  ;;  %v25752_v22 = vld [vmem:[#allocation52_spill] sm:$0xff] }
 0x49f   : > { %v17444_v49 = vpop.f32.mrf.mxu0  ;;  %v13735_v13 = vadd.f32 %v17413_v7, %v13009_v38  ;;  %v12653_v38 = vadd.f32 %v25752_v22, %v25751_v18 }
 0x4a0   : > { %v14272_v34 = vmax.f32 %v14240_v35, 0.0  ;;  %v14238_v56 = vadd.f32 %v24731_v30, %v14199_v20  ;;  %v14202_v40 = vadd.f32 %v17444_v49, %v13732_v44  ;;  %v13618_v15 = vpop.f32.mrf.mxu1  ;;  %v25750_v44 = vld [vmem:[#allocation50_spill] sm:$0xff]  ;;  %v25753_v49 = vld [vmem:[#allocation27_spill] sm:$0xff] }
 0x4a1   : > { %v14075_v2 = vpop.f32.mrf.mxu0  ;;  %v13733_v24 = vadd.f32 %v13618_v15, %v13007_v47  ;;  %v13011_v6 = vadd.f32 %v25750_v44, %v12652_v48 }
 0x4a2   : > { %14305 = vst.msk [vmem:[%s24744_s30 + $0x10] sm:$0xff] %vm14302_vm8, %v14272_v34  ;;  %v14270_v32 = vmax.f32 %v14238_v56, 0.0  ;;  %v14241_v43 = vadd.f32 %v24731_v30, %v14202_v40  ;;  %v14200_v29 = vadd.f32 %v14075_v2, %v13730_v26  ;;  %v17414_v3 = vpop.f32.mrf.mxu1  ;;  %v13014_v34 = vadd.f32 %v25753_v49, %v12655_v46  ;;  %v25754_v2 = vld [vmem:[#allocation66_spill] sm:$0xff] }
 0x4a3   : > { %v17447_v36 = vpop.f32.mrf.mxu0  ;;  %v13736_v14 = vadd.f32 %v17414_v3, %v13010_v52 }
 0x4a4   : > { %14303 = vst.msk [vmem:[%s24744_s30] sm:$0xff] %vm14302_vm8, %v14270_v32  ;;  %v14273_v61 = vmax.f32 %v14241_v43, 0.0  ;;  %v14239_v39 = vadd.f32 %v24731_v30, %v14200_v29  ;;  %v14205_v0 = vadd.f32 %v17447_v36, %v13735_v13  ;;  %v13621_v16 = vpop.f32.mrf.mxu1  ;;  %v13012_v32 = vadd.f32 %v25754_v2, %v12653_v38 }
 0x4a5   : > { %v14088_v10 = vpop.f32.mrf.mxu0  ;;  %v13734_v12 = vadd.f32 %v13621_v16, %v13008_v19 }
 0x4a6   : > { %14306 = vst.msk [vmem:[%s24744_s30 + $0x18] sm:$0xff] %vm14302_vm8, %v14273_v61  ;;  %v14271_v33 = vmax.f32 %v14239_v39, 0.0  ;;  %v14244_v59 = vadd.f32 %v24731_v30, %v14205_v0  ;;  %v14203_v50 = vadd.f32 %v14088_v10, %v13733_v24 }
 0x4a7   : > { %v17448_v35 = vpop.f32.mrf.mxu0  ;;  %v17417_v20 = vpop.f32.mrf.mxu1 }
 0x4a8   : > { %14304 = vst.msk [vmem:[%s24744_s30 + $0x8] sm:$0xff] %vm14302_vm8, %v14271_v33  ;;  %v14276_v26 = vmax.f32 %v14244_v59, 0.0  ;;  %v14242_v7 = vadd.f32 %v24731_v30, %v14203_v50  ;;  %v14206_v47 = vadd.f32 %v17448_v35, %v13736_v14  ;;  %v13739_v8 = vadd.f32 %v17417_v20, %v13013_v63 }
 0x4a9   : > { %v14091_v56 = vpop.f32.mrf.mxu0  ;;  %v13634_v40 = vpop.f32.mrf.mxu1 }
 0x4aa   : > { %14309 = vst.msk [vmem:[%s24744_s30 + $0x30] sm:$0xff] %vm14302_vm8, %v14276_v26  ;;  %v14274_v13 = vmax.f32 %v14242_v7, 0.0  ;;  %v14245_v15 = vadd.f32 %v24731_v30, %v14206_v47  ;;  %v14204_v52 = vadd.f32 %v14091_v56, %v13734_v12  ;;  %v13737_v51 = vadd.f32 %v13634_v40, %v13011_v6 }
 0x4ab   : > { %v17451_v43 = vpop.f32.mrf.mxu0  ;;  %v17418_v29 = vpop.f32.mrf.mxu1 }
 0x4ac   : > { %14307 = vst.msk [vmem:[%s24744_s30 + $0x20] sm:$0xff] %vm14302_vm8, %v14274_v13  ;;  %v14277_v24 = vmax.f32 %v14245_v15, 0.0  ;;  %v14243_v3 = vadd.f32 %v24731_v30, %v14204_v52  ;;  %v14209_v19 = vadd.f32 %v17451_v43, %v13739_v8  ;;  %v13740_v48 = vadd.f32 %v17418_v29, %v13014_v34 }
 0x4ad   : > { %v14104_v36 = vpop.f32.mrf.mxu0  ;;  %v13637_v61 = vpop.f32.mrf.mxu1 }
 0x4ae   : > { %14310 = vst.msk [vmem:[%s24744_s30 + $0x38] sm:$0xff] %vm14302_vm8, %v14277_v24  ;;  %v14275_v39 = vmax.f32 %v14243_v3, 0.0  ;;  %v14248_v0 = vadd.f32 %v24731_v30, %v14209_v19  ;;  %v14207_v14 = vadd.f32 %v14104_v36, %v13737_v51  ;;  %v13738_v16 = vadd.f32 %v13637_v61, %v13012_v32 }
 0x4af   : > { %v17452_v42 = vpop.f32.mrf.mxu0 }
 0x4b0   : > { %14308 = vst.msk [vmem:[%s24744_s30 + $0x28] sm:$0xff] %vm14302_vm8, %v14275_v39  ;;  %v14280_v63 = vmax.f32 %v14248_v0, 0.0  ;;  %v14246_v31 = vadd.f32 %v24731_v30, %v14207_v14  ;;  %v14210_v17 = vadd.f32 %v17452_v42, %v13740_v48 }
 0x4b1   : > { %v14107_v46 = vpop.f32.mrf.mxu0 }
 0x4b2   : > { %14313 = vst.msk [vmem:[%s24744_s30 + $0x50] sm:$0xff] %vm14302_vm8, %v14280_v63  ;;  %v14278_v10 = vmax.f32 %v14246_v31, 0.0  ;;  %v14249_v33 = vadd.f32 %v24731_v30, %v14210_v17  ;;  %v14208_v59 = vadd.f32 %v14107_v46, %v13738_v16 }
 0x4b4   : > { %14311 = vst.msk [vmem:[%s24744_s30 + $0x40] sm:$0xff] %vm14302_vm8, %v14278_v10  ;;  %v14281_v50 = vmax.f32 %v14249_v33, 0.0  ;;  %v14247_v12 = vadd.f32 %v24731_v30, %v14208_v59  ;;  %v17455_v44 = vpop.f32.mrf.mxu0 }
 0x4b5   : > { %v17421_v6 = vpop.f32.mrf.mxu1 }
 0x4b6   : > { %14314 = vst.msk [vmem:[%s24744_s30 + $0x58] sm:$0xff] %vm14302_vm8, %v14281_v50  ;;  %v14279_v18 = vmax.f32 %v14247_v12, 0.0  ;;  %v13743_v22 = vadd.f32 %v17421_v6, %v24653_v53  ;;  %v14120_v38 = vpop.f32.mrf.mxu0 }
 0x4b7   : > { %v13650_v35 = vpop.f32.mrf.mxu1 }
 0x4b8   : > { %14312 = vst.msk [vmem:[%s24744_s30 + $0x48] sm:$0xff] %vm14302_vm8, %v14279_v18  ;;  %v14213_v20 = vadd.f32 %v17455_v44, %v13743_v22  ;;  %v13741_v26 = vadd.f32 %v13650_v35, %v24656_v28  ;;  %v17456_v47 = vpop.f32.mrf.mxu0 }
 0x4b9   : > { %v17422_v7 = vpop.f32.mrf.mxu1 }
 0x4ba   : > { %v14252_v8 = vadd.f32 %v24731_v30, %v14213_v20  ;;  %v14211_v49 = vadd.f32 %v14120_v38, %v13741_v26  ;;  %v13744_v34 = vadd.f32 %v17422_v7, %v24659_v25  ;;  %v14123_v52 = vpop.f32.mrf.mxu0 }
 0x4bb   : > { %v13653_v56 = vpop.f32.mrf.mxu1 }
 0x4bc   : > { %v14284_v40 = vmax.f32 %v14252_v8, 0.0  ;;  %v14250_v53 = vadd.f32 %v24731_v30, %v14211_v49  ;;  %v14214_v13 = vadd.f32 %v17456_v47, %v13744_v34  ;;  %v13742_v15 = vadd.f32 %v13653_v56, %v24662_v1 }
 0x4be   : > { %14317 = vst.msk [vmem:[%s24744_s30 + $0x70] sm:$0xff] %vm14302_vm8, %v14284_v40  ;;  %v14282_v28 = vmax.f32 %v14250_v53, 0.0  ;;  %v14253_v51 = vadd.f32 %v24731_v30, %v14214_v13  ;;  %v14212_v2 = vadd.f32 %v14123_v52, %v13742_v15 }
 0x4c0   : > { %14315 = vst.msk [vmem:[%s24744_s30 + $0x60] sm:$0xff] %vm14302_vm8, %v14282_v28  ;;  %v14285_v32 = vmax.f32 %v14253_v51, 0.0  ;;  %v14251_v25 = vadd.f32 %v24731_v30, %v14212_v2 }
 0x4c2   : > { %14318 = vst.msk [vmem:[%s24744_s30 + $0x78] sm:$0xff] %vm14302_vm8, %v14285_v32  ;;  %v14283_v43 = vmax.f32 %v14251_v25, 0.0  ;;  %v17459_v29 = vpop.f32.mrf.mxu0 }
 0x4c3   : > { %v17425_v24 = vpop.f32.mrf.mxu1 }
 0x4c4   : > { %14316 = vst.msk [vmem:[%s24744_s30 + $0x68] sm:$0xff] %vm14302_vm8, %v14283_v43  ;;  %v13747_v1 = vadd.f32 %v17425_v24, %v24665_v27  ;;  %v14136_v3 = vpop.f32.mrf.mxu0 }
 0x4c5   : > { %v13666_v19 = vpop.f32.mrf.mxu1 }
 0x4c6   : > { %v14217_v48 = vadd.f32 %v17459_v29, %v13747_v1  ;;  %v13745_v36 = vadd.f32 %v13666_v19, %v24668_v62  ;;  %v17460_v39 = vpop.f32.mrf.mxu0 }
 0x4c7   : > { %v17426_v61 = vpop.f32.mrf.mxu1 }
 0x4c8   : > { %v14256_v0 = vadd.f32 %v24731_v30, %v14217_v48  ;;  %v14215_v14 = vadd.f32 %v14136_v3, %v13745_v36  ;;  %v13748_v16 = vadd.f32 %v17426_v61, %v24671_v45  ;;  %v14139_v46 = vpop.f32.mrf.mxu0 }
 0x4c9   : > { %v13669_v42 = vpop.f32.mrf.mxu1 }
 0x4ca   : > { %v14288_v63 = vmax.f32 %v14256_v0, 0.0  ;;  %v14254_v27 = vadd.f32 %v24731_v30, %v14215_v14  ;;  %v14218_v31 = vadd.f32 %v17460_v39, %v13748_v16  ;;  %v13746_v17 = vadd.f32 %v13669_v42, %v24674_v58 }
 0x4cc   : > { %14321 = vst.msk [vmem:[%s24744_s30 + $0x90] sm:$0xff] %vm14302_vm8, %v14288_v63  ;;  %v14286_v62 = vmax.f32 %v14254_v27, 0.0  ;;  %v14257_v10 = vadd.f32 %v24731_v30, %v14218_v31  ;;  %v14216_v33 = vadd.f32 %v14139_v46, %v13746_v17 }
 0x4ce   : > { %14319 = vst.msk [vmem:[%s24744_s30 + $0x80] sm:$0xff] %vm14302_vm8, %v14286_v62  ;;  %v14289_v59 = vmax.f32 %v14257_v10, 0.0  ;;  %v14255_v45 = vadd.f32 %v24731_v30, %v14216_v33 }
 0x4d0   : > { %14322 = vst.msk [vmem:[%s24744_s30 + $0x98] sm:$0xff] %vm14302_vm8, %v14289_v59  ;;  %v14287_v50 = vmax.f32 %v14255_v45, 0.0  ;;  %v17463_v12 = vpop.f32.mrf.mxu0 }
 0x4d1   : > { %v17429_v44 = vpop.f32.mrf.mxu1 }
 0x4d2   : > { %14320 = vst.msk [vmem:[%s24744_s30 + $0x88] sm:$0xff] %vm14302_vm8, %v14287_v50  ;;  %v13751_v58 = vadd.f32 %v17429_v44, %v24677_v54  ;;  %v14152_v6 = vpop.f32.mrf.mxu0 }
 0x4d3   : > { %v13682_v18 = vpop.f32.mrf.mxu1 }
 0x4d4   : > { %v14221_v22 = vadd.f32 %v17463_v12, %v13751_v58  ;;  %v13749_v38 = vadd.f32 %v13682_v18, %v24680_v9  ;;  %v17464_v20 = vpop.f32.mrf.mxu0 }
 0x4d5   : > { %v17430_v35 = vpop.f32.mrf.mxu1 }
 0x4d6   : > { %v14260_v26 = vadd.f32 %v24731_v30, %v14221_v22  ;;  %v14219_v7 = vadd.f32 %v14152_v6, %v13749_v38  ;;  %v13752_v47 = vadd.f32 %v17430_v35, %v24683_v11  ;;  %v14155_v40 = vpop.f32.mrf.mxu0 }
 0x4d7   : > { %v13685_v8 = vpop.f32.mrf.mxu1 }
 0x4d8   : > { %v14292_v49 = vmax.f32 %v14260_v26, 0.0  ;;  %v14258_v54 = vadd.f32 %v24731_v30, %v14219_v7  ;;  %v14222_v34 = vadd.f32 %v17464_v20, %v13752_v47  ;;  %v13750_v56 = vadd.f32 %v13685_v8, %v24686_v4 }
 0x4da   : > { %14325 = vst.msk [vmem:[%s24744_s30 + $0xb0] sm:$0xff] %vm14302_vm8, %v14292_v49  ;;  %v14290_v9 = vmax.f32 %v14258_v54, 0.0  ;;  %v14261_v53 = vadd.f32 %v24731_v30, %v14222_v34  ;;  %v14220_v13 = vadd.f32 %v14155_v40, %v13750_v56 }
 0x4dc   : > { %14323 = vst.msk [vmem:[%s24744_s30 + $0xa0] sm:$0xff] %vm14302_vm8, %v14290_v9  ;;  %v14293_v15 = vmax.f32 %v14261_v53, 0.0  ;;  %v14259_v11 = vadd.f32 %v24731_v30, %v14220_v13 }
 0x4de   : > { %14326 = vst.msk [vmem:[%s24744_s30 + $0xb8] sm:$0xff] %vm14302_vm8, %v14293_v15  ;;  %v14291_v52 = vmax.f32 %v14259_v11, 0.0  ;;  %v17467_v28 = vpop.f32.mrf.mxu0 }
 0x4df   : > { %v17433_v51 = vpop.f32.mrf.mxu1 }
 0x4e0   : > { %14324 = vst.msk [vmem:[%s24744_s30 + $0xa8] sm:$0xff] %vm14302_vm8, %v14291_v52  ;;  %v13755_v4 = vadd.f32 %v17433_v51, %v24689_v23  ;;  %v14168_v2 = vpop.f32.mrf.mxu0 }
 0x4e1   : > { %v13698_v32 = vpop.f32.mrf.mxu1 }
 0x4e2   : > { %v14225_v25 = vadd.f32 %v17467_v28, %v13755_v4  ;;  %v13753_v43 = vadd.f32 %v13698_v32, %v24692_v5  ;;  %v17468_v24 = vpop.f32.mrf.mxu0 }
 0x4e3   : > { %v17434_v29 = vpop.f32.mrf.mxu1 }
 0x4e4   : > { %v14264_v1 = vadd.f32 %v24731_v30, %v14225_v25  ;;  %v14223_v3 = vadd.f32 %v14168_v2, %v13753_v43  ;;  %v13756_v19 = vadd.f32 %v17434_v29, %v24696_v55  ;;  %v14171_v0 = vpop.f32.mrf.mxu0 }
 0x4e5   : > { %v13701_v48 = vpop.f32.mrf.mxu1 }
 0x4e6   : > { %v14296_v36 = vmax.f32 %v14264_v1, 0.0  ;;  %v14262_v23 = vadd.f32 %v24731_v30, %v14223_v3  ;;  %v14226_v61 = vadd.f32 %v17468_v24, %v13756_v19  ;;  %v13754_v39 = vadd.f32 %v13701_v48, %v24701_v21 }
 0x4e8   : > { %14329 = vst.msk [vmem:[%s24744_s30 + $0xd0] sm:$0xff] %vm14302_vm8, %v14296_v36  ;;  %v14294_v5 = vmax.f32 %v14262_v23, 0.0  ;;  %v14265_v14 = vadd.f32 %v24731_v30, %v14226_v61  ;;  %v14224_v16 = vadd.f32 %v14171_v0, %v13754_v39 }
 0x4ea   : > { %14327 = vst.msk [vmem:[%s24744_s30 + $0xc0] sm:$0xff] %vm14302_vm8, %v14294_v5  ;;  %v14297_v42 = vmax.f32 %v14265_v14, 0.0  ;;  %v14263_v55 = vadd.f32 %v24731_v30, %v14224_v16 }
 0x4ec   : > { %14330 = vst.msk [vmem:[%s24744_s30 + $0xd8] sm:$0xff] %vm14302_vm8, %v14297_v42  ;;  %v14295_v63 = vmax.f32 %v14263_v55, 0.0  ;;  %v17471_v27 = vpop.f32.mrf.mxu0 }
 0x4ed   : > { %v17437_v31 = vpop.f32.mrf.mxu1 }
 0x4ee   : > { %14328 = vst.msk [vmem:[%s24744_s30 + $0xc8] sm:$0xff] %vm14302_vm8, %v14295_v63  ;;  %v13759_v21 = vadd.f32 %v17437_v31, %v24707_v57  ;;  %v14184_v17 = vpop.f32.mrf.mxu0 }
 0x4ef   : > { %v13714_v46 = vpop.f32.mrf.mxu1 }
 0x4f0   : > { %v14229_v62 = vadd.f32 %v17471_v27, %v13759_v21  ;;  %v13757_v10 = vadd.f32 %v13714_v46, %v24713_v60  ;;  %v17472_v59 = vpop.f32.mrf.mxu0 }
 0x4f1   : > { %v17438_v33 = vpop.f32.mrf.mxu1 }
 0x4f2   : > { %v14268_v45 = vadd.f32 %v24731_v30, %v14229_v62  ;;  %v14227_v50 = vadd.f32 %v14184_v17, %v13757_v10  ;;  %v13760_v12 = vadd.f32 %v17438_v33, %v24719_v41  ;;  %v14187_v22 = vpop.f32.mrf.mxu0 }
 0x4f3   : > { %v13717_v44 = vpop.f32.mrf.mxu1 }
 0x4f4   : > { %v14300_v58 = vmax.f32 %v14268_v45, 0.0  ;;  %v14266_v57 = vadd.f32 %v24731_v30, %v14227_v50  ;;  %v14230_v6 = vadd.f32 %v17472_v59, %v13760_v12  ;;  %v13758_v18 = vadd.f32 %v13717_v44, %v24724_v37 }
 0x4f6   : > { %14333 = vst.msk [vmem:[%s24744_s30 + $0xf0] sm:$0xff] %vm14302_vm8, %v14300_v58  ;;  %v14298_v60 = vmax.f32 %v14266_v57, 0.0  ;;  %v14269_v38 = vadd.f32 %v24731_v30, %v14230_v6  ;;  %v14228_v35 = vadd.f32 %v14187_v22, %v13758_v18 }
 0x4f8   : > { %14331 = vst.msk [vmem:[%s24744_s30 + $0xe0] sm:$0xff] %vm14302_vm8, %v14298_v60  ;;  %v14301_v20 = vmax.f32 %v14269_v38, 0.0  ;;  %v14267_v41 = vadd.f32 %v24731_v30, %v14228_v35 }
 0x4fa   : > { %14334 = vst.msk [vmem:[%s24744_s30 + $0xf8] sm:$0xff] %vm14302_vm8, %v14301_v20  ;;  %v14299_v26 = vmax.f32 %v14267_v41, 0.0 }
 0x4fc   : > { %14332 = vst.msk [vmem:[%s24744_s30 + $0xe8] sm:$0xff] %vm14302_vm8, %v14299_v26 }
 0x4fd PF: > { %s15_s22 = sadd.s32 1, %s17753_s22   ;;  %s25755_s18 = smov %s17745_s20 }
 0x4fe   : > { %p12_p10 = scmp.ge.s32.totalorder %s15_s22, 18   ;;  %s25756_s19 = smov %s17749_s21 }
 0x4ff   : > { %s25757_s20 = smov %s25760_s23  ;;  %s25758_s21 = smov %s25764_s24 }
 0x500   :  { %14 = sbr.rel (!%p12_p10) target bundleno = 3 (0x3), region = 108 }

</bundles_post_ra>
